<compile_context>
chip_gen: v7x
topology: tpu7x:2x2x1
jax: 0.10.0
libtpu: 0.0.40
codegen_flags: <defaults>
</compile_context>

<pallas_src>
import functools

import jax
import jax.numpy as jnp
from jax.experimental import pallas as pl
from jax.experimental.pallas import tpu as pltpu

BN_EPS = 1e-3                       # learn2learn ConvBlock BatchNorm eps
POOL_TILE_BYTES = 4 * 1024 * 1024   # input-slab byte budget per kernel-B grid step
VMEM_LIMIT = 32 * 1024 * 1024       # scoped VMEM; safe on v5e / v6e / v7x


# ---------------------------------------------------------------------------
# Kernel A: in-kernel im2col + single wide-K MXU matmul + BN partial statistics
# ---------------------------------------------------------------------------
def _conv_stats_kernel(x_ref, w_ref, acc_ref, stat_ref, patch_ref, *, H, W, Cin):
    # x_ref    : (1, H+2, W+2, Cin) bf16   spatially padded input image
    # w_ref    : (9*Cin, Cout)      bf16   flattened conv weight
    # acc_ref  : (1, H*W, Cout)     bf16   pre-activation output (bias-free)
    # stat_ref : (1, 2, Cout)       f32    per-image [sum, sum_sq]
    # patch_ref: (H, W, 9*Cin)      bf16   VMEM scratch holding the im2col slab

    # In-kernel im2col: 9 shifted windows of the padded image, packed on lanes.
    for k in range(9):
        dy, dx = divmod(k, 3)
        patch_ref[:, :, k * Cin:(k + 1) * Cin] = x_ref[0, dy:dy + H, dx:dx + W, :]

    patches = patch_ref[...].reshape(H * W, 9 * Cin)        # collapse leading dims
    # One wide contraction (K = 9*Cin) -- not 9 small K=Cin dots.
    acc = jnp.dot(patches, w_ref[...], preferred_element_type=jnp.float32)
    # Conv bias omitted on purpose: exactly absorbed by the batch-stats BN mean.

    s = jnp.sum(acc, axis=0, keepdims=True)                 # (1, Cout) f32
    ss = jnp.sum(acc * acc, axis=0, keepdims=True)          # (1, Cout) f32
    stat_ref[0] = jnp.concatenate([s, ss], axis=0)          # (2, Cout)

    # bf16 writeback halves the HBM round trip to kernel B.
    # TODO(synk): lane-dense (H*W//2, 2*Cout) store (needs an in-kernel relayout).
    acc_ref[0] = acc.astype(acc_ref.dtype)


def _conv_stats(xpad, w2d, H, W, Cin, Cout):
    N = xpad.shape[0]
    kernel = functools.partial(_conv_stats_kernel, H=H, W=W, Cin=Cin)
    return pl.pallas_call(
        kernel,
        grid=(N,),
        in_specs=[
            pl.BlockSpec((1, H + 2, W + 2, Cin), lambda n: (n, 0, 0, 0)),
            pl.BlockSpec((9 * Cin, Cout), lambda n: (0, 0)),
        ],
        out_specs=[
            pl.BlockSpec((1, H * W, Cout), lambda n: (n, 0, 0)),
            pl.BlockSpec((1, 2, Cout), lambda n: (n, 0, 0)),
        ],
        out_shape=[
            jax.ShapeDtypeStruct((N, H * W, Cout), jnp.bfloat16),
            jax.ShapeDtypeStruct((N, 2, Cout), jnp.float32),
        ],
        scratch_shapes=[pltpu.VMEM((H, W, 9 * Cin), jnp.bfloat16)],
        compiler_params=pltpu.CompilerParams(
            dimension_semantics=("parallel",),
            vmem_limit_bytes=VMEM_LIMIT),
    )(xpad, w2d)


# ---------------------------------------------------------------------------
# Kernel B: BN affine + ReLU + fused 2x2 max-pool (stride 2), bf16 in/out
# ---------------------------------------------------------------------------
def _bn_relu_pool_kernel(y_ref, scale_ref, shift_ref, o_ref):
    # y_ref     : (1, 2*TR, W2, 2C) bf16  pre-activations; lanes = [c@w_even | c@w_odd]
    # scale_ref : (1, 1, 1, 2C)     f32   gamma / sqrt(var+eps), duplicated halves
    # shift_ref : (1, 1, 1, 2C)     f32   beta - mean*scale, duplicated halves
    # o_ref     : (1, TR, W2, C)    bf16  pooled activations
    tr, w2, c = o_ref.shape[1], o_ref.shape[2], o_ref.shape[3]
    y = y_ref[...].astype(jnp.float32)
    y = jnp.maximum(y * scale_ref[...] + shift_ref[...], 0.0)          # BN + ReLU
    y = y.reshape(tr, 2, w2, 2 * c)                                    # expose h-pairs (free)
    hmax = jnp.max(y, axis=1)                                          # pool over h-pair
    o_ref[0] = jnp.maximum(hmax[..., :c], hmax[..., c:]).astype(o_ref.dtype)  # pool over w-pair


def _pick_pool_row_tile(h2, w2, c):
    # Largest divisor of h2 whose bf16 input slab fits the byte budget.
    bytes_per_pooled_row = 2 * w2 * 2 * c * 2
    tr = max(1, min(h2, POOL_TILE_BYTES // max(bytes_per_pooled_row, 1)))
    while h2 % tr:
        tr -= 1
    return tr


def _bn_relu_pool(acc4, scale, shift, H2, W2, C):
    # acc4: (N, H, W2, 2C) bf16 view of the pre-activations.  If H is odd the last
    # row is simply never fetched (floor pooling folded into BlockSpec indexing).
    N = acc4.shape[0]
    tr = _pick_pool_row_tile(H2, W2, C)
    scale2 = jnp.concatenate([scale, scale]).reshape(1, 1, 1, 2 * C).astype(jnp.float32)
    shift2 = jnp.concatenate([shift, shift]).reshape(1, 1, 1, 2 * C).astype(jnp.float32)
    return pl.pallas_call(
        _bn_relu_pool_kernel,
        grid=(N, H2 // tr),
        in_specs=[
            pl.BlockSpec((1, 2 * tr, W2, 2 * C), lambda n, r: (n, r, 0, 0)),
            pl.BlockSpec((1, 1, 1, 2 * C), lambda n, r: (0, 0, 0, 0)),
            pl.BlockSpec((1, 1, 1, 2 * C), lambda n, r: (0, 0, 0, 0)),
        ],
        out_specs=pl.BlockSpec((1, tr, W2, C), lambda n, r: (n, r, 0, 0)),
        out_shape=jax.ShapeDtypeStruct((N, H2, W2, C), jnp.bfloat16),
        compiler_params=pltpu.CompilerParams(
            dimension_semantics=("parallel", "parallel"),
            vmem_limit_bytes=VMEM_LIMIT),
    )(acc4, scale2, shift2)


# ---------------------------------------------------------------------------
# Full forward (JAX glue is only padding / tiny stat reductions / free bitcasts)
# ---------------------------------------------------------------------------
@jax.jit
def convnet_forward(x_nchw, params):
    # x_nchw: (N, Cin, H, W) float32 (PyTorch NCHW convention).
    x = jnp.transpose(x_nchw, (0, 2, 3, 1)).astype(jnp.bfloat16)      # -> NHWC bf16
    for (w, _b, g, bt) in params:   # conv bias `_b` is a no-op under batch-stats BN
        N, H, W, Cin = x.shape
        Cout = w.shape[-1]

        # Pad Cin up to a multiple of 8 (layer 1: 3 -> 8) so lane packing is tidy.
        Cin_p = -(-Cin // 8) * 8
        if Cin_p != Cin:
            x = jnp.pad(x, ((0, 0), (0, 0), (0, 0), (0, Cin_p - Cin)))
            w = jnp.pad(w, ((0, 0), (0, 0), (0, Cin_p - Cin), (0, 0)))
        w2d = w.reshape(9 * Cin_p, Cout).astype(jnp.bfloat16)

        # Spatial halo (padding=1) added once here; im2col happens inside kernel A.
        xpad = jnp.pad(x, ((0, 0), (1, 1), (1, 1), (0, 0)))

        acc, pstats = _conv_stats(xpad, w2d, H, W, Cin_p, Cout)       # bf16, f32

        # BatchNorm batch statistics (training mode), reduced over tiny partials.
        M = N * H * W
        tot = jnp.sum(pstats, axis=0)                                 # (2, Cout)
        mean = tot[0] / M
        var = jnp.maximum(tot[1] / M - mean * mean, 0.0)              # biased variance
        scale = g * jax.lax.rsqrt(var + BN_EPS)
        shift = bt - mean * scale

        # Floor-mode 2x2 pooling.  Odd H: last row skipped by kernel-B indexing.
        H2, W2 = H // 2, W // 2
        if W % 2 == 0:
            acc4 = acc.reshape(N, H, W2, 2 * Cout)                    # free row-major relabel
        else:
            # TODO(synk): fold the odd-W column crop into kernel B (lane slicing).
            acc4 = acc.reshape(N, H, W, Cout)[:, :, :2 * W2, :].reshape(N, H, W2, 2 * Cout)

        x = _bn_relu_pool(acc4, scale, shift, H2, W2, Cout)           # (N, H2, W2, Cout) bf16

    # Match PyTorch x.view(x.size(0), -1) on an NCHW tensor: flatten (C, H, W).
    x = jnp.transpose(x.astype(jnp.float32), (0, 3, 1, 2))
    return x.reshape(x.shape[0], -1)


# ---------------------------------------------------------------------------
# Deterministic parameter construction (synthetic init, shapes from __init__)
# ---------------------------------------------------------------------------
def init_params(key, x_dim=3, hid_dim=64, n_layers=4):
    params = []
    cin = x_dim
    for _ in range(n_layers):
        key, kw, kg = jax.random.split(key, 3)
        fan_in = 9 * cin
        w = jax.random.normal(kw, (3, 3, cin, hid_dim), jnp.float32) / jnp.sqrt(fan_in)
        b = jnp.zeros((hid_dim,), jnp.float32)                # conv bias (absorbed by BN)
        g = jax.random.uniform(kg, (hid_dim,), jnp.float32)   # BN weight (l2l: uniform_)
        bt = jnp.zeros((hid_dim,), jnp.float32)               # BN bias
        params.append((w, b, g, bt))
        cin = hid_dim
    return params


if __name__ == "__main__":
    key = jax.random.PRNGKey(0)
    kx, kp = jax.random.split(key)

    # Small shapes: batch=2, x_dim=3 input channels, 16x16 spatial.
    # After 4 conv blocks with 2x2 pooling: 16 -> 8 -> 4 -> 2 -> 1 => output (2, 64).
    x = jax.random.normal(kx, (2, 3, 16, 16), jnp.float32)
    params = init_params(kp, x_dim=3, hid_dim=64, n_layers=4)

    out = convnet_forward(x, params)
    out = jax.block_until_ready(out)
    assert out.shape == (2, 64), out.shape
    assert jnp.all(jnp.isfinite(out))
    print("KERNEL_OK")
</pallas_src>

<mosaic_0001>
module attributes {stable_mosaic.version = 11 : i64} {
  func.func @_conv_stats_kernel(%arg0: i32, %arg1: memref<1x18x18x8xbf16, #tpu.memory_space<vmem>>, %arg2: memref<72x64xbf16, #tpu.memory_space<vmem>>, %arg3: memref<1x256x64xbf16, #tpu.memory_space<vmem>>, %arg4: memref<1x2x64xf32, #tpu.memory_space<vmem>>, %arg5: memref<16x16x72xbf16, #tpu.memory_space<vmem>>) attributes {dimension_semantics = [#tpu.dimension_semantics<parallel>], iteration_bounds = array<i64: 2>, scalar_prefetch = 0 : i64, scratch_operands = 1 : i64, tpu.core_type = #tpu.core_type<tc>, window_params = [{transform_indices = @transform_0, window_bounds = array<i64: 1, 18, 18, 8>}, {pipeline_mode = #tpu.pipeline_mode<synchronous>, transform_indices = @transform_1, window_bounds = array<i64: 72, 64>}, {transform_indices = @transform_2, window_bounds = array<i64: 1, 256, 64>}, {transform_indices = @transform_3, window_bounds = array<i64: 1, 2, 64>}]} {
    %c0 = arith.constant 0 : index
    %c0_0 = arith.constant 0 : index
    %c0_1 = arith.constant 0 : index
    %c0_2 = arith.constant 0 : index
    %0 = vector.load %arg1[%c0, %c0_0, %c0_1, %c0_2] : memref<1x18x18x8xbf16, #tpu.memory_space<vmem>>, vector<1x16x16x8xbf16>
    %1 = vector.shape_cast %0 : vector<1x16x16x8xbf16> to vector<16x16x8xbf16>
    %c0_3 = arith.constant 0 : index
    %c0_4 = arith.constant 0 : index
    %c0_5 = arith.constant 0 : index
    %2 = vector.load %arg5[%c0_3, %c0_4, %c0_5] : memref<16x16x72xbf16, #tpu.memory_space<vmem>>, vector<16x16x8xbf16>
    tpu.vector_store %arg5[%c0_3, %c0_4, %c0_5], %1 {strides = array<i32>} : memref<16x16x72xbf16, #tpu.memory_space<vmem>>, vector<16x16x8xbf16>,
    %c0_6 = arith.constant 0 : index
    %c0_7 = arith.constant 0 : index
    %c1 = arith.constant 1 : index
    %c0_8 = arith.constant 0 : index
    %3 = vector.load %arg1[%c0_6, %c0_7, %c1, %c0_8] : memref<1x18x18x8xbf16, #tpu.memory_space<vmem>>, vector<1x16x16x8xbf16>
    %4 = vector.shape_cast %3 : vector<1x16x16x8xbf16> to vector<16x16x8xbf16>
    %c0_9 = arith.constant 0 : index
    %c0_10 = arith.constant 0 : index
    %c8 = arith.constant 8 : index
    %5 = vector.load %arg5[%c0_9, %c0_10, %c8] : memref<16x16x72xbf16, #tpu.memory_space<vmem>>, vector<16x16x8xbf16>
    tpu.vector_store %arg5[%c0_9, %c0_10, %c8], %4 {strides = array<i32>} : memref<16x16x72xbf16, #tpu.memory_space<vmem>>, vector<16x16x8xbf16>,
    %c0_11 = arith.constant 0 : index
    %c0_12 = arith.constant 0 : index
    %c2 = arith.constant 2 : index
    %c0_13 = arith.constant 0 : index
    %6 = vector.load %arg1[%c0_11, %c0_12, %c2, %c0_13] : memref<1x18x18x8xbf16, #tpu.memory_space<vmem>>, vector<1x16x16x8xbf16>
    %7 = vector.shape_cast %6 : vector<1x16x16x8xbf16> to vector<16x16x8xbf16>
    %c0_14 = arith.constant 0 : index
    %c0_15 = arith.constant 0 : index
    %c16 = arith.constant 16 : index
    %8 = vector.load %arg5[%c0_14, %c0_15, %c16] : memref<16x16x72xbf16, #tpu.memory_space<vmem>>, vector<16x16x8xbf16>
    tpu.vector_store %arg5[%c0_14, %c0_15, %c16], %7 {strides = array<i32>} : memref<16x16x72xbf16, #tpu.memory_space<vmem>>, vector<16x16x8xbf16>,
    %c0_16 = arith.constant 0 : index
    %c1_17 = arith.constant 1 : index
    %c0_18 = arith.constant 0 : index
    %c0_19 = arith.constant 0 : index
    %9 = vector.load %arg1[%c0_16, %c1_17, %c0_18, %c0_19] : memref<1x18x18x8xbf16, #tpu.memory_space<vmem>>, vector<1x16x16x8xbf16>
    %10 = vector.shape_cast %9 : vector<1x16x16x8xbf16> to vector<16x16x8xbf16>
    %c0_20 = arith.constant 0 : index
    %c0_21 = arith.constant 0 : index
    %c24 = arith.constant 24 : index
    %11 = vector.load %arg5[%c0_20, %c0_21, %c24] : memref<16x16x72xbf16, #tpu.memory_space<vmem>>, vector<16x16x8xbf16>
    tpu.vector_store %arg5[%c0_20, %c0_21, %c24], %10 {strides = array<i32>} : memref<16x16x72xbf16, #tpu.memory_space<vmem>>, vector<16x16x8xbf16>,
    %c0_22 = arith.constant 0 : index
    %c1_23 = arith.constant 1 : index
    %c1_24 = arith.constant 1 : index
    %c0_25 = arith.constant 0 : index
    %12 = vector.load %arg1[%c0_22, %c1_23, %c1_24, %c0_25] : memref<1x18x18x8xbf16, #tpu.memory_space<vmem>>, vector<1x16x16x8xbf16>
    %13 = vector.shape_cast %12 : vector<1x16x16x8xbf16> to vector<16x16x8xbf16>
    %c0_26 = arith.constant 0 : index
    %c0_27 = arith.constant 0 : index
    %c32 = arith.constant 32 : index
    %14 = vector.load %arg5[%c0_26, %c0_27, %c32] : memref<16x16x72xbf16, #tpu.memory_space<vmem>>, vector<16x16x8xbf16>
    tpu.vector_store %arg5[%c0_26, %c0_27, %c32], %13 {strides = array<i32>} : memref<16x16x72xbf16, #tpu.memory_space<vmem>>, vector<16x16x8xbf16>,
    %c0_28 = arith.constant 0 : index
    %c1_29 = arith.constant 1 : index
    %c2_30 = arith.constant 2 : index
    %c0_31 = arith.constant 0 : index
    %15 = vector.load %arg1[%c0_28, %c1_29, %c2_30, %c0_31] : memref<1x18x18x8xbf16, #tpu.memory_space<vmem>>, vector<1x16x16x8xbf16>
    %16 = vector.shape_cast %15 : vector<1x16x16x8xbf16> to vector<16x16x8xbf16>
    %c0_32 = arith.constant 0 : index
    %c0_33 = arith.constant 0 : index
    %c40 = arith.constant 40 : index
    %17 = vector.load %arg5[%c0_32, %c0_33, %c40] : memref<16x16x72xbf16, #tpu.memory_space<vmem>>, vector<16x16x8xbf16>
    tpu.vector_store %arg5[%c0_32, %c0_33, %c40], %16 {strides = array<i32>} : memref<16x16x72xbf16, #tpu.memory_space<vmem>>, vector<16x16x8xbf16>,
    %c0_34 = arith.constant 0 : index
    %c2_35 = arith.constant 2 : index
    %c0_36 = arith.constant 0 : index
    %c0_37 = arith.constant 0 : index
    %18 = vector.load %arg1[%c0_34, %c2_35, %c0_36, %c0_37] : memref<1x18x18x8xbf16, #tpu.memory_space<vmem>>, vector<1x16x16x8xbf16>
    %19 = vector.shape_cast %18 : vector<1x16x16x8xbf16> to vector<16x16x8xbf16>
    %c0_38 = arith.constant 0 : index
    %c0_39 = arith.constant 0 : index
    %c48 = arith.constant 48 : index
    %20 = vector.load %arg5[%c0_38, %c0_39, %c48] : memref<16x16x72xbf16, #tpu.memory_space<vmem>>, vector<16x16x8xbf16>
    tpu.vector_store %arg5[%c0_38, %c0_39, %c48], %19 {strides = array<i32>} : memref<16x16x72xbf16, #tpu.memory_space<vmem>>, vector<16x16x8xbf16>,
    %c0_40 = arith.constant 0 : index
    %c2_41 = arith.constant 2 : index
    %c1_42 = arith.constant 1 : index
    %c0_43 = arith.constant 0 : index
    %21 = vector.load %arg1[%c0_40, %c2_41, %c1_42, %c0_43] : memref<1x18x18x8xbf16, #tpu.memory_space<vmem>>, vector<1x16x16x8xbf16>
    %22 = vector.shape_cast %21 : vector<1x16x16x8xbf16> to vector<16x16x8xbf16>
    %c0_44 = arith.constant 0 : index
    %c0_45 = arith.constant 0 : index
    %c56 = arith.constant 56 : index
    %23 = vector.load %arg5[%c0_44, %c0_45, %c56] : memref<16x16x72xbf16, #tpu.memory_space<vmem>>, vector<16x16x8xbf16>
    tpu.vector_store %arg5[%c0_44, %c0_45, %c56], %22 {strides = array<i32>} : memref<16x16x72xbf16, #tpu.memory_space<vmem>>, vector<16x16x8xbf16>,
    %c0_46 = arith.constant 0 : index
    %c2_47 = arith.constant 2 : index
    %c2_48 = arith.constant 2 : index
    %c0_49 = arith.constant 0 : index
    %24 = vector.load %arg1[%c0_46, %c2_47, %c2_48, %c0_49] : memref<1x18x18x8xbf16, #tpu.memory_space<vmem>>, vector<1x16x16x8xbf16>
    %25 = vector.shape_cast %24 : vector<1x16x16x8xbf16> to vector<16x16x8xbf16>
    %c0_50 = arith.constant 0 : index
    %c0_51 = arith.constant 0 : index
    %c64 = arith.constant 64 : index
    %26 = vector.load %arg5[%c0_50, %c0_51, %c64] : memref<16x16x72xbf16, #tpu.memory_space<vmem>>, vector<16x16x8xbf16>
    tpu.vector_store %arg5[%c0_50, %c0_51, %c64], %25 {strides = array<i32>} : memref<16x16x72xbf16, #tpu.memory_space<vmem>>, vector<16x16x8xbf16>,
    %c0_52 = arith.constant 0 : index
    %c0_53 = arith.constant 0 : index
    %c0_54 = arith.constant 0 : index
    %27 = vector.load %arg5[%c0_52, %c0_53, %c0_54] : memref<16x16x72xbf16, #tpu.memory_space<vmem>>, vector<16x16x72xbf16>
    %28 = vector.shape_cast %27 : vector<16x16x72xbf16> to vector<256x72xbf16>
    %c0_55 = arith.constant 0 : index
    %c0_56 = arith.constant 0 : index
    %29 = vector.load %arg2[%c0_55, %c0_56] : memref<72x64xbf16, #tpu.memory_space<vmem>>, vector<72x64xbf16>
    %cst = arith.constant dense<0.000000e+00> : vector<256x64xf32>
    %30 = tpu.matmul %28, %29, %cst {dimension_numbers = #tpu.dot_dimension_numbers<[1], [0], [0], [1], [0, 0, 1, 1], [], []>} : vector<256x72xbf16>, vector<72x64xbf16>, vector<256x64xf32> -> vector<256x64xf32>
    %cst_57 = arith.constant dense<0.000000e+00> : vector<64xf32>
    %31 = vector.multi_reduction <add>, %30, %cst_57 [0] : vector<256x64xf32> to vector<64xf32>
    %32 = vector.shape_cast %31 : vector<64xf32> to vector<1x64xf32>
    %33 = arith.mulf %30, %30 : vector<256x64xf32>
    %cst_58 = arith.constant dense<0.000000e+00> : vector<64xf32>
    %34 = vector.multi_reduction <add>, %33, %cst_58 [0] : vector<256x64xf32> to vector<64xf32>
    %35 = vector.shape_cast %34 : vector<64xf32> to vector<1x64xf32>
    %36 = tpu.concatenate %32, %35 in 0 : vector<1x64xf32>, vector<1x64xf32> -> vector<2x64xf32>
    %c0_59 = arith.constant 0 : index
    %c0_60 = arith.constant 0 : index
    %c0_61 = arith.constant 0 : index
    %37 = vector.load %arg4[%c0_59, %c0_60, %c0_61] : memref<1x2x64xf32, #tpu.memory_space<vmem>>, vector<1x2x64xf32>
    %38 = vector.shape_cast %37 : vector<1x2x64xf32> to vector<2x64xf32>
    %39 = vector.shape_cast %36 : vector<2x64xf32> to vector<1x2x64xf32>
    tpu.vector_store %arg4[%c0_59, %c0_60, %c0_61], %39 {strides = array<i32>} : memref<1x2x64xf32, #tpu.memory_space<vmem>>, vector<1x2x64xf32>,
    %40 = arith.truncf %30 : vector<256x64xf32> to vector<256x64xbf16>
    %c0_62 = arith.constant 0 : index
    %c0_63 = arith.constant 0 : index
    %c0_64 = arith.constant 0 : index
    %41 = vector.load %arg3[%c0_62, %c0_63, %c0_64] : memref<1x256x64xbf16, #tpu.memory_space<vmem>>, vector<1x256x64xbf16>
    %42 = vector.shape_cast %41 : vector<1x256x64xbf16> to vector<256x64xbf16>
    %43 = vector.shape_cast %40 : vector<256x64xbf16> to vector<1x256x64xbf16>
    tpu.vector_store %arg3[%c0_62, %c0_63, %c0_64], %43 {strides = array<i32>} : memref<1x256x64xbf16, #tpu.memory_space<vmem>>, vector<1x256x64xbf16>,
    return
  }
  func.func @transform_0(%arg0: i32) -> (i32, i32, i32, i32) {
    %c0_i32 = arith.constant 0 : i32
    %c0_i32_0 = arith.constant 0 : i32
    %c0_i32_1 = arith.constant 0 : i32
    %c0_i32_2 = arith.constant 0 : i32
    return %arg0, %c0_i32, %c0_i32_0, %c0_i32_1 : i32, i32, i32, i32
  }
  func.func @transform_1(%arg0: i32) -> (i32, i32) {
    %c0_i32 = arith.constant 0 : i32
    %c0_i32_0 = arith.constant 0 : i32
    %c0_i32_1 = arith.constant 0 : i32
    return %c0_i32, %c0_i32_0 : i32, i32
  }
  func.func @transform_2(%arg0: i32) -> (i32, i32, i32) {
    %c0_i32 = arith.constant 0 : i32
    %c0_i32_0 = arith.constant 0 : i32
    %c0_i32_1 = arith.constant 0 : i32
    return %arg0, %c0_i32, %c0_i32_0 : i32, i32, i32
  }
  func.func @transform_3(%arg0: i32) -> (i32, i32, i32) {
    %c0_i32 = arith.constant 0 : i32
    %c0_i32_0 = arith.constant 0 : i32
    %c0_i32_1 = arith.constant 0 : i32
    return %arg0, %c0_i32, %c0_i32_0 : i32, i32, i32
  }
}

module attributes {stable_mosaic.version = 11 : i64} {
  func.func @_bn_relu_pool_kernel(%arg0: i32, %arg1: i32, %arg2: memref<1x16x8x128xbf16, #tpu.memory_space<vmem>>, %arg3: memref<1x1x1x128xf32, #tpu.memory_space<vmem>>, %arg4: memref<1x1x1x128xf32, #tpu.memory_space<vmem>>, %arg5: memref<1x8x8x64xbf16, #tpu.memory_space<vmem>>) attributes {dimension_semantics = [#tpu.dimension_semantics<parallel>, #tpu.dimension_semantics<parallel>], iteration_bounds = array<i64: 2, 1>, scalar_prefetch = 0 : i64, scratch_operands = 0 : i64, tpu.core_type = #tpu.core_type<tc>, window_params = [{transform_indices = @transform_0, window_bounds = array<i64: 1, 16, 8, 128>}, {pipeline_mode = #tpu.pipeline_mode<synchronous>, transform_indices = @transform_1, window_bounds = array<i64: 1, 1, 1, 128>}, {pipeline_mode = #tpu.pipeline_mode<synchronous>, transform_indices = @transform_2, window_bounds = array<i64: 1, 1, 1, 128>}, {transform_indices = @transform_3, window_bounds = array<i64: 1, 8, 8, 64>}]} {
    %c0 = arith.constant 0 : index
    %c0_0 = arith.constant 0 : index
    %c0_1 = arith.constant 0 : index
    %c0_2 = arith.constant 0 : index
    %0 = vector.load %arg2[%c0, %c0_0, %c0_1, %c0_2] : memref<1x16x8x128xbf16, #tpu.memory_space<vmem>>, vector<1x16x8x128xbf16>
    %1 = arith.extf %0 : vector<1x16x8x128xbf16> to vector<1x16x8x128xf32>
    %c0_3 = arith.constant 0 : index
    %c0_4 = arith.constant 0 : index
    %c0_5 = arith.constant 0 : index
    %c0_6 = arith.constant 0 : index
    %2 = vector.load %arg3[%c0_3, %c0_4, %c0_5, %c0_6] : memref<1x1x1x128xf32, #tpu.memory_space<vmem>>, vector<1x1x1x128xf32>
    %3 = vector.broadcast %2 : vector<1x1x1x128xf32> to vector<1x16x8x128xf32>
    %4 = arith.mulf %1, %3 : vector<1x16x8x128xf32>
    %c0_7 = arith.constant 0 : index
    %c0_8 = arith.constant 0 : index
    %c0_9 = arith.constant 0 : index
    %c0_10 = arith.constant 0 : index
    %5 = vector.load %arg4[%c0_7, %c0_8, %c0_9, %c0_10] : memref<1x1x1x128xf32, #tpu.memory_space<vmem>>, vector<1x1x1x128xf32>
    %6 = vector.broadcast %5 : vector<1x1x1x128xf32> to vector<1x16x8x128xf32>
    %7 = arith.addf %4, %6 : vector<1x16x8x128xf32>
    %cst = arith.constant 0.000000e+00 : f32
    %8 = vector.broadcast %cst : f32 to vector<1x16x8x128xf32>
    %9 = arith.maximumf %7, %8 : vector<1x16x8x128xf32>
    %10 = vector.shape_cast %9 : vector<1x16x8x128xf32> to vector<8x2x8x128xf32>
    %cst_11 = arith.constant dense<0xFF800000> : vector<8x8x128xf32>
    %11 = vector.multi_reduction <maximumf>, %10, %cst_11 [1] : vector<8x2x8x128xf32> to vector<8x8x128xf32>
    %12 = vector.extract_strided_slice %11 {offsets = [0, 0, 0], sizes = [8, 8, 64], strides = [1, 1, 1]} : vector<8x8x128xf32> to vector<8x8x64xf32>
    %13 = vector.extract_strided_slice %11 {offsets = [0, 0, 64], sizes = [8, 8, 64], strides = [1, 1, 1]} : vector<8x8x128xf32> to vector<8x8x64xf32>
    %14 = arith.maximumf %12, %13 : vector<8x8x64xf32>
    %15 = arith.truncf %14 : vector<8x8x64xf32> to vector<8x8x64xbf16>
    %c0_12 = arith.constant 0 : index
    %c0_13 = arith.constant 0 : index
    %c0_14 = arith.constant 0 : index
    %c0_15 = arith.constant 0 : index
    %16 = vector.load %arg5[%c0_12, %c0_13, %c0_14, %c0_15] : memref<1x8x8x64xbf16, #tpu.memory_space<vmem>>, vector<1x8x8x64xbf16>
    %17 = vector.shape_cast %16 : vector<1x8x8x64xbf16> to vector<8x8x64xbf16>
    %18 = vector.shape_cast %15 : vector<8x8x64xbf16> to vector<1x8x8x64xbf16>
    tpu.vector_store %arg5[%c0_12, %c0_13, %c0_14, %c0_15], %18 {strides = array<i32>} : memref<1x8x8x64xbf16, #tpu.memory_space<vmem>>, vector<1x8x8x64xbf16>,
    return
  }
  func.func @transform_0(%arg0: i32, %arg1: i32) -> (i32, i32, i32, i32) {
    %c0_i32 = arith.constant 0 : i32
    %c0_i32_0 = arith.constant 0 : i32
    %c0_i32_1 = arith.constant 0 : i32
    return %arg0, %arg1, %c0_i32, %c0_i32_0 : i32, i32, i32, i32
  }
  func.func @transform_1(%arg0: i32, %arg1: i32) -> (i32, i32, i32, i32) {
    %c0_i32 = arith.constant 0 : i32
    %c0_i32_0 = arith.constant 0 : i32
    %c0_i32_1 = arith.constant 0 : i32
    %c0_i32_2 = arith.constant 0 : i32
    %c0_i32_3 = arith.constant 0 : i32
    return %c0_i32, %c0_i32_0, %c0_i32_1, %c0_i32_2 : i32, i32, i32, i32
  }
  func.func @transform_2(%arg0: i32, %arg1: i32) -> (i32, i32, i32, i32) {
    %c0_i32 = arith.constant 0 : i32
    %c0_i32_0 = arith.constant 0 : i32
    %c0_i32_1 = arith.constant 0 : i32
    %c0_i32_2 = arith.constant 0 : i32
    %c0_i32_3 = arith.constant 0 : i32
    return %c0_i32, %c0_i32_0, %c0_i32_1, %c0_i32_2 : i32, i32, i32, i32
  }
  func.func @transform_3(%arg0: i32, %arg1: i32) -> (i32, i32, i32, i32) {
    %c0_i32 = arith.constant 0 : i32
    %c0_i32_0 = arith.constant 0 : i32
    %c0_i32_1 = arith.constant 0 : i32
    return %arg0, %arg1, %c0_i32, %c0_i32_0 : i32, i32, i32, i32
  }
}

module attributes {stable_mosaic.version = 11 : i64} {
  func.func @_conv_stats_kernel(%arg0: i32, %arg1: memref<1x10x10x64xbf16, #tpu.memory_space<vmem>>, %arg2: memref<576x64xbf16, #tpu.memory_space<vmem>>, %arg3: memref<1x64x64xbf16, #tpu.memory_space<vmem>>, %arg4: memref<1x2x64xf32, #tpu.memory_space<vmem>>, %arg5: memref<8x8x576xbf16, #tpu.memory_space<vmem>>) attributes {dimension_semantics = [#tpu.dimension_semantics<parallel>], iteration_bounds = array<i64: 2>, scalar_prefetch = 0 : i64, scratch_operands = 1 : i64, tpu.core_type = #tpu.core_type<tc>, window_params = [{transform_indices = @transform_0, window_bounds = array<i64: 1, 10, 10, 64>}, {pipeline_mode = #tpu.pipeline_mode<synchronous>, transform_indices = @transform_1, window_bounds = array<i64: 576, 64>}, {transform_indices = @transform_2, window_bounds = array<i64: 1, 64, 64>}, {transform_indices = @transform_3, window_bounds = array<i64: 1, 2, 64>}]} {
    %c0 = arith.constant 0 : index
    %c0_0 = arith.constant 0 : index
    %c0_1 = arith.constant 0 : index
    %c0_2 = arith.constant 0 : index
    %0 = vector.load %arg1[%c0, %c0_0, %c0_1, %c0_2] : memref<1x10x10x64xbf16, #tpu.memory_space<vmem>>, vector<1x8x8x64xbf16>
    %1 = vector.shape_cast %0 : vector<1x8x8x64xbf16> to vector<8x8x64xbf16>
    %c0_3 = arith.constant 0 : index
    %c0_4 = arith.constant 0 : index
    %c0_5 = arith.constant 0 : index
    %2 = vector.load %arg5[%c0_3, %c0_4, %c0_5] : memref<8x8x576xbf16, #tpu.memory_space<vmem>>, vector<8x8x64xbf16>
    tpu.vector_store %arg5[%c0_3, %c0_4, %c0_5], %1 {strides = array<i32>} : memref<8x8x576xbf16, #tpu.memory_space<vmem>>, vector<8x8x64xbf16>,
    %c0_6 = arith.constant 0 : index
    %c0_7 = arith.constant 0 : index
    %c1 = arith.constant 1 : index
    %c0_8 = arith.constant 0 : index
    %3 = vector.load %arg1[%c0_6, %c0_7, %c1, %c0_8] : memref<1x10x10x64xbf16, #tpu.memory_space<vmem>>, vector<1x8x8x64xbf16>
    %4 = vector.shape_cast %3 : vector<1x8x8x64xbf16> to vector<8x8x64xbf16>
    %c0_9 = arith.constant 0 : index
    %c0_10 = arith.constant 0 : index
    %c64 = arith.constant 64 : index
    %5 = vector.load %arg5[%c0_9, %c0_10, %c64] : memref<8x8x576xbf16, #tpu.memory_space<vmem>>, vector<8x8x64xbf16>
    tpu.vector_store %arg5[%c0_9, %c0_10, %c64], %4 {strides = array<i32>} : memref<8x8x576xbf16, #tpu.memory_space<vmem>>, vector<8x8x64xbf16>,
    %c0_11 = arith.constant 0 : index
    %c0_12 = arith.constant 0 : index
    %c2 = arith.constant 2 : index
    %c0_13 = arith.constant 0 : index
    %6 = vector.load %arg1[%c0_11, %c0_12, %c2, %c0_13] : memref<1x10x10x64xbf16, #tpu.memory_space<vmem>>, vector<1x8x8x64xbf16>
    %7 = vector.shape_cast %6 : vector<1x8x8x64xbf16> to vector<8x8x64xbf16>
    %c0_14 = arith.constant 0 : index
    %c0_15 = arith.constant 0 : index
    %c128 = arith.constant 128 : index
    %8 = vector.load %arg5[%c0_14, %c0_15, %c128] : memref<8x8x576xbf16, #tpu.memory_space<vmem>>, vector<8x8x64xbf16>
    tpu.vector_store %arg5[%c0_14, %c0_15, %c128], %7 {strides = array<i32>} : memref<8x8x576xbf16, #tpu.memory_space<vmem>>, vector<8x8x64xbf16>,
    %c0_16 = arith.constant 0 : index
    %c1_17 = arith.constant 1 : index
    %c0_18 = arith.constant 0 : index
    %c0_19 = arith.constant 0 : index
    %9 = vector.load %arg1[%c0_16, %c1_17, %c0_18, %c0_19] : memref<1x10x10x64xbf16, #tpu.memory_space<vmem>>, vector<1x8x8x64xbf16>
    %10 = vector.shape_cast %9 : vector<1x8x8x64xbf16> to vector<8x8x64xbf16>
    %c0_20 = arith.constant 0 : index
    %c0_21 = arith.constant 0 : index
    %c192 = arith.constant 192 : index
    %11 = vector.load %arg5[%c0_20, %c0_21, %c192] : memref<8x8x576xbf16, #tpu.memory_space<vmem>>, vector<8x8x64xbf16>
    tpu.vector_store %arg5[%c0_20, %c0_21, %c192], %10 {strides = array<i32>} : memref<8x8x576xbf16, #tpu.memory_space<vmem>>, vector<8x8x64xbf16>,
    %c0_22 = arith.constant 0 : index
    %c1_23 = arith.constant 1 : index
    %c1_24 = arith.constant 1 : index
    %c0_25 = arith.constant 0 : index
    %12 = vector.load %arg1[%c0_22, %c1_23, %c1_24, %c0_25] : memref<1x10x10x64xbf16, #tpu.memory_space<vmem>>, vector<1x8x8x64xbf16>
    %13 = vector.shape_cast %12 : vector<1x8x8x64xbf16> to vector<8x8x64xbf16>
    %c0_26 = arith.constant 0 : index
    %c0_27 = arith.constant 0 : index
    %c256 = arith.constant 256 : index
    %14 = vector.load %arg5[%c0_26, %c0_27, %c256] : memref<8x8x576xbf16, #tpu.memory_space<vmem>>, vector<8x8x64xbf16>
    tpu.vector_store %arg5[%c0_26, %c0_27, %c256], %13 {strides = array<i32>} : memref<8x8x576xbf16, #tpu.memory_space<vmem>>, vector<8x8x64xbf16>,
    %c0_28 = arith.constant 0 : index
    %c1_29 = arith.constant 1 : index
    %c2_30 = arith.constant 2 : index
    %c0_31 = arith.constant 0 : index
    %15 = vector.load %arg1[%c0_28, %c1_29, %c2_30, %c0_31] : memref<1x10x10x64xbf16, #tpu.memory_space<vmem>>, vector<1x8x8x64xbf16>
    %16 = vector.shape_cast %15 : vector<1x8x8x64xbf16> to vector<8x8x64xbf16>
    %c0_32 = arith.constant 0 : index
    %c0_33 = arith.constant 0 : index
    %c320 = arith.constant 320 : index
    %17 = vector.load %arg5[%c0_32, %c0_33, %c320] : memref<8x8x576xbf16, #tpu.memory_space<vmem>>, vector<8x8x64xbf16>
    tpu.vector_store %arg5[%c0_32, %c0_33, %c320], %16 {strides = array<i32>} : memref<8x8x576xbf16, #tpu.memory_space<vmem>>, vector<8x8x64xbf16>,
    %c0_34 = arith.constant 0 : index
    %c2_35 = arith.constant 2 : index
    %c0_36 = arith.constant 0 : index
    %c0_37 = arith.constant 0 : index
    %18 = vector.load %arg1[%c0_34, %c2_35, %c0_36, %c0_37] : memref<1x10x10x64xbf16, #tpu.memory_space<vmem>>, vector<1x8x8x64xbf16>
    %19 = vector.shape_cast %18 : vector<1x8x8x64xbf16> to vector<8x8x64xbf16>
    %c0_38 = arith.constant 0 : index
    %c0_39 = arith.constant 0 : index
    %c384 = arith.constant 384 : index
    %20 = vector.load %arg5[%c0_38, %c0_39, %c384] : memref<8x8x576xbf16, #tpu.memory_space<vmem>>, vector<8x8x64xbf16>
    tpu.vector_store %arg5[%c0_38, %c0_39, %c384], %19 {strides = array<i32>} : memref<8x8x576xbf16, #tpu.memory_space<vmem>>, vector<8x8x64xbf16>,
    %c0_40 = arith.constant 0 : index
    %c2_41 = arith.constant 2 : index
    %c1_42 = arith.constant 1 : index
    %c0_43 = arith.constant 0 : index
    %21 = vector.load %arg1[%c0_40, %c2_41, %c1_42, %c0_43] : memref<1x10x10x64xbf16, #tpu.memory_space<vmem>>, vector<1x8x8x64xbf16>
    %22 = vector.shape_cast %21 : vector<1x8x8x64xbf16> to vector<8x8x64xbf16>
    %c0_44 = arith.constant 0 : index
    %c0_45 = arith.constant 0 : index
    %c448 = arith.constant 448 : index
    %23 = vector.load %arg5[%c0_44, %c0_45, %c448] : memref<8x8x576xbf16, #tpu.memory_space<vmem>>, vector<8x8x64xbf16>
    tpu.vector_store %arg5[%c0_44, %c0_45, %c448], %22 {strides = array<i32>} : memref<8x8x576xbf16, #tpu.memory_space<vmem>>, vector<8x8x64xbf16>,
    %c0_46 = arith.constant 0 : index
    %c2_47 = arith.constant 2 : index
    %c2_48 = arith.constant 2 : index
    %c0_49 = arith.constant 0 : index
    %24 = vector.load %arg1[%c0_46, %c2_47, %c2_48, %c0_49] : memref<1x10x10x64xbf16, #tpu.memory_space<vmem>>, vector<1x8x8x64xbf16>
    %25 = vector.shape_cast %24 : vector<1x8x8x64xbf16> to vector<8x8x64xbf16>
    %c0_50 = arith.constant 0 : index
    %c0_51 = arith.constant 0 : index
    %c512 = arith.constant 512 : index
    %26 = vector.load %arg5[%c0_50, %c0_51, %c512] : memref<8x8x576xbf16, #tpu.memory_space<vmem>>, vector<8x8x64xbf16>
    tpu.vector_store %arg5[%c0_50, %c0_51, %c512], %25 {strides = array<i32>} : memref<8x8x576xbf16, #tpu.memory_space<vmem>>, vector<8x8x64xbf16>,
    %c0_52 = arith.constant 0 : index
    %c0_53 = arith.constant 0 : index
    %c0_54 = arith.constant 0 : index
    %27 = vector.load %arg5[%c0_52, %c0_53, %c0_54] : memref<8x8x576xbf16, #tpu.memory_space<vmem>>, vector<8x8x576xbf16>
    %28 = vector.shape_cast %27 : vector<8x8x576xbf16> to vector<64x576xbf16>
    %c0_55 = arith.constant 0 : index
    %c0_56 = arith.constant 0 : index
    %29 = vector.load %arg2[%c0_55, %c0_56] : memref<576x64xbf16, #tpu.memory_space<vmem>>, vector<576x64xbf16>
    %cst = arith.constant dense<0.000000e+00> : vector<64x64xf32>
    %30 = tpu.matmul %28, %29, %cst {dimension_numbers = #tpu.dot_dimension_numbers<[1], [0], [0], [1], [0, 0, 1, 1], [], []>} : vector<64x576xbf16>, vector<576x64xbf16>, vector<64x64xf32> -> vector<64x64xf32>
    %cst_57 = arith.constant dense<0.000000e+00> : vector<64xf32>
    %31 = vector.multi_reduction <add>, %30, %cst_57 [0] : vector<64x64xf32> to vector<64xf32>
    %32 = vector.shape_cast %31 : vector<64xf32> to vector<1x64xf32>
    %33 = arith.mulf %30, %30 : vector<64x64xf32>
    %cst_58 = arith.constant dense<0.000000e+00> : vector<64xf32>
    %34 = vector.multi_reduction <add>, %33, %cst_58 [0] : vector<64x64xf32> to vector<64xf32>
    %35 = vector.shape_cast %34 : vector<64xf32> to vector<1x64xf32>
    %36 = tpu.concatenate %32, %35 in 0 : vector<1x64xf32>, vector<1x64xf32> -> vector<2x64xf32>
    %c0_59 = arith.constant 0 : index
    %c0_60 = arith.constant 0 : index
    %c0_61 = arith.constant 0 : index
    %37 = vector.load %arg4[%c0_59, %c0_60, %c0_61] : memref<1x2x64xf32, #tpu.memory_space<vmem>>, vector<1x2x64xf32>
    %38 = vector.shape_cast %37 : vector<1x2x64xf32> to vector<2x64xf32>
    %39 = vector.shape_cast %36 : vector<2x64xf32> to vector<1x2x64xf32>
    tpu.vector_store %arg4[%c0_59, %c0_60, %c0_61], %39 {strides = array<i32>} : memref<1x2x64xf32, #tpu.memory_space<vmem>>, vector<1x2x64xf32>,
    %40 = arith.truncf %30 : vector<64x64xf32> to vector<64x64xbf16>
    %c0_62 = arith.constant 0 : index
    %c0_63 = arith.constant 0 : index
    %c0_64 = arith.constant 0 : index
    %41 = vector.load %arg3[%c0_62, %c0_63, %c0_64] : memref<1x64x64xbf16, #tpu.memory_space<vmem>>, vector<1x64x64xbf16>
    %42 = vector.shape_cast %41 : vector<1x64x64xbf16> to vector<64x64xbf16>
    %43 = vector.shape_cast %40 : vector<64x64xbf16> to vector<1x64x64xbf16>
    tpu.vector_store %arg3[%c0_62, %c0_63, %c0_64], %43 {strides = array<i32>} : memref<1x64x64xbf16, #tpu.memory_space<vmem>>, vector<1x64x64xbf16>,
    return
  }
  func.func @transform_0(%arg0: i32) -> (i32, i32, i32, i32) {
    %c0_i32 = arith.constant 0 : i32
    %c0_i32_0 = arith.constant 0 : i32
    %c0_i32_1 = arith.constant 0 : i32
    %c0_i32_2 = arith.constant 0 : i32
    return %arg0, %c0_i32, %c0_i32_0, %c0_i32_1 : i32, i32, i32, i32
  }
  func.func @transform_1(%arg0: i32) -> (i32, i32) {
    %c0_i32 = arith.constant 0 : i32
    %c0_i32_0 = arith.constant 0 : i32
    %c0_i32_1 = arith.constant 0 : i32
    return %c0_i32, %c0_i32_0 : i32, i32
  }
  func.func @transform_2(%arg0: i32) -> (i32, i32, i32) {
    %c0_i32 = arith.constant 0 : i32
    %c0_i32_0 = arith.constant 0 : i32
    %c0_i32_1 = arith.constant 0 : i32
    return %arg0, %c0_i32, %c0_i32_0 : i32, i32, i32
  }
  func.func @transform_3(%arg0: i32) -> (i32, i32, i32) {
    %c0_i32 = arith.constant 0 : i32
    %c0_i32_0 = arith.constant 0 : i32
    %c0_i32_1 = arith.constant 0 : i32
    return %arg0, %c0_i32, %c0_i32_0 : i32, i32, i32
  }
}

module attributes {stable_mosaic.version = 11 : i64} {
  func.func @_bn_relu_pool_kernel(%arg0: i32, %arg1: i32, %arg2: memref<1x8x4x128xbf16, #tpu.memory_space<vmem>>, %arg3: memref<1x1x1x128xf32, #tpu.memory_space<vmem>>, %arg4: memref<1x1x1x128xf32, #tpu.memory_space<vmem>>, %arg5: memref<1x4x4x64xbf16, #tpu.memory_space<vmem>>) attributes {dimension_semantics = [#tpu.dimension_semantics<parallel>, #tpu.dimension_semantics<parallel>], iteration_bounds = array<i64: 2, 1>, scalar_prefetch = 0 : i64, scratch_operands = 0 : i64, tpu.core_type = #tpu.core_type<tc>, window_params = [{transform_indices = @transform_0, window_bounds = array<i64: 1, 8, 4, 128>}, {pipeline_mode = #tpu.pipeline_mode<synchronous>, transform_indices = @transform_1, window_bounds = array<i64: 1, 1, 1, 128>}, {pipeline_mode = #tpu.pipeline_mode<synchronous>, transform_indices = @transform_2, window_bounds = array<i64: 1, 1, 1, 128>}, {transform_indices = @transform_3, window_bounds = array<i64: 1, 4, 4, 64>}]} {
    %c0 = arith.constant 0 : index
    %c0_0 = arith.constant 0 : index
    %c0_1 = arith.constant 0 : index
    %c0_2 = arith.constant 0 : index
    %0 = vector.load %arg2[%c0, %c0_0, %c0_1, %c0_2] : memref<1x8x4x128xbf16, #tpu.memory_space<vmem>>, vector<1x8x4x128xbf16>
    %1 = arith.extf %0 : vector<1x8x4x128xbf16> to vector<1x8x4x128xf32>
    %c0_3 = arith.constant 0 : index
    %c0_4 = arith.constant 0 : index
    %c0_5 = arith.constant 0 : index
    %c0_6 = arith.constant 0 : index
    %2 = vector.load %arg3[%c0_3, %c0_4, %c0_5, %c0_6] : memref<1x1x1x128xf32, #tpu.memory_space<vmem>>, vector<1x1x1x128xf32>
    %3 = vector.broadcast %2 : vector<1x1x1x128xf32> to vector<1x8x4x128xf32>
    %4 = arith.mulf %1, %3 : vector<1x8x4x128xf32>
    %c0_7 = arith.constant 0 : index
    %c0_8 = arith.constant 0 : index
    %c0_9 = arith.constant 0 : index
    %c0_10 = arith.constant 0 : index
    %5 = vector.load %arg4[%c0_7, %c0_8, %c0_9, %c0_10] : memref<1x1x1x128xf32, #tpu.memory_space<vmem>>, vector<1x1x1x128xf32>
    %6 = vector.broadcast %5 : vector<1x1x1x128xf32> to vector<1x8x4x128xf32>
    %7 = arith.addf %4, %6 : vector<1x8x4x128xf32>
    %cst = arith.constant 0.000000e+00 : f32
    %8 = vector.broadcast %cst : f32 to vector<1x8x4x128xf32>
    %9 = arith.maximumf %7, %8 : vector<1x8x4x128xf32>
    %10 = vector.shape_cast %9 : vector<1x8x4x128xf32> to vector<4x2x4x128xf32>
    %cst_11 = arith.constant dense<0xFF800000> : vector<4x4x128xf32>
    %11 = vector.multi_reduction <maximumf>, %10, %cst_11 [1] : vector<4x2x4x128xf32> to vector<4x4x128xf32>
    %12 = vector.extract_strided_slice %11 {offsets = [0, 0, 0], sizes = [4, 4, 64], strides = [1, 1, 1]} : vector<4x4x128xf32> to vector<4x4x64xf32>
    %13 = vector.extract_strided_slice %11 {offsets = [0, 0, 64], sizes = [4, 4, 64], strides = [1, 1, 1]} : vector<4x4x128xf32> to vector<4x4x64xf32>
    %14 = arith.maximumf %12, %13 : vector<4x4x64xf32>
    %15 = arith.truncf %14 : vector<4x4x64xf32> to vector<4x4x64xbf16>
    %c0_12 = arith.constant 0 : index
    %c0_13 = arith.constant 0 : index
    %c0_14 = arith.constant 0 : index
    %c0_15 = arith.constant 0 : index
    %16 = vector.load %arg5[%c0_12, %c0_13, %c0_14, %c0_15] : memref<1x4x4x64xbf16, #tpu.memory_space<vmem>>, vector<1x4x4x64xbf16>
    %17 = vector.shape_cast %16 : vector<1x4x4x64xbf16> to vector<4x4x64xbf16>
    %18 = vector.shape_cast %15 : vector<4x4x64xbf16> to vector<1x4x4x64xbf16>
    tpu.vector_store %arg5[%c0_12, %c0_13, %c0_14, %c0_15], %18 {strides = array<i32>} : memref<1x4x4x64xbf16, #tpu.memory_space<vmem>>, vector<1x4x4x64xbf16>,
    return
  }
  func.func @transform_0(%arg0: i32, %arg1: i32) -> (i32, i32, i32, i32) {
    %c0_i32 = arith.constant 0 : i32
    %c0_i32_0 = arith.constant 0 : i32
    %c0_i32_1 = arith.constant 0 : i32
    return %arg0, %arg1, %c0_i32, %c0_i32_0 : i32, i32, i32, i32
  }
  func.func @transform_1(%arg0: i32, %arg1: i32) -> (i32, i32, i32, i32) {
    %c0_i32 = arith.constant 0 : i32
    %c0_i32_0 = arith.constant 0 : i32
    %c0_i32_1 = arith.constant 0 : i32
    %c0_i32_2 = arith.constant 0 : i32
    %c0_i32_3 = arith.constant 0 : i32
    return %c0_i32, %c0_i32_0, %c0_i32_1, %c0_i32_2 : i32, i32, i32, i32
  }
  func.func @transform_2(%arg0: i32, %arg1: i32) -> (i32, i32, i32, i32) {
    %c0_i32 = arith.constant 0 : i32
    %c0_i32_0 = arith.constant 0 : i32
    %c0_i32_1 = arith.constant 0 : i32
    %c0_i32_2 = arith.constant 0 : i32
    %c0_i32_3 = arith.constant 0 : i32
    return %c0_i32, %c0_i32_0, %c0_i32_1, %c0_i32_2 : i32, i32, i32, i32
  }
  func.func @transform_3(%arg0: i32, %arg1: i32) -> (i32, i32, i32, i32) {
    %c0_i32 = arith.constant 0 : i32
    %c0_i32_0 = arith.constant 0 : i32
    %c0_i32_1 = arith.constant 0 : i32
    return %arg0, %arg1, %c0_i32, %c0_i32_0 : i32, i32, i32, i32
  }
}

module attributes {stable_mosaic.version = 11 : i64} {
  func.func @_conv_stats_kernel(%arg0: i32, %arg1: memref<1x6x6x64xbf16, #tpu.memory_space<vmem>>, %arg2: memref<576x64xbf16, #tpu.memory_space<vmem>>, %arg3: memref<1x16x64xbf16, #tpu.memory_space<vmem>>, %arg4: memref<1x2x64xf32, #tpu.memory_space<vmem>>, %arg5: memref<4x4x576xbf16, #tpu.memory_space<vmem>>) attributes {dimension_semantics = [#tpu.dimension_semantics<parallel>], iteration_bounds = array<i64: 2>, scalar_prefetch = 0 : i64, scratch_operands = 1 : i64, tpu.core_type = #tpu.core_type<tc>, window_params = [{transform_indices = @transform_0, window_bounds = array<i64: 1, 6, 6, 64>}, {pipeline_mode = #tpu.pipeline_mode<synchronous>, transform_indices = @transform_1, window_bounds = array<i64: 576, 64>}, {transform_indices = @transform_2, window_bounds = array<i64: 1, 16, 64>}, {transform_indices = @transform_3, window_bounds = array<i64: 1, 2, 64>}]} {
    %c0 = arith.constant 0 : index
    %c0_0 = arith.constant 0 : index
    %c0_1 = arith.constant 0 : index
    %c0_2 = arith.constant 0 : index
    %0 = vector.load %arg1[%c0, %c0_0, %c0_1, %c0_2] : memref<1x6x6x64xbf16, #tpu.memory_space<vmem>>, vector<1x4x4x64xbf16>
    %1 = vector.shape_cast %0 : vector<1x4x4x64xbf16> to vector<4x4x64xbf16>
    %c0_3 = arith.constant 0 : index
    %c0_4 = arith.constant 0 : index
    %c0_5 = arith.constant 0 : index
    %2 = vector.load %arg5[%c0_3, %c0_4, %c0_5] : memref<4x4x576xbf16, #tpu.memory_space<vmem>>, vector<4x4x64xbf16>
    tpu.vector_store %arg5[%c0_3, %c0_4, %c0_5], %1 {strides = array<i32>} : memref<4x4x576xbf16, #tpu.memory_space<vmem>>, vector<4x4x64xbf16>,
    %c0_6 = arith.constant 0 : index
    %c0_7 = arith.constant 0 : index
    %c1 = arith.constant 1 : index
    %c0_8 = arith.constant 0 : index
    %3 = vector.load %arg1[%c0_6, %c0_7, %c1, %c0_8] : memref<1x6x6x64xbf16, #tpu.memory_space<vmem>>, vector<1x4x4x64xbf16>
    %4 = vector.shape_cast %3 : vector<1x4x4x64xbf16> to vector<4x4x64xbf16>
    %c0_9 = arith.constant 0 : index
    %c0_10 = arith.constant 0 : index
    %c64 = arith.constant 64 : index
    %5 = vector.load %arg5[%c0_9, %c0_10, %c64] : memref<4x4x576xbf16, #tpu.memory_space<vmem>>, vector<4x4x64xbf16>
    tpu.vector_store %arg5[%c0_9, %c0_10, %c64], %4 {strides = array<i32>} : memref<4x4x576xbf16, #tpu.memory_space<vmem>>, vector<4x4x64xbf16>,
    %c0_11 = arith.constant 0 : index
    %c0_12 = arith.constant 0 : index
    %c2 = arith.constant 2 : index
    %c0_13 = arith.constant 0 : index
    %6 = vector.load %arg1[%c0_11, %c0_12, %c2, %c0_13] : memref<1x6x6x64xbf16, #tpu.memory_space<vmem>>, vector<1x4x4x64xbf16>
    %7 = vector.shape_cast %6 : vector<1x4x4x64xbf16> to vector<4x4x64xbf16>
    %c0_14 = arith.constant 0 : index
    %c0_15 = arith.constant 0 : index
    %c128 = arith.constant 128 : index
    %8 = vector.load %arg5[%c0_14, %c0_15, %c128] : memref<4x4x576xbf16, #tpu.memory_space<vmem>>, vector<4x4x64xbf16>
    tpu.vector_store %arg5[%c0_14, %c0_15, %c128], %7 {strides = array<i32>} : memref<4x4x576xbf16, #tpu.memory_space<vmem>>, vector<4x4x64xbf16>,
    %c0_16 = arith.constant 0 : index
    %c1_17 = arith.constant 1 : index
    %c0_18 = arith.constant 0 : index
    %c0_19 = arith.constant 0 : index
    %9 = vector.load %arg1[%c0_16, %c1_17, %c0_18, %c0_19] : memref<1x6x6x64xbf16, #tpu.memory_space<vmem>>, vector<1x4x4x64xbf16>
    %10 = vector.shape_cast %9 : vector<1x4x4x64xbf16> to vector<4x4x64xbf16>
    %c0_20 = arith.constant 0 : index
    %c0_21 = arith.constant 0 : index
    %c192 = arith.constant 192 : index
    %11 = vector.load %arg5[%c0_20, %c0_21, %c192] : memref<4x4x576xbf16, #tpu.memory_space<vmem>>, vector<4x4x64xbf16>
    tpu.vector_store %arg5[%c0_20, %c0_21, %c192], %10 {strides = array<i32>} : memref<4x4x576xbf16, #tpu.memory_space<vmem>>, vector<4x4x64xbf16>,
    %c0_22 = arith.constant 0 : index
    %c1_23 = arith.constant 1 : index
    %c1_24 = arith.constant 1 : index
    %c0_25 = arith.constant 0 : index
    %12 = vector.load %arg1[%c0_22, %c1_23, %c1_24, %c0_25] : memref<1x6x6x64xbf16, #tpu.memory_space<vmem>>, vector<1x4x4x64xbf16>
    %13 = vector.shape_cast %12 : vector<1x4x4x64xbf16> to vector<4x4x64xbf16>
    %c0_26 = arith.constant 0 : index
    %c0_27 = arith.constant 0 : index
    %c256 = arith.constant 256 : index
    %14 = vector.load %arg5[%c0_26, %c0_27, %c256] : memref<4x4x576xbf16, #tpu.memory_space<vmem>>, vector<4x4x64xbf16>
    tpu.vector_store %arg5[%c0_26, %c0_27, %c256], %13 {strides = array<i32>} : memref<4x4x576xbf16, #tpu.memory_space<vmem>>, vector<4x4x64xbf16>,
    %c0_28 = arith.constant 0 : index
    %c1_29 = arith.constant 1 : index
    %c2_30 = arith.constant 2 : index
    %c0_31 = arith.constant 0 : index
    %15 = vector.load %arg1[%c0_28, %c1_29, %c2_30, %c0_31] : memref<1x6x6x64xbf16, #tpu.memory_space<vmem>>, vector<1x4x4x64xbf16>
    %16 = vector.shape_cast %15 : vector<1x4x4x64xbf16> to vector<4x4x64xbf16>
    %c0_32 = arith.constant 0 : index
    %c0_33 = arith.constant 0 : index
    %c320 = arith.constant 320 : index
    %17 = vector.load %arg5[%c0_32, %c0_33, %c320] : memref<4x4x576xbf16, #tpu.memory_space<vmem>>, vector<4x4x64xbf16>
    tpu.vector_store %arg5[%c0_32, %c0_33, %c320], %16 {strides = array<i32>} : memref<4x4x576xbf16, #tpu.memory_space<vmem>>, vector<4x4x64xbf16>,
    %c0_34 = arith.constant 0 : index
    %c2_35 = arith.constant 2 : index
    %c0_36 = arith.constant 0 : index
    %c0_37 = arith.constant 0 : index
    %18 = vector.load %arg1[%c0_34, %c2_35, %c0_36, %c0_37] : memref<1x6x6x64xbf16, #tpu.memory_space<vmem>>, vector<1x4x4x64xbf16>
    %19 = vector.shape_cast %18 : vector<1x4x4x64xbf16> to vector<4x4x64xbf16>
    %c0_38 = arith.constant 0 : index
    %c0_39 = arith.constant 0 : index
    %c384 = arith.constant 384 : index
    %20 = vector.load %arg5[%c0_38, %c0_39, %c384] : memref<4x4x576xbf16, #tpu.memory_space<vmem>>, vector<4x4x64xbf16>
    tpu.vector_store %arg5[%c0_38, %c0_39, %c384], %19 {strides = array<i32>} : memref<4x4x576xbf16, #tpu.memory_space<vmem>>, vector<4x4x64xbf16>,
    %c0_40 = arith.constant 0 : index
    %c2_41 = arith.constant 2 : index
    %c1_42 = arith.constant 1 : index
    %c0_43 = arith.constant 0 : index
    %21 = vector.load %arg1[%c0_40, %c2_41, %c1_42, %c0_43] : memref<1x6x6x64xbf16, #tpu.memory_space<vmem>>, vector<1x4x4x64xbf16>
    %22 = vector.shape_cast %21 : vector<1x4x4x64xbf16> to vector<4x4x64xbf16>
    %c0_44 = arith.constant 0 : index
    %c0_45 = arith.constant 0 : index
    %c448 = arith.constant 448 : index
    %23 = vector.load %arg5[%c0_44, %c0_45, %c448] : memref<4x4x576xbf16, #tpu.memory_space<vmem>>, vector<4x4x64xbf16>
    tpu.vector_store %arg5[%c0_44, %c0_45, %c448], %22 {strides = array<i32>} : memref<4x4x576xbf16, #tpu.memory_space<vmem>>, vector<4x4x64xbf16>,
    %c0_46 = arith.constant 0 : index
    %c2_47 = arith.constant 2 : index
    %c2_48 = arith.constant 2 : index
    %c0_49 = arith.constant 0 : index
    %24 = vector.load %arg1[%c0_46, %c2_47, %c2_48, %c0_49] : memref<1x6x6x64xbf16, #tpu.memory_space<vmem>>, vector<1x4x4x64xbf16>
    %25 = vector.shape_cast %24 : vector<1x4x4x64xbf16> to vector<4x4x64xbf16>
    %c0_50 = arith.constant 0 : index
    %c0_51 = arith.constant 0 : index
    %c512 = arith.constant 512 : index
    %26 = vector.load %arg5[%c0_50, %c0_51, %c512] : memref<4x4x576xbf16, #tpu.memory_space<vmem>>, vector<4x4x64xbf16>
    tpu.vector_store %arg5[%c0_50, %c0_51, %c512], %25 {strides = array<i32>} : memref<4x4x576xbf16, #tpu.memory_space<vmem>>, vector<4x4x64xbf16>,
    %c0_52 = arith.constant 0 : index
    %c0_53 = arith.constant 0 : index
    %c0_54 = arith.constant 0 : index
    %27 = vector.load %arg5[%c0_52, %c0_53, %c0_54] : memref<4x4x576xbf16, #tpu.memory_space<vmem>>, vector<4x4x576xbf16>
    %28 = vector.shape_cast %27 : vector<4x4x576xbf16> to vector<16x576xbf16>
    %c0_55 = arith.constant 0 : index
    %c0_56 = arith.constant 0 : index
    %29 = vector.load %arg2[%c0_55, %c0_56] : memref<576x64xbf16, #tpu.memory_space<vmem>>, vector<576x64xbf16>
    %cst = arith.constant dense<0.000000e+00> : vector<16x64xf32>
    %30 = tpu.matmul %28, %29, %cst {dimension_numbers = #tpu.dot_dimension_numbers<[1], [0], [0], [1], [0, 0, 1, 1], [], []>} : vector<16x576xbf16>, vector<576x64xbf16>, vector<16x64xf32> -> vector<16x64xf32>
    %cst_57 = arith.constant dense<0.000000e+00> : vector<64xf32>
    %31 = vector.multi_reduction <add>, %30, %cst_57 [0] : vector<16x64xf32> to vector<64xf32>
    %32 = vector.shape_cast %31 : vector<64xf32> to vector<1x64xf32>
    %33 = arith.mulf %30, %30 : vector<16x64xf32>
    %cst_58 = arith.constant dense<0.000000e+00> : vector<64xf32>
    %34 = vector.multi_reduction <add>, %33, %cst_58 [0] : vector<16x64xf32> to vector<64xf32>
    %35 = vector.shape_cast %34 : vector<64xf32> to vector<1x64xf32>
    %36 = tpu.concatenate %32, %35 in 0 : vector<1x64xf32>, vector<1x64xf32> -> vector<2x64xf32>
    %c0_59 = arith.constant 0 : index
    %c0_60 = arith.constant 0 : index
    %c0_61 = arith.constant 0 : index
    %37 = vector.load %arg4[%c0_59, %c0_60, %c0_61] : memref<1x2x64xf32, #tpu.memory_space<vmem>>, vector<1x2x64xf32>
    %38 = vector.shape_cast %37 : vector<1x2x64xf32> to vector<2x64xf32>
    %39 = vector.shape_cast %36 : vector<2x64xf32> to vector<1x2x64xf32>
    tpu.vector_store %arg4[%c0_59, %c0_60, %c0_61], %39 {strides = array<i32>} : memref<1x2x64xf32, #tpu.memory_space<vmem>>, vector<1x2x64xf32>,
    %40 = arith.truncf %30 : vector<16x64xf32> to vector<16x64xbf16>
    %c0_62 = arith.constant 0 : index
    %c0_63 = arith.constant 0 : index
    %c0_64 = arith.constant 0 : index
    %41 = vector.load %arg3[%c0_62, %c0_63, %c0_64] : memref<1x16x64xbf16, #tpu.memory_space<vmem>>, vector<1x16x64xbf16>
    %42 = vector.shape_cast %41 : vector<1x16x64xbf16> to vector<16x64xbf16>
    %43 = vector.shape_cast %40 : vector<16x64xbf16> to vector<1x16x64xbf16>
    tpu.vector_store %arg3[%c0_62, %c0_63, %c0_64], %43 {strides = array<i32>} : memref<1x16x64xbf16, #tpu.memory_space<vmem>>, vector<1x16x64xbf16>,
    return
  }
  func.func @transform_0(%arg0: i32) -> (i32, i32, i32, i32) {
    %c0_i32 = arith.constant 0 : i32
    %c0_i32_0 = arith.constant 0 : i32
    %c0_i32_1 = arith.constant 0 : i32
    %c0_i32_2 = arith.constant 0 : i32
    return %arg0, %c0_i32, %c0_i32_0, %c0_i32_1 : i32, i32, i32, i32
  }
  func.func @transform_1(%arg0: i32) -> (i32, i32) {
    %c0_i32 = arith.constant 0 : i32
    %c0_i32_0 = arith.constant 0 : i32
    %c0_i32_1 = arith.constant 0 : i32
    return %c0_i32, %c0_i32_0 : i32, i32
  }
  func.func @transform_2(%arg0: i32) -> (i32, i32, i32) {
    %c0_i32 = arith.constant 0 : i32
    %c0_i32_0 = arith.constant 0 : i32
    %c0_i32_1 = arith.constant 0 : i32
    return %arg0, %c0_i32, %c0_i32_0 : i32, i32, i32
  }
  func.func @transform_3(%arg0: i32) -> (i32, i32, i32) {
    %c0_i32 = arith.constant 0 : i32
    %c0_i32_0 = arith.constant 0 : i32
    %c0_i32_1 = arith.constant 0 : i32
    return %arg0, %c0_i32, %c0_i32_0 : i32, i32, i32
  }
}

module attributes {stable_mosaic.version = 11 : i64} {
  func.func @_bn_relu_pool_kernel(%arg0: i32, %arg1: i32, %arg2: memref<1x4x2x128xbf16, #tpu.memory_space<vmem>>, %arg3: memref<1x1x1x128xf32, #tpu.memory_space<vmem>>, %arg4: memref<1x1x1x128xf32, #tpu.memory_space<vmem>>, %arg5: memref<1x2x2x64xbf16, #tpu.memory_space<vmem>>) attributes {dimension_semantics = [#tpu.dimension_semantics<parallel>, #tpu.dimension_semantics<parallel>], iteration_bounds = array<i64: 2, 1>, scalar_prefetch = 0 : i64, scratch_operands = 0 : i64, tpu.core_type = #tpu.core_type<tc>, window_params = [{transform_indices = @transform_0, window_bounds = array<i64: 1, 4, 2, 128>}, {pipeline_mode = #tpu.pipeline_mode<synchronous>, transform_indices = @transform_1, window_bounds = array<i64: 1, 1, 1, 128>}, {pipeline_mode = #tpu.pipeline_mode<synchronous>, transform_indices = @transform_2, window_bounds = array<i64: 1, 1, 1, 128>}, {transform_indices = @transform_3, window_bounds = array<i64: 1, 2, 2, 64>}]} {
    %c0 = arith.constant 0 : index
    %c0_0 = arith.constant 0 : index
    %c0_1 = arith.constant 0 : index
    %c0_2 = arith.constant 0 : index
    %0 = vector.load %arg2[%c0, %c0_0, %c0_1, %c0_2] : memref<1x4x2x128xbf16, #tpu.memory_space<vmem>>, vector<1x4x2x128xbf16>
    %1 = arith.extf %0 : vector<1x4x2x128xbf16> to vector<1x4x2x128xf32>
    %c0_3 = arith.constant 0 : index
    %c0_4 = arith.constant 0 : index
    %c0_5 = arith.constant 0 : index
    %c0_6 = arith.constant 0 : index
    %2 = vector.load %arg3[%c0_3, %c0_4, %c0_5, %c0_6] : memref<1x1x1x128xf32, #tpu.memory_space<vmem>>, vector<1x1x1x128xf32>
    %3 = vector.broadcast %2 : vector<1x1x1x128xf32> to vector<1x4x2x128xf32>
    %4 = arith.mulf %1, %3 : vector<1x4x2x128xf32>
    %c0_7 = arith.constant 0 : index
    %c0_8 = arith.constant 0 : index
    %c0_9 = arith.constant 0 : index
    %c0_10 = arith.constant 0 : index
    %5 = vector.load %arg4[%c0_7, %c0_8, %c0_9, %c0_10] : memref<1x1x1x128xf32, #tpu.memory_space<vmem>>, vector<1x1x1x128xf32>
    %6 = vector.broadcast %5 : vector<1x1x1x128xf32> to vector<1x4x2x128xf32>
    %7 = arith.addf %4, %6 : vector<1x4x2x128xf32>
    %cst = arith.constant 0.000000e+00 : f32
    %8 = vector.broadcast %cst : f32 to vector<1x4x2x128xf32>
    %9 = arith.maximumf %7, %8 : vector<1x4x2x128xf32>
    %10 = vector.shape_cast %9 : vector<1x4x2x128xf32> to vector<2x2x2x128xf32>
    %cst_11 = arith.constant dense<0xFF800000> : vector<2x2x128xf32>
    %11 = vector.multi_reduction <maximumf>, %10, %cst_11 [1] : vector<2x2x2x128xf32> to vector<2x2x128xf32>
    %12 = vector.extract_strided_slice %11 {offsets = [0, 0, 0], sizes = [2, 2, 64], strides = [1, 1, 1]} : vector<2x2x128xf32> to vector<2x2x64xf32>
    %13 = vector.extract_strided_slice %11 {offsets = [0, 0, 64], sizes = [2, 2, 64], strides = [1, 1, 1]} : vector<2x2x128xf32> to vector<2x2x64xf32>
    %14 = arith.maximumf %12, %13 : vector<2x2x64xf32>
    %15 = arith.truncf %14 : vector<2x2x64xf32> to vector<2x2x64xbf16>
    %c0_12 = arith.constant 0 : index
    %c0_13 = arith.constant 0 : index
    %c0_14 = arith.constant 0 : index
    %c0_15 = arith.constant 0 : index
    %16 = vector.load %arg5[%c0_12, %c0_13, %c0_14, %c0_15] : memref<1x2x2x64xbf16, #tpu.memory_space<vmem>>, vector<1x2x2x64xbf16>
    %17 = vector.shape_cast %16 : vector<1x2x2x64xbf16> to vector<2x2x64xbf16>
    %18 = vector.shape_cast %15 : vector<2x2x64xbf16> to vector<1x2x2x64xbf16>
    tpu.vector_store %arg5[%c0_12, %c0_13, %c0_14, %c0_15], %18 {strides = array<i32>} : memref<1x2x2x64xbf16, #tpu.memory_space<vmem>>, vector<1x2x2x64xbf16>,
    return
  }
  func.func @transform_0(%arg0: i32, %arg1: i32) -> (i32, i32, i32, i32) {
    %c0_i32 = arith.constant 0 : i32
    %c0_i32_0 = arith.constant 0 : i32
    %c0_i32_1 = arith.constant 0 : i32
    return %arg0, %arg1, %c0_i32, %c0_i32_0 : i32, i32, i32, i32
  }
  func.func @transform_1(%arg0: i32, %arg1: i32) -> (i32, i32, i32, i32) {
    %c0_i32 = arith.constant 0 : i32
    %c0_i32_0 = arith.constant 0 : i32
    %c0_i32_1 = arith.constant 0 : i32
    %c0_i32_2 = arith.constant 0 : i32
    %c0_i32_3 = arith.constant 0 : i32
    return %c0_i32, %c0_i32_0, %c0_i32_1, %c0_i32_2 : i32, i32, i32, i32
  }
  func.func @transform_2(%arg0: i32, %arg1: i32) -> (i32, i32, i32, i32) {
    %c0_i32 = arith.constant 0 : i32
    %c0_i32_0 = arith.constant 0 : i32
    %c0_i32_1 = arith.constant 0 : i32
    %c0_i32_2 = arith.constant 0 : i32
    %c0_i32_3 = arith.constant 0 : i32
    return %c0_i32, %c0_i32_0, %c0_i32_1, %c0_i32_2 : i32, i32, i32, i32
  }
  func.func @transform_3(%arg0: i32, %arg1: i32) -> (i32, i32, i32, i32) {
    %c0_i32 = arith.constant 0 : i32
    %c0_i32_0 = arith.constant 0 : i32
    %c0_i32_1 = arith.constant 0 : i32
    return %arg0, %arg1, %c0_i32, %c0_i32_0 : i32, i32, i32, i32
  }
}

module attributes {stable_mosaic.version = 11 : i64} {
  func.func @_conv_stats_kernel(%arg0: i32, %arg1: memref<1x4x4x64xbf16, #tpu.memory_space<vmem>>, %arg2: memref<576x64xbf16, #tpu.memory_space<vmem>>, %arg3: memref<1x4x64xbf16, #tpu.memory_space<vmem>>, %arg4: memref<1x2x64xf32, #tpu.memory_space<vmem>>, %arg5: memref<2x2x576xbf16, #tpu.memory_space<vmem>>) attributes {dimension_semantics = [#tpu.dimension_semantics<parallel>], iteration_bounds = array<i64: 2>, scalar_prefetch = 0 : i64, scratch_operands = 1 : i64, tpu.core_type = #tpu.core_type<tc>, window_params = [{transform_indices = @transform_0, window_bounds = array<i64: 1, 4, 4, 64>}, {pipeline_mode = #tpu.pipeline_mode<synchronous>, transform_indices = @transform_1, window_bounds = array<i64: 576, 64>}, {transform_indices = @transform_2, window_bounds = array<i64: 1, 4, 64>}, {transform_indices = @transform_3, window_bounds = array<i64: 1, 2, 64>}]} {
    %c0 = arith.constant 0 : index
    %c0_0 = arith.constant 0 : index
    %c0_1 = arith.constant 0 : index
    %c0_2 = arith.constant 0 : index
    %0 = vector.load %arg1[%c0, %c0_0, %c0_1, %c0_2] : memref<1x4x4x64xbf16, #tpu.memory_space<vmem>>, vector<1x2x2x64xbf16>
    %1 = vector.shape_cast %0 : vector<1x2x2x64xbf16> to vector<2x2x64xbf16>
    %c0_3 = arith.constant 0 : index
    %c0_4 = arith.constant 0 : index
    %c0_5 = arith.constant 0 : index
    %2 = vector.load %arg5[%c0_3, %c0_4, %c0_5] : memref<2x2x576xbf16, #tpu.memory_space<vmem>>, vector<2x2x64xbf16>
    tpu.vector_store %arg5[%c0_3, %c0_4, %c0_5], %1 {strides = array<i32>} : memref<2x2x576xbf16, #tpu.memory_space<vmem>>, vector<2x2x64xbf16>,
    %c0_6 = arith.constant 0 : index
    %c0_7 = arith.constant 0 : index
    %c1 = arith.constant 1 : index
    %c0_8 = arith.constant 0 : index
    %3 = vector.load %arg1[%c0_6, %c0_7, %c1, %c0_8] : memref<1x4x4x64xbf16, #tpu.memory_space<vmem>>, vector<1x2x2x64xbf16>
    %4 = vector.shape_cast %3 : vector<1x2x2x64xbf16> to vector<2x2x64xbf16>
    %c0_9 = arith.constant 0 : index
    %c0_10 = arith.constant 0 : index
    %c64 = arith.constant 64 : index
    %5 = vector.load %arg5[%c0_9, %c0_10, %c64] : memref<2x2x576xbf16, #tpu.memory_space<vmem>>, vector<2x2x64xbf16>
    tpu.vector_store %arg5[%c0_9, %c0_10, %c64], %4 {strides = array<i32>} : memref<2x2x576xbf16, #tpu.memory_space<vmem>>, vector<2x2x64xbf16>,
    %c0_11 = arith.constant 0 : index
    %c0_12 = arith.constant 0 : index
    %c2 = arith.constant 2 : index
    %c0_13 = arith.constant 0 : index
    %6 = vector.load %arg1[%c0_11, %c0_12, %c2, %c0_13] : memref<1x4x4x64xbf16, #tpu.memory_space<vmem>>, vector<1x2x2x64xbf16>
    %7 = vector.shape_cast %6 : vector<1x2x2x64xbf16> to vector<2x2x64xbf16>
    %c0_14 = arith.constant 0 : index
    %c0_15 = arith.constant 0 : index
    %c128 = arith.constant 128 : index
    %8 = vector.load %arg5[%c0_14, %c0_15, %c128] : memref<2x2x576xbf16, #tpu.memory_space<vmem>>, vector<2x2x64xbf16>
    tpu.vector_store %arg5[%c0_14, %c0_15, %c128], %7 {strides = array<i32>} : memref<2x2x576xbf16, #tpu.memory_space<vmem>>, vector<2x2x64xbf16>,
    %c0_16 = arith.constant 0 : index
    %c1_17 = arith.constant 1 : index
    %c0_18 = arith.constant 0 : index
    %c0_19 = arith.constant 0 : index
    %9 = vector.load %arg1[%c0_16, %c1_17, %c0_18, %c0_19] : memref<1x4x4x64xbf16, #tpu.memory_space<vmem>>, vector<1x2x2x64xbf16>
    %10 = vector.shape_cast %9 : vector<1x2x2x64xbf16> to vector<2x2x64xbf16>
    %c0_20 = arith.constant 0 : index
    %c0_21 = arith.constant 0 : index
    %c192 = arith.constant 192 : index
    %11 = vector.load %arg5[%c0_20, %c0_21, %c192] : memref<2x2x576xbf16, #tpu.memory_space<vmem>>, vector<2x2x64xbf16>
    tpu.vector_store %arg5[%c0_20, %c0_21, %c192], %10 {strides = array<i32>} : memref<2x2x576xbf16, #tpu.memory_space<vmem>>, vector<2x2x64xbf16>,
    %c0_22 = arith.constant 0 : index
    %c1_23 = arith.constant 1 : index
    %c1_24 = arith.constant 1 : index
    %c0_25 = arith.constant 0 : index
    %12 = vector.load %arg1[%c0_22, %c1_23, %c1_24, %c0_25] : memref<1x4x4x64xbf16, #tpu.memory_space<vmem>>, vector<1x2x2x64xbf16>
    %13 = vector.shape_cast %12 : vector<1x2x2x64xbf16> to vector<2x2x64xbf16>
    %c0_26 = arith.constant 0 : index
    %c0_27 = arith.constant 0 : index
    %c256 = arith.constant 256 : index
    %14 = vector.load %arg5[%c0_26, %c0_27, %c256] : memref<2x2x576xbf16, #tpu.memory_space<vmem>>, vector<2x2x64xbf16>
    tpu.vector_store %arg5[%c0_26, %c0_27, %c256], %13 {strides = array<i32>} : memref<2x2x576xbf16, #tpu.memory_space<vmem>>, vector<2x2x64xbf16>,
    %c0_28 = arith.constant 0 : index
    %c1_29 = arith.constant 1 : index
    %c2_30 = arith.constant 2 : index
    %c0_31 = arith.constant 0 : index
    %15 = vector.load %arg1[%c0_28, %c1_29, %c2_30, %c0_31] : memref<1x4x4x64xbf16, #tpu.memory_space<vmem>>, vector<1x2x2x64xbf16>
    %16 = vector.shape_cast %15 : vector<1x2x2x64xbf16> to vector<2x2x64xbf16>
    %c0_32 = arith.constant 0 : index
    %c0_33 = arith.constant 0 : index
    %c320 = arith.constant 320 : index
    %17 = vector.load %arg5[%c0_32, %c0_33, %c320] : memref<2x2x576xbf16, #tpu.memory_space<vmem>>, vector<2x2x64xbf16>
    tpu.vector_store %arg5[%c0_32, %c0_33, %c320], %16 {strides = array<i32>} : memref<2x2x576xbf16, #tpu.memory_space<vmem>>, vector<2x2x64xbf16>,
    %c0_34 = arith.constant 0 : index
    %c2_35 = arith.constant 2 : index
    %c0_36 = arith.constant 0 : index
    %c0_37 = arith.constant 0 : index
    %18 = vector.load %arg1[%c0_34, %c2_35, %c0_36, %c0_37] : memref<1x4x4x64xbf16, #tpu.memory_space<vmem>>, vector<1x2x2x64xbf16>
    %19 = vector.shape_cast %18 : vector<1x2x2x64xbf16> to vector<2x2x64xbf16>
    %c0_38 = arith.constant 0 : index
    %c0_39 = arith.constant 0 : index
    %c384 = arith.constant 384 : index
    %20 = vector.load %arg5[%c0_38, %c0_39, %c384] : memref<2x2x576xbf16, #tpu.memory_space<vmem>>, vector<2x2x64xbf16>
    tpu.vector_store %arg5[%c0_38, %c0_39, %c384], %19 {strides = array<i32>} : memref<2x2x576xbf16, #tpu.memory_space<vmem>>, vector<2x2x64xbf16>,
    %c0_40 = arith.constant 0 : index
    %c2_41 = arith.constant 2 : index
    %c1_42 = arith.constant 1 : index
    %c0_43 = arith.constant 0 : index
    %21 = vector.load %arg1[%c0_40, %c2_41, %c1_42, %c0_43] : memref<1x4x4x64xbf16, #tpu.memory_space<vmem>>, vector<1x2x2x64xbf16>
    %22 = vector.shape_cast %21 : vector<1x2x2x64xbf16> to vector<2x2x64xbf16>
    %c0_44 = arith.constant 0 : index
    %c0_45 = arith.constant 0 : index
    %c448 = arith.constant 448 : index
    %23 = vector.load %arg5[%c0_44, %c0_45, %c448] : memref<2x2x576xbf16, #tpu.memory_space<vmem>>, vector<2x2x64xbf16>
    tpu.vector_store %arg5[%c0_44, %c0_45, %c448], %22 {strides = array<i32>} : memref<2x2x576xbf16, #tpu.memory_space<vmem>>, vector<2x2x64xbf16>,
    %c0_46 = arith.constant 0 : index
    %c2_47 = arith.constant 2 : index
    %c2_48 = arith.constant 2 : index
    %c0_49 = arith.constant 0 : index
    %24 = vector.load %arg1[%c0_46, %c2_47, %c2_48, %c0_49] : memref<1x4x4x64xbf16, #tpu.memory_space<vmem>>, vector<1x2x2x64xbf16>
    %25 = vector.shape_cast %24 : vector<1x2x2x64xbf16> to vector<2x2x64xbf16>
    %c0_50 = arith.constant 0 : index
    %c0_51 = arith.constant 0 : index
    %c512 = arith.constant 512 : index
    %26 = vector.load %arg5[%c0_50, %c0_51, %c512] : memref<2x2x576xbf16, #tpu.memory_space<vmem>>, vector<2x2x64xbf16>
    tpu.vector_store %arg5[%c0_50, %c0_51, %c512], %25 {strides = array<i32>} : memref<2x2x576xbf16, #tpu.memory_space<vmem>>, vector<2x2x64xbf16>,
    %c0_52 = arith.constant 0 : index
    %c0_53 = arith.constant 0 : index
    %c0_54 = arith.constant 0 : index
    %27 = vector.load %arg5[%c0_52, %c0_53, %c0_54] : memref<2x2x576xbf16, #tpu.memory_space<vmem>>, vector<2x2x576xbf16>
    %28 = vector.shape_cast %27 : vector<2x2x576xbf16> to vector<4x576xbf16>
    %c0_55 = arith.constant 0 : index
    %c0_56 = arith.constant 0 : index
    %29 = vector.load %arg2[%c0_55, %c0_56] : memref<576x64xbf16, #tpu.memory_space<vmem>>, vector<576x64xbf16>
    %cst = arith.constant dense<0.000000e+00> : vector<4x64xf32>
    %30 = tpu.matmul %28, %29, %cst {dimension_numbers = #tpu.dot_dimension_numbers<[1], [0], [0], [1], [0, 0, 1, 1], [], []>} : vector<4x576xbf16>, vector<576x64xbf16>, vector<4x64xf32> -> vector<4x64xf32>
    %cst_57 = arith.constant dense<0.000000e+00> : vector<64xf32>
    %31 = vector.multi_reduction <add>, %30, %cst_57 [0] : vector<4x64xf32> to vector<64xf32>
    %32 = vector.shape_cast %31 : vector<64xf32> to vector<1x64xf32>
    %33 = arith.mulf %30, %30 : vector<4x64xf32>
    %cst_58 = arith.constant dense<0.000000e+00> : vector<64xf32>
    %34 = vector.multi_reduction <add>, %33, %cst_58 [0] : vector<4x64xf32> to vector<64xf32>
    %35 = vector.shape_cast %34 : vector<64xf32> to vector<1x64xf32>
    %36 = tpu.concatenate %32, %35 in 0 : vector<1x64xf32>, vector<1x64xf32> -> vector<2x64xf32>
    %c0_59 = arith.constant 0 : index
    %c0_60 = arith.constant 0 : index
    %c0_61 = arith.constant 0 : index
    %37 = vector.load %arg4[%c0_59, %c0_60, %c0_61] : memref<1x2x64xf32, #tpu.memory_space<vmem>>, vector<1x2x64xf32>
    %38 = vector.shape_cast %37 : vector<1x2x64xf32> to vector<2x64xf32>
    %39 = vector.shape_cast %36 : vector<2x64xf32> to vector<1x2x64xf32>
    tpu.vector_store %arg4[%c0_59, %c0_60, %c0_61], %39 {strides = array<i32>} : memref<1x2x64xf32, #tpu.memory_space<vmem>>, vector<1x2x64xf32>,
    %40 = arith.truncf %30 : vector<4x64xf32> to vector<4x64xbf16>
    %c0_62 = arith.constant 0 : index
    %c0_63 = arith.constant 0 : index
    %c0_64 = arith.constant 0 : index
    %41 = vector.load %arg3[%c0_62, %c0_63, %c0_64] : memref<1x4x64xbf16, #tpu.memory_space<vmem>>, vector<1x4x64xbf16>
    %42 = vector.shape_cast %41 : vector<1x4x64xbf16> to vector<4x64xbf16>
    %43 = vector.shape_cast %40 : vector<4x64xbf16> to vector<1x4x64xbf16>
    tpu.vector_store %arg3[%c0_62, %c0_63, %c0_64], %43 {strides = array<i32>} : memref<1x4x64xbf16, #tpu.memory_space<vmem>>, vector<1x4x64xbf16>,
    return
  }
  func.func @transform_0(%arg0: i32) -> (i32, i32, i32, i32) {
    %c0_i32 = arith.constant 0 : i32
    %c0_i32_0 = arith.constant 0 : i32
    %c0_i32_1 = arith.constant 0 : i32
    %c0_i32_2 = arith.constant 0 : i32
    return %arg0, %c0_i32, %c0_i32_0, %c0_i32_1 : i32, i32, i32, i32
  }
  func.func @transform_1(%arg0: i32) -> (i32, i32) {
    %c0_i32 = arith.constant 0 : i32
    %c0_i32_0 = arith.constant 0 : i32
    %c0_i32_1 = arith.constant 0 : i32
    return %c0_i32, %c0_i32_0 : i32, i32
  }
  func.func @transform_2(%arg0: i32) -> (i32, i32, i32) {
    %c0_i32 = arith.constant 0 : i32
    %c0_i32_0 = arith.constant 0 : i32
    %c0_i32_1 = arith.constant 0 : i32
    return %arg0, %c0_i32, %c0_i32_0 : i32, i32, i32
  }
  func.func @transform_3(%arg0: i32) -> (i32, i32, i32) {
    %c0_i32 = arith.constant 0 : i32
    %c0_i32_0 = arith.constant 0 : i32
    %c0_i32_1 = arith.constant 0 : i32
    return %arg0, %c0_i32, %c0_i32_0 : i32, i32, i32
  }
}

module attributes {stable_mosaic.version = 11 : i64} {
  func.func @_bn_relu_pool_kernel(%arg0: i32, %arg1: i32, %arg2: memref<1x2x1x128xbf16, #tpu.memory_space<vmem>>, %arg3: memref<1x1x1x128xf32, #tpu.memory_space<vmem>>, %arg4: memref<1x1x1x128xf32, #tpu.memory_space<vmem>>, %arg5: memref<1x1x1x64xbf16, #tpu.memory_space<vmem>>) attributes {dimension_semantics = [#tpu.dimension_semantics<parallel>, #tpu.dimension_semantics<parallel>], iteration_bounds = array<i64: 2, 1>, scalar_prefetch = 0 : i64, scratch_operands = 0 : i64, tpu.core_type = #tpu.core_type<tc>, window_params = [{transform_indices = @transform_0, window_bounds = array<i64: 1, 2, 1, 128>}, {pipeline_mode = #tpu.pipeline_mode<synchronous>, transform_indices = @transform_1, window_bounds = array<i64: 1, 1, 1, 128>}, {pipeline_mode = #tpu.pipeline_mode<synchronous>, transform_indices = @transform_2, window_bounds = array<i64: 1, 1, 1, 128>}, {transform_indices = @transform_3, window_bounds = array<i64: 1, 1, 1, 64>}]} {
    %c0 = arith.constant 0 : index
    %c0_0 = arith.constant 0 : index
    %c0_1 = arith.constant 0 : index
    %c0_2 = arith.constant 0 : index
    %0 = vector.load %arg2[%c0, %c0_0, %c0_1, %c0_2] : memref<1x2x1x128xbf16, #tpu.memory_space<vmem>>, vector<1x2x1x128xbf16>
    %1 = arith.extf %0 : vector<1x2x1x128xbf16> to vector<1x2x1x128xf32>
    %c0_3 = arith.constant 0 : index
    %c0_4 = arith.constant 0 : index
    %c0_5 = arith.constant 0 : index
    %c0_6 = arith.constant 0 : index
    %2 = vector.load %arg3[%c0_3, %c0_4, %c0_5, %c0_6] : memref<1x1x1x128xf32, #tpu.memory_space<vmem>>, vector<1x1x1x128xf32>
    %3 = vector.broadcast %2 : vector<1x1x1x128xf32> to vector<1x2x1x128xf32>
    %4 = arith.mulf %1, %3 : vector<1x2x1x128xf32>
    %c0_7 = arith.constant 0 : index
    %c0_8 = arith.constant 0 : index
    %c0_9 = arith.constant 0 : index
    %c0_10 = arith.constant 0 : index
    %5 = vector.load %arg4[%c0_7, %c0_8, %c0_9, %c0_10] : memref<1x1x1x128xf32, #tpu.memory_space<vmem>>, vector<1x1x1x128xf32>
    %6 = vector.broadcast %5 : vector<1x1x1x128xf32> to vector<1x2x1x128xf32>
    %7 = arith.addf %4, %6 : vector<1x2x1x128xf32>
    %cst = arith.constant 0.000000e+00 : f32
    %8 = vector.broadcast %cst : f32 to vector<1x2x1x128xf32>
    %9 = arith.maximumf %7, %8 : vector<1x2x1x128xf32>
    %cst_11 = arith.constant dense<0xFF800000> : vector<1x1x128xf32>
    %10 = vector.multi_reduction <maximumf>, %9, %cst_11 [1] : vector<1x2x1x128xf32> to vector<1x1x128xf32>
    %11 = vector.extract_strided_slice %10 {offsets = [0, 0, 0], sizes = [1, 1, 64], strides = [1, 1, 1]} : vector<1x1x128xf32> to vector<1x1x64xf32>
    %12 = vector.extract_strided_slice %10 {offsets = [0, 0, 64], sizes = [1, 1, 64], strides = [1, 1, 1]} : vector<1x1x128xf32> to vector<1x1x64xf32>
    %13 = arith.maximumf %11, %12 : vector<1x1x64xf32>
    %14 = arith.truncf %13 : vector<1x1x64xf32> to vector<1x1x64xbf16>
    %c0_12 = arith.constant 0 : index
    %c0_13 = arith.constant 0 : index
    %c0_14 = arith.constant 0 : index
    %c0_15 = arith.constant 0 : index
    %15 = vector.load %arg5[%c0_12, %c0_13, %c0_14, %c0_15] : memref<1x1x1x64xbf16, #tpu.memory_space<vmem>>, vector<1x1x1x64xbf16>
    %16 = vector.shape_cast %15 : vector<1x1x1x64xbf16> to vector<1x1x64xbf16>
    %17 = vector.shape_cast %14 : vector<1x1x64xbf16> to vector<1x1x1x64xbf16>
    tpu.vector_store %arg5[%c0_12, %c0_13, %c0_14, %c0_15], %17 {strides = array<i32>} : memref<1x1x1x64xbf16, #tpu.memory_space<vmem>>, vector<1x1x1x64xbf16>,
    return
  }
  func.func @transform_0(%arg0: i32, %arg1: i32) -> (i32, i32, i32, i32) {
    %c0_i32 = arith.constant 0 : i32
    %c0_i32_0 = arith.constant 0 : i32
    %c0_i32_1 = arith.constant 0 : i32
    return %arg0, %arg1, %c0_i32, %c0_i32_0 : i32, i32, i32, i32
  }
  func.func @transform_1(%arg0: i32, %arg1: i32) -> (i32, i32, i32, i32) {
    %c0_i32 = arith.constant 0 : i32
    %c0_i32_0 = arith.constant 0 : i32
    %c0_i32_1 = arith.constant 0 : i32
    %c0_i32_2 = arith.constant 0 : i32
    %c0_i32_3 = arith.constant 0 : i32
    return %c0_i32, %c0_i32_0, %c0_i32_1, %c0_i32_2 : i32, i32, i32, i32
  }
  func.func @transform_2(%arg0: i32, %arg1: i32) -> (i32, i32, i32, i32) {
    %c0_i32 = arith.constant 0 : i32
    %c0_i32_0 = arith.constant 0 : i32
    %c0_i32_1 = arith.constant 0 : i32
    %c0_i32_2 = arith.constant 0 : i32
    %c0_i32_3 = arith.constant 0 : i32
    return %c0_i32, %c0_i32_0, %c0_i32_1, %c0_i32_2 : i32, i32, i32, i32
  }
  func.func @transform_3(%arg0: i32, %arg1: i32) -> (i32, i32, i32, i32) {
    %c0_i32 = arith.constant 0 : i32
    %c0_i32_0 = arith.constant 0 : i32
    %c0_i32_1 = arith.constant 0 : i32
    return %arg0, %arg1, %c0_i32, %c0_i32_0 : i32, i32, i32, i32
  }
}

</mosaic_0001>

<bundles_post_ra>
// kernel: convnet_forward.9
= control target key start
LH: loop header
LB: loop body
LE: loop exit
PB: predicated region body
PF: predicated region fallthrough
CT: control target
= control target key end

     0   :  { %s600_s12 = smov 0   ;;  %s602_s13 = smov 0   ;;  %s701_s0 = inlined_call_operand.vmem [shape: bf16[2,16,8,128], index: 0, kind: input, shape index: {}]   ;;  %s702_s1 = inlined_call_operand.vmem [shape: f32[1,1,1,128], index: 1, kind: input, shape index: {}]   ;;  %s703_s2 = inlined_call_operand.vmem [shape: f32[1,1,1,128], index: 2, kind: input, shape index: {}]   ;;  %s704_s3 = inlined_call_operand.vmem [shape: bf16[2,8,8,64], index: 3, kind: output, shape index: {}]  }
   0x1   :  { %s604_s14 = smov 0  }
   0x2 LB: > { %s25_s15 = sadd.s32 1, %s573_s13  ;;  %p460_p0 = scmp.ge.s32.totalorder %s577_s14, 1  ;;  %s577_s14 = sphi %s604_s14, %s13_s14   ;;  %s573_s13 = sphi %s602_s13, %s706_s13   ;;  %s569_s12 = sphi %s600_s12, %s705_s12  }
   0x3   : > { %p27_p1 = scmp.ge.s32.totalorder %s25_s15, 2  ;;  %p158_p2 = scmp.lt.s32.totalorder %s577_s14, 3 }
   0x5   : > { %s708_s15 = smov (%p27_p1, %s25_s15), 0  ;;  %p159_p3 = pnand %p460_p0, %p158_p2 }
   0x6   : > { %p191_p4 = scmp.lt.s32.totalorder (!%p159_p3), %s569_s12, 1  ;;  %v629_v0 = vld [vmem:[%s702_s1] ss:$0 sm:$0xff] (!%p159_p3)  ;;  %s579_s24 = smov (!%p159_p3), 64   ;;  %vm360_vm0 = vcmask (!%p159_p3), 519168  }
   0x7   : > { %162 = sbr.rel (%p159_p3) target bundleno = 164 (0xa4), region = 32  ;;  %v638_v9 = vld [vmem:[%s703_s2] ss:$0 sm:$0xff] (!%p159_p3) }
   0xe   : > { %s710_s12 = smov (!%p191_p4, %s569_s12), 1 }
   0xf   : > { %s469_s16 = sshll.u32 %s710_s12, 6  ;;  %s470_s25 = sshll.u32 %s710_s12, 5 }
  0x10   : > { %s624_s19 = scalar_lea.vmem %s701_s0, %s469_s16  ;;  %s208_s28 = scalar_lea.vmem %s704_s3, %s470_s25 }
  0x11   : > { %v506_v1 = vld [vmem:[%s624_s19 + $0x20] sm:$0xff]   ;;  %v507_v2 = vld [vmem:[%s624_s19 + $0x28] sm:$0xff]   ;;  %v508_v30 = vld [vmem:[%s624_s19 + $0x30] sm:$0xff]  }
  0x12   : > { %v472_v3 = vld [vmem:[%s624_s19] sm:$0xff]   ;;  %v489_v4 = vunpack.c.l.bf16 %v506_v1  ;;  %v490_v5 = vunpack.c.h.bf16 %v506_v1  ;;  %v493_v6 = vunpack.c.l.bf16 %v507_v2  ;;  %v494_v7 = vunpack.c.h.bf16 %v507_v2  ;;  %v503_v8 = vld [vmem:[%s624_s19 + $0x8] sm:$0xff]   ;;  %v509_v35 = vld [vmem:[%s624_s19 + $0x38] sm:$0xff]  }
  0x13   : > { %v473_v10 = vunpack.c.l.bf16 %v472_v3  ;;  %v474_v11 = vunpack.c.h.bf16 %v472_v3  ;;  %v477_v12 = vunpack.c.l.bf16 %v503_v8  ;;  %v478_v13 = vunpack.c.h.bf16 %v503_v8  ;;  %v504_v40 = vld [vmem:[%s624_s19 + $0x10] sm:$0xff]   ;;  %v505_v49 = vld [vmem:[%s624_s19 + $0x18] sm:$0xff]  }
  0x14   : > { %v257_v14 = vmul.f32 %v489_v4, %v629_v0  ;;  %v258_v15 = vmul.f32 %v490_v5, %v629_v0  ;;  %v259_v16 = vmul.f32 %v493_v6, %v629_v0  ;;  %v260_v17 = vmul.f32 %v494_v7, %v629_v0 }
  0x15   : > { %v249_v18 = vmul.f32 %v473_v10, %v629_v0  ;;  %v250_v19 = vmul.f32 %v474_v11, %v629_v0  ;;  %v251_v20 = vmul.f32 %v477_v12, %v629_v0  ;;  %v252_v21 = vmul.f32 %v478_v13, %v629_v0 }
  0x16   : > { %v280_v22 = vadd.f32 %v638_v9, %v257_v14  ;;  %v281_v23 = vadd.f32 %v638_v9, %v258_v15  ;;  %v282_v24 = vadd.f32 %v638_v9, %v259_v16  ;;  %v283_v25 = vadd.f32 %v638_v9, %v260_v17 }
  0x17   : > { %v272_v26 = vadd.f32 %v638_v9, %v249_v18  ;;  %v273_v27 = vadd.f32 %v638_v9, %v250_v19  ;;  %v274_v28 = vadd.f32 %v638_v9, %v251_v20  ;;  %v275_v29 = vadd.f32 %v638_v9, %v252_v21 }
  0x18   : > { %v296_v31 = vmax.f32 %v280_v22, 0.0  ;;  %v297_v32 = vmax.f32 %v281_v23, 0.0  ;;  %v298_v33 = vmax.f32 %v282_v24, 0.0  ;;  %v299_v34 = vmax.f32 %v283_v25, 0.0 }
  0x19   : > { %v288_v36 = vmax.f32 %v272_v26, 0.0  ;;  %v289_v37 = vmax.f32 %v273_v27, 0.0  ;;  %v290_v38 = vmax.f32 %v274_v28, 0.0  ;;  %v291_v39 = vmax.f32 %v275_v29, 0.0 }
  0x1a   : > { %v308_v41 = vmax.f32 %v296_v31, %v297_v32  ;;  %v309_v42 = vmax.f32 %v298_v33, %v299_v34  ;;  %v497_v43 = vunpack.c.l.bf16 %v508_v30  ;;  %v498_v44 = vunpack.c.h.bf16 %v508_v30 }
  0x1b   : > { %v304_v45 = vmax.f32 %v288_v36, %v289_v37  ;;  %v305_v46 = vmax.f32 %v290_v38, %v291_v39  ;;  %v501_v47 = vunpack.c.l.bf16 %v509_v35  ;;  %v502_v48 = vunpack.c.h.bf16 %v509_v35 }
  0x1c   : > { %v545_v50 = vpack.i.bf16 %v309_v42, %v308_v41  ;;  %v261_v51 = vmul.f32 %v497_v43, %v629_v0  ;;  %v262_v52 = vmul.f32 %v498_v44, %v629_v0  ;;  %v481_v53 = vunpack.c.l.bf16 %v504_v40 }
  0x1d   : > { %v535_v54 = vpack.i.bf16 %v305_v46, %v304_v45  ;;  %v263_v55 = vmul.f32 %v501_v47, %v629_v0  ;;  %v264_v56 = vmul.f32 %v502_v48, %v629_v0  ;;  %v482_v57 = vunpack.c.h.bf16 %v504_v40 }
  0x1e   : > { %546 = vrot.lane.b32.xlu1 %v545_v50, %s579_s24  ;;  %v284_v58 = vadd.f32 %v638_v9, %v261_v51  ;;  %v285_v59 = vadd.f32 %v638_v9, %v262_v52  ;;  %v485_v60 = vunpack.c.l.bf16 %v505_v49  ;;  %v486_v61 = vunpack.c.h.bf16 %v505_v49 }
  0x1f   : > { %536 = vrot.lane.b32.xlu0 %v535_v54, %s579_s24  ;;  %v286_v62 = vadd.f32 %v638_v9, %v263_v55  ;;  %v287_v63 = vadd.f32 %v638_v9, %v264_v56  ;;  %v253_v1 = vmul.f32 %v481_v53, %v629_v0  ;;  %v254_v2 = vmul.f32 %v482_v57, %v629_v0 }
  0x20   : > { %v300_v3 = vmax.f32 %v284_v58, 0.0  ;;  %v301_v4 = vmax.f32 %v285_v59, 0.0  ;;  %v255_v5 = vmul.f32 %v485_v60, %v629_v0  ;;  %v256_v6 = vmul.f32 %v486_v61, %v629_v0 }
  0x21   : > { %v302_v7 = vmax.f32 %v286_v62, 0.0  ;;  %v303_v8 = vmax.f32 %v287_v63, 0.0  ;;  %v276_v10 = vadd.f32 %v638_v9, %v253_v1  ;;  %v277_v11 = vadd.f32 %v638_v9, %v254_v2 }
  0x22   : > { %v310_v12 = vmax.f32 %v300_v3, %v301_v4  ;;  %v278_v13 = vadd.f32 %v638_v9, %v255_v5  ;;  %v279_v14 = vadd.f32 %v638_v9, %v256_v6 }
  0x23   : > { %v311_v15 = vmax.f32 %v302_v7, %v303_v8  ;;  %v292_v16 = vmax.f32 %v276_v10, 0.0  ;;  %v293_v17 = vmax.f32 %v277_v11, 0.0 }
  0x24   : > { %v294_v18 = vmax.f32 %v278_v13, 0.0  ;;  %v295_v19 = vmax.f32 %v279_v14, 0.0 }
  0x25   : > { %v550_v20 = vpack.i.bf16 %v311_v15, %v310_v12  ;;  %v306_v21 = vmax.f32 %v292_v16, %v293_v17 }
  0x26   : > { %v307_v0 = vmax.f32 %v294_v18, %v295_v19 }
  0x27   : > { %551 = vrot.lane.b32.xlu1 %v550_v20, %s579_s24 }
  0x28   : > { %v540_v22 = vpack.i.bf16 %v307_v0, %v306_v21 }
  0x2a   : > { %541 = vrot.lane.b32.xlu0 %v540_v22, %s579_s24 }
  0x90   : > { %v547_v23 = vpop.permute.xlu1 %546 }
  0x91   : > { %v549_v24 = vunpack.i.h.bf16 %v547_v23  ;;  %v548_v25 = vunpack.i.l.bf16 %v547_v23  ;;  %v537_v26 = vpop.permute.xlu0 %536 }
  0x92   : > { %v539_v27 = vunpack.i.h.bf16 %v537_v26  ;;  %v538_v9 = vunpack.i.l.bf16 %v537_v26 }
  0x93   : > { %v349_v28 = vmax.f32 %v309_v42, %v549_v24  ;;  %v348_v29 = vmax.f32 %v308_v41, %v548_v25 }
  0x94   : > { %v345_v30 = vmax.f32 %v305_v46, %v539_v27  ;;  %v344_v31 = vmax.f32 %v304_v45, %v538_v9 }
  0x95   : > { %v357_v32 = vpack.c.bf16 %v349_v28, %v349_v28  ;;  %v356_v33 = vpack.c.bf16 %v348_v29, %v348_v29 }
  0x96   : > { %v353_v34 = vpack.c.bf16 %v345_v30, %v345_v30  ;;  %v352_v35 = vpack.c.bf16 %v344_v31, %v344_v31 }
  0x97   : > { %366 = vst.msk [vmem:[%s208_s28 + $0x14] sm:$0xf] %vm360_vm0, %v357_v32  ;;  %365 = vst.msk [vmem:[%s208_s28 + $0x10] sm:$0xf] %vm360_vm0, %v356_v33 }
  0x98   : > { %362 = vst.msk [vmem:[%s208_s28 + $0x4] sm:$0xf] %vm360_vm0, %v353_v34  ;;  %361 = vst.msk [vmem:[%s208_s28] sm:$0xf] %vm360_vm0, %v352_v35 }
  0x99   : > { %v552_v36 = vpop.permute.xlu1 %551 }
  0x9a   : > { %v554_v37 = vunpack.i.h.bf16 %v552_v36  ;;  %v553_v38 = vunpack.i.l.bf16 %v552_v36 }
  0x9c   : > { %v351_v39 = vmax.f32 %v311_v15, %v554_v37  ;;  %v350_v40 = vmax.f32 %v310_v12, %v553_v38  ;;  %v542_v41 = vpop.permute.xlu0 %541 }
  0x9d   : > { %v544_v42 = vunpack.i.h.bf16 %v542_v41  ;;  %v543_v43 = vunpack.i.l.bf16 %v542_v41 }
  0x9e   : > { %v359_v44 = vpack.c.bf16 %v351_v39, %v351_v39  ;;  %v358_v45 = vpack.c.bf16 %v350_v40, %v350_v40 }
  0x9f   : > { %v347_v46 = vmax.f32 %v307_v0, %v544_v42  ;;  %v346_v47 = vmax.f32 %v306_v21, %v543_v43 }
  0xa0   : > { %368 = vst.msk [vmem:[%s208_s28 + $0x1c] sm:$0xf] %vm360_vm0, %v359_v44  ;;  %367 = vst.msk [vmem:[%s208_s28 + $0x18] sm:$0xf] %vm360_vm0, %v358_v45 }
  0xa1   : > { %v355_v48 = vpack.c.bf16 %v347_v46, %v347_v46  ;;  %v354_v49 = vpack.c.bf16 %v346_v47, %v346_v47 }
  0xa3   : > { %364 = vst.msk [vmem:[%s208_s28 + $0xc] sm:$0xf] %vm360_vm0, %v355_v48  ;;  %363 = vst.msk [vmem:[%s208_s28 + $0x8] sm:$0xf] %vm360_vm0, %v354_v49 }
  0xa4 PF: > { %s13_s14 = sadd.s32 1, %s577_s14   ;;  %s705_s12 = smov %s573_s13 }
  0xa5   : > { %p10_p5 = scmp.ge.s32.totalorder %s13_s14, 4   ;;  %s706_s13 = smov %s708_s15 }
  0xa7   :  { %12 = sbr.rel (!%p10_p5) target bundleno = 2 (0x2), region = 62 }

// kernel: convnet_forward.11
= control target key start
LH: loop header
LB: loop body
LE: loop exit
PB: predicated region body
PF: predicated region fallthrough
CT: control target
= control target key end

     0   :  { %s488_s12 = smov 0   ;;  %s490_s13 = smov 0   ;;  %s539_s0 = inlined_call_operand.vmem [shape: bf16[2,8,4,128], index: 0, kind: input, shape index: {}]   ;;  %s540_s1 = inlined_call_operand.vmem [shape: f32[1,1,1,128], index: 1, kind: input, shape index: {}]   ;;  %s541_s2 = inlined_call_operand.vmem [shape: f32[1,1,1,128], index: 2, kind: input, shape index: {}]   ;;  %s542_s3 = inlined_call_operand.vmem [shape: bf16[2,4,4,64], index: 3, kind: output, shape index: {}]  }
   0x1   :  { %s492_s14 = smov 0  }
   0x2 LB: > { %s25_s15 = sadd.s32 1, %s461_s13  ;;  %p397_p0 = scmp.ge.s32.totalorder %s465_s14, 1  ;;  %s465_s14 = sphi %s492_s14, %s13_s14   ;;  %s461_s13 = sphi %s490_s13, %s544_s13   ;;  %s457_s12 = sphi %s488_s12, %s543_s12  }
   0x3   : > { %p27_p1 = scmp.ge.s32.totalorder %s25_s15, 2  ;;  %p158_p2 = scmp.lt.s32.totalorder %s465_s14, 3 }
   0x5   : > { %s546_s15 = smov (%p27_p1, %s25_s15), 0  ;;  %p159_p3 = pnand %p397_p0, %p158_p2 }
   0x6   : > { %p191_p4 = scmp.lt.s32.totalorder (!%p159_p3), %s457_s12, 1  ;;  %v402_v0 = vld [vmem:[%s540_s1] ss:$0 sm:$0xff] (!%p159_p3)  ;;  %vm264_vm0 = vcmask (!%p159_p3), 1043456   ;;  %s467_s24 = smov (!%p159_p3), 64   ;;  %vm301_vm1 = vcmask (!%p159_p3), 517120  }
   0x7   : > { %162 = sbr.rel (%p159_p3) target bundleno = 158 (0x9e), region = 32  ;;  %v403_v4 = vld [vmem:[%s541_s2] ss:$0 sm:$0xff] (!%p159_p3) }
   0xe   : > { %s548_s12 = smov (!%p191_p4, %s457_s12), 1 }
   0xf   : > { %s406_s16 = sshll.u32 %s548_s12, 4  ;;  %s407_s25 = sshll.u32 %s548_s12, 3 }
  0x10   : > { %s198_s19 = scalar_lea.vmem %s539_s0, %s406_s16  ;;  %s208_s28 = scalar_lea.vmem %s542_s3, %s407_s25 }
  0x11   : > { %v210_v1 = vld [vmem:[%s198_s19] sm:$0x3]  ;;  %v211_v2 = vld [vmem:[%s198_s19 + $0x2] sm:$0x3]  ;;  %v212_v3 = vld [vmem:[%s198_s19 + $0x4] sm:$0x3] }
  0x12   : > { %v213_v5 = vld [vmem:[%s198_s19 + $0x6] sm:$0x3]  ;;  %v218_v6 = vunpack.c.l.bf16 %v210_v1  ;;  %v219_v7 = vunpack.c.l.bf16 %v211_v2  ;;  %v220_v8 = vunpack.c.l.bf16 %v212_v3  ;;  %v214_v9 = vld [vmem:[%s198_s19 + $0x8] sm:$0x3]  ;;  %v215_v10 = vld [vmem:[%s198_s19 + $0xa] sm:$0x3] }
  0x13   : > { %v221_v11 = vunpack.c.l.bf16 %v213_v5  ;;  %v216_v12 = vld [vmem:[%s198_s19 + $0xc] sm:$0x3]  ;;  %v217_v13 = vld [vmem:[%s198_s19 + $0xe] sm:$0x3]  ;;  %v222_v14 = vunpack.c.l.bf16 %v214_v9  ;;  %v223_v15 = vunpack.c.l.bf16 %v215_v10 }
  0x14   : > { %v233_v16 = vmul.f32 %v402_v0, %v218_v6  ;;  %v234_v17 = vmul.f32 %v402_v0, %v219_v7  ;;  %v235_v18 = vmul.f32 %v402_v0, %v220_v8  ;;  %v224_v19 = vunpack.c.l.bf16 %v216_v12 }
  0x15   : > { %v236_v20 = vmul.f32 %v402_v0, %v221_v11  ;;  %v225_v21 = vunpack.c.l.bf16 %v217_v13  ;;  %v237_v22 = vmul.f32 %v402_v0, %v222_v14  ;;  %v238_v23 = vmul.f32 %v402_v0, %v223_v15 }
  0x16   : > { %v248_v24 = vadd.f32 %v403_v4, %v233_v16  ;;  %v249_v25 = vadd.f32 %v403_v4, %v234_v17  ;;  %v250_v26 = vadd.f32 %v403_v4, %v235_v18  ;;  %v239_v27 = vmul.f32 %v402_v0, %v224_v19 }
  0x17   : > { %v251_v28 = vadd.f32 %v403_v4, %v236_v20  ;;  %v240_v29 = vmul.f32 %v402_v0, %v225_v21  ;;  %v252_v30 = vadd.f32 %v403_v4, %v237_v22  ;;  %v253_v31 = vadd.f32 %v403_v4, %v238_v23 }
  0x18   : > { %v256_v32 = vmax.f32 %v248_v24, 0.0  ;;  %v257_v33 = vmax.f32 %v249_v25, 0.0  ;;  %v258_v34 = vmax.f32 %v250_v26, 0.0  ;;  %v254_v35 = vadd.f32 %v403_v4, %v239_v27 }
  0x19   : > { %v259_v36 = vmax.f32 %v251_v28, 0.0  ;;  %v255_v37 = vadd.f32 %v403_v4, %v240_v29  ;;  %v260_v38 = vmax.f32 %v252_v30, 0.0  ;;  %v261_v39 = vmax.f32 %v253_v31, 0.0 }
  0x1a   : > { %v265_v40 = vsel %vm264_vm0, %v256_v32, -inf  ;;  %v266_v41 = vsel %vm264_vm0, %v257_v33, -inf  ;;  %v268_v42 = vsel %vm264_vm0, %v258_v34, -inf  ;;  %v262_v43 = vmax.f32 %v254_v35, 0.0 }
  0x1b   : > { %v267_v44 = vmax.f32 %v265_v40, %v266_v41  ;;  %v269_v45 = vsel %vm264_vm0, %v259_v36, -inf  ;;  %v263_v46 = vmax.f32 %v255_v37, 0.0  ;;  %v271_v47 = vsel %vm264_vm0, %v260_v38, -inf }
  0x1c   : > { %v270_v48 = vmax.f32 %v268_v42, %v269_v45  ;;  %v272_v49 = vsel %vm264_vm0, %v261_v39, -inf  ;;  %v274_v50 = vsel %vm264_vm0, %v262_v43, -inf }
  0x1d   : > { %v273_v51 = vmax.f32 %v271_v47, %v272_v49  ;;  %v275_v52 = vsel %vm264_vm0, %v263_v46, -inf }
  0x1e   : > { %v433_v53 = vpack.i.bf16 %v270_v48, %v267_v44  ;;  %v276_v54 = vmax.f32 %v274_v50, %v275_v52 }
  0x20   : > { %434 = vrot.lane.b32.xlu0 %v433_v53, %s467_s24  ;;  %v438_v55 = vpack.i.bf16 %v276_v54, %v273_v51 }
  0x24   : > { %439 = vrot.lane.b32.xlu0 %v438_v55, %s467_s24 }
  0x92   : > { %v435_v56 = vpop.permute.xlu0 %434 }
  0x93   : > { %v437_v57 = vunpack.i.h.bf16 %v435_v56  ;;  %v436_v58 = vunpack.i.l.bf16 %v435_v56 }
  0x95   : > { %v294_v59 = vmax.f32 %v270_v48, %v437_v57  ;;  %v293_v60 = vmax.f32 %v267_v44, %v436_v58 }
  0x96   : > { %v440_v61 = vpop.permute.xlu0 %439 }
  0x97   : > { %v298_v62 = vpack.c.bf16 %v294_v59, %v294_v59  ;;  %v297_v63 = vpack.c.bf16 %v293_v60, %v293_v60  ;;  %v442_v0 = vunpack.i.h.bf16 %v440_v61  ;;  %v441_v1 = vunpack.i.l.bf16 %v440_v61 }
  0x99   : > { %303 = vst.msk [vmem:[%s208_s28 + $0x2] sm:$0x3] %vm301_vm1, %v298_v62  ;;  %302 = vst.msk [vmem:[%s208_s28] sm:$0x3] %vm301_vm1, %v297_v63  ;;  %v296_v2 = vmax.f32 %v276_v54, %v442_v0  ;;  %v295_v3 = vmax.f32 %v273_v51, %v441_v1 }
  0x9b   : > { %v300_v4 = vpack.c.bf16 %v296_v2, %v296_v2  ;;  %v299_v5 = vpack.c.bf16 %v295_v3, %v295_v3 }
  0x9d   : > { %305 = vst.msk [vmem:[%s208_s28 + $0x6] sm:$0x3] %vm301_vm1, %v300_v4  ;;  %304 = vst.msk [vmem:[%s208_s28 + $0x4] sm:$0x3] %vm301_vm1, %v299_v5 }
  0x9e PF: > { %s13_s14 = sadd.s32 1, %s465_s14   ;;  %s543_s12 = smov %s461_s13 }
  0x9f   : > { %p10_p5 = scmp.ge.s32.totalorder %s13_s14, 4   ;;  %s544_s13 = smov %s546_s15 }
  0xa1   :  { %12 = sbr.rel (!%p10_p5) target bundleno = 2 (0x2), region = 62 }

// kernel: convnet_forward.10
= control target key start
LH: loop header
LB: loop body
LE: loop exit
PB: predicated region body
PF: predicated region fallthrough
CT: control target
= control target key end

     0   :  { %s2196_s12 = smov 0   ;;  %s2789_s0 = inlined_call_operand.vmem [shape: bf16[2,10,10,64], index: 0, kind: input, shape index: {}]   ;;  %s2790_s1 = inlined_call_operand.vmem [shape: bf16[576,64], index: 1, kind: input, shape index: {}]   ;;  %s2791_s2 = inlined_call_operand.vmem [shape: bf16[2,64,64], index: 2, kind: output, shape index: {0}]   ;;  %s2792_s3 = inlined_call_operand.vmem [shape: f32[2,2,64], index: 3, kind: output, shape index: {1}]  }
   0x1 LB: > { %s1793_s13 = sadd.s32 4294967295, %s2173_s12   ;;  %p1797_p0 = scmp.ge.s32.totalorder %s2173_s12, 1  ;;  %s2173_s12 = sphi %s2196_s12, %s14_s12  }
   0x2   : > { %p140_p1 = scmp.lt.s32.totalorder %s2173_s12, 3 }
   0x4   : > { %p141_p2 = pnand %p1797_p0, %p140_p1 }
   0x5   : > { %p168_p3 = scmp.lt.s32.totalorder (!%p141_p2), %s1793_s13, 1  ;;  %v2107_v0 = vld [vmem:[%s2790_s1 + $0x40] sm:$0xff] (!%p141_p2)   ;;  %vm396_vm0 = vcmask (!%p141_p2), 1042432   ;;  %v2109_v2 = vld [vmem:[%s2790_s1 + $0x48] sm:$0xff] (!%p141_p2)   ;;  %vm397_vm1 = vcmask (!%p141_p2), 1046532   ;;  %v2111_v4 = vld [vmem:[%s2790_s1 + $0x50] sm:$0xff] (!%p141_p2)  }
   0x6   : > { %144 = sbr.rel (%p141_p2) target bundleno = 454 (0x1c6), region = 28  ;;  %v2108_v1 = vld [vmem:[%s2790_s1] sm:$0xff] (!%p141_p2)   ;;  %1985 = vmatprep.subr.bf16.mxu0 (!%p141_p2), %v2107_v0  ;;  %v2110_v3 = vld [vmem:[%s2790_s1 + $0x8] sm:$0xff] (!%p141_p2)   ;;  %vm216_vm2 = vsmask.f32 (!%p141_p2), 3328  ;;  %s2175_s28 = smov (!%p141_p2), 64   ;;  %vm2232_vm3 = vmor (!%p141_p2), %vm396_vm0, %vm397_vm1 }
   0x7   : > { %1986 = vmatpush3.bf16.msra.mxu0 (!%p141_p2), %v2108_v1  ;;  %vm217_vm4 = vsmask.f32 (!%p141_p2), 7440  ;;  %v2112_v33 = vld [vmem:[%s2790_s1 + $0xc0] sm:$0xff] (!%p141_p2)   ;;  %v2113_v56 = vld [vmem:[%s2790_s1 + $0x10] sm:$0xff] (!%p141_p2)   ;;  %vm191_vm6 = vcmask (!%p141_p2), 519168   ;;  %vm355_vm7 = vcmask (!%p141_p2), 1043968  }
   0x8   : > { %1987 = vmatprep.subr.bf16.mxu0 (!%p141_p2), %v2109_v2  ;;  %vm2260_vm5 = vmor (!%p141_p2), %vm216_vm2, %vm217_vm4  ;;  %2025 = vmatprep.subr.bf16.mxu1 (!%p141_p2), %v2112_v33  ;;  %v2114_v62 = vld [vmem:[%s2790_s1 + $0x80] sm:$0xff] (!%p141_p2)   ;;  %vm1405_vm8 = vcmask (!%p141_p2), 523264   ;;  %vm1663_vm9 = vcmask (!%p141_p2), 1040384   ;;  %vm1665_vm10 = vcmask (!%p141_p2), 517120  }
   0x9   : > { %2026 = vmatpush3.bf16.msra.mxu1 (!%p141_p2), %v2114_v62 }
   0xb   : > { %1988 = vmatpush3.bf16.msra.mxu0 (!%p141_p2), %v2110_v3 }
   0xc   : > { %1989 = vmatprep.subr.bf16.mxu0 (!%p141_p2), %v2111_v4  ;;  %v2115_v4 = vld [vmem:[%s2790_s1 + $0x58] sm:$0xff] (!%p141_p2)  }
   0xd   : > { %s2798_s13 = smov (!%p168_p3, %s1793_s13), 1 }
   0xe   : > { %s2097_s18 = smul.u32 80, %s2798_s13  ;;  %s1801_s22 = sshll.u32 %s2798_s13, 1 }
   0xf   : > { %1990 = vmatpush3.bf16.msra.mxu0 %v2113_v56  ;;  %v2121_v56 = vld [vmem:[%s2790_s1 + $0x20] sm:$0xff]   ;;  %s181_s26 = scalar_lea.vmem %s2792_s3, %s1801_s22 }
  0x10   : > { %s2222_s25 = scalar_lea.vmem %s2789_s0, %s2097_s18  ;;  %1991 = vmatprep.subr.bf16.mxu0 %v2115_v4  ;;  %s1976_s18 = sshll.u32 %s2798_s13, 5 }
  0x11   : > { %v1810_v5 = vld [vmem:[%s2222_s25 + $0x8] sm:$0xf]  ;;  %v1812_v6 = vld [vmem:[%s2222_s25 + $0x18] sm:$0xf]  ;;  %v1835_v9 = vld [vmem:[%s2222_s25 + $0xc] sm:$0x1]  ;;  %s2748_s21 = scalar_lea.vmem %s2791_s2, %s1976_s18 }
  0x12   : > { %464 = vrot.lane.b32.xlu1 %v1810_v5, %s2175_s28  ;;  %468 = vrot.lane.b32.xlu0 %v1812_v6, %s2175_s28  ;;  %v1834_v8 = vld [vmem:[%s2222_s25 + $0x8] sm:$0xe]  ;;  %v1811_v10 = vld [vmem:[%s2222_s25 + $0x10] sm:$0xf]  ;;  %v674_v12 = vrot.slane %v1835_v9, 5 }
  0x13   : > { %v1850_v11 = vrot.slane %v1834_v8, 9  ;;  %v200_v13 = vld [vmem:[%s2222_s25] sm:$0xf]  ;;  %v201_v14 = vld [vmem:[%s2222_s25 + $0x4] sm:$0x1] }
  0x14   : > { %v220_v15 = vshrl.u32 %v200_v13, 16  ;;  %v223_v16 = vshll.u32 %v200_v13, 16  ;;  %v1836_v17 = vld [vmem:[%s2222_s25 + $0x10] sm:$0xe]  ;;  %v1813_v19 = vld [vmem:[%s2222_s25 + $0x20] sm:$0xf] }
  0x15   : > { %v675_v18 = vsel %vm2232_vm3, %v1850_v11, %v674_v12  ;;  %v229_v20 = vshll.u32 %v201_v14, 16  ;;  %v1837_v21 = vld [vmem:[%s2222_s25 + $0x14] sm:$0x1]  ;;  %v1851_v22 = vrot.slane %v1836_v17, 9  ;;  %v202_v23 = vld [vmem:[%s2222_s25 + $0x8] sm:$0xf] }
  0x16   : > { %466 = vrot.lane.b32.xlu1 %v1811_v10, %s2175_s28  ;;  %704 = vrot.lane.b32.xlu0 %v675_v18, %s2175_s28  ;;  %v222_v24 = vrot.slane %v220_v15, 4  ;;  %v225_v25 = vrot.slane %v223_v16, 5  ;;  %v678_v26 = vrot.slane %v1837_v21, 5  ;;  %v203_v27 = vld [vmem:[%s2222_s25 + $0xc] sm:$0x1]  ;;  %v234_v28 = vshrl.u32 %v202_v23, 16 }
  0x17   : > { %v231_v29 = vrot.slane %v229_v20, 5  ;;  %v237_v30 = vshll.u32 %v202_v23, 16  ;;  %v243_v31 = vshll.u32 %v203_v27, 16  ;;  %v206_v32 = vld [vmem:[%s2222_s25 + $0x18] sm:$0xf]  ;;  %v2116_v11 = vld [vmem:[%s2790_s1 + $0xc8] sm:$0xff]  }
  0x18   : > { %v226_v34 = vor.u32 %v225_v25, %v222_v24  ;;  %v679_v35 = vsel %vm2232_vm3, %v1851_v22, %v678_v26  ;;  %v236_v36 = vrot.slane %v234_v28, 4  ;;  %v207_v37 = vld [vmem:[%s2222_s25 + $0x1c] sm:$0x1]  ;;  %v262_v38 = vshrl.u32 %v206_v32, 16  ;;  %v204_v39 = vld [vmem:[%s2222_s25 + $0x10] sm:$0xf]  ;;  %2027 = vmatprep.subr.bf16.mxu1 %v2116_v11 }
  0x19   : > { %v239_v41 = vrot.slane %v237_v30, 5  ;;  %v245_v42 = vrot.slane %v243_v31, 5  ;;  %v265_v43 = vshll.u32 %v206_v32, 16  ;;  %v271_v44 = vshll.u32 %v207_v37, 16  ;;  %v205_v45 = vld [vmem:[%s2222_s25 + $0x14] sm:$0x1] }
  0x1a   : > { %470 = vrot.lane.b32.xlu1 %v1813_v19, %s2175_s28  ;;  %v227_v46 = vrot.slane %v226_v34, 4  ;;  %v264_v47 = vrot.slane %v262_v38, 4  ;;  %v248_v48 = vshrl.u32 %v204_v39, 16  ;;  %v251_v49 = vshll.u32 %v204_v39, 16  ;;  %v1868_v50 = vld [vmem:[%s2222_s25 + $0x18] sm:$0xf] }
  0x1b   : > { %v240_v51 = vor.u32 %v239_v41, %v236_v36  ;;  %v267_v52 = vrot.slane %v265_v43, 5  ;;  %v273_v53 = vrot.slane %v271_v44, 5  ;;  %v257_v54 = vshll.u32 %v205_v45, 16  ;;  %v1869_v55 = vld [vmem:[%s2222_s25 + $0x1c] sm:$0x1]  ;;  %v2118_v32 = vld [vmem:[%s2790_s1 + $0x88] sm:$0xff]  }
  0x1c   : > { %v232_v57 = vsel %vm2260_vm5, %v227_v46, %v231_v29  ;;  %v250_v58 = vrot.slane %v248_v48, 4  ;;  %v253_v59 = vrot.slane %v251_v49, 5  ;;  %v784_v60 = vshrl.u32 %v1868_v50, 16  ;;  %v1866_v61 = vld [vmem:[%s2222_s25 + $0x10] sm:$0xf]  ;;  %v2117_v17 = vld [vmem:[%s2790_s1 + $0x18] sm:$0xff]   ;;  %2028 = vmatpush3.bf16.msra.mxu1 %v2118_v32 }
  0x1d   : > { %331 = vrot.lane.b32.xlu0 %v232_v57, %s2175_s28  ;;  %v241_v63 = vrot.slane %v240_v51, 4  ;;  %v268_v0 = vor.u32 %v267_v52, %v264_v47  ;;  %v259_v1 = vrot.slane %v257_v54, 5  ;;  %v787_v2 = vshll.u32 %v1868_v50, 16  ;;  %v1867_v3 = vld [vmem:[%s2222_s25 + $0x14] sm:$0x1]  ;;  %1992 = vmatpush3.bf16.msra.mxu0 %v2117_v17  ;;  %v2119_v38 = vld [vmem:[%s2790_s1 + $0x60] sm:$0xff]  }
  0x1e   : > { %706 = vrot.lane.b32.xlu1 %v679_v35, %s2175_s28  ;;  %v254_v5 = vor.u32 %v253_v59, %v250_v58  ;;  %v786_v6 = vrot.slane %v784_v60, 4  ;;  %v793_v8 = vshll.u32 %v1869_v55, 16  ;;  %v770_v9 = vshrl.u32 %v1866_v61, 16  ;;  %v210_v10 = vld [vmem:[%s2222_s25 + $0x28] sm:$0xf]  ;;  %1993 = vmatprep.subr.bf16.mxu0 %v2119_v38  ;;  %v2120_v50 = vld [vmem:[%s2790_s1 + $0xd0] sm:$0xff]  }
  0x1f   : > { %v246_v12 = vsel %vm2260_vm5, %v241_v63, %v245_v42  ;;  %v269_v13 = vrot.slane %v268_v0, 4  ;;  %v789_v14 = vrot.slane %v787_v2, 5  ;;  %v773_v15 = vshll.u32 %v1866_v61, 16  ;;  %v211_v16 = vld [vmem:[%s2222_s25 + $0x2c] sm:$0x1]  ;;  %2029 = vmatprep.subr.bf16.mxu1 %v2120_v50  ;;  %v2127_v50 = vld [vmem:[%s2790_s1 + $0x70] sm:$0xff]  }
  0x20   : > { %v255_v18 = vrot.slane %v254_v5, 4  ;;  %v795_v19 = vrot.slane %v793_v8, 5  ;;  %v772_v20 = vrot.slane %v770_v9, 4  ;;  %v779_v21 = vshll.u32 %v1867_v3, 16  ;;  %v208_v22 = vld [vmem:[%s2222_s25 + $0x20] sm:$0xf] }
  0x21   : > { %333 = vrot.lane.b32.xlu0 %v246_v12, %s2175_s28  ;;  %v274_v23 = vsel %vm2260_vm5, %v269_v13, %v273_v53  ;;  %v790_v24 = vor.u32 %v789_v14, %v786_v6  ;;  %v775_v25 = vrot.slane %v773_v15, 5  ;;  %v290_v26 = vshrl.u32 %v210_v10, 16  ;;  %v209_v27 = vld [vmem:[%s2222_s25 + $0x24] sm:$0x1]  ;;  %v1840_v37 = vld [vmem:[%s2222_s25 + $0x20] sm:$0xe]  ;;  %1994 = vmatpush3.bf16.msra.mxu0 %v2121_v56 }
  0x22   : > { %337 = vrot.lane.b32.xlu1 %v274_v23, %s2175_s28  ;;  %v260_v28 = vsel %vm2260_vm5, %v255_v18, %v259_v1  ;;  %v781_v29 = vrot.slane %v779_v21, 5  ;;  %v293_v30 = vshll.u32 %v210_v10, 16  ;;  %v299_v31 = vshll.u32 %v211_v16, 16  ;;  %v1841_v44 = vld [vmem:[%s2222_s25 + $0x24] sm:$0x1]  ;;  %v2122_v8 = vld [vmem:[%s2790_s1 + $0x90] sm:$0xff]  }
  0x23   : > { %v791_v33 = vrot.slane %v790_v24, 4  ;;  %v776_v34 = vor.u32 %v775_v25, %v772_v20  ;;  %v292_v35 = vrot.slane %v290_v26, 4  ;;  %v276_v36 = vshrl.u32 %v208_v22, 16  ;;  %v2313_v49 = vld [vmem:[%s2222_s25 + $0x18] sm:$0xe]  ;;  %v2123_v15 = vld [vmem:[%s2790_s1 + $0x68] sm:$0xff]   ;;  %2030 = vmatpush3.bf16.msra.mxu1 %v2122_v8 }
  0x24   : > { %v295_v39 = vrot.slane %v293_v30, 5  ;;  %v301_v41 = vrot.slane %v299_v31, 5  ;;  %v279_v42 = vshll.u32 %v208_v22, 16  ;;  %v285_v43 = vshll.u32 %v209_v27, 16  ;;  %v2320_v55 = vld [vmem:[%s2222_s25 + $0x1c] sm:$0x1]  ;;  %1995 = vmatprep.subr.bf16.mxu0 %v2123_v15 }
  0x25   : > { %335 = vrot.lane.b32.xlu0 %v260_v28, %s2175_s28  ;;  %v796_v45 = vsel %vm2260_vm5, %v791_v33, %v795_v19  ;;  %v777_v46 = vrot.slane %v776_v34, 4  ;;  %v278_v47 = vrot.slane %v276_v36, 4  ;;  %v1853_v48 = vrot.slane %v1840_v37, 9  ;;  %v1872_v60 = vld [vmem:[%s2222_s25 + $0x28] sm:$0xf]  ;;  %v2124_v26 = vld [vmem:[%s2790_s1 + $0xd8] sm:$0xff]  }
  0x26   : > { %883 = vrot.lane.b32.xlu1 %v796_v45, %s2175_s28  ;;  %v296_v51 = vor.u32 %v295_v39, %v292_v35  ;;  %v281_v52 = vrot.slane %v279_v42, 5  ;;  %v287_v53 = vrot.slane %v285_v43, 5  ;;  %v686_v54 = vrot.slane %v1841_v44, 5  ;;  %v1873_v61 = vld [vmem:[%s2222_s25 + $0x2c] sm:$0x1]  ;;  %2031 = vmatprep.subr.bf16.mxu1 %v2124_v26  ;;  %v2126_v37 = vld [vmem:[%s2790_s1 + $0x98] sm:$0xff]  }
  0x27   : > { %v782_v57 = vsel %vm2260_vm5, %v777_v46, %v781_v29  ;;  %v1852_v58 = vrot.slane %v2313_v49, 9  ;;  %v682_v59 = vrot.slane %v2320_v55, 5  ;;  %v812_v0 = vshrl.u32 %v1872_v60, 16  ;;  %v1870_v1 = vld [vmem:[%s2222_s25 + $0x20] sm:$0xf]  ;;  %v2125_v31 = vld [vmem:[%s2790_s1 + $0x28] sm:$0xff]   ;;  %2032 = vmatpush3.bf16.msra.mxu1 %v2126_v37 }
  0x28   : > { %v297_v62 = vrot.slane %v296_v51, 4  ;;  %v282_v63 = vor.u32 %v281_v52, %v278_v47  ;;  %v1871_v2 = vld [vmem:[%s2222_s25 + $0x24] sm:$0x1]  ;;  %v815_v3 = vshll.u32 %v1872_v60, 16  ;;  %v821_v4 = vshll.u32 %v1873_v61, 16  ;;  %1996 = vmatpush3.bf16.msra.mxu0 %v2125_v31 }
  0x29   : > { %881 = vrot.lane.b32.xlu0 %v782_v57, %s2175_s28  ;;  %v798_v5 = vshrl.u32 %v1870_v1, 16  ;;  %v214_v6 = vld [vmem:[%s2222_s25 + $0x38] sm:$0xf]  ;;  %v1815_v11 = vld [vmem:[%s2222_s25 + $0x30] sm:$0xf]  ;;  %v814_v12 = vrot.slane %v812_v0, 4  ;;  %v687_v16 = vsel %vm2232_vm3, %v1853_v48, %v686_v54  ;;  %v683_v56 = vsel %vm2232_vm3, %v1852_v58, %v682_v59  ;;  %1997 = vmatprep.subr.bf16.mxu0 %v2127_v50 }
  0x2a   : > { %v302_v9 = vsel %vm2260_vm5, %v297_v62, %v301_v41  ;;  %v283_v10 = vrot.slane %v282_v63, 4  ;;  %v801_v13 = vshll.u32 %v1870_v1, 16  ;;  %v215_v14 = vld [vmem:[%s2222_s25 + $0x3c] sm:$0x1]  ;;  %v817_v17 = vrot.slane %v815_v3, 5  ;;  %v2128_v49 = vld [vmem:[%s2790_s1 + $0xe0] sm:$0xff]  }
  0x2b   : > { %341 = vrot.lane.b32.xlu1 %v302_v9, %s2175_s28  ;;  %v800_v18 = vrot.slane %v798_v5, 4  ;;  %v807_v19 = vshll.u32 %v1871_v2, 16  ;;  %v212_v20 = vld [vmem:[%s2222_s25 + $0x30] sm:$0xf]  ;;  %v318_v23 = vshrl.u32 %v214_v6, 16  ;;  %v321_v24 = vshll.u32 %v214_v6, 16  ;;  %2033 = vmatprep.subr.bf16.mxu1 %v2128_v49 }
  0x2c   : > { %v288_v21 = vsel %vm2260_vm5, %v283_v10, %v287_v53  ;;  %v803_v22 = vrot.slane %v801_v13, 5  ;;  %v213_v25 = vld [vmem:[%s2222_s25 + $0x34] sm:$0x1]  ;;  %v818_v27 = vor.u32 %v817_v17, %v814_v12  ;;  %v2356_v28 = vrot.slane %v821_v4, 5  ;;  %v1814_v32 = vld [vmem:[%s2222_s25 + $0x28] sm:$0xf] }
  0x2d   : > { %339 = vrot.lane.b32.xlu0 %v288_v21, %s2175_s28  ;;  %v327_v29 = vshll.u32 %v215_v14, 16  ;;  %v304_v30 = vshrl.u32 %v212_v20, 16  ;;  %v320_v34 = vrot.slane %v318_v23, 4  ;;  %v323_v35 = vrot.slane %v321_v24, 5  ;;  %v2369_v43 = vld [vmem:[%s2222_s25 + $0x30] sm:$0xe] }
  0x2e   : > { %v804_v33 = vor.u32 %v803_v22, %v800_v18  ;;  %v307_v36 = vshll.u32 %v212_v20, 16  ;;  %v819_v38 = vrot.slane %v818_v27, 4  ;;  %v2366_v39 = vrot.slane %v807_v19, 5  ;;  %v2374_v48 = vld [vmem:[%s2222_s25 + $0x34] sm:$0x1]  ;;  %v2130_v12 = vld [vmem:[%s2790_s1 + $0xa0] sm:$0xff]  }
  0x2f   : > { %474 = vrot.lane.b32.xlu1 %v1815_v11, %s2175_s28  ;;  %v306_v41 = vrot.slane %v304_v30, 4  ;;  %v313_v42 = vshll.u32 %v213_v25, 16  ;;  %v324_v45 = vor.u32 %v323_v35, %v320_v34  ;;  %v2371_v46 = vrot.slane %v327_v29, 5  ;;  %v2384_v53 = vld [vmem:[%s2222_s25 + $0x28] sm:$0xe]  ;;  %v2129_v6 = vld [vmem:[%s2790_s1 + $0x30] sm:$0xff]   ;;  %2034 = vmatpush3.bf16.msra.mxu1 %v2130_v12 }
  0x30   : > { %v805_v44 = vrot.slane %v804_v33, 4  ;;  %v309_v47 = vrot.slane %v307_v36, 5  ;;  %v1855_v52 = vrot.slane %v2369_v43, 9  ;;  %v2387_v54 = vld [vmem:[%s2222_s25 + $0x2c] sm:$0x1]  ;;  %v694_v61 = vrot.slane %v2374_v48, 5  ;;  %1998 = vmatpush3.bf16.msra.mxu0 %v2129_v6 }
  0x31   : > { %472 = vrot.lane.b32.xlu0 %v1814_v32, %s2175_s28  ;;  %v2380_v51 = vrot.slane %v313_v42, 5  ;;  %v325_v57 = vrot.slane %v324_v45, 4  ;;  %v1876_v62 = vld [vmem:[%s2222_s25 + $0x38] sm:$0xf]  ;;  %v1877_v63 = vld [vmem:[%s2222_s25 + $0x3c] sm:$0x1]  ;;  %v824_v58 = vsel %vm2260_vm5, %v819_v38, %v2356_v28 }
  0x32   : > { %v310_v60 = vor.u32 %v309_v47, %v306_v41  ;;  %v1854_v0 = vrot.slane %v2384_v53, 9  ;;  %v840_v1 = vshrl.u32 %v1876_v62, 16  ;;  %v843_v55 = vshll.u32 %v1876_v62, 16  ;;  %v1874_v2 = vld [vmem:[%s2222_s25 + $0x30] sm:$0xf]  ;;  %v2131_v18 = vld [vmem:[%s2790_s1 + $0x78] sm:$0xff]  }
  0x33   : > { %710 = vrot.lane.b32.xlu1 %v687_v16, %s2175_s28  ;;  %v849_v3 = vshll.u32 %v1877_v63, 16  ;;  %v1875_v4 = vld [vmem:[%s2222_s25 + $0x34] sm:$0x1]  ;;  %v826_v5 = vshrl.u32 %v1874_v2, 16  ;;  %v829_v10 = vshll.u32 %v1874_v2, 16  ;;  %v810_v13 = vsel %vm2260_vm5, %v805_v44, %v2366_v39  ;;  %v2132_v24 = vld [vmem:[%s2790_s1 + $0xe8] sm:$0xff]   ;;  %1999 = vmatprep.subr.bf16.mxu0 %v2131_v18 }
  0x34   : > { %v311_v59 = vrot.slane %v310_v60, 4  ;;  %v842_v8 = vrot.slane %v840_v1, 4  ;;  %v845_v9 = vrot.slane %v843_v55, 5  ;;  %v2413_v11 = vld [vmem:[%s2222_s25 + $0x40] sm:$0xe]  ;;  %v690_v14 = vrot.slane %v2387_v54, 5  ;;  %2035 = vmatprep.subr.bf16.mxu1 %v2132_v24 }
  0x35   : > { %708 = vrot.lane.b32.xlu0 %v683_v56, %s2175_s28  ;;  %v828_v15 = vrot.slane %v826_v5, 4  ;;  %v835_v16 = vshll.u32 %v1875_v4, 16  ;;  %v2423_v17 = vld [vmem:[%s2222_s25 + $0x44] sm:$0x1]  ;;  %v2429_v20 = vrot.slane %v849_v3, 5  ;;  %v831_v21 = vrot.slane %v829_v10, 5 }
  0x36   : > { %v846_v19 = vor.u32 %v845_v9, %v842_v8  ;;  %v1857_v22 = vrot.slane %v2413_v11, 9  ;;  %v2433_v23 = vld [vmem:[%s2222_s25 + $0x38] sm:$0xe]  ;;  %v330_v25 = vsel %vm2260_vm5, %v325_v57, %v2371_v46  ;;  %v702_v27 = vrot.slane %v2423_v17, 5  ;;  %v2445_v28 = vld [vmem:[%s2222_s25 + $0x3c] sm:$0x1] }
  0x37   : > { %887 = vrot.lane.b32.xlu1 %v824_v58, %s2175_s28  ;;  %v2441_v26 = vrot.slane %v835_v16, 5  ;;  %v1880_v29 = vld [vmem:[%s2222_s25 + $0x48] sm:$0xf]  ;;  %v316_v30 = vsel %vm2260_vm5, %v311_v59, %v2380_v51  ;;  %v832_v32 = vor.u32 %v831_v21, %v828_v15  ;;  %v1856_v33 = vrot.slane %v2433_v23, 9  ;;  %v1881_v34 = vld [vmem:[%s2222_s25 + $0x4c] sm:$0x1] }
  0x38   : > { %v2452_v31 = vrot.slane %v846_v19, 4  ;;  %v1878_v35 = vld [vmem:[%s2222_s25 + $0x40] sm:$0xf]  ;;  %v868_v37 = vshrl.u32 %v1880_v29, 16  ;;  %v871_v38 = vshll.u32 %v1880_v29, 16  ;;  %v877_v39 = vshll.u32 %v1881_v34, 16 }
  0x39   : > { %885 = vrot.lane.b32.xlu0 %v810_v13, %s2175_s28  ;;  %v1817_v36 = vld [vmem:[%s2222_s25 + $0x40] sm:$0xf]  ;;  %v1879_v41 = vld [vmem:[%s2222_s25 + $0x44] sm:$0x1]  ;;  %v854_v42 = vshrl.u32 %v1878_v35, 16  ;;  %v698_v44 = vrot.slane %v2445_v28, 5  ;;  %v695_v6 = vsel %vm2232_vm3, %v1855_v52, %v694_v61  ;;  %v691_v13 = vsel %vm2232_vm3, %v1854_v0, %v690_v14 }
  0x3a   : > { %v857_v45 = vshll.u32 %v1878_v35, 16  ;;  %v364_v46 = vld [vmem:[%s2222_s25] sm:$0xe]  ;;  %v365_v47 = vld [vmem:[%s2222_s25 + $0x4] sm:$0x1]  ;;  %v2464_v51 = vrot.slane %v832_v32, 4  ;;  %v852_v54 = vsel %vm2260_vm5, %v2452_v31, %v2429_v20 }
  0x3b   : > { %345 = vrot.lane.b32.xlu1 %v330_v25, %s2175_s28  ;;  %v1816_v50 = vld [vmem:[%s2222_s25 + $0x38] sm:$0xf]  ;;  %v870_v56 = vrot.slane %v868_v37, 4  ;;  %v873_v57 = vrot.slane %v871_v38, 5  ;;  %v2466_v60 = vrot.slane %v877_v39, 5  ;;  %v856_v62 = vrot.slane %v854_v42, 4 }
  0x3c   : > { %v863_v63 = vshll.u32 %v1879_v41, 16  ;;  %v1802_v1 = vrot.slane %v364_v46, 9  ;;  %v368_v55 = vld [vmem:[%s2222_s25 + $0x10] sm:$0xe]  ;;  %v2133_v2 = vld [vmem:[%s2790_s1 + $0x38] sm:$0xff]   ;;  %v401_v58 = vrot.slane %v365_v47, 5  ;;  %v838_v20 = vsel %vm2260_vm5, %v2464_v51, %v2441_v26 }
  0x3d   : > { %343 = vrot.lane.b32.xlu0 %v316_v30, %s2175_s28  ;;  %v874_v49 = vor.u32 %v873_v57, %v870_v56  ;;  %v369_v59 = vld [vmem:[%s2222_s25 + $0x14] sm:$0x1]  ;;  %v1804_v3 = vrot.slane %v368_v55, 9  ;;  %v859_v4 = vrot.slane %v857_v45, 5  ;;  %2000 = vmatpush3.bf16.msra.mxu0 %v2133_v2  ;;  %v366_v10 = vld [vmem:[%s2222_s25 + $0x8] sm:$0xe]  ;;  %v703_v37 = vsel %vm2232_vm3, %v1857_v22, %v702_v27 }
  0x3e   : > { %v409_v5 = vrot.slane %v369_v59, 5  ;;  %v2481_v8 = vrot.slane %v863_v63, 5  ;;  %v402_v9 = vsel %vm2232_vm3, %v1802_v1, %v401_v58  ;;  %v2134_v12 = vld [vmem:[%s2790_s1 + $0xa8] sm:$0xff]   ;;  %v1803_v61 = vrot.slane %v366_v10, 9  ;;  %v2138_v16 = vld [vmem:[%s2790_s1 + $0xf0] sm:$0xff]   ;;  %v2142_v34 = vld [vmem:[%s2790_s1 + $0xf8] sm:$0xff]  }
  0x3f   : > { %478 = vrot.lane.b32.xlu1 %v1817_v36, %s2175_s28  ;;  %v2490_v48 = vrot.slane %v874_v49, 4  ;;  %439 = vst.msk [vmem:[#allocation2 + $0x4] sm:$0xf] %vm191_vm6, %v402_v9  ;;  %v367_v52 = vld [vmem:[%s2222_s25 + $0xc] sm:$0x1]  ;;  %2036 = vmatpush3.bf16.msra.mxu1 %v2134_v12  ;;  %v2139_v24 = vld [vmem:[%s2790_s1 + $0xb0] sm:$0xff]   ;;  %v860_v25 = vor.u32 %v859_v4, %v856_v62  ;;  %v699_v11 = vsel %vm2232_vm3, %v1856_v33, %v698_v44 }
  0x40   : > { %v410_v43 = vsel %vm2232_vm3, %v1804_v3, %v409_v5  ;;  %v405_v15 = vrot.slane %v367_v52, 5  ;;  %v1818_v53 = vld [vmem:[%s2222_s25 + $0x8] sm:$0xf]  ;;  %v1819_v18 = vld [vmem:[%s2222_s25 + $0xc] sm:$0x1]  ;;  %2037 = vmatprep.subr.bf16.mxu1 %v2138_v16  ;;  %v2143_v26 = vld [vmem:[%s2790_s1 + $0xb8] sm:$0xff]  }
  0x41   : > { %476 = vrot.lane.b32.xlu0 %v1816_v50, %s2175_s28  ;;  %441 = vst.msk [vmem:[#allocation2 + $0x2c] sm:$0xf] %vm191_vm6, %v410_v43  ;;  %v513_v14 = vshrl.u32 %v1818_v53, 16  ;;  %v516_v19 = vshll.u32 %v1818_v53, 16  ;;  %v522_v21 = vshll.u32 %v1819_v18, 16  ;;  %v2542_v41 = vld [vmem:[%s2790_s1 + $0x100] sm:$0xff]   ;;  %v880_v23 = vsel %vm2260_vm5, %v2490_v48, %v2466_v60 }
  0x42   : > { %v406_v0 = vsel %vm2232_vm3, %v1803_v61, %v405_v15  ;;  %v370_v32 = vld [vmem:[%s2222_s25 + $0x18] sm:$0xe]  ;;  %v371_v35 = vld [vmem:[%s2222_s25 + $0x1c] sm:$0x1]  ;;  %v183_v42 = vld [vmem:[%s2222_s25] sm:$0xf]  ;;  %2073 = vmatprep.subr.bf16.mxu0 %v2542_v41 }
  0x43   : > { %714 = vrot.lane.b32.xlu1 %v695_v6, %s2175_s28  ;;  %440 = vst.msk [vmem:[#allocation2 + $0x18] sm:$0xf] %vm191_vm6, %v406_v0  ;;  %v515_v29 = vrot.slane %v513_v14, 4  ;;  %v518_v30 = vrot.slane %v516_v19, 5  ;;  %v524_v31 = vrot.slane %v522_v21, 5  ;;  %2038 = vmatpush3.bf16.msra.mxu1 %v2139_v24  ;;  %v1805_v36 = vrot.slane %v370_v32, 9 }
  0x44   : > { %v413_v39 = vrot.slane %v371_v35, 5  ;;  %2039 = vmatprep.subr.bf16.mxu1 %v2142_v34  ;;  %v861_v17 = vrot.slane %v860_v25, 4  ;;  %192 = vst.msk [vmem:[#allocation2] sm:$0xf] %vm191_vm6, %v183_v42  ;;  %v1820_v28 = vld [vmem:[%s2222_s25 + $0x10] sm:$0xf] }
  0x45   : > { %712 = vrot.lane.b32.xlu0 %v691_v13, %s2175_s28  ;;  %v519_v38 = vor.u32 %v518_v30, %v515_v29  ;;  %v1821_v33 = vld [vmem:[%s2222_s25 + $0x14] sm:$0x1]  ;;  %v527_v45 = vshrl.u32 %v1820_v28, 16  ;;  %v530_v46 = vshll.u32 %v1820_v28, 16  ;;  %v184_v60 = vld [vmem:[%s2222_s25 + $0x8] sm:$0xf] }
  0x46   : > { %v414_v27 = vsel %vm2232_vm3, %v1805_v36, %v413_v39  ;;  %v536_v47 = vshll.u32 %v1821_v33, 16  ;;  %v866_v50 = vsel %vm2260_vm5, %v861_v17, %v2481_v8  ;;  %193 = vst.msk [vmem:[#allocation2 + $0x14] sm:$0xf] %vm191_vm6, %v184_v60  ;;  %v186_v63 = vld [vmem:[%s2222_s25 + $0x18] sm:$0xf] }
  0x47   : > { %891 = vrot.lane.b32.xlu1 %v852_v54, %s2175_s28  ;;  %v520_v22 = vrot.slane %v519_v38, 4  ;;  %2040 = vmatpush3.bf16.msra.mxu1 %v2143_v26  ;;  %442 = vst.msk [vmem:[#allocation2 + $0x40] sm:$0xf] %vm191_vm6, %v414_v27  ;;  %v529_v51 = vrot.slane %v527_v45, 4  ;;  %v532_v56 = vrot.slane %v530_v46, 5 }
  0x48   : > { %2089 = vmatprep.subr.bf16.mxu1 %v2542_v41  ;;  %v538_v57 = vrot.slane %v536_v47, 5  ;;  %195 = vst.msk [vmem:[#allocation2 + $0x3c] sm:$0xf] %vm191_vm6, %v186_v63  ;;  %v185_v55 = vld [vmem:[%s2222_s25 + $0x10] sm:$0xf] }
  0x49   : > { %889 = vrot.lane.b32.xlu0 %v838_v20, %s2175_s28  ;;  %v525_v44 = vsel %vm2260_vm5, %v520_v22, %v524_v31  ;;  %v533_v62 = vor.u32 %v532_v56, %v529_v51  ;;  %194 = vst.msk [vmem:[#allocation2 + $0x28] sm:$0xf] %vm191_vm6, %v185_v55  ;;  %v1859_v49 = vld [vmem:[%s2222_s25 + $0x18] sm:$0xf]  ;;  %v1858_v58 = vld [vmem:[%s2222_s25 + $0x10] sm:$0xf] }
  0x4a   : > { %632 = vst.msk [vmem:[#allocation2 + $0x8] sm:$0xf] %vm191_vm6, %v525_v44  ;;  %746 = vst.msk [vmem:[#allocation2 + $0x20] sm:$0xf] %vm191_vm6, %v1859_v49  ;;  %v188_v59 = vld [vmem:[%s2222_s25 + $0x28] sm:$0xf] }
  0x4b   : > { %718 = vrot.lane.b32.xlu1 %v703_v37, %s2175_s28  ;;  %v534_v1 = vrot.slane %v533_v62, 4  ;;  %745 = vst.msk [vmem:[#allocation2 + $0xc] sm:$0xf] %vm191_vm6, %v1858_v58  ;;  %197 = vst.msk [vmem:[#allocation2 + $0x64] sm:$0xf] %vm191_vm6, %v188_v59 }
  0x4c   : > { %v187_v3 = vld [vmem:[%s2222_s25 + $0x20] sm:$0xf]  ;;  %v374_v4 = vld [vmem:[%s2222_s25 + $0x28] sm:$0xe]  ;;  %v375_v5 = vld [vmem:[%s2222_s25 + $0x2c] sm:$0x1] }
  0x4d   : > { %716 = vrot.lane.b32.xlu0 %v699_v11, %s2175_s28  ;;  %v539_v2 = vsel %vm2260_vm5, %v534_v1, %v538_v57  ;;  %196 = vst.msk [vmem:[#allocation2 + $0x50] sm:$0xf] %vm191_vm6, %v187_v3  ;;  %v1807_v6 = vrot.slane %v374_v4, 9  ;;  %v421_v8 = vrot.slane %v375_v5, 5  ;;  %v372_v9 = vld [vmem:[%s2222_s25 + $0x20] sm:$0xe] }
  0x4e   : > { %633 = vst.msk [vmem:[#allocation2 + $0x1c] sm:$0xf] %vm191_vm6, %v539_v2  ;;  %v373_v10 = vld [vmem:[%s2222_s25 + $0x24] sm:$0x1]  ;;  %v1806_v48 = vrot.slane %v372_v9, 9 }
  0x4f   : > { %895 = vrot.lane.b32.xlu1 %v880_v23, %s2175_s28  ;;  %v422_v12 = vsel %vm2232_vm3, %v1807_v6, %v421_v8  ;;  %v417_v43 = vrot.slane %v373_v10, 5  ;;  %v1824_v52 = vld [vmem:[%s2222_s25 + $0x20] sm:$0xf]  ;;  %v1825_v61 = vld [vmem:[%s2222_s25 + $0x24] sm:$0x1] }
  0x50   : > { %444 = vst.msk [vmem:[#allocation2 + $0x68] sm:$0xf] %vm191_vm6, %v422_v12  ;;  %v555_v13 = vshrl.u32 %v1824_v52, 16  ;;  %v558_v15 = vshll.u32 %v1824_v52, 16  ;;  %v1822_v16 = vld [vmem:[%s2222_s25 + $0x18] sm:$0xf] }
  0x51   : > { %893 = vrot.lane.b32.xlu0 %v866_v50, %s2175_s28  ;;  %v418_v54 = vsel %vm2232_vm3, %v1806_v48, %v417_v43  ;;  %v564_v53 = vshll.u32 %v1825_v61, 16  ;;  %v1823_v18 = vld [vmem:[%s2222_s25 + $0x1c] sm:$0x1]  ;;  %v541_v0 = vshrl.u32 %v1822_v16, 16  ;;  %v544_v14 = vshll.u32 %v1822_v16, 16 }
  0x52   : > { %443 = vst.msk [vmem:[#allocation2 + $0x54] sm:$0xf] %vm191_vm6, %v418_v54  ;;  %v557_v19 = vrot.slane %v555_v13, 4  ;;  %v560_v21 = vrot.slane %v558_v15, 5  ;;  %v550_v24 = vshll.u32 %v1823_v18, 16 }
  0x53   : > { %v1861_v20 = vld [vmem:[%s2222_s25 + $0x28] sm:$0xf]  ;;  %v543_v25 = vrot.slane %v541_v0, 4  ;;  %v546_v29 = vrot.slane %v544_v14, 5  ;;  %v1860_v30 = vld [vmem:[%s2222_s25 + $0x20] sm:$0xf] }
  0x54   : > { %748 = vst.msk [vmem:[#allocation2 + $0x48] sm:$0xf] %vm191_vm6, %v1861_v20  ;;  %v561_v31 = vor.u32 %v560_v21, %v557_v19  ;;  %v566_v32 = vrot.slane %v564_v53, 5  ;;  %v552_v34 = vrot.slane %v550_v24, 5  ;;  %747 = vst.msk [vmem:[#allocation2 + $0x34] sm:$0xf] %vm191_vm6, %v1860_v30 }
  0x55   : > { %v547_v35 = vor.u32 %v546_v29, %v543_v25  ;;  %v190_v36 = vld [vmem:[%s2222_s25 + $0x38] sm:$0xf]  ;;  %v189_v26 = vld [vmem:[%s2222_s25 + $0x30] sm:$0xf]  ;;  %v379_v39 = vld [vmem:[%s2222_s25 + $0x3c] sm:$0x1] }
  0x56   : > { %v378_v37 = vld [vmem:[%s2222_s25 + $0x38] sm:$0xe]  ;;  %v562_v38 = vrot.slane %v561_v31, 4  ;;  %199 = vst.msk [vmem:[#allocation2 + $0x8c] sm:$0xf] %vm191_vm6, %v190_v36  ;;  %v429_v22 = vrot.slane %v379_v39, 5 }
  0x57   : > { %198 = vst.msk [vmem:[#allocation2 + $0x78] sm:$0xf] %vm191_vm6, %v189_v26  ;;  %v1809_v42 = vrot.slane %v378_v37, 9  ;;  %v376_v11 = vld [vmem:[%s2222_s25 + $0x30] sm:$0xe]  ;;  %v548_v17 = vrot.slane %v547_v35, 4 }
  0x58   : > { %v377_v27 = vld [vmem:[%s2222_s25 + $0x34] sm:$0x1]  ;;  %v1808_v23 = vrot.slane %v376_v11, 9  ;;  %v567_v28 = vsel %vm2260_vm5, %v562_v38, %v566_v32  ;;  %v1828_v44 = vld [vmem:[%s2222_s25 + $0x30] sm:$0xf] }
  0x59   : > { %v425_v33 = vrot.slane %v377_v27, 5  ;;  %v1829_v45 = vld [vmem:[%s2222_s25 + $0x34] sm:$0x1]  ;;  %635 = vst.msk [vmem:[#allocation2 + $0x44] sm:$0xf] %vm191_vm6, %v567_v28  ;;  %v553_v46 = vsel %vm2260_vm5, %v548_v17, %v552_v34  ;;  %v430_v47 = vsel %vm2232_vm3, %v1809_v42, %v429_v22  ;;  %v583_v50 = vshrl.u32 %v1828_v44, 16 }
  0x5a   : > { %v586_v51 = vshll.u32 %v1828_v44, 16  ;;  %634 = vst.msk [vmem:[#allocation2 + $0x30] sm:$0xf] %vm191_vm6, %v553_v46  ;;  %446 = vst.msk [vmem:[#allocation2 + $0x90] sm:$0xf] %vm191_vm6, %v430_v47  ;;  %v592_v57 = vshll.u32 %v1829_v45, 16 }
  0x5b   : > { %v426_v56 = vsel %vm2232_vm3, %v1808_v23, %v425_v33  ;;  %v1826_v60 = vld [vmem:[%s2222_s25 + $0x28] sm:$0xf]  ;;  %v1827_v62 = vld [vmem:[%s2222_s25 + $0x2c] sm:$0x1]  ;;  %v585_v63 = vrot.slane %v583_v50, 4 }
  0x5c   : > { %445 = vst.msk [vmem:[#allocation2 + $0x7c] sm:$0xf] %vm191_vm6, %v426_v56  ;;  %v588_v1 = vrot.slane %v586_v51, 5  ;;  %v569_v55 = vshrl.u32 %v1826_v60, 16  ;;  %v572_v2 = vshll.u32 %v1826_v60, 16  ;;  %v594_v58 = vrot.slane %v592_v57, 5 }
  0x5d   : > { %v1863_v49 = vld [vmem:[%s2222_s25 + $0x38] sm:$0xf]  ;;  %v578_v59 = vshll.u32 %v1827_v62, 16  ;;  %v1862_v3 = vld [vmem:[%s2222_s25 + $0x30] sm:$0xf] }
  0x5e   : > { %750 = vst.msk [vmem:[#allocation2 + $0x70] sm:$0xf] %vm191_vm6, %v1863_v49  ;;  %v1832_v4 = vld [vmem:[%s2222_s25 + $0x40] sm:$0xf]  ;;  %v589_v5 = vor.u32 %v588_v1, %v585_v63  ;;  %v571_v6 = vrot.slane %v569_v55, 4  ;;  %v574_v8 = vrot.slane %v572_v2, 5 }
  0x5f   : > { %749 = vst.msk [vmem:[#allocation2 + $0x5c] sm:$0xf] %vm191_vm6, %v1862_v3  ;;  %v1833_v9 = vld [vmem:[%s2222_s25 + $0x44] sm:$0x1]  ;;  %v611_v10 = vshrl.u32 %v1832_v4, 16  ;;  %v580_v12 = vrot.slane %v578_v59, 5 }
  0x60   : > { %v614_v48 = vshll.u32 %v1832_v4, 16  ;;  %v620_v43 = vshll.u32 %v1833_v9, 16  ;;  %v590_v52 = vrot.slane %v589_v5, 4  ;;  %v575_v61 = vor.u32 %v574_v8, %v571_v6  ;;  %v1830_v15 = vld [vmem:[%s2222_s25 + $0x38] sm:$0xf] }
  0x61   : > { %v613_v13 = vrot.slane %v611_v10, 4  ;;  %v1831_v53 = vld [vmem:[%s2222_s25 + $0x3c] sm:$0x1]  ;;  %v597_v18 = vshrl.u32 %v1830_v15, 16  ;;  %v600_v0 = vshll.u32 %v1830_v15, 16 }
  0x62   : > { %v616_v16 = vrot.slane %v614_v48, 5  ;;  %v622_v54 = vrot.slane %v620_v43, 5  ;;  %v595_v14 = vsel %vm2260_vm5, %v590_v52, %v594_v58  ;;  %v576_v19 = vrot.slane %v575_v61, 4  ;;  %v1865_v24 = vld [vmem:[%s2222_s25 + $0x48] sm:$0xf] }
  0x63   : > { %v606_v21 = vshll.u32 %v1831_v53, 16  ;;  %v1864_v20 = vld [vmem:[%s2222_s25 + $0x40] sm:$0xf]  ;;  %637 = vst.msk [vmem:[#allocation2 + $0x6c] sm:$0xf] %vm191_vm6, %v595_v14  ;;  %v599_v29 = vrot.slane %v597_v18, 4 }
  0x64   : > { %v617_v25 = vor.u32 %v616_v16, %v613_v13  ;;  %v602_v30 = vrot.slane %v600_v0, 5  ;;  %752 = vst.msk [vmem:[#allocation2 + $0x98] sm:$0xf] %vm191_vm6, %v1865_v24  ;;  %751 = vst.msk [vmem:[#allocation2 + $0x84] sm:$0xf] %vm191_vm6, %v1864_v20  ;;  %v581_v31 = vsel %vm2260_vm5, %v576_v19, %v580_v12 }
  0x65   : > { %v608_v32 = vrot.slane %v606_v21, 5  ;;  %v1882_v34 = vld [vmem:[%s2222_s25 + $0x10] sm:$0xe]  ;;  %v1883_v35 = vld [vmem:[%s2222_s25 + $0x14] sm:$0x1] }
  0x66   : > { %636 = vst.msk [vmem:[#allocation2 + $0x58] sm:$0xf] %vm191_vm6, %v581_v31  ;;  %v618_v36 = vrot.slane %v617_v25, 4  ;;  %v603_v26 = vor.u32 %v602_v30, %v599_v29  ;;  %v1884_v37 = vld [vmem:[%s2222_s25 + $0x18] sm:$0xe]  ;;  %v1898_v39 = vrot.slane %v1882_v34, 9 }
  0x67   : > { %v1885_v38 = vld [vmem:[%s2222_s25 + $0x1c] sm:$0x1]  ;;  %v947_v42 = vrot.slane %v1883_v35, 5  ;;  %v1899_v11 = vrot.slane %v1884_v37, 9  ;;  %v1886_v22 = vld [vmem:[%s2222_s25 + $0x20] sm:$0xe] }
  0x68   : > { %v951_v17 = vrot.slane %v1885_v38, 5  ;;  %v623_v27 = vsel %vm2260_vm5, %v618_v36, %v622_v54  ;;  %v604_v23 = vrot.slane %v603_v26, 4  ;;  %v1887_v28 = vld [vmem:[%s2222_s25 + $0x24] sm:$0x1]  ;;  %v1888_v33 = vld [vmem:[%s2222_s25 + $0x28] sm:$0xe] }
  0x69   : > { %v1900_v44 = vrot.slane %v1886_v22, 9  ;;  %639 = vst.msk [vmem:[#allocation2 + $0x94] sm:$0xf] %vm191_vm6, %v623_v27  ;;  %v948_v45 = vsel %vm2232_vm3, %v1898_v39, %v947_v42  ;;  %v1889_v47 = vld [vmem:[%s2222_s25 + $0x2c] sm:$0x1]  ;;  %v955_v50 = vrot.slane %v1887_v28, 5 }
  0x6a   : > { %v952_v46 = vsel %vm2232_vm3, %v1899_v11, %v951_v17  ;;  %v1901_v51 = vrot.slane %v1888_v33, 9  ;;  %v1890_v56 = vld [vmem:[%s2222_s25 + $0x30] sm:$0xe]  ;;  %v609_v57 = vsel %vm2260_vm5, %v604_v23, %v608_v32  ;;  %985 = vst.msk [vmem:[#allocation2 + $0x10] sm:$0xf] %vm191_vm6, %v948_v45  ;;  %v959_v60 = vrot.slane %v1889_v47, 5 }
  0x6b   : > { %986 = vst.msk [vmem:[#allocation2 + $0x24] sm:$0xf] %vm191_vm6, %v952_v46  ;;  %v1891_v62 = vld [vmem:[%s2222_s25 + $0x34] sm:$0x1]  ;;  %v1892_v63 = vld [vmem:[%s2222_s25 + $0x38] sm:$0xe]  ;;  %v956_v55 = vsel %vm2232_vm3, %v1900_v44, %v955_v50 }
  0x6c   : > { %v1902_v1 = vrot.slane %v1890_v56, 9  ;;  %638 = vst.msk [vmem:[#allocation2 + $0x80] sm:$0xf] %vm191_vm6, %v609_v57  ;;  %v1893_v2 = vld [vmem:[%s2222_s25 + $0x3c] sm:$0x1]  ;;  %v963_v49 = vrot.slane %v1891_v62, 5  ;;  %v960_v59 = vsel %vm2232_vm3, %v1901_v51, %v959_v60 }
  0x6d   : > { %v1903_v40 = vrot.slane %v1892_v63, 9  ;;  %v1894_v58 = vld [vmem:[%s2222_s25 + $0x40] sm:$0xe]  ;;  %987 = vst.msk [vmem:[#allocation2 + $0x38] sm:$0xf] %vm191_vm6, %v956_v55  ;;  %v967_v3 = vrot.slane %v1893_v2, 5 }
  0x6e   : > { %v1895_v4 = vld [vmem:[%s2222_s25 + $0x44] sm:$0x1]  ;;  %v1896_v5 = vld [vmem:[%s2222_s25 + $0x48] sm:$0xe]  ;;  %v1904_v6 = vrot.slane %v1894_v58, 9  ;;  %v964_v8 = vsel %vm2232_vm3, %v1902_v1, %v963_v49  ;;  %v2156_v34 = vld [vmem:[%s2790_s1 + $0x110] sm:$0xff]  }
  0x6f   : > { %988 = vst.msk [vmem:[#allocation2 + $0x4c] sm:$0xf] %vm191_vm6, %v960_v59  ;;  %v1897_v9 = vld [vmem:[%s2222_s25 + $0x4c] sm:$0x1]  ;;  %v971_v10 = vrot.slane %v1895_v4, 5  ;;  %v1905_v12 = vrot.slane %v1896_v5, 9  ;;  %v968_v48 = vsel %vm2232_vm3, %v1903_v40, %v967_v3 }
  0x70   : > { %989 = vst.msk [vmem:[#allocation2 + $0x60] sm:$0xf] %vm191_vm6, %v964_v8  ;;  %v975_v43 = vrot.slane %v1897_v9, 5  ;;  %990 = vst.msk [vmem:[#allocation2 + $0x74] sm:$0xf] %vm191_vm6, %v968_v48  ;;  %v2152_v29 = vld [vmem:[%s2790_s1 + $0x108] sm:$0xff]  }
  0x71   : > { %v972_v52 = vsel %vm2232_vm3, %v1904_v6, %v971_v10  ;;  %v2157_v11 = vld [vmem:[%s2790_s1 + $0x118] sm:$0xff]  }
  0x72   : > { %v976_v61 = vsel %vm2232_vm3, %v1905_v12, %v975_v43  ;;  %991 = vst.msk [vmem:[#allocation2 + $0x88] sm:$0xf] %vm191_vm6, %v972_v52  ;;  %v2160_v49 = vld [vmem:[#allocation2 + $0x10] ss:$20 sps:$4 sm:$0xff]  }
  0x73   : > { %992 = vst.msk [vmem:[#allocation2 + $0x9c] sm:$0xf] %vm191_vm6, %v976_v61 }
  0x76   : > { %v2161_v5 = vld [vmem:[#allocation2 + $0x38] ss:$20 sps:$4 sm:$0xff]  }
  0x77   : > { %v2165_v12 = vld [vmem:[#allocation2 + $0x60] ss:$20 sps:$4 sm:$0xff]  }
  0x7a   : > { %v2166_v52 = vld [vmem:[#allocation2 + $0x88] ss:$20 sps:$4 sm:$0xff]  }
  0x84   : > { %v465_v13 = vpop.permute.xlu1 %464  ;;  %v469_v15 = vpop.permute.xlu0 %468 }
  0x85   : > { %488 = vst.msk [vmem:[#allocation2 + $0x4] sm:$0xf] %vm355_vm7, %v465_v13  ;;  %490 = vst.msk [vmem:[#allocation2 + $0x2c] sm:$0xf] %vm355_vm7, %v469_v15 }
  0x88   : > { %v467_v16 = vpop.permute.xlu1 %466  ;;  %v705_v54 = vpop.permute.xlu0 %704 }
  0x89   : > { %489 = vst.msk [vmem:[#allocation2 + $0x18] sm:$0xf] %vm355_vm7, %v467_v16  ;;  %728 = vst.msk [vmem:[#allocation2 + $0x8] sm:$0xf] %vm355_vm7, %v705_v54 }
  0x8c   : > { %v471_v53 = vpop.permute.xlu1 %470 }
  0x8d   : > { %491 = vst.msk [vmem:[#allocation2 + $0x40] sm:$0xf] %vm355_vm7, %v471_v53 }
  0x8f   : > { %v332_v7 = vpop.permute.xlu0 %331 }
  0x90   : > { %356 = vst.msk [vmem:[#allocation2] sm:$0xf] %vm355_vm7, %v332_v7  ;;  %v707_v18 = vpop.permute.xlu1 %706  ;;  %v2137_v25 = vld [vmem:[#allocation2 + $0x4] ss:$20 sps:$4 sm:$0xff]  }
  0x91   : > { %729 = vst.msk [vmem:[#allocation2 + $0x1c] sm:$0xf] %vm355_vm7, %v707_v18  ;;  %1450 = vmatprep.mubr.bf16.mxu0 %v2137_v25 }
  0x93   : > { %v334_v0 = vpop.permute.xlu0 %333 }
  0x94   : > { %357 = vst.msk [vmem:[#allocation2 + $0x14] sm:$0xf] %vm355_vm7, %v334_v0  ;;  %v338_v14 = vpop.permute.xlu1 %337  ;;  %v2140_v32 = vld [vmem:[#allocation2 + $0x2c] ss:$20 sps:$4 sm:$0xff]  }
  0x95   : > { %359 = vst.msk [vmem:[#allocation2 + $0x3c] sm:$0xf] %vm355_vm7, %v338_v14 }
  0x97   : > { %v336_v19 = vpop.permute.xlu0 %335 }
  0x98   : > { %358 = vst.msk [vmem:[#allocation2 + $0x28] sm:$0xf] %vm355_vm7, %v336_v19  ;;  %v884_v21 = vpop.permute.xlu1 %883  ;;  %v2144_v38 = vld [vmem:[#allocation2 + $0x8] ss:$20 sps:$4 sm:$0xff]  }
  0x99   : > { %906 = vst.msk [vmem:[#allocation2 + $0x20] sm:$0xf] %vm355_vm7, %v884_v21 }
  0x9b   : > { %v882_v24 = vpop.permute.xlu0 %881  ;;  %v2135_v20 = vld [vmem:[#allocation2] ss:$20 sps:$4 sm:$0xff]  }
  0x9c   : > { %905 = vst.msk [vmem:[#allocation2 + $0xc] sm:$0xf] %vm355_vm7, %v882_v24  ;;  %1451 = vmatmul.mubr.bf16.vlgmr.msra.gmra.mrb[0].mxu0 %v2135_v20  ;;  %v1002_v26 = vld [vmem:[#allocation2 + $0x3c] sm:$0xff] }
  0x9d   : > { %v342_v30 = vpop.permute.xlu1 %341  ;;  %2074 = vmatpush3.bf16.msra.mxu0 %v2542_v41  ;;  %1458 = vmatprep.mubr.bf16.mxu0 %v2140_v32 }
  0x9e   : > { %361 = vst.msk [vmem:[#allocation2 + $0x64] sm:$0xf] %vm355_vm7, %v342_v30  ;;  %2075 = vmatprep.subr.bf16.mxu0 %v2152_v29 }
  0x9f   : > { %v340_v31 = vpop.permute.xlu0 %339  ;;  %v999_v36 = vld [vmem:[#allocation2 + $0x28] sm:$0xff] }
  0xa0   : > { %360 = vst.msk [vmem:[#allocation2 + $0x50] sm:$0xf] %vm355_vm7, %v340_v31  ;;  %v1911_v42 = vcombine.low %v999_v36, %v1002_v26 }
  0xa1   : > { %v475_v35 = vpop.permute.xlu1 %474  ;;  %2076 = vmatpush3.bf16.msra.mxu0 %v2152_v29 }
  0xa2   : > { %493 = vst.msk [vmem:[#allocation2 + $0x68] sm:$0xf] %vm355_vm7, %v475_v35  ;;  %2077 = vmatprep.subr.bf16.mxu0 %v2156_v34 }
  0xa3   : > { %v473_v37 = vpop.permute.xlu0 %472  ;;  %v2146_v39 = vld [vmem:[#allocation2 + $0xc] ss:$20 sps:$4 sm:$0xff]  }
  0xa4   : > { %492 = vst.msk [vmem:[#allocation2 + $0x54] sm:$0xf] %vm355_vm7, %v473_v37  ;;  %1515 = vmatprep.mubr.bf16.mxu1 %v2146_v39  ;;  %1459 = vmatmul.mubr.bf16.gmra.mrb[4].mxu0 %v1911_v42 }
  0xa5   : > { %v711_v17 = vpop.permute.xlu1 %710  ;;  %1516 = vmatmul.mubr.bf16.vlgmr.msra.gmra.mrb[0].mxu1 %v2144_v38  ;;  %2078 = vmatpush3.bf16.msra.mxu0 %v2156_v34 }
  0xa6   : > { %731 = vst.msk [vmem:[#allocation2 + $0x44] sm:$0xf] %vm355_vm7, %v711_v17  ;;  %2093 = vmatpush3.bf16.msra.mxu1 %v2542_v41  ;;  %2079 = vmatprep.subr.bf16.mxu0 %v2157_v11 }
  0xa7   : > { %v709_v22 = vpop.permute.xlu0 %708  ;;  %2090 = vmatprep.subr.bf16.mxu1 %v2152_v29 }
  0xa8   : > { %730 = vst.msk [vmem:[#allocation2 + $0x30] sm:$0xf] %vm355_vm7, %v709_v22 }
  0xa9   : > { %v888_v27 = vpop.permute.xlu1 %887  ;;  %v1008_v23 = vld [vmem:[#allocation2 + $0x64] sm:$0xff]  ;;  %2080 = vmatpush3.bf16.msra.mxu0 %v2157_v11 }
  0xaa   : > { %908 = vst.msk [vmem:[#allocation2 + $0x48] sm:$0xf] %vm355_vm7, %v888_v27  ;;  %2094 = vmatpush3.bf16.msra.mxu1 %v2152_v29 }
  0xab   : > { %v886_v28 = vpop.permute.xlu0 %885  ;;  %v1005_v33 = vld [vmem:[#allocation2 + $0x50] sm:$0xff]  ;;  %2091 = vmatprep.subr.bf16.mxu1 %v2156_v34 }
  0xac   : > { %v2148_v44 = vld [vmem:[#allocation2 + $0x54] ss:$20 sps:$4 sm:$0xff]   ;;  %907 = vst.msk [vmem:[#allocation2 + $0x34] sm:$0xf] %vm355_vm7, %v886_v28  ;;  %v1916_v45 = vcombine.low %v1005_v33, %v1008_v23 }
  0xad   : > { %v346_v46 = vpop.permute.xlu1 %345  ;;  %1466 = vmatprep.mubr.bf16.mxu0 %v2148_v44 }
  0xae   : > { %363 = vst.msk [vmem:[#allocation2 + $0x8c] sm:$0xf] %vm355_vm7, %v346_v46  ;;  %1467 = vmatmul.mubr.bf16.gmra.mrb[8].mxu0 %v1916_v45  ;;  %2095 = vmatpush3.bf16.msra.mxu1 %v2156_v34 }
  0xaf   : > { %v344_v41 = vpop.permute.xlu0 %343  ;;  %2092 = vmatprep.subr.bf16.mxu1 %v2157_v11  ;;  %v2153_v56 = vld [vmem:[#allocation2 + $0x30] ss:$20 sps:$4 sm:$0xff]  }
  0xb0   : > { %362 = vst.msk [vmem:[#allocation2 + $0x78] sm:$0xf] %vm355_vm7, %v344_v41 }
  0xb1   : > { %v479_v47 = vpop.permute.xlu1 %478 }
  0xb2   : > { %495 = vst.msk [vmem:[#allocation2 + $0x90] sm:$0xf] %vm355_vm7, %v479_v47  ;;  %2096 = vmatpush3.bf16.msra.mxu1 %v2157_v11 }
  0xb3   : > { %v477_v50 = vpop.permute.xlu0 %476  ;;  %v2150_v51 = vld [vmem:[#allocation2 + $0x34] ss:$20 sps:$4 sm:$0xff]  }
  0xb4   : > { %494 = vst.msk [vmem:[#allocation2 + $0x7c] sm:$0xf] %vm355_vm7, %v477_v50  ;;  %1523 = vmatprep.mubr.bf16.mxu1 %v2150_v51 }
  0xb5   : > { %v715_v57 = vpop.permute.xlu1 %714  ;;  %1524 = vmatmul.mubr.bf16.gmra.mrb[4].mxu1 %v2153_v56 }
  0xb6   : > { %733 = vst.msk [vmem:[#allocation2 + $0x6c] sm:$0xf] %vm355_vm7, %v715_v57 }
  0xb7   : > { %v713_v60 = vpop.permute.xlu0 %712 }
  0xb8   : > { %732 = vst.msk [vmem:[#allocation2 + $0x58] sm:$0xf] %vm355_vm7, %v713_v60 }
  0xb9   : > { %v892_v62 = vpop.permute.xlu1 %891  ;;  %v1014_v63 = vld [vmem:[#allocation2 + $0x8c] sm:$0xff] }
  0xba   : > { %910 = vst.msk [vmem:[#allocation2 + $0x70] sm:$0xf] %vm355_vm7, %v892_v62 }
  0xbb   : > { %v890_v1 = vpop.permute.xlu0 %889  ;;  %v1011_v55 = vld [vmem:[#allocation2 + $0x78] sm:$0xff] }
  0xbc   : > { %v2154_v2 = vld [vmem:[#allocation2 + $0x7c] ss:$20 sps:$4 sm:$0xff]   ;;  %909 = vst.msk [vmem:[#allocation2 + $0x5c] sm:$0xf] %vm355_vm7, %v890_v1  ;;  %v1921_v40 = vcombine.low %v1011_v55, %v1014_v63 }
  0xbd   : > { %v719_v58 = vpop.permute.xlu1 %718  ;;  %1474 = vmatprep.mubr.bf16.mxu0 %v2154_v2 }
  0xbe   : > { %735 = vst.msk [vmem:[#allocation2 + $0x94] sm:$0xf] %vm355_vm7, %v719_v58  ;;  %1475 = vmatmul.mubr.bf16.gmra.mrb[12].mxu0 %v1921_v40 }
  0xbf   : > { %v717_v59 = vpop.permute.xlu0 %716  ;;  %2081 = vmatprep.mubr.msk.bf16.mxu0 %vm1405_vm8, %v2160_v49 }
  0xc0   : > { %734 = vst.msk [vmem:[#allocation2 + $0x80] sm:$0xf] %vm355_vm7, %v717_v59 }
  0xc1   : > { %v896_v3 = vpop.permute.xlu1 %895  ;;  %v1009_v4 = vld [vmem:[#allocation2 + $0x6c] sm:$0xff] }
  0xc2   : > { %912 = vst.msk [vmem:[#allocation2 + $0x98] sm:$0xf] %vm355_vm7, %v896_v3 }
  0xc3   : > { %v894_v6 = vpop.permute.xlu0 %893  ;;  %v1006_v8 = vld [vmem:[#allocation2 + $0x58] sm:$0xff] }
  0xc4   : > { %v2158_v9 = vld [vmem:[#allocation2 + $0x5c] ss:$20 sps:$4 sm:$0xff]   ;;  %911 = vst.msk [vmem:[#allocation2 + $0x84] sm:$0xf] %vm355_vm7, %v894_v6  ;;  %v1918_v10 = vcombine.low %v1006_v8, %v1009_v4 }
  0xc5   : > { %1531 = vmatprep.mubr.bf16.mxu1 %v2158_v9 }
  0xc6   : > { %1532 = vmatmul.mubr.bf16.gmra.mrb[8].mxu1 %v1918_v10  ;;  %2082 = vmatmul.mubr.msk.bf16.vlgmr.msra.gmra.mrb[16].mxu0 %vm1405_vm8, %v2161_v5 }
  0xc7   : > { %v2164_v43 = vld [vmem:[#allocation2 + $0x80] ss:$20 sps:$4 sm:$0xff]  }
  0xcb   : > { %v2162_v48 = vld [vmem:[#allocation2 + $0x84] ss:$20 sps:$4 sm:$0xff]  }
  0xcc   : > { %1539 = vmatprep.mubr.bf16.mxu1 %v2162_v48 }
  0xce   : > { %1540 = vmatmul.mubr.bf16.gmra.mrb[12].mxu1 %v2164_v43 }
  0xcf   : > { %2085 = vmatprep.mubr.msk.bf16.mxu1 %vm1405_vm8, %v2165_v12 }
  0xd6   : > { %2086 = vmatmul.mubr.msk.bf16.vlgmr.msra.gmra.mrb[16].mxu1 %vm1405_vm8, %v2166_v52 }
 0x16f   : > { %v2001_v61 = vpop.f32.mrb[0].mxu0 }
 0x170   : > { %v2002_v13 = vpop.f32.mrb[1].mxu0 }
 0x171   : > { %v2003_v15 = vadd.f32 %v2002_v13, %v2001_v61  ;;  %v2004_v16 = vpop.f32.mrb[2].mxu0 }
 0x172   : > { %v2005_v54 = vpop.f32.mrb[3].mxu0 }
 0x173   : > { %v2006_v53 = vadd.f32 %v2005_v54, %v2004_v16 }
 0x177   : > { %v2007_v7 = vpop.f32.mrb[4].mxu0 }
 0x178   : > { %v2041_v18 = vpop.f32.mrb[0].mxu1  ;;  %v2008_v0 = vpop.f32.mrb[5].mxu0 }
 0x179   : > { %v2042_v14 = vpop.f32.mrb[1].mxu1  ;;  %v2009_v19 = vadd.f32 %v2008_v0, %v2007_v7  ;;  %v2010_v24 = vpop.f32.mrb[6].mxu0 }
 0x17a   : > { %v2043_v21 = vadd.f32 %v2042_v14, %v2041_v18  ;;  %v2044_v20 = vpop.f32.mrb[2].mxu1  ;;  %v2011_v25 = vpop.f32.mrb[7].mxu0 }
 0x17b   : > { %v2045_v29 = vpop.f32.mrb[3].mxu1  ;;  %v2012_v30 = vadd.f32 %v2011_v25, %v2010_v24 }
 0x17c   : > { %v2046_v31 = vadd.f32 %v2045_v29, %v2044_v20  ;;  %v1518_v32 = vadd.f32 %v2043_v21, %v2003_v15 }
 0x17e   : > { %v1521_v34 = vadd.f32 %v2046_v31, %v2006_v53 }
 0x181   : > { %v2013_v35 = vpop.f32.mrb[8].mxu0 }
 0x182   : > { %v2014_v36 = vpop.f32.mrb[9].mxu0 }
 0x183   : > { %v2015_v26 = vadd.f32 %v2014_v36, %v2013_v35  ;;  %v2016_v37 = vpop.f32.mrb[10].mxu0 }
 0x184   : > { %v2017_v38 = vpop.f32.mrb[11].mxu0 }
 0x185   : > { %v2018_v39 = vadd.f32 %v2017_v38, %v2016_v37 }
 0x188   : > { %v2047_v42 = vpop.f32.mrb[4].mxu1 }
 0x189   : > { %v2048_v11 = vpop.f32.mrb[5].mxu1 }
 0x18a   : > { %v2049_v17 = vadd.f32 %v2048_v11, %v2047_v42  ;;  %v2050_v22 = vpop.f32.mrb[6].mxu1 }
 0x18b   : > { %v2051_v27 = vpop.f32.mrb[7].mxu1 }
 0x18c   : > { %v2052_v23 = vadd.f32 %v2051_v27, %v2050_v22  ;;  %v1526_v28 = vadd.f32 %v2049_v17, %v2009_v19 }
 0x18e   : > { %v1529_v33 = vadd.f32 %v2052_v23, %v2012_v30 }
 0x191   : > { %v2019_v44 = vpop.f32.mrb[12].mxu0 }
 0x192   : > { %v2020_v45 = vpop.f32.mrb[13].mxu0 }
 0x193   : > { %v2021_v46 = vadd.f32 %v2020_v45, %v2019_v44  ;;  %v2022_v41 = vpop.f32.mrb[14].mxu0 }
 0x194   : > { %v2023_v47 = vpop.f32.mrb[15].mxu0 }
 0x195   : > { %v2024_v50 = vadd.f32 %v2023_v47, %v2022_v41 }
 0x199   : > { %v2053_v51 = vpop.f32.mrb[8].mxu1  ;;  %v2083_v56 = vpop.f32.mrb[16].mxu0 }
 0x19a   : > { %v1591_v57 = vadd.f32 %v2083_v56, %v1526_v28  ;;  %v2054_v60 = vpop.f32.mrb[9].mxu1  ;;  %v1582_v62 = vpop.f32.mrb[17].mxu0 }
 0x19b   : > { %v2055_v63 = vadd.f32 %v2054_v60, %v2053_v51  ;;  %v1583_v1 = vadd.f32 %v1582_v62, %v1518_v32  ;;  %v2056_v55 = vpop.f32.mrb[10].mxu1  ;;  %v2084_v2 = vpop.f32.mrb[18].mxu0 }
 0x19c   : > { %v1979_v49 = vpack.c.bf16 %v1591_v57, %v1591_v57  ;;  %v1594_v40 = vadd.f32 %v2084_v2, %v1529_v33  ;;  %v2057_v58 = vpop.f32.mrb[11].mxu1  ;;  %v1585_v59 = vpop.f32.mrb[19].mxu0  ;;  %v1636_v12 = vmul.f32 %v1591_v57, %v1591_v57  ;;  %v1616_v15 = vsel %vm1405_vm8, %v1591_v57, 0.0 }
 0x19d   : > { %v1977_v3 = vpack.c.bf16 %v1583_v1, %v1583_v1  ;;  %v2058_v4 = vadd.f32 %v2057_v58, %v2056_v55  ;;  %v1634_v6 = vmul.f32 %v1583_v1, %v1583_v1  ;;  %v1586_v8 = vadd.f32 %v1585_v59, %v1521_v34 }
 0x19e   : > { %1701 = vst.msk [vmem:[%s2748_s21 + $0x8] sm:$0xf] %vm191_vm6, %v1979_v49  ;;  %v1980_v5 = vpack.c.bf16 %v1594_v40, %v1594_v40  ;;  %v1534_v9 = vadd.f32 %v2055_v63, %v2015_v26  ;;  %v1613_v48 = vsel %vm1405_vm8, %v1583_v1, 0.0  ;;  %v1637_v7 = vmul.f32 %v1594_v40, %v1594_v40 }
 0x19f   : > { %1699 = vst.msk [vmem:[%s2748_s21] sm:$0xf] %vm191_vm6, %v1977_v3  ;;  %v1537_v10 = vadd.f32 %v2058_v4, %v2018_v39  ;;  %v1614_v43 = vsel %vm1405_vm8, %v1586_v8, 0.0  ;;  %v1635_v52 = vmul.f32 %v1586_v8, %v1586_v8  ;;  %v1978_v61 = vpack.c.bf16 %v1586_v8, %v1586_v8 }
 0x1a0   : > { %1702 = vst.msk [vmem:[%s2748_s21 + $0xc] sm:$0xf] %vm191_vm6, %v1980_v5  ;;  %v1615_v16 = vadd.f32 %v1614_v43, %v1613_v48  ;;  %v1642_v53 = vsel %vm1405_vm8, %v1634_v6, 0.0  ;;  %v1645_v20 = vsel %vm1405_vm8, %v1636_v12, 0.0  ;;  %v1618_v25 = vsel %vm1405_vm8, %v1594_v40, 0.0 }
 0x1a1   : > { %v2059_v13 = vpop.f32.mrb[12].mxu1  ;;  %v1643_v18 = vsel %vm1405_vm8, %v1635_v52, 0.0  ;;  %1700 = vst.msk [vmem:[%s2748_s21 + $0x4] sm:$0xf] %vm191_vm6, %v1978_v61  ;;  %v1647_v34 = vsel %vm1405_vm8, %v1637_v7, 0.0 }
 0x1a2   : > { %v2060_v54 = vpop.f32.mrb[13].mxu1  ;;  %v1617_v19 = vadd.f32 %v1616_v15, %v1615_v16  ;;  %v1644_v21 = vadd.f32 %v1643_v18, %v1642_v53 }
 0x1a3   : > { %v2061_v0 = vadd.f32 %v2060_v54, %v2059_v13  ;;  %v2062_v14 = vpop.f32.mrb[14].mxu1 }
 0x1a4   : > { %v2063_v24 = vpop.f32.mrb[15].mxu1  ;;  %v1646_v31 = vadd.f32 %v1645_v20, %v1644_v21  ;;  %v1619_v32 = vadd.f32 %v1618_v25, %v1617_v19 }
 0x1a5   : > { %v2064_v29 = vadd.f32 %v2063_v24, %v2062_v14  ;;  %v1542_v30 = vadd.f32 %v2061_v0, %v2021_v46 }
 0x1a6   : > { %v1648_v36 = vadd.f32 %v1647_v34, %v1646_v31 }
 0x1a7   : > { %v1545_v35 = vadd.f32 %v2064_v29, %v2024_v50 }
 0x1a9   : > { %v2087_v26 = vpop.f32.mrb[16].mxu1 }
 0x1aa   : > { %v1607_v37 = vadd.f32 %v2087_v26, %v1542_v30  ;;  %v1598_v38 = vpop.f32.mrb[17].mxu1 }
 0x1ab   : > { %v1599_v39 = vadd.f32 %v1598_v38, %v1534_v9  ;;  %v2088_v42 = vpop.f32.mrb[18].mxu1 }
 0x1ac   : > { %v1983_v11 = vpack.c.bf16 %v1607_v37, %v1607_v37  ;;  %v1610_v17 = vadd.f32 %v2088_v42, %v1545_v35  ;;  %v1601_v22 = vpop.f32.mrb[19].mxu1  ;;  %v1640_v44 = vmul.f32 %v1607_v37, %v1607_v37  ;;  %v1624_v60 = vsel %vm1405_vm8, %v1607_v37, 0.0 }
 0x1ad   : > { %v1620_v27 = vsel %vm1405_vm8, %v1599_v39, 0.0  ;;  %v1638_v23 = vmul.f32 %v1599_v39, %v1599_v39  ;;  %v1981_v28 = vpack.c.bf16 %v1599_v39, %v1599_v39  ;;  %v1602_v33 = vadd.f32 %v1601_v22, %v1537_v10 }
 0x1ae   : > { %1705 = vst.msk [vmem:[%s2748_s21 + $0x18] sm:$0xf] %vm191_vm6, %v1983_v11  ;;  %v1621_v45 = vadd.f32 %v1620_v27, %v1619_v32  ;;  %v1984_v41 = vpack.c.bf16 %v1610_v17, %v1610_v17  ;;  %v1641_v62 = vmul.f32 %v1610_v17, %v1610_v17  ;;  %v1653_v2 = vsel %vm1405_vm8, %v1640_v44, 0.0 }
 0x1af   : > { %v1649_v46 = vsel %vm1405_vm8, %v1638_v23, 0.0  ;;  %1703 = vst.msk [vmem:[%s2748_s21 + $0x10] sm:$0xf] %vm191_vm6, %v1981_v28  ;;  %v1622_v47 = vsel %vm1405_vm8, %v1602_v33, 0.0  ;;  %v1639_v50 = vmul.f32 %v1602_v33, %v1602_v33  ;;  %v1982_v57 = vpack.c.bf16 %v1602_v33, %v1602_v33 }
 0x1b0   : > { %v1650_v51 = vadd.f32 %v1649_v46, %v1648_v36  ;;  %v1623_v56 = vadd.f32 %v1622_v47, %v1621_v45  ;;  %1706 = vst.msk [vmem:[%s2748_s21 + $0x1c] sm:$0xf] %vm191_vm6, %v1984_v41  ;;  %v1626_v49 = vsel %vm1405_vm8, %v1610_v17, 0.0  ;;  %v1655_v59 = vsel %vm1405_vm8, %v1641_v62, 0.0 }
 0x1b1   : > { %v1651_v63 = vsel %vm1405_vm8, %v1639_v50, 0.0  ;;  %1704 = vst.msk [vmem:[%s2748_s21 + $0x14] sm:$0xf] %vm191_vm6, %v1982_v57 }
 0x1b2   : > { %v1625_v1 = vadd.f32 %v1624_v60, %v1623_v56  ;;  %v1652_v55 = vadd.f32 %v1651_v63, %v1650_v51 }
 0x1b4   : > { %v1627_v40 = vadd.f32 %v1626_v49, %v1625_v1  ;;  %v1654_v58 = vadd.f32 %v1653_v2, %v1652_v55 }
 0x1b6   : > { %v1628_v3 = vrot.slane %v1627_v40, 4  ;;  %v1656_v4 = vadd.f32 %v1655_v59, %v1654_v58 }
 0x1b8   : > { %v1629_v5 = vadd.f32 %v1628_v3, %v1627_v40  ;;  %v1657_v6 = vrot.slane %v1656_v4, 4 }
 0x1ba   : > { %v1630_v8 = vrot.slane %v1629_v5, 2  ;;  %v1658_v9 = vadd.f32 %v1657_v6, %v1656_v4 }
 0x1bc   : > { %v1631_v10 = vadd.f32 %v1630_v8, %v1629_v5  ;;  %v1659_v12 = vrot.slane %v1658_v9, 2 }
 0x1be   : > { %v1632_v48 = vrot.slane %v1631_v10, 1  ;;  %v1660_v43 = vadd.f32 %v1659_v12, %v1658_v9 }
 0x1c0   : > { %v1661_v52 = vrot.slane %v1660_v43, 1  ;;  %v1633_v61 = vadd.f32 %v1632_v48, %v1631_v10 }
 0x1c2   : > { %v1662_v13 = vadd.f32 %v1661_v52, %v1660_v43 }
 0x1c4   : > { %v1664_v15 = vsel %vm1663_vm9, %v1633_v61, %v1662_v13 }
 0x1c5   : > { %1666 = vst.msk [vmem:[%s181_s26] sm:$0x3] %vm1665_vm10, %v1664_v15 }
 0x1c6 PF: > { %s14_s12 = sadd.s32 1, %s2173_s12  }
 0x1c7   : > { %p11_p4 = scmp.ge.s32.totalorder %s14_s12, 4  }
 0x1c9   :  { %13 = sbr.rel (!%p11_p4) target bundleno = 1 (0x1), region = 72 }

// kernel: convnet_forward.12
= control target key start
LH: loop header
LB: loop body
LE: loop exit
PB: predicated region body
PF: predicated region fallthrough
CT: control target
= control target key end

     0   :  { %s1672_s12 = smov 0   ;;  %s1951_s0 = inlined_call_operand.vmem [shape: bf16[2,6,6,64], index: 0, kind: input, shape index: {}]   ;;  %s1952_s1 = inlined_call_operand.vmem [shape: bf16[576,64], index: 1, kind: input, shape index: {}]   ;;  %s1953_s2 = inlined_call_operand.vmem [shape: bf16[2,16,64], index: 2, kind: output, shape index: {0}]   ;;  %s1954_s3 = inlined_call_operand.vmem [shape: f32[2,2,64], index: 3, kind: output, shape index: {1}]  }
   0x1 LB: > { %s1405_s13 = sadd.s32 4294967295, %s1646_s12   ;;  %p1409_p0 = scmp.ge.s32.totalorder %s1646_s12, 1  ;;  %s1646_s12 = sphi %s1672_s12, %s14_s12  }
   0x2   : > { %p140_p1 = scmp.lt.s32.totalorder %s1646_s12, 3 }
   0x4   : > { %p141_p2 = pnand %p1409_p0, %p140_p1 }
   0x5   : > { %p168_p3 = scmp.lt.s32.totalorder (!%p141_p2), %s1405_s13, 1  ;;  %vm352_vm0 = vcmask (!%p141_p2), 1040384   ;;  %vm353_vm1 = vcmask (!%p141_p2), 1042434   ;;  %vm355_vm2 = vcmask (!%p141_p2), 1044484   ;;  %vm357_vm3 = vcmask (!%p141_p2), 1046534   ;;  %v1596_v0 = vld [vmem:[%s1952_s1 + $0x40] sm:$0xff] (!%p141_p2)  }
   0x6   : > { %144 = sbr.rel (%p141_p2) target bundleno = 422 (0x1a6), region = 28  ;;  %vm232_vm4 = vsmask.f32 (!%p141_p2), 1280  ;;  %vm233_vm5 = vsmask.f32 (!%p141_p2), 3336  ;;  %v1597_v1 = vld [vmem:[%s1952_s1] sm:$0xff] (!%p141_p2)   ;;  %vm354_vm6 = vmor (!%p141_p2), %vm352_vm0, %vm353_vm1  ;;  %1522 = vmatprep.subr.bf16.mxu0 (!%p141_p2), %v1596_v0 }
   0x7   : > { %vm235_vm7 = vsmask.f32 (!%p141_p2), 5392  ;;  %vm187_vm8 = vcmask (!%p141_p2), 517120   ;;  %v1598_v3 = vld [vmem:[%s1952_s1 + $0xc0] sm:$0xff] (!%p141_p2)   ;;  %s1648_s24 = smov (!%p141_p2), 64   ;;  %1523 = vmatpush3.bf16.msra.mxu0 (!%p141_p2), %v1597_v1  ;;  %vm356_vm10 = vmor (!%p141_p2), %vm354_vm6, %vm355_vm2  ;;  %v1600_v18 = vld [vmem:[%s1952_s1 + $0x48] sm:$0xff] (!%p141_p2)  }
   0x8   : > { %vm237_vm9 = vsmask.f32 (!%p141_p2), 7448  ;;  %1544 = vmatprep.subr.bf16.mxu1 (!%p141_p2), %v1598_v3  ;;  %v1599_v9 = vld [vmem:[%s1952_s1 + $0x80] sm:$0xff] (!%p141_p2)   ;;  %vm1713_vm11 = vmor (!%p141_p2), %vm356_vm10, %vm357_vm3  ;;  %v1601_v24 = vld [vmem:[%s1952_s1 + $0x8] sm:$0xff] (!%p141_p2)   ;;  %1524 = vmatprep.subr.bf16.mxu0 (!%p141_p2), %v1600_v18  ;;  %vm307_vm15 = vcmask (!%p141_p2), 1041920   ;;  %vm1651_vm1 = vmmov (!%p141_p2), 0  }
   0x9   : > { %vm1722_vm12 = vmor (!%p141_p2), %vm232_vm4, %vm233_vm5  ;;  %1545 = vmatpush3.bf16.msra.mxu1 (!%p141_p2), %v1599_v9  ;;  %v1602_v27 = vld [vmem:[%s1952_s1 + $0xc8] sm:$0xff] (!%p141_p2)   ;;  %v1604_v53 = vld [vmem:[%s1952_s1 + $0x50] sm:$0xff] (!%p141_p2)   ;;  %vm1158_vm2 = vcmask (!%p141_p2), 523264   ;;  %vm1316_vm3 = vcmask (!%p141_p2), 519168  }
   0xa   : > { %vm1743_vm13 = vmor (!%p141_p2), %vm1722_vm12, %vm235_vm7  ;;  %v1603_v33 = vld [vmem:[%s1952_s1 + $0x88] sm:$0xff] (!%p141_p2)   ;;  %1546 = vmatprep.subr.bf16.mxu1 (!%p141_p2), %v1602_v27  ;;  %v1605_v58 = vld [vmem:[%s1952_s1 + $0x10] sm:$0xff] (!%p141_p2)  }
   0xb   : > { %1525 = vmatpush3.bf16.msra.mxu0 (!%p141_p2), %v1601_v24  ;;  %vm1762_vm14 = vmor (!%p141_p2), %vm1743_vm13, %vm237_vm9  ;;  %v1606_v63 = vld [vmem:[%s1952_s1 + $0xd0] sm:$0xff] (!%p141_p2)   ;;  %v1612_v44 = vld [vmem:[%s1952_s1 + $0x60] sm:$0xff] (!%p141_p2)  }
   0xc   : > { %1526 = vmatprep.subr.bf16.mxu0 (!%p141_p2), %v1604_v53  ;;  %v1610_v53 = vld [vmem:[%s1952_s1 + $0xd8] sm:$0xff] (!%p141_p2)  }
   0xd   : > { %s1964_s13 = smov (!%p168_p3, %s1405_s13), 1  ;;  %1547 = vmatpush3.bf16.msra.mxu1 %v1603_v33 }
   0xe   : > { %s1583_s14 = smul.u32 24, %s1964_s13  ;;  %1548 = vmatprep.subr.bf16.mxu1 %v1606_v63  ;;  %v1615_v63 = vld [vmem:[%s1952_s1 + $0xa0] sm:$0xff]   ;;  %s1519_s17 = sshll.u32 %s1964_s13, 3 }
   0xf   : > { %1527 = vmatpush3.bf16.msra.mxu0 %v1605_v58  ;;  %v1611_v58 = vld [vmem:[%s1952_s1 + $0x98] sm:$0xff]   ;;  %s177_s20 = scalar_lea.vmem %s1953_s2, %s1519_s17  ;;  %s1413_s22 = sshll.u32 %s1964_s13, 1 }
  0x10   : > { %s1692_s21 = scalar_lea.vmem %s1951_s0, %s1583_s14  ;;  %s181_s26 = scalar_lea.vmem %s1954_s3, %s1413_s22 }
  0x11   : > { %v1431_v2 = vld.sshfl [vmem:[%s1692_s21 + $0x8] sm:$0x3 pattern:$0x76325410]  ;;  %v183_v23 = vld [vmem:[%s1692_s21] sm:$0x3] }
  0x12   : > { %422 = vrot.lane.b32.xlu1 %v1431_v2, %s1648_s24  ;;  %v1430_v4 = vld.sshfl [vmem:[%s1692_s21 + $0x4] sm:$0x3 pattern:$0x76325410]  ;;  %v185_v6 = vld [vmem:[%s1692_s21 + $0x8] sm:$0x3] }
  0x13   : > { %420 = vrot.lane.b32.xlu0 %v1430_v4, %s1648_s24  ;;  %v1433_v5 = vld.sshfl [vmem:[%s1692_s21 + $0x10] sm:$0x3 pattern:$0x76325410]  ;;  %190 = vst.msk [vmem:[#allocation2 + $0x14] sm:$0x3] %vm187_vm8, %v185_v6 }
  0x14   : > { %v1432_v7 = vld.sshfl [vmem:[%s1692_s21 + $0xc] sm:$0x3 pattern:$0x76325410]  ;;  %188 = vst.msk [vmem:[#allocation2] sm:$0x3] %vm187_vm8, %v183_v23 }
  0x15   : > { %v1447_v8 = vld.sshfl [vmem:[%s1692_s21 + $0x8] sm:$0x12 pattern:$0x76325410]  ;;  %v186_v33 = vld [vmem:[%s1692_s21 + $0xc] sm:$0x3] }
  0x16   : > { %426 = vrot.lane.b32.xlu1 %v1433_v5, %s1648_s24  ;;  %v563_v11 = vcombine.high %v1447_v8, %v1447_v8  ;;  %v1451_v12 = vrot.slane %v1447_v8, 9  ;;  %v1446_v13 = vld.sshfl [vmem:[%s1692_s21 + $0x4] sm:$0x12 pattern:$0x76325410]  ;;  %v1607_v8 = vld [vmem:[%s1952_s1 + $0x90] sm:$0xff]  }
  0x17   : > { %424 = vrot.lane.b32.xlu0 %v1432_v7, %s1648_s24  ;;  %v555_v14 = vcombine.high %v1446_v13, %v1446_v13  ;;  %v1450_v15 = vrot.slane %v1446_v13, 9  ;;  %v1416_v16 = vld.sshfl [vmem:[%s1692_s21 + $0x8] sm:$0x13 pattern:$0x76325410]  ;;  %v1608_v13 = vld [vmem:[%s1952_s1 + $0x58] sm:$0xff]   ;;  %1549 = vmatpush3.bf16.msra.mxu1 %v1607_v8 }
  0x18   : > { %v586_v19 = vrot.slane %v563_v11, 7  ;;  %v223_v20 = vcombine.high %v1416_v16, %v1416_v16  ;;  %v268_v21 = vshrl.u32 %v1416_v16, 16  ;;  %v271_v22 = vshll.u32 %v1416_v16, 16  ;;  %1528 = vmatprep.subr.bf16.mxu0 %v1608_v13  ;;  %191 = vst.msk [vmem:[#allocation2 + $0x1e] sm:$0x3] %vm187_vm8, %v186_v33  ;;  %1550 = vmatprep.subr.bf16.mxu1 %v1610_v53  ;;  %v1624_v8 = vld [vmem:[%s1952_s1 + $0x78] sm:$0xff]  }
  0x19   : > { %v582_v25 = vrot.slane %v555_v14, 7  ;;  %v1414_v26 = vld.sshfl [vmem:[%s1692_s21] sm:$0x13 pattern:$0x76325410]  ;;  %v1649_v13 = vmov 0.0  }
  0x1a   : > { %v587_v28 = vsel %vm1713_vm11, %v1451_v12, %v586_v19  ;;  %v270_v30 = vrot.slane %v268_v21, 6  ;;  %v273_v31 = vrot.slane %v271_v22, 7  ;;  %v277_v32 = vshll.u32 %v223_v20, 16  ;;  %v1634_v53 = vld [vmem:[%s1952_s1 + $0x100] sm:$0xff]  }
  0x1b   : > { %598 = vrot.lane.b32.xlu1 %v587_v28, %s1648_s24  ;;  %v583_v34 = vsel %vm1713_vm11, %v1450_v15, %v582_v25  ;;  %v207_v35 = vcombine.high %v1414_v26, %v1414_v26  ;;  %v240_v36 = vshrl.u32 %v1414_v26, 16  ;;  %v243_v37 = vshll.u32 %v1414_v26, 16  ;;  %v1417_v38 = vld.sshfl [vmem:[%s1692_s21 + $0xc] sm:$0x13 pattern:$0x76325410]  ;;  %1551 = vmatpush3.bf16.msra.mxu1 %v1611_v58 }
  0x1c   : > { %381 = vst.msk [vmem:[#allocation2 + $0x16] sm:$0x3] %vm187_vm8, %v587_v28  ;;  %793 = vst.msk [vmem:[#allocation2 + $0x8] sm:$0x3] %vm187_vm8, %v587_v28  ;;  %596 = vrot.lane.b32.xlu0 %v583_v34, %s1648_s24  ;;  %v274_v39 = vor.u32 %v273_v31, %v270_v30  ;;  %v279_v40 = vrot.slane %v277_v32, 7  ;;  %v231_v41 = vcombine.high %v1417_v38, %v1417_v38  ;;  %v282_v42 = vshrl.u32 %v1417_v38, 16 }
  0x1d   : > { %v1415_v43 = vld.sshfl [vmem:[%s1692_s21 + $0x4] sm:$0x13 pattern:$0x76325410]  ;;  %380 = vst.msk [vmem:[#allocation2 + $0xc] sm:$0x3] %vm187_vm8, %v583_v34 }
  0x1e   : > { %v242_v45 = vrot.slane %v240_v36, 6  ;;  %v245_v46 = vrot.slane %v243_v37, 7  ;;  %v249_v47 = vshll.u32 %v207_v35, 16  ;;  %v285_v48 = vshll.u32 %v1417_v38, 16  ;;  %v184_v38 = vld [vmem:[%s1692_s21 + $0x4] sm:$0x3] }
  0x1f   : > { %v275_v49 = vrot.slane %v274_v39, 2  ;;  %v284_v50 = vrot.slane %v282_v42, 6  ;;  %v291_v51 = vshll.u32 %v231_v41, 16  ;;  %v215_v52 = vcombine.high %v1415_v43, %v1415_v43  ;;  %189 = vst.msk [vmem:[#allocation2 + $0xa] sm:$0x3] %vm187_vm8, %v184_v38 }
  0x20   : > { %v246_v54 = vor.u32 %v245_v46, %v242_v45  ;;  %v251_v55 = vrot.slane %v249_v47, 7  ;;  %v287_v56 = vrot.slane %v285_v48, 7  ;;  %v254_v57 = vshrl.u32 %v1415_v43, 16  ;;  %v1609_v47 = vld [vmem:[%s1952_s1 + $0x18] sm:$0xff]  }
  0x21   : > { %v1774_v59 = vsel %vm1762_vm14, %v275_v49, %v279_v40  ;;  %v293_v60 = vrot.slane %v291_v51, 7  ;;  %v257_v61 = vshll.u32 %v1415_v43, 16  ;;  %v263_v62 = vshll.u32 %v215_v52, 16  ;;  %1529 = vmatpush3.bf16.msra.mxu0 %v1609_v47 }
  0x22   : > { %299 = vrot.lane.b32.xlu1 %v1774_v59, %s1648_s24  ;;  %v247_v0 = vrot.slane %v246_v54, 2  ;;  %v288_v1 = vor.u32 %v287_v56, %v284_v50  ;;  %v256_v2 = vrot.slane %v254_v57, 6  ;;  %v1449_v3 = vld.sshfl [vmem:[%s1692_s21 + $0x10] sm:$0x12 pattern:$0x76325410]  ;;  %1530 = vmatprep.subr.bf16.mxu0 %v1612_v44 }
  0x23   : > { %537 = vst.msk [vmem:[#allocation2 + $0xe] sm:$0x3] %vm187_vm8, %v1774_v59  ;;  %v259_v4 = vrot.slane %v257_v61, 7  ;;  %v265_v5 = vrot.slane %v263_v62, 7  ;;  %v579_v6 = vcombine.high %v1449_v3, %v1449_v3  ;;  %v1453_v7 = vrot.slane %v1449_v3, 9  ;;  %v1619_v3 = vld [vmem:[%s1952_s1 + $0xa8] sm:$0xff]  }
  0x24   : > { %v252_v9 = vsel %vm1762_vm14, %v247_v0, %v251_v55  ;;  %v289_v11 = vrot.slane %v288_v1, 2  ;;  %v1448_v12 = vld.sshfl [vmem:[%s1692_s21 + $0xc] sm:$0x12 pattern:$0x76325410] }
  0x25   : > { %295 = vrot.lane.b32.xlu0 %v252_v9, %s1648_s24  ;;  %v260_v14 = vor.u32 %v259_v4, %v256_v2  ;;  %v594_v15 = vrot.slane %v579_v6, 7  ;;  %v571_v16 = vcombine.high %v1448_v12, %v1448_v12  ;;  %v1452_v17 = vrot.slane %v1448_v12, 9  ;;  %v1465_v18 = vld.sshfl [vmem:[%s1692_s21 + $0x14] sm:$0x13 pattern:$0x76325410] }
  0x26   : > { %v294_v19 = vsel %vm1762_vm14, %v289_v11, %v293_v60  ;;  %v660_v20 = vcombine.high %v1465_v18, %v1465_v18  ;;  %v704_v21 = vshrl.u32 %v1465_v18, 16  ;;  %v707_v22 = vshll.u32 %v1465_v18, 16  ;;  %v1464_v23 = vld.sshfl [vmem:[%s1692_s21 + $0x10] sm:$0x13 pattern:$0x76325410] }
  0x27   : > { %301 = vrot.lane.b32.xlu1 %v294_v19, %s1648_s24  ;;  %v261_v24 = vrot.slane %v260_v14, 2  ;;  %v595_v25 = vsel %vm1713_vm11, %v1453_v7, %v594_v15  ;;  %v590_v26 = vrot.slane %v571_v16, 7  ;;  %v652_v27 = vcombine.high %v1464_v23, %v1464_v23  ;;  %v1418_v28 = vld.sshfl [vmem:[%s1692_s21] sm:$0x12 pattern:$0x76325410] }
  0x28   : > { %538 = vst.msk [vmem:[#allocation2 + $0x18] sm:$0x3] %vm187_vm8, %v294_v19  ;;  %v706_v29 = vrot.slane %v704_v21, 6  ;;  %v709_v30 = vrot.slane %v707_v22, 7  ;;  %v713_v31 = vshll.u32 %v660_v20, 16  ;;  %v690_v32 = vshrl.u32 %v1464_v23, 16 }
  0x29   : > { %795 = vst.msk [vmem:[#allocation2 + $0x1c] sm:$0x3] %vm187_vm8, %v595_v25  ;;  %v266_v34 = vsel %vm1762_vm14, %v261_v24, %v265_v5  ;;  %v591_v35 = vsel %vm1713_vm11, %v1452_v17, %v590_v26  ;;  %v693_v36 = vshll.u32 %v1464_v23, 16  ;;  %v699_v37 = vshll.u32 %v652_v27, 16  ;;  %v1455_v55 = vld [vmem:[%s1692_s21 + $0xc] sm:$0x3] }
  0x2a   : > { %297 = vrot.lane.b32.xlu0 %v266_v34, %s1648_s24  ;;  %v710_v39 = vor.u32 %v709_v30, %v706_v29  ;;  %v715_v40 = vrot.slane %v713_v31, 7  ;;  %v692_v41 = vrot.slane %v690_v32, 6  ;;  %v327_v42 = vcombine.high %v1418_v28, %v1418_v28  ;;  %382 = vst.msk [vmem:[#allocation2 + $0x20] sm:$0x3] %vm187_vm8, %v591_v35  ;;  %536 = vst.msk [vmem:[#allocation2 + $0x4] sm:$0x3] %vm187_vm8, %v266_v34 }
  0x2b   : > { %794 = vst.msk [vmem:[#allocation2 + $0x12] sm:$0x3] %vm187_vm8, %v591_v35  ;;  %602 = vrot.lane.b32.xlu1 %v595_v25, %s1648_s24  ;;  %v695_v43 = vrot.slane %v693_v36, 7  ;;  %v701_v45 = vrot.slane %v699_v37, 7  ;;  %v1422_v46 = vrot.slane %v1418_v28, 9  ;;  %v1613_v60 = vld [vmem:[%s1952_s1 + $0x20] sm:$0xff]  }
  0x2c   : > { %v711_v48 = vrot.slane %v710_v39, 2  ;;  %v361_v49 = vrot.slane %v327_v42, 7  ;;  %618 = vst.msk [vmem:[#allocation2 + $0x10] sm:$0x3] %vm187_vm8, %v1455_v55  ;;  %v1454_v57 = vld [vmem:[%s1692_s21 + $0x8] sm:$0x3]  ;;  %1531 = vmatpush3.bf16.msra.mxu0 %v1613_v60 }
  0x2d   : > { %v696_v50 = vor.u32 %v695_v43, %v692_v41  ;;  %617 = vst.msk [vmem:[#allocation2 + $0x6] sm:$0x3] %vm187_vm8, %v1454_v57  ;;  %v1457_v61 = vld [vmem:[%s1692_s21 + $0x14] sm:$0x3]  ;;  %v1456_v62 = vld [vmem:[%s1692_s21 + $0x10] sm:$0x3] }
  0x2e   : > { %600 = vrot.lane.b32.xlu0 %v591_v35, %s1648_s24  ;;  %v362_v51 = vsel %vm1713_vm11, %v1422_v46, %v361_v49  ;;  %v716_v54 = vsel %vm1762_vm14, %v711_v48, %v715_v40  ;;  %620 = vst.msk [vmem:[#allocation2 + $0x24] sm:$0x3] %vm187_vm8, %v1457_v61  ;;  %619 = vst.msk [vmem:[#allocation2 + $0x1a] sm:$0x3] %vm187_vm8, %v1456_v62  ;;  %v1616_v0 = vld [vmem:[%s1952_s1 + $0x68] sm:$0xff]   ;;  %v1620_v4 = vld [vmem:[%s1952_s1 + $0x70] sm:$0xff]   ;;  %v892_v35 = vlaneseq }
  0x2f   : > { %719 = vrot.lane.b32.xlu1 %v294_v19, %s1648_s24  ;;  %v697_v52 = vrot.slane %v696_v50, 2  ;;  %379 = vst.msk [vmem:[#allocation2 + $0x2] sm:$0x3] %vm187_vm8, %v362_v51  ;;  %v1617_v1 = vld [vmem:[%s1952_s1 + $0x28] sm:$0xff]   ;;  %1532 = vmatprep.subr.bf16.mxu0 %v1616_v0  ;;  %v1621_v5 = vld [vmem:[%s1952_s1 + $0x30] sm:$0xff]   ;;  %v1625_v9 = vld [vmem:[%s1952_s1 + $0x38] sm:$0xff]  }
  0x30   : > { %v1618_v2 = vld [vmem:[%s1952_s1 + $0xe8] sm:$0xff]   ;;  %1533 = vmatpush3.bf16.msra.mxu0 %v1617_v1  ;;  %v1622_v6 = vld [vmem:[%s1952_s1 + $0xf0] sm:$0xff]   ;;  %v1626_v11 = vld [vmem:[%s1952_s1 + $0xf8] sm:$0xff]   ;;  %v1650_v33 = vmov 1983009808   ;;  %v893_v38 = vshrl.u32 %v892_v35, 7 }
  0x31   : > { %v702_v56 = vsel %vm1762_vm14, %v697_v52, %v701_v45  ;;  %1534 = vmatprep.subr.bf16.mxu0 %v1620_v4  ;;  %v1623_v7 = vld [vmem:[%s1952_s1 + $0xb0] sm:$0xff]   ;;  %v1627_v12 = vld [vmem:[%s1952_s1 + $0xb8] sm:$0xff]   ;;  %v890_v34 = vunpack.c.l.s4 %v1650_v33 }
  0x32   : > { %717 = vrot.lane.b32.xlu0 %v1774_v59, %s1648_s24  ;;  %539 = vst.msk [vmem:[#allocation2 + $0x22] sm:$0x3] %vm187_vm8, %v702_v56  ;;  %v1614_v59 = vld [vmem:[%s1952_s1 + $0xe0] sm:$0xff]   ;;  %v1638_v55 = vld [vmem:[#allocation2 + $0x8] ss:$10 sps:$4 sm:$0x33]  }
  0x33   : > { %723 = vrot.lane.b32.xlu1 %v716_v54, %s1648_s24  ;;  %1552 = vmatprep.subr.bf16.mxu1 %v1614_v59  ;;  %v1473_v14 = vld.sshfl [vmem:[%s1692_s21 + $0x14] sm:$0x12 pattern:$0x76325410]  ;;  %v891_v37 = vunpack.c.0.s8 %v890_v34  ;;  %v1635_v54 = vld [vmem:[%s1952_s1 + $0x108] sm:$0xff]   ;;  %v1637_v60 = vld [vmem:[%s1952_s1 + $0x118] sm:$0xff]  }
  0x34   : > { %1553 = vmatpush3.bf16.msra.mxu1 %v1615_v63  ;;  %1535 = vmatpush3.bf16.msra.mxu0 %v1621_v5  ;;  %v772_v15 = vcombine.high %v1473_v14, %v1473_v14  ;;  %v1477_v16 = vrot.slane %v1473_v14, 9  ;;  %v1636_v57 = vld [vmem:[%s1952_s1 + $0x110] sm:$0xff]  }
  0x35   : > { %1554 = vmatprep.subr.bf16.mxu1 %v1618_v2  ;;  %1536 = vmatprep.subr.bf16.mxu0 %v1624_v8  ;;  %v894_v40 = vsub.s32 %v891_v37, %v893_v38 }
  0x36   : > { %721 = vrot.lane.b32.xlu0 %v702_v56, %s1648_s24  ;;  %v787_v17 = vrot.slane %v772_v15, 7 }
  0x37   : > { %v929_v58 = vrot.slane %v1638_v55, %v894_v40 }
  0x38   : > { %1555 = vmatpush3.bf16.msra.mxu1 %v1619_v3  ;;  %1537 = vmatpush3.bf16.msra.mxu0 %v1625_v9  ;;  %v788_v18 = vsel %vm1713_vm11, %v1477_v16, %v787_v17 }
  0x39   : > { %1556 = vmatprep.subr.bf16.mxu1 %v1622_v6  ;;  %1571 = vmatprep.subr.bf16.mxu0 %v1649_v13  ;;  %796 = vst.msk [vmem:[#allocation2 + $0x26] sm:$0x3] %vm187_vm8, %v788_v18 }
  0x3c   : > { %1557 = vmatpush3.bf16.msra.mxu1 %v1623_v7 }
  0x3d   : > { %1558 = vmatprep.subr.bf16.mxu1 %v1626_v11 }
  0x40   : > { %1559 = vmatpush3.bf16.msra.mxu1 %v1627_v12  ;;  %v1639_v56 = vld [vmem:[#allocation2 + $0x1c] ss:$10 sps:$4 sm:$0x33]  }
  0x41   : > { %v936_v44 = vrot.slane %v1639_v56, %v894_v40 }
  0x43   : > { %v937_v59 = vcombine.low %v929_v58, %v936_v44 }
  0x84   : > { %v423_v19 = vpop.permute.xlu1 %422 }
  0x85   : > { %433 = vst.msk [vmem:[#allocation2 + $0xc] sm:$0x3] %vm307_vm15, %v423_v19  ;;  %v421_v20 = vpop.permute.xlu0 %420 }
  0x86   : > { %432 = vst.msk [vmem:[#allocation2 + $0x2] sm:$0x3] %vm307_vm15, %v421_v20 }
  0x88   : > { %v427_v21 = vpop.permute.xlu1 %426 }
  0x89   : > { %435 = vst.msk [vmem:[#allocation2 + $0x20] sm:$0x3] %vm307_vm15, %v427_v21  ;;  %v425_v22 = vpop.permute.xlu0 %424 }
  0x8a   : > { %434 = vst.msk [vmem:[#allocation2 + $0x16] sm:$0x3] %vm307_vm15, %v425_v22 }
  0x8d   : > { %v599_v23 = vpop.permute.xlu1 %598 }
  0x8e   : > { %609 = vst.msk [vmem:[#allocation2 + $0xe] sm:$0x3] %vm307_vm15, %v599_v23  ;;  %v597_v10 = vpop.permute.xlu0 %596 }
  0x8f   : > { %608 = vst.msk [vmem:[#allocation2 + $0x4] sm:$0x3] %vm307_vm15, %v597_v10 }
  0x94   : > { %v300_v24 = vpop.permute.xlu1 %299 }
  0x95   : > { %310 = vst.msk [vmem:[#allocation2 + $0x14] sm:$0x3] %vm307_vm15, %v300_v24 }
  0x97   : > { %v296_v25 = vpop.permute.xlu0 %295 }
  0x98   : > { %308 = vst.msk [vmem:[#allocation2] sm:$0x3] %vm307_vm15, %v296_v25 }
  0x99   : > { %v302_v26 = vpop.permute.xlu1 %301 }
  0x9a   : > { %311 = vst.msk [vmem:[#allocation2 + $0x1e] sm:$0x3] %vm307_vm15, %v302_v26 }
  0x9c   : > { %v298_v27 = vpop.permute.xlu0 %297 }
  0x9d   : > { %309 = vst.msk [vmem:[#allocation2 + $0xa] sm:$0x3] %vm307_vm15, %v298_v27  ;;  %v603_v28 = vpop.permute.xlu1 %602 }
  0x9e   : > { %611 = vst.msk [vmem:[#allocation2 + $0x22] sm:$0x3] %vm307_vm15, %v603_v28 }
  0xa0   : > { %v601_v29 = vpop.permute.xlu0 %600 }
  0xa1   : > { %610 = vst.msk [vmem:[#allocation2 + $0x18] sm:$0x3] %vm307_vm15, %v601_v29  ;;  %v720_v30 = vpop.permute.xlu1 %719  ;;  %v1630_v42 = vld [vmem:[#allocation2 + $0x14] ss:$10 sps:$4 sm:$0xff]  }
  0xa2   : > { %730 = vst.msk [vmem:[#allocation2 + $0x10] sm:$0x3] %vm307_vm15, %v720_v30  ;;  %v909_v46 = vrot.slane %v1630_v42, %v894_v40 }
  0xa4   : > { %v718_v31 = vpop.permute.xlu0 %717  ;;  %v1628_v39 = vld [vmem:[#allocation2] ss:$10 sps:$4 sm:$0xff]  }
  0xa5   : > { %729 = vst.msk [vmem:[#allocation2 + $0x6] sm:$0x3] %vm307_vm15, %v718_v31  ;;  %v724_v32 = vpop.permute.xlu1 %723  ;;  %v895_v45 = vrot.slane %v1628_v39, %v894_v40 }
  0xa6   : > { %732 = vst.msk [vmem:[#allocation2 + $0x24] sm:$0x3] %vm307_vm15, %v724_v32 }
  0xa7   : > { %v918_v49 = vcombine.high %v895_v45, %v909_v46  ;;  %v917_v51 = vcombine.low %v895_v45, %v909_v46 }
  0xa8   : > { %v722_v36 = vpop.permute.xlu0 %721 }
  0xa9   : > { %731 = vst.msk [vmem:[#allocation2 + $0x1a] sm:$0x3] %vm307_vm15, %v722_v36  ;;  %1194 = vmatprep.mubr.bf16.mxu0 %v918_v49 }
  0xaa   : > { %1195 = vmatmul.mubr.bf16.vlgmr.msra.gmra.mrb[0].mxu0 %v917_v51 }
  0xab   : > { %1572 = vmatpush3.bf16.msra.mxu0 %v1634_v53  ;;  %1579 = vmatprep.mubr.msk.bf16.mxu0 %vm1651_vm1, %v1649_v13 }
  0xac   : > { %v1632_v41 = vld [vmem:[#allocation2 + $0x4] ss:$10 sps:$4 sm:$0xff]   ;;  %1573 = vmatprep.subr.bf16.mxu0 %v1649_v13 }
  0xad   : > { %v902_v47 = vrot.slane %v1632_v41, %v894_v40 }
  0xaf   : > { %1574 = vmatpush3.bf16.msra.mxu0 %v1635_v54 }
  0xb0   : > { %v1633_v43 = vld [vmem:[#allocation2 + $0x18] ss:$10 sps:$4 sm:$0xff]   ;;  %1575 = vmatprep.subr.bf16.mxu0 %v1649_v13 }
  0xb1   : > { %v916_v48 = vrot.slane %v1633_v43, %v894_v40 }
  0xb3   : > { %v920_v50 = vcombine.high %v902_v47, %v916_v48  ;;  %v919_v52 = vcombine.low %v902_v47, %v916_v48  ;;  %1576 = vmatpush3.bf16.msra.mxu0 %v1636_v57 }
  0xb4   : > { %1577 = vmatprep.subr.bf16.mxu0 %v1649_v13 }
  0xb5   : > { %1235 = vmatprep.mubr.bf16.mxu1 %v920_v50 }
  0xb6   : > { %1236 = vmatmul.mubr.bf16.vlgmr.msra.gmra.mrb[0].mxu1 %v919_v52 }
  0xb7   : > { %1578 = vmatpush3.bf16.msra.mxu0 %v1637_v60 }
  0xba   : > { %1580 = vmatmul.mubr.msk.bf16.vlgmr.msra.gmra.mrb[4].mxu0 %vm1158_vm2, %v937_v59 }
 0x17d   : > { %v1538_v61 = vpop.f32.mrb[0].mxu0 }
 0x17e   : > { %v1539_v63 = vpop.f32.mrb[1].mxu0 }
 0x17f   : > { %v1540_v1 = vadd.f32 %v1539_v63, %v1538_v61  ;;  %v1541_v3 = vpop.f32.mrb[2].mxu0 }
 0x180   : > { %v1542_v5 = vpop.f32.mrb[3].mxu0 }
 0x181   : > { %v1543_v7 = vadd.f32 %v1542_v5, %v1541_v3 }
 0x189   : > { %v1560_v62 = vpop.f32.mrb[0].mxu1 }
 0x18a   : > { %v1561_v0 = vpop.f32.mrb[1].mxu1 }
 0x18b   : > { %v1562_v2 = vadd.f32 %v1561_v0, %v1560_v62  ;;  %v1563_v4 = vpop.f32.mrb[2].mxu1 }
 0x18c   : > { %v1564_v6 = vpop.f32.mrb[3].mxu1 }
 0x18d   : > { %v1565_v8 = vadd.f32 %v1564_v6, %v1563_v4  ;;  %v1238_v9 = vadd.f32 %v1562_v2, %v1540_v1  ;;  %v1278_v12 = vpop.f32.mrb[4].mxu0 }
 0x18e   : > { %v1581_v14 = vpop.f32.mrb[5].mxu0 }
 0x18f   : > { %v1241_v11 = vadd.f32 %v1565_v8, %v1543_v7  ;;  %v1279_v13 = vadd.f32 %v1278_v12, %v1238_v9  ;;  %v1281_v15 = vpop.f32.mrb[6].mxu0 }
 0x190   : > { %v1582_v19 = vpop.f32.mrb[7].mxu0 }
 0x191   : > { %v1294_v16 = vmul.f32 %v1279_v13, %v1279_v13  ;;  %v1520_v17 = vpack.c.bf16 %v1279_v13, %v1279_v13  ;;  %v1282_v18 = vadd.f32 %v1281_v15, %v1241_v11  ;;  %v1285_v20 = vsel %vm1158_vm2, %v1279_v13, 0.0 }
 0x193   : > { %1317 = vst.msk [vmem:[%s177_s20] sm:$0xf] %vm1316_vm3, %v1520_v17  ;;  %v1286_v21 = vsel %vm1158_vm2, %v1282_v18, 0.0  ;;  %v1295_v22 = vmul.f32 %v1282_v18, %v1282_v18  ;;  %v1521_v23 = vpack.c.bf16 %v1282_v18, %v1282_v18  ;;  %v1296_v24 = vsel %vm1158_vm2, %v1294_v16, 0.0 }
 0x194   : > { %v1287_v10 = vadd.f32 %v1286_v21, %v1285_v20 }
 0x195   : > { %v1297_v25 = vsel %vm1158_vm2, %v1295_v22, 0.0  ;;  %1318 = vst.msk [vmem:[%s177_s20 + $0x4] sm:$0xf] %vm1316_vm3, %v1521_v23 }
 0x196   : > { %v1288_v26 = vrot.slane %v1287_v10, 4  ;;  %v1298_v27 = vadd.f32 %v1297_v25, %v1296_v24 }
 0x198   : > { %v1289_v28 = vadd.f32 %v1288_v26, %v1287_v10  ;;  %v1299_v29 = vrot.slane %v1298_v27, 4 }
 0x19a   : > { %v1290_v30 = vrot.slane %v1289_v28, 2  ;;  %v1300_v31 = vadd.f32 %v1299_v29, %v1298_v27 }
 0x19c   : > { %v1291_v32 = vadd.f32 %v1290_v30, %v1289_v28  ;;  %v1301_v33 = vrot.slane %v1300_v31, 2 }
 0x19e   : > { %v1292_v34 = vrot.slane %v1291_v32, 1  ;;  %v1302_v35 = vadd.f32 %v1301_v33, %v1300_v31 }
 0x1a0   : > { %v1303_v36 = vrot.slane %v1302_v35, 1  ;;  %v1293_v37 = vadd.f32 %v1292_v34, %v1291_v32 }
 0x1a2   : > { %v1304_v38 = vadd.f32 %v1303_v36, %v1302_v35 }
 0x1a4   : > { %v1306_v39 = vsel %vm352_vm0, %v1293_v37, %v1304_v38 }
 0x1a5   : > { %1307 = vst.msk [vmem:[%s181_s26] sm:$0x3] %vm187_vm8, %v1306_v39 }
 0x1a6 PF: > { %s14_s12 = sadd.s32 1, %s1646_s12  }
 0x1a7   : > { %p11_p4 = scmp.ge.s32.totalorder %s14_s12, 4  }
 0x1a9   :  { %13 = sbr.rel (!%p11_p4) target bundleno = 1 (0x1), region = 72 }

// kernel: convnet_forward.13
= control target key start
LH: loop header
LB: loop body
LE: loop exit
PB: predicated region body
PF: predicated region fallthrough
CT: control target
= control target key end

     0   :  { %s425_s12 = smov 0   ;;  %s427_s13 = smov 0   ;;  %s468_s0 = inlined_call_operand.vmem [shape: bf16[2,4,2,128], index: 0, kind: input, shape index: {}]   ;;  %s469_s1 = inlined_call_operand.vmem [shape: f32[1,1,1,128], index: 1, kind: input, shape index: {}]   ;;  %s470_s2 = inlined_call_operand.vmem [shape: f32[1,1,1,128], index: 2, kind: input, shape index: {}]   ;;  %s471_s3 = inlined_call_operand.vmem [shape: bf16[2,2,2,64], index: 3, kind: output, shape index: {}]  }
   0x1   :  { %s429_s14 = smov 0  }
   0x2 LB: > { %s25_s15 = sadd.s32 1, %s398_s13  ;;  %p343_p0 = scmp.ge.s32.totalorder %s402_s14, 1  ;;  %s402_s14 = sphi %s429_s14, %s13_s14   ;;  %s398_s13 = sphi %s427_s13, %s473_s13   ;;  %s394_s12 = sphi %s425_s12, %s472_s12  }
   0x3   : > { %p27_p1 = scmp.ge.s32.totalorder %s25_s15, 2  ;;  %p157_p2 = scmp.lt.s32.totalorder %s402_s14, 3 }
   0x5   : > { %s475_s15 = smov (%p27_p1, %s25_s15), 0  ;;  %p158_p3 = pnand %p343_p0, %p157_p2 }
   0x6   : > { %p188_p4 = scmp.lt.s32.totalorder (!%p158_p3), %s394_s12, 1  ;;  %v346_v0 = vld [vmem:[%s469_s1] ss:$0 sm:$0xff] (!%p158_p3)  ;;  %vm239_vm0 = vcmask (!%p158_p3), 1041408   ;;  %s404_s24 = smov (!%p158_p3), 64   ;;  %vm258_vm1 = vcmask (!%p158_p3), 516096  }
   0x7   : > { %161 = sbr.rel (%p158_p3) target bundleno = 154 (0x9a), region = 32  ;;  %v347_v9 = vld [vmem:[%s470_s2] ss:$0 sm:$0xff] (!%p158_p3) }
   0xe   : > { %s477_s12 = smov (!%p188_p4, %s394_s12), 1 }
   0xf   : > { %s344_s16 = sshll.u32 %s477_s12, 2  ;;  %s345_s25 = sshll.u32 %s477_s12, 1 }
  0x10   : > { %s194_s19 = scalar_lea.vmem %s468_s0, %s344_s16  ;;  %s203_s28 = scalar_lea.vmem %s471_s3, %s345_s25 }
  0x11   : > { %v205_v1 = vld [vmem:[%s194_s19] sm:$0x1]  ;;  %v206_v2 = vld [vmem:[%s194_s19 + $0x1] sm:$0x1]  ;;  %v207_v3 = vld [vmem:[%s194_s19 + $0x2] sm:$0x1] }
  0x12   : > { %v208_v4 = vld [vmem:[%s194_s19 + $0x3] sm:$0x1]  ;;  %v209_v5 = vunpack.c.l.bf16 %v205_v1  ;;  %v210_v6 = vunpack.c.l.bf16 %v206_v2  ;;  %v211_v7 = vunpack.c.l.bf16 %v207_v3 }
  0x13   : > { %v212_v8 = vunpack.c.l.bf16 %v208_v4 }
  0x14   : > { %v220_v10 = vmul.f32 %v346_v0, %v209_v5  ;;  %v221_v11 = vmul.f32 %v346_v0, %v210_v6  ;;  %v222_v12 = vmul.f32 %v346_v0, %v211_v7 }
  0x15   : > { %v223_v13 = vmul.f32 %v346_v0, %v212_v8 }
  0x16   : > { %v231_v14 = vadd.f32 %v347_v9, %v220_v10  ;;  %v232_v15 = vadd.f32 %v347_v9, %v221_v11  ;;  %v233_v16 = vadd.f32 %v347_v9, %v222_v12 }
  0x17   : > { %v234_v17 = vadd.f32 %v347_v9, %v223_v13 }
  0x18   : > { %v235_v18 = vmax.f32 %v231_v14, 0.0  ;;  %v236_v19 = vmax.f32 %v232_v15, 0.0  ;;  %v237_v20 = vmax.f32 %v233_v16, 0.0 }
  0x19   : > { %v238_v21 = vmax.f32 %v234_v17, 0.0 }
  0x1a   : > { %v240_v22 = vsel %vm239_vm0, %v235_v18, -inf  ;;  %v241_v23 = vsel %vm239_vm0, %v236_v19, -inf  ;;  %v243_v24 = vsel %vm239_vm0, %v237_v20, -inf }
  0x1b   : > { %v242_v25 = vmax.f32 %v240_v22, %v241_v23  ;;  %v244_v26 = vsel %vm239_vm0, %v238_v21, -inf }
  0x1c   : > { %v245_v27 = vmax.f32 %v243_v24, %v244_v26 }
  0x1e   : > { %v375_v28 = vpack.i.bf16 %v245_v27, %v242_v25 }
  0x20   : > { %376 = vrot.lane.b32.xlu0 %v375_v28, %s404_s24 }
  0x92   : > { %v377_v29 = vpop.permute.xlu0 %376 }
  0x93   : > { %v379_v30 = vunpack.i.h.bf16 %v377_v29  ;;  %v378_v31 = vunpack.i.l.bf16 %v377_v29 }
  0x95   : > { %v255_v32 = vmax.f32 %v245_v27, %v379_v30  ;;  %v254_v33 = vmax.f32 %v242_v25, %v378_v31 }
  0x97   : > { %v257_v34 = vpack.c.bf16 %v255_v32, %v255_v32  ;;  %v256_v35 = vpack.c.bf16 %v254_v33, %v254_v33 }
  0x99   : > { %260 = vst.msk [vmem:[%s203_s28 + $0x1] sm:$0x1] %vm258_vm1, %v257_v34  ;;  %259 = vst.msk [vmem:[%s203_s28] sm:$0x1] %vm258_vm1, %v256_v35 }
  0x9a PF: > { %s13_s14 = sadd.s32 1, %s402_s14   ;;  %s472_s12 = smov %s398_s13 }
  0x9b   : > { %p10_p5 = scmp.ge.s32.totalorder %s13_s14, 4   ;;  %s473_s13 = smov %s475_s15 }
  0x9d   :  { %12 = sbr.rel (!%p10_p5) target bundleno = 2 (0x2), region = 62 }

// kernel: convnet_forward.8
= control target key start
LH: loop header
LB: loop body
LE: loop exit
PB: predicated region body
PF: predicated region fallthrough
CT: control target
= control target key end

     0   :  { %s4506_s12 = smov 0   ;;  %s5314_s0 = inlined_call_operand.vmem [shape: bf16[2,18,18,8], index: 0, kind: input, shape index: {}]   ;;  %s5315_s1 = inlined_call_operand.vmem [shape: bf16[72,64], index: 1, kind: input, shape index: {}]   ;;  %s5316_s2 = inlined_call_operand.vmem [shape: bf16[2,256,64], index: 2, kind: output, shape index: {0}]   ;;  %s5317_s3 = inlined_call_operand.vmem [shape: f32[2,2,64], index: 3, kind: output, shape index: {1}]  }
   0x1 LB: > { %s3540_s13 = sadd.s32 4294967295, %s4476_s12   ;;  %p3544_p0 = scmp.ge.s32.totalorder %s4476_s12, 1  ;;  %s4476_s12 = sphi %s4506_s12, %s14_s12  }
   0x2   : > { %p140_p1 = scmp.lt.s32.totalorder %s4476_s12, 3 }
   0x4   : > { %p141_p2 = pnand %p3544_p0, %p140_p1 }
   0x5   : > { %p168_p3 = scmp.lt.s32.totalorder (!%p141_p2), %s3540_s13, 1  ;;  %vm938_vm0 = vcmask (!%p141_p2), 1046528   ;;  %s4478_s18 = smov (!%p141_p2), 24   ;;  %vm504_vm1 = vsmask.f32 (!%p141_p2), 7424  ;;  %vm311_vm2 = vcmask (!%p141_p2), 64512  }
   0x6   : > { %144 = sbr.rel (%p141_p2) target bundleno = 634 (0x27a), region = 28  ;;  %s4479_s19 = smov (!%p141_p2), 40   ;;  %vm745_vm3 = vcmask (!%p141_p2), 130112   ;;  %vm1035_vm4 = vcmask (!%p141_p2), 195712   ;;  %vm1213_vm5 = vcmask (!%p141_p2), 261312   ;;  %vm1646_vm6 = vcmask (!%p141_p2), 326912  }
   0x7   : > { %s4480_s20 = smov (!%p141_p2), 16   ;;  %s4481_s21 = smov (!%p141_p2), 8   ;;  %vm1935_vm7 = vcmask (!%p141_p2), 392512   ;;  %vm2113_vm8 = vcmask (!%p141_p2), 458112   ;;  %vm2546_vm9 = vcmask (!%p141_p2), 523712   ;;  %vm2835_vm10 = vcmask (!%p141_p2), 589312  }
   0x8   : > { %s4482_s22 = smov (!%p141_p2), 32   ;;  %s4483_s23 = smov (!%p141_p2), 48   ;;  %vm2953_vm11 = vcmask (!%p141_p2), 1043456   ;;  %vm2904_vm12 = vcmask (!%p141_p2), 588800   ;;  %vm3421_vm13 = vcmask (!%p141_p2), 519168   ;;  %vm3118_vm14 = vcmask (!%p141_p2), 523264  }
   0x9   : > { %s4484_s24 = smov (!%p141_p2), 56   ;;  %s4485_s25 = smov (!%p141_p2), 64   ;;  %vm3289_vm15 = vcmask (!%p141_p2), 1040384  }
   0xd   : > { %s5319_s13 = smov (!%p168_p3, %s3540_s13), 1 }
   0xe   : > { %s4208_s14 = smul.u32 216, %s5319_s13  ;;  %s4100_s9 = sshll.u32 %s5319_s13, 7 }
   0xf   : > { %s3548_s15 = sshll.u32 %s5319_s13, 1 }
  0x10   : > { %s4520_s17 = scalar_lea.vmem %s5314_s0, %s4208_s14  ;;  %s5170_s14 = scalar_lea.vmem %s5316_s2, %s4100_s9 }
  0x11   : > { %v4225_v0 = vld [vmem:[%s4520_s17 + $0x18] sm:$0xff]   ;;  %v4226_v1 = vld [vmem:[%s4520_s17 + $0xc] sm:$0xff]   ;;  %v4228_v3 = vld [vmem:[%s4520_s17 + $0x14] ss:$0 sps:$4 sm:$0x11]  }
  0x12   : > { %1167 = vrot.lane.b32.xlu1 %v4225_v0, %s4478_s18  ;;  %1165 = vrot.lane.b32.xlu0 %v4226_v1, %s4478_s18  ;;  %v4227_v2 = vld [vmem:[%s4520_s17 + $0xc] sm:$0xfe]   ;;  %v4233_v4 = vld [vmem:[%s4520_s17] sm:$0xff]   ;;  %v1840_v6 = vrot.slane %v4228_v3, 1 }
  0x13   : > { %v1839_v5 = vrot.slane %v4227_v2, 1  ;;  %v4229_v7 = vld [vmem:[%s4520_s17] sm:$0xfe]   ;;  %v4230_v8 = vld [vmem:[%s4520_s17 + $0x8] ss:$0 sps:$4 sm:$0x11]  }
  0x14   : > { %v506_v9 = vshrl.u32 %v4233_v4, 16  ;;  %v939_v11 = vrot.slane %v4229_v7, 1  ;;  %v4231_v12 = vld [vmem:[%s4520_s17 + $0xc] sm:$0xfe]   ;;  %v508_v13 = vshll.u32 %v4233_v4, 16  ;;  %v940_v14 = vrot.slane %v4230_v8, 1 }
  0x15   : > { %v1841_v10 = vsel %vm938_vm0, %v1839_v5, %v1840_v6  ;;  %v4232_v15 = vld [vmem:[%s4520_s17 + $0x14] ss:$0 sps:$4 sm:$0x11]   ;;  %v942_v16 = vrot.slane %v4231_v12, 1  ;;  %v4235_v21 = vld [vmem:[%s4520_s17 + $0x18] sm:$0xfe]  }
  0x16   : > { %1887 = vrot.lane.b32.xlu0 %v1841_v10, %s4479_s19  ;;  %v510_v17 = vrot.slane %v508_v13, 1  ;;  %v941_v18 = vsel %vm938_vm0, %v939_v11, %v940_v14  ;;  %v943_v19 = vrot.slane %v4232_v15, 1  ;;  %v4234_v20 = vld [vmem:[%s4520_s17 + $0x8] ss:$0 sps:$4 sm:$0x11]   ;;  %v1842_v26 = vrot.slane %v4235_v21, 1 }
  0x17   : > { %987 = vrot.lane.b32.xlu1 %v941_v18, %s4480_s20  ;;  %v513_v24 = vshll.u32 %v4234_v20, 16  ;;  %v4236_v25 = vld [vmem:[%s4520_s17 + $0x20] ss:$0 sps:$4 sm:$0x11]   ;;  %v4237_v27 = vld [vmem:[%s4520_s17 + $0xc] sm:$0xff]   ;;  %v4239_v31 = vld [vmem:[%s4520_s17 + $0x18] sm:$0xff]  }
  0x18   : > { %v944_v22 = vsel %vm938_vm0, %v942_v16, %v943_v19  ;;  %v511_v23 = vor.u32 %v510_v17, %v506_v9  ;;  %v1843_v29 = vrot.slane %v4236_v25, 1  ;;  %v4238_v30 = vld [vmem:[%s4520_s17 + $0x14] ss:$0 sps:$4 sm:$0x11]   ;;  %v518_v32 = vshrl.u32 %v4237_v27, 16  ;;  %v4241_v41 = vld [vmem:[%s4520_s17 + $0xc] sm:$0xff]  }
  0x19   : > { %v515_v28 = vrot.slane %v513_v24, 1  ;;  %v520_v33 = vshll.u32 %v4237_v27, 16  ;;  %v525_v36 = vshll.u32 %v4238_v30, 16  ;;  %v4240_v37 = vld [vmem:[%s4520_s17 + $0x20] ss:$0 sps:$4 sm:$0x11]  }
  0x1a   : > { %v1844_v35 = vsel %vm938_vm0, %v1842_v26, %v1843_v29  ;;  %v1419_v39 = vshrl.u32 %v4239_v31, 16  ;;  %v1421_v40 = vshll.u32 %v4239_v31, 16  ;;  %v1426_v43 = vshll.u32 %v4240_v37, 16  ;;  %v4242_v46 = vld [vmem:[%s4520_s17 + $0x14] ss:$0 sps:$4 sm:$0x11]  }
  0x1b   : > { %989 = vrot.lane.b32.xlu1 %v944_v22, %s4480_s20  ;;  %v516_v34 = vsel %vm504_vm1, %v511_v23, %v515_v28  ;;  %v522_v38 = vrot.slane %v520_v33, 1  ;;  %v527_v42 = vrot.slane %v525_v36, 1  ;;  %v1407_v47 = vshrl.u32 %v4241_v41, 16  ;;  %v4244_v54 = vld [vmem:[%s4520_s17 + $0x24] sm:$0xff]   ;;  %v4245_v58 = vld [vmem:[%s4520_s17 + $0x18] sm:$0xff]  }
  0x1c   : > { %697 = vrot.lane.b32.xlu0 %v516_v34, %s4481_s21  ;;  %v1423_v45 = vrot.slane %v1421_v40, 1  ;;  %v1409_v48 = vshll.u32 %v4241_v41, 16  ;;  %v1428_v49 = vrot.slane %v1426_v43, 1  ;;  %v1414_v53 = vshll.u32 %v4242_v46, 16  ;;  %v4243_v59 = vld [vmem:[%s4520_s17 + $0x18] sm:$0xff]   ;;  %v4247_v61 = vld [vmem:[%s4520_s17 + $0x24] sm:$0xff]  }
  0x1d   : > { %v523_v44 = vor.u32 %v522_v38, %v518_v32  ;;  %v4246_v60 = vld [vmem:[%s4520_s17 + $0x20] ss:$0 sps:$4 sm:$0x11]   ;;  %v2307_v63 = vshrl.u32 %v4245_v58, 16  ;;  %v2309_v0 = vshll.u32 %v4245_v58, 16  ;;  %v2319_v3 = vshrl.u32 %v4247_v61, 16 }
  0x1e   : > { %v1424_v51 = vor.u32 %v1423_v45, %v1419_v39  ;;  %v1411_v52 = vrot.slane %v1409_v48, 1  ;;  %v1416_v57 = vrot.slane %v1414_v53, 1  ;;  %v2314_v1 = vshll.u32 %v4246_v60, 16  ;;  %v4248_v2 = vld [vmem:[%s4520_s17 + $0x2c] ss:$0 sps:$4 sm:$0x11]  }
  0x1f   : > { %1889 = vrot.lane.b32.xlu1 %v1844_v35, %s4479_s19  ;;  %v528_v50 = vsel %vm504_vm1, %v523_v44, %v527_v42  ;;  %v2321_v4 = vshll.u32 %v4247_v61, 16  ;;  %v2311_v5 = vrot.slane %v2309_v0, 1  ;;  %v4251_v6 = vld [vmem:[%s4520_s17 + $0x18] sm:$0xff]   ;;  %v2326_v9 = vshll.u32 %v4248_v2, 16  ;;  %v4255_v11 = vld [vmem:[%s4520_s17 + $0x24] sm:$0xff]   ;;  %v4262_v58 = vld [vmem:[%s4520_s17 + $0x30] sm:$0xff]  }
  0x20   : > { %699 = vrot.lane.b32.xlu0 %v528_v50, %s4481_s21  ;;  %v1429_v55 = vsel %vm504_vm1, %v1424_v51, %v1428_v49  ;;  %v1412_v56 = vor.u32 %v1411_v52, %v1407_v47  ;;  %v2316_v7 = vrot.slane %v2314_v1, 1  ;;  %v4249_v10 = vld [vmem:[%s4520_s17 + $0x18] sm:$0xfe]   ;;  %v4250_v13 = vld [vmem:[%s4520_s17 + $0x20] ss:$0 sps:$4 sm:$0x11]  }
  0x21   : > { %v2323_v8 = vrot.slane %v2321_v4, 1  ;;  %v2312_v12 = vor.u32 %v2311_v5, %v2307_v63  ;;  %v530_v14 = vshrl.u32 %v4251_v6, 16  ;;  %v2328_v16 = vrot.slane %v2326_v9, 1  ;;  %v4252_v20 = vld [vmem:[%s4520_s17 + $0x20] ss:$0 sps:$4 sm:$0x11]  }
  0x22   : > { %v1417_v62 = vsel %vm504_vm1, %v1412_v56, %v1416_v57  ;;  %v2739_v17 = vrot.slane %v4249_v10, 1  ;;  %v2740_v19 = vrot.slane %v4250_v13, 1  ;;  %v532_v21 = vshll.u32 %v4251_v6, 16  ;;  %v4253_v26 = vld [vmem:[%s4520_s17 + $0x24] sm:$0xfe]   ;;  %v4265_v50 = vld [vmem:[%s4520_s17 + $0x30] sm:$0xff]  }
  0x23   : > { %1600 = vrot.lane.b32.xlu1 %v1429_v55, %s4482_s22  ;;  %v2324_v15 = vor.u32 %v2323_v8, %v2319_v3  ;;  %v2317_v18 = vsel %vm504_vm1, %v2312_v12, %v2316_v7  ;;  %v542_v22 = vshrl.u32 %v4255_v11, 16  ;;  %v537_v25 = vshll.u32 %v4252_v20, 16  ;;  %v4254_v27 = vld [vmem:[%s4520_s17 + $0x2c] ss:$0 sps:$4 sm:$0x11]   ;;  %v4263_v47 = vld [vmem:[%s4520_s17 + $0x24] sm:$0xff]  }
  0x24   : > { %1598 = vrot.lane.b32.xlu0 %v1417_v62, %s4482_s22  ;;  %v534_v24 = vrot.slane %v532_v21, 1  ;;  %v544_v28 = vshll.u32 %v4255_v11, 16  ;;  %v2741_v29 = vsel %vm938_vm0, %v2739_v17, %v2740_v19  ;;  %v2742_v32 = vrot.slane %v4253_v26, 1  ;;  %v4256_v34 = vld [vmem:[%s4520_s17 + $0x2c] ss:$0 sps:$4 sm:$0x11]  }
  0x25   : > { %v2329_v23 = vsel %vm504_vm1, %v2324_v15, %v2328_v16  ;;  %v539_v31 = vrot.slane %v537_v25, 1  ;;  %v2743_v33 = vrot.slane %v4254_v27, 1  ;;  %v4257_v37 = vld [vmem:[%s4520_s17 + $0x18] sm:$0xfe]   ;;  %v549_v39 = vshll.u32 %v4256_v34, 16  ;;  %v4273_v16 = vld [vmem:[%s4520_s17 + $0x30] sm:$0xff]  }
  0x26   : > { %v535_v30 = vor.u32 %v534_v24, %v530_v14  ;;  %v546_v35 = vrot.slane %v544_v28, 1  ;;  %v4258_v40 = vld [vmem:[%s4520_s17 + $0x20] ss:$0 sps:$4 sm:$0x11]   ;;  %v945_v42 = vrot.slane %v4257_v37, 1  ;;  %v1431_v53 = vshrl.u32 %v4263_v47, 16 }
  0x27   : > { %2067 = vrot.lane.b32.xlu1 %v4244_v54, %s4483_s23  ;;  %v2744_v41 = vsel %vm938_vm0, %v2742_v32, %v2743_v33  ;;  %v551_v43 = vrot.slane %v549_v39, 1  ;;  %v946_v44 = vrot.slane %v4258_v40, 1  ;;  %v4259_v45 = vld [vmem:[%s4520_s17 + $0x24] sm:$0xfe]   ;;  %v1433_v56 = vshll.u32 %v4263_v47, 16  ;;  %v4275_v21 = vld [vmem:[%s4520_s17 + $0x3c] sm:$0xff]  }
  0x28   : > { %2065 = vrot.lane.b32.xlu0 %v4243_v59, %s4483_s23  ;;  %v540_v36 = vsel %vm504_vm1, %v535_v30, %v539_v31  ;;  %v547_v38 = vor.u32 %v546_v35, %v542_v22  ;;  %v4260_v46 = vld [vmem:[%s4520_s17 + $0x2c] ss:$0 sps:$4 sm:$0x11]   ;;  %v948_v49 = vrot.slane %v4259_v45, 1  ;;  %v4261_v54 = vld [vmem:[%s4520_s17 + $0x24] sm:$0xff]   ;;  %v1443_v62 = vshrl.u32 %v4265_v50, 16 }
  0x29   : > { %v947_v51 = vsel %vm938_vm0, %v945_v42, %v946_v44  ;;  %v949_v52 = vrot.slane %v4260_v46, 1  ;;  %v4264_v55 = vld [vmem:[%s4520_s17 + $0x2c] ss:$0 sps:$4 sm:$0x11]   ;;  %v1435_v59 = vrot.slane %v1433_v56, 1  ;;  %v1445_v63 = vshll.u32 %v4265_v50, 16 }
  0x2a   : > { %v552_v48 = vsel %vm504_vm1, %v547_v38, %v551_v43  ;;  %v1438_v60 = vshll.u32 %v4264_v55, 16  ;;  %v4266_v61 = vld [vmem:[%s4520_s17 + $0x38] ss:$0 sps:$4 sm:$0x11]   ;;  %v4267_v3 = vld [vmem:[%s4520_s17 + $0x24] sm:$0xfe]  }
  0x2b   : > { %2500 = vrot.lane.b32.xlu1 %v2329_v23, %s4484_s24  ;;  %v950_v57 = vsel %vm938_vm0, %v948_v49, %v949_v52  ;;  %v1436_v0 = vor.u32 %v1435_v59, %v1431_v53  ;;  %v1450_v2 = vshll.u32 %v4266_v61, 16  ;;  %v1447_v4 = vrot.slane %v1445_v63, 1  ;;  %v4268_v5 = vld [vmem:[%s4520_s17 + $0x2c] ss:$0 sps:$4 sm:$0x11]   ;;  %v4271_v23 = vld [vmem:[%s4520_s17 + $0x30] sm:$0xff]  }
  0x2c   : > { %2498 = vrot.lane.b32.xlu0 %v2317_v18, %s4484_s24  ;;  %v1440_v1 = vrot.slane %v1438_v60, 1  ;;  %v1845_v7 = vrot.slane %v4267_v3, 1  ;;  %v1846_v10 = vrot.slane %v4268_v5, 1  ;;  %v4269_v11 = vld [vmem:[%s4520_s17 + $0x30] sm:$0xfe]   ;;  %v2331_v19 = vshrl.u32 %v4273_v16, 16 }
  0x2d   : > { %v1452_v6 = vrot.slane %v1450_v2, 1  ;;  %v1448_v9 = vor.u32 %v1447_v4, %v1443_v62  ;;  %v4270_v12 = vld [vmem:[%s4520_s17 + $0x38] ss:$0 sps:$4 sm:$0x11]   ;;  %v1848_v14 = vrot.slane %v4269_v11, 1  ;;  %v2333_v20 = vshll.u32 %v4273_v16, 16 }
  0x2e   : > { %v1441_v8 = vsel %vm504_vm1, %v1436_v0, %v1440_v1  ;;  %v1849_v15 = vrot.slane %v4270_v12, 1  ;;  %v1847_v17 = vsel %vm938_vm0, %v1845_v7, %v1846_v10  ;;  %v4274_v18 = vld [vmem:[%s4520_s17 + $0x38] ss:$0 sps:$4 sm:$0x11]   ;;  %v4272_v24 = vld [vmem:[%s4520_s17 + $0x3c] sm:$0xff]   ;;  %v2343_v28 = vshrl.u32 %v4275_v21, 16 }
  0x2f   : > { %701 = vrot.lane.b32.xlu1 %v540_v36, %s4481_s21  ;;  %v1453_v13 = vsel %vm504_vm1, %v1448_v9, %v1452_v6  ;;  %v2335_v25 = vrot.slane %v2333_v20, 1  ;;  %v2338_v26 = vshll.u32 %v4274_v18, 16  ;;  %v4276_v27 = vld [vmem:[%s4520_s17 + $0x44] ss:$0 sps:$4 sm:$0x11]   ;;  %v4279_v30 = vld [vmem:[%s4520_s17 + $0x30] sm:$0xff]  }
  0x30   : > { %2787 = vrot.lane.b32.xlu0 %v2741_v29, %s4485_s25  ;;  %v1850_v22 = vsel %vm938_vm0, %v1848_v14, %v1849_v15  ;;  %v2345_v29 = vshll.u32 %v4275_v21, 16  ;;  %v2350_v33 = vshll.u32 %v4276_v27, 16  ;;  %v4277_v34 = vld [vmem:[%s4520_s17 + $0x30] sm:$0xfe]   ;;  %v554_v42 = vshrl.u32 %v4279_v30, 16  ;;  %v4283_v50 = vld [vmem:[%s4520_s17 + $0x3c] sm:$0xff]  }
  0x31   : > { %v2336_v31 = vor.u32 %v2335_v25, %v2331_v19  ;;  %v2340_v32 = vrot.slane %v2338_v26, 1  ;;  %v4278_v36 = vld [vmem:[%s4520_s17 + $0x38] ss:$0 sps:$4 sm:$0x11]   ;;  %v2745_v38 = vrot.slane %v4277_v34, 1  ;;  %v556_v43 = vshll.u32 %v4279_v30, 16 }
  0x32   : > { %v2347_v35 = vrot.slane %v2345_v29, 1  ;;  %v2352_v37 = vrot.slane %v2350_v33, 1  ;;  %v2746_v40 = vrot.slane %v4278_v36, 1  ;;  %v4282_v49 = vld [vmem:[%s4520_s17 + $0x44] ss:$0 sps:$4 sm:$0x11]  }
  0x33   : > { %703 = vrot.lane.b32.xlu1 %v552_v48, %s4481_s21  ;;  %v2341_v44 = vsel %vm504_vm1, %v2336_v31, %v2340_v32  ;;  %v558_v46 = vrot.slane %v556_v43, 1  ;;  %v4281_v48 = vld [vmem:[%s4520_s17 + $0x3c] sm:$0xfe]   ;;  %v2749_v55 = vrot.slane %v4282_v49, 1  ;;  %v4285_v60 = vld [vmem:[%s4520_s17 + $0x30] sm:$0xfe]  }
  0x34   : > { %2789 = vrot.lane.b32.xlu0 %v2744_v41, %s4485_s25  ;;  %v2348_v39 = vor.u32 %v2347_v35, %v2343_v28  ;;  %v4280_v41 = vld [vmem:[%s4520_s17 + $0x38] ss:$0 sps:$4 sm:$0x11]   ;;  %v2748_v53 = vrot.slane %v4281_v48, 1  ;;  %v951_v0 = vrot.slane %v4285_v60, 1  ;;  %v4291_v7 = vld [vmem:[%s4520_s17 + $0x3c] sm:$0xff]  }
  0x35   : > { %v561_v47 = vshll.u32 %v4280_v41, 16  ;;  %v4284_v56 = vld [vmem:[%s4520_s17 + $0x44] ss:$0 sps:$4 sm:$0x11]   ;;  %v4287_v5 = vld [vmem:[%s4520_s17 + $0x3c] sm:$0xfe]  }
  0x36   : > { %v2353_v45 = vsel %vm504_vm1, %v2348_v39, %v2352_v37  ;;  %v573_v62 = vshll.u32 %v4284_v56, 16  ;;  %v4286_v63 = vld [vmem:[%s4520_s17 + $0x38] ss:$0 sps:$4 sm:$0x11]   ;;  %v2750_v1 = vsel %vm938_vm0, %v2748_v53, %v2749_v55  ;;  %v954_v9 = vrot.slane %v4287_v5, 1  ;;  %v4293_v10 = vld [vmem:[%s4520_s17 + $0x48] sm:$0xff]  }
  0x37   : > { %993 = vrot.lane.b32.xlu1 %v950_v57, %s4480_s20  ;;  %v563_v52 = vrot.slane %v561_v47, 1  ;;  %v566_v57 = vshrl.u32 %v4283_v50, 16  ;;  %v952_v4 = vrot.slane %v4286_v63, 1  ;;  %v4288_v6 = vld [vmem:[%s4520_s17 + $0x44] ss:$0 sps:$4 sm:$0x11]  }
  0x38   : > { %991 = vrot.lane.b32.xlu0 %v947_v51, %s4480_s20  ;;  %v559_v51 = vor.u32 %v558_v46, %v554_v42  ;;  %v575_v3 = vrot.slane %v573_v62, 1  ;;  %v955_v11 = vrot.slane %v4288_v6, 1  ;;  %v1455_v12 = vshrl.u32 %v4291_v7, 16  ;;  %v4289_v19 = vld [vmem:[%s4520_s17 + $0x3c] sm:$0xff]   ;;  %v4290_v21 = vld [vmem:[%s4520_s17 + $0x48] sm:$0xff]   ;;  %v4303_v48 = vld [vmem:[%s4520_s17 + $0x54] sm:$0xff]  }
  0x39   : > { %v1457_v14 = vshll.u32 %v4291_v7, 16  ;;  %v1467_v15 = vshrl.u32 %v4293_v10, 16  ;;  %v1469_v18 = vshll.u32 %v4293_v10, 16  ;;  %v4295_v29 = vld [vmem:[%s4520_s17 + $0x3c] sm:$0xfe]   ;;  %v4301_v31 = vld [vmem:[%s4520_s17 + $0x48] sm:$0xff]  }
  0x3a   : > { %v564_v59 = vsel %vm504_vm1, %v559_v51, %v563_v52  ;;  %v956_v16 = vsel %vm938_vm0, %v954_v9, %v955_v11  ;;  %v4296_v30 = vld [vmem:[%s4520_s17 + $0x44] ss:$0 sps:$4 sm:$0x11]   ;;  %v1851_v33 = vrot.slane %v4295_v29, 1  ;;  %v4297_v34 = vld [vmem:[%s4520_s17 + $0x48] sm:$0xfe]  }
  0x3b   : > { %1171 = vrot.lane.b32.xlu1 %v4262_v58, %s4478_s18  ;;  %v568_v58 = vshll.u32 %v4283_v50, 16  ;;  %v1459_v20 = vrot.slane %v1457_v14, 1  ;;  %v1852_v36 = vrot.slane %v4296_v30, 1  ;;  %v4298_v37 = vld [vmem:[%s4520_s17 + $0x50] ss:$0 sps:$4 sm:$0x11]  }
  0x3c   : > { %1169 = vrot.lane.b32.xlu0 %v4261_v54, %s4478_s18  ;;  %v2747_v54 = vsel %vm938_vm0, %v2745_v38, %v2746_v40  ;;  %v1854_v39 = vrot.slane %v4297_v34, 1  ;;  %v2355_v40 = vshrl.u32 %v4301_v31, 16  ;;  %v1855_v41 = vrot.slane %v4298_v37, 1  ;;  %v4299_v47 = vld [vmem:[%s4520_s17 + $0x48] sm:$0xff]   ;;  %v4300_v50 = vld [vmem:[%s4520_s17 + $0x54] sm:$0xff]  }
  0x3d   : > { %v570_v61 = vrot.slane %v568_v58, 1  ;;  %v1460_v25 = vor.u32 %v1459_v20, %v1455_v12  ;;  %v2357_v42 = vshll.u32 %v4301_v31, 16  ;;  %v1853_v43 = vsel %vm938_vm0, %v1851_v33, %v1852_v36  ;;  %v4304_v49 = vld [vmem:[%s4520_s17 + $0x5c] ss:$0 sps:$4 sm:$0x11]   ;;  %v4307_v55 = vld [vmem:[%s4520_s17 + $0x48] sm:$0xff]  }
  0x3e   : > { %v1856_v46 = vsel %vm938_vm0, %v1854_v39, %v1855_v41  ;;  %v2367_v52 = vshrl.u32 %v4303_v48, 16  ;;  %v2369_v53 = vshll.u32 %v4303_v48, 16  ;;  %v4305_v58 = vld [vmem:[%s4520_s17 + $0x48] sm:$0xfe]   ;;  %v4309_v6 = vld [vmem:[%s4520_s17 + $0x54] sm:$0xfe]  }
  0x3f   : > { %1604 = vrot.lane.b32.xlu1 %v1453_v13, %s4482_s22  ;;  %v571_v2 = vor.u32 %v570_v61, %v566_v57  ;;  %v953_v13 = vsel %vm938_vm0, %v951_v0, %v952_v4  ;;  %v2751_v62 = vrot.slane %v4305_v58, 1  ;;  %v578_v0 = vshrl.u32 %v4307_v55, 16  ;;  %v4310_v10 = vld [vmem:[%s4520_s17 + $0x5c] ss:$0 sps:$4 sm:$0x11]   ;;  %v4319_v31 = vld [vmem:[%s4520_s17 + $0x54] sm:$0xff]  }
  0x40   : > { %1602 = vrot.lane.b32.xlu0 %v1441_v8, %s4482_s22  ;;  %v2371_v60 = vrot.slane %v2369_v53, 1  ;;  %v580_v4 = vshll.u32 %v4307_v55, 16  ;;  %v2754_v12 = vrot.slane %v4309_v6, 1  ;;  %v4316_v30 = vld [vmem:[%s4520_s17 + $0x5c] ss:$0 sps:$4 sm:$0x11]  }
  0x41   : > { %v576_v8 = vsel %vm504_vm1, %v571_v2, %v575_v3  ;;  %v4308_v3 = vld [vmem:[%s4520_s17 + $0x50] ss:$0 sps:$4 sm:$0x11]   ;;  %v4321_v33 = vld [vmem:[%s4520_s17 + $0x60] sm:$0xff]   ;;  %v1479_v36 = vshrl.u32 %v4319_v31, 16  ;;  %v1481_v39 = vshll.u32 %v4319_v31, 16 }
  0x42   : > { %v2372_v2 = vor.u32 %v2371_v60, %v2367_v52  ;;  %v585_v9 = vshll.u32 %v4308_v3, 16  ;;  %v1491_v41 = vshrl.u32 %v4321_v33, 16  ;;  %v4323_v52 = vld [vmem:[%s4520_s17 + $0x54] sm:$0xfe]   ;;  %v4329_v55 = vld [vmem:[%s4520_s17 + $0x60] sm:$0xff]   ;;  %v4331_v3 = vld [vmem:[%s4520_s17 + $0x6c] sm:$0xff]  }
  0x43   : > { %1893 = vrot.lane.b32.xlu1 %v1850_v22, %s4479_s19  ;;  %v4326_v60 = vld [vmem:[%s4520_s17 + $0x68] ss:$0 sps:$4 sm:$0x11]  }
  0x44   : > { %1891 = vrot.lane.b32.xlu0 %v1847_v17, %s4479_s19  ;;  %v4292_v17 = vld [vmem:[%s4520_s17 + $0x44] ss:$0 sps:$4 sm:$0x11]   ;;  %v4337_v31 = vld [vmem:[%s4520_s17 + $0x68] ss:$0 sps:$4 sm:$0x11]  }
  0x45   : > { %v1462_v22 = vshll.u32 %v4292_v17, 16 }
  0x47   : > { %2071 = vrot.lane.b32.xlu1 %v4272_v24, %s4483_s23  ;;  %v1471_v24 = vrot.slane %v1469_v18, 1  ;;  %v1464_v26 = vrot.slane %v1462_v22, 1  ;;  %v4312_v18 = vld [vmem:[%s4520_s17 + $0x5c] ss:$0 sps:$4 sm:$0x11]  }
  0x48   : > { %2069 = vrot.lane.b32.xlu0 %v4271_v23, %s4483_s23  ;;  %v4294_v23 = vld [vmem:[%s4520_s17 + $0x50] ss:$0 sps:$4 sm:$0x11]  }
  0x49   : > { %v1472_v27 = vor.u32 %v1471_v24, %v1467_v15  ;;  %v1474_v28 = vshll.u32 %v4294_v23, 16  ;;  %v1465_v35 = vsel %vm504_vm1, %v1460_v25, %v1464_v26  ;;  %v587_v15 = vrot.slane %v585_v9, 1  ;;  %v4314_v24 = vld [vmem:[%s4520_s17 + $0x50] ss:$0 sps:$4 sm:$0x11]  }
  0x4a   : > { %v597_v23 = vshll.u32 %v4312_v18, 16  ;;  %v4315_v26 = vld [vmem:[%s4520_s17 + $0x54] sm:$0xfe]   ;;  %v958_v29 = vrot.slane %v4314_v24, 1 }
  0x4b   : > { %2504 = vrot.lane.b32.xlu1 %v2353_v45, %s4484_s24  ;;  %v1476_v32 = vrot.slane %v1474_v28, 1  ;;  %v2359_v45 = vrot.slane %v2357_v42, 1  ;;  %v1493_v42 = vshll.u32 %v4321_v33, 16  ;;  %v4338_v33 = vld [vmem:[%s4520_s17 + $0xc] sm:$0xff]  }
  0x4c   : > { %2502 = vrot.lane.b32.xlu0 %v2341_v44, %s4484_s24  ;;  %v4302_v44 = vld [vmem:[%s4520_s17 + $0x50] ss:$0 sps:$4 sm:$0x11]   ;;  %v599_v28 = vrot.slane %v597_v23, 1  ;;  %313 = vst.msk [vmem:[#allocation2 + $0x8] sm:$0xff] %vm311_vm2, %v4338_v33 }
  0x4d   : > { %v1477_v38 = vsel %vm504_vm1, %v1472_v27, %v1476_v32  ;;  %v2362_v51 = vshll.u32 %v4302_v44, 16  ;;  %v2360_v56 = vor.u32 %v2359_v45, %v2355_v40  ;;  %v960_v32 = vrot.slane %v4315_v26, 1 }
  0x4e   : > { %v1483_v44 = vrot.slane %v1481_v39, 1  ;;  %v1495_v48 = vrot.slane %v1493_v42, 1  ;;  %v4339_v39 = vld [vmem:[%s4520_s17 + $0x6c] sm:$0xfe]  }
  0x4f   : > { %705 = vrot.lane.b32.xlu1 %v564_v59, %s4481_s21  ;;  %v2364_v57 = vrot.slane %v2362_v51, 1  ;;  %v4306_v59 = vld [vmem:[%s4520_s17 + $0x50] ss:$0 sps:$4 sm:$0x11]  }
  0x50   : > { %2791 = vrot.lane.b32.xlu0 %v2747_v54, %s4485_s25  ;;  %v2374_v54 = vshll.u32 %v4304_v49, 16  ;;  %v2752_v63 = vrot.slane %v4306_v59, 1  ;;  %v1484_v49 = vor.u32 %v1483_v44, %v1479_v36  ;;  %v1496_v53 = vor.u32 %v1495_v48, %v1491_v41  ;;  %v4325_v59 = vld [vmem:[%s4520_s17 + $0x60] sm:$0xfe]   ;;  %v4341_v41 = vld [vmem:[%s4520_s17 + $0x6c] sm:$0xff]  }
  0x51   : > { %v2365_v5 = vsel %vm504_vm1, %v2360_v56, %v2364_v57  ;;  %v1857_v57 = vrot.slane %v4323_v52, 1  ;;  %v614_v48 = vshrl.u32 %v4341_v41, 16 }
  0x52   : > { %v2376_v61 = vrot.slane %v2374_v54, 1  ;;  %v2753_v17 = vsel %vm938_vm0, %v2751_v62, %v2752_v63  ;;  %v4324_v54 = vld [vmem:[%s4520_s17 + $0x5c] ss:$0 sps:$4 sm:$0x11]   ;;  %v1860_v63 = vrot.slane %v4325_v59, 1 }
  0x53   : > { %707 = vrot.lane.b32.xlu1 %v576_v8, %s4481_s21  ;;  %v582_v8 = vrot.slane %v580_v4, 1  ;;  %v1858_v58 = vrot.slane %v4324_v54, 1 }
  0x54   : > { %2793 = vrot.lane.b32.xlu0 %v2750_v1, %s4485_s25  ;;  %v4311_v1 = vld [vmem:[%s4520_s17 + $0x54] sm:$0xff]   ;;  %v2377_v7 = vsel %vm504_vm1, %v2372_v2, %v2376_v61  ;;  %v4330_v2 = vld [vmem:[%s4520_s17 + $0x68] ss:$0 sps:$4 sm:$0x11]  }
  0x55   : > { %v590_v11 = vshrl.u32 %v4311_v1, 16  ;;  %v583_v14 = vor.u32 %v582_v8, %v578_v0  ;;  %v1861_v0 = vrot.slane %v4326_v60, 1  ;;  %v1859_v4 = vsel %vm938_vm0, %v1857_v57, %v1858_v58 }
  0x57   : > { %997 = vrot.lane.b32.xlu1 %v956_v16, %s4480_s20  ;;  %v2755_v16 = vrot.slane %v4310_v10, 1  ;;  %v588_v20 = vsel %vm504_vm1, %v583_v14, %v587_v15  ;;  %v1862_v9 = vsel %vm938_vm0, %v1860_v63, %v1861_v0  ;;  %v4327_v10 = vld [vmem:[%s4520_s17 + $0x60] sm:$0xff]   ;;  %v2393_v14 = vshll.u32 %v4331_v3, 16  ;;  %v4328_v15 = vld [vmem:[%s4520_s17 + $0x6c] sm:$0xff]  }
  0x58   : > { %995 = vrot.lane.b32.xlu0 %v953_v13, %s4480_s20  ;;  %v592_v13 = vshll.u32 %v4311_v1, 16  ;;  %v2381_v1 = vshll.u32 %v4329_v55, 16  ;;  %v4345_v63 = vld [vmem:[%s4520_s17 + $0x6c] sm:$0xfe]  }
  0x59   : > { %v2756_v27 = vsel %vm938_vm0, %v2754_v12, %v2755_v16  ;;  %v4332_v12 = vld [vmem:[%s4520_s17 + $0x74] ss:$0 sps:$4 sm:$0x11]   ;;  %v4333_v16 = vld [vmem:[%s4520_s17] sm:$0xff]   ;;  %v2395_v18 = vrot.slane %v2393_v14, 1 }
  0x5a   : > { %v2383_v8 = vrot.slane %v2381_v1, 1  ;;  %312 = vst.msk [vmem:[#allocation2] sm:$0xff] %vm311_vm2, %v4333_v16  ;;  %v4346_v0 = vld [vmem:[%s4520_s17 + $0x74] ss:$0 sps:$4 sm:$0x11]   ;;  %v4347_v1 = vld [vmem:[%s5315_s1] sm:$0xff]  }
  0x5b   : > { %1175 = vrot.lane.b32.xlu1 %v4290_v21, %s4478_s18  ;;  %v4313_v21 = vld [vmem:[%s4520_s17 + $0x48] sm:$0xfe]   ;;  %4154 = vmatprep.subr.bf16.mxu0 %v4347_v1 }
  0x5c   : > { %1173 = vrot.lane.b32.xlu0 %v4289_v19, %s4478_s18  ;;  %v594_v19 = vrot.slane %v592_v13, 1  ;;  %v957_v25 = vrot.slane %v4313_v21, 1  ;;  %v2391_v13 = vshrl.u32 %v4331_v3, 16  ;;  %4155 = vmatpush3.bf16.msra.mxu0 %v4347_v1 }
  0x5d   : > { %4196 = vmatprep.subr.bf16.mxu1 %v4347_v1 }
  0x5e   : > { %v595_v22 = vor.u32 %v594_v19, %v590_v11  ;;  %v959_v37 = vsel %vm938_vm0, %v957_v25, %v958_v29  ;;  %v2386_v11 = vshll.u32 %v4330_v2, 16  ;;  %v2398_v19 = vshll.u32 %v4332_v12, 16  ;;  %v4335_v25 = vld [vmem:[%s4520_s17 + $0x68] ss:$0 sps:$4 sm:$0x11]   ;;  %v4351_v12 = vld [vmem:[%s4520_s17 + $0x6c] sm:$0xff]   ;;  %4201 = vmatpush3.bf16.msra.mxu1 %v4347_v1 }
  0x5f   : > { %1608 = vrot.lane.b32.xlu1 %v1477_v38, %s4482_s22  ;;  %v4320_v38 = vld [vmem:[%s4520_s17 + $0x5c] ss:$0 sps:$4 sm:$0x11]   ;;  %v2396_v23 = vor.u32 %v2395_v18, %v2391_v13  ;;  %v4352_v13 = vld [vmem:[%s4520_s17 + $0x74] ss:$0 sps:$4 sm:$0x11]  }
  0x60   : > { %1606 = vrot.lane.b32.xlu0 %v1465_v35, %s4482_s22  ;;  %v600_v34 = vsel %vm504_vm1, %v595_v22, %v599_v28  ;;  %v961_v35 = vrot.slane %v4316_v30, 1  ;;  %v1486_v45 = vshll.u32 %v4320_v38, 16  ;;  %v4334_v22 = vld [vmem:[%s4520_s17 + $0x60] sm:$0xfe]   ;;  %v2400_v24 = vrot.slane %v2398_v19, 1 }
  0x61   : > { %v2757_v28 = vrot.slane %v4334_v22, 1  ;;  %v2758_v30 = vrot.slane %v4335_v25, 1  ;;  %v1503_v16 = vshrl.u32 %v4351_v12, 16  ;;  %v1510_v18 = vshll.u32 %v4352_v13, 16 }
  0x62   : > { %v962_v40 = vsel %vm938_vm0, %v960_v32, %v961_v35  ;;  %v2401_v35 = vsel %vm504_vm1, %v2396_v23, %v2400_v24  ;;  %v4354_v19 = vld [vmem:[%s4520_s17 + $0x80] ss:$0 sps:$4 sm:$0x11]   ;;  %v4355_v23 = vld [vmem:[%s5315_s1 + $0x10] sm:$0xff]   ;;  %v4356_v24 = vld [vmem:[%s4520_s17 + $0x18] sm:$0xff]  }
  0x63   : > { %1897 = vrot.lane.b32.xlu1 %v1856_v46, %s4479_s19  ;;  %v4322_v46 = vld [vmem:[%s4520_s17 + $0x68] ss:$0 sps:$4 sm:$0x11]   ;;  %v2759_v42 = vsel %vm938_vm0, %v2757_v28, %v2758_v30  ;;  %v4361_v28 = vld [vmem:[%s5315_s1 + $0x18] sm:$0xff]   ;;  %314 = vst.msk [vmem:[#allocation2 + $0x10] sm:$0xff] %vm311_vm2, %v4356_v24 }
  0x64   : > { %1895 = vrot.lane.b32.xlu0 %v1853_v43, %s4479_s19  ;;  %v4317_v43 = vld [vmem:[%s4520_s17 + $0x54] sm:$0xff]   ;;  %v1498_v51 = vshll.u32 %v4322_v46, 16  ;;  %v2760_v46 = vrot.slane %v4339_v39, 1  ;;  %v4362_v30 = vld [vmem:[%s4520_s17 + $0x24] sm:$0xff]  }
  0x65   : > { %315 = vst.msk [vmem:[#allocation2 + $0x18] sm:$0xff] %vm311_vm2, %v4362_v30 }
  0x66   : > { %v1500_v56 = vrot.slane %v1498_v51, 1  ;;  %v4342_v51 = vld [vmem:[%s4520_s17 + $0x74] ss:$0 sps:$4 sm:$0x11]  }
  0x67   : > { %2075 = vrot.lane.b32.xlu1 %v4300_v50, %s4483_s23  ;;  %v1488_v50 = vrot.slane %v1486_v45, 1  ;;  %v621_v54 = vshll.u32 %v4342_v51, 16  ;;  %v4365_v51 = vld [vmem:[%s5315_s1 + $0x20] ss:$0 sps:$4 sm:$0xff]  }
  0x68   : > { %2073 = vrot.lane.b32.xlu0 %v4299_v47, %s4483_s23  ;;  %v4318_v47 = vld [vmem:[%s4520_s17 + $0x60] sm:$0xff]   ;;  %v1501_v62 = vsel %vm504_vm1, %v1496_v53, %v1500_v56  ;;  %v4344_v56 = vld [vmem:[%s4520_s17 + $0x68] ss:$0 sps:$4 sm:$0x11]  }
  0x69   : > { %v1489_v61 = vsel %vm504_vm1, %v1484_v49, %v1488_v50  ;;  %v616_v49 = vshll.u32 %v4341_v41, 16  ;;  %v623_v60 = vrot.slane %v621_v54, 1  ;;  %v2955_v54 = vsel %vm2953_vm11, %v4365_v51, 0 }
  0x6b   : > { %2508 = vrot.lane.b32.xlu1 %v2377_v7, %s4484_s24  ;;  %v2379_v7 = vshrl.u32 %v4329_v55, 16  ;;  %v618_v53 = vrot.slane %v616_v49, 1  ;;  %v4343_v55 = vld [vmem:[%s4520_s17 + $0x60] sm:$0xfe]   ;;  %v4363_v49 = vld [vmem:[%s4520_s17 + $0x78] sm:$0xff]  }
  0x6c   : > { %2506 = vrot.lane.b32.xlu0 %v2365_v5, %s4484_s24 }
  0x6d   : > { %v2384_v21 = vor.u32 %v2383_v8, %v2379_v7  ;;  %v619_v58 = vor.u32 %v618_v53, %v614_v48  ;;  %v967_v7 = vrot.slane %v4346_v0, 1  ;;  %v4350_v8 = vld [vmem:[%s5315_s1 + $0x8] sm:$0xff]  }
  0x6e   : > { %4156 = vmatprep.subr.bf16.mxu0 %v4350_v8  ;;  %4197 = vmatprep.subr.bf16.mxu1 %v4350_v8 }
  0x6f   : > { %709 = vrot.lane.b32.xlu1 %v588_v20, %s4481_s21  ;;  %v4336_v20 = vld [vmem:[%s4520_s17 + $0x60] sm:$0xff]   ;;  %v624_v2 = vsel %vm504_vm1, %v619_v58, %v623_v60  ;;  %4157 = vmatpush3.bf16.msra.mxu0 %v4350_v8 }
  0x70   : > { %2795 = vrot.lane.b32.xlu0 %v2753_v17, %s4485_s25  ;;  %v2388_v17 = vrot.slane %v2386_v11, 1  ;;  %v602_v29 = vshrl.u32 %v4336_v20, 16  ;;  %v604_v32 = vshll.u32 %v4336_v20, 16  ;;  %v4349_v11 = vld [vmem:[%s4520_s17 + $0x78] sm:$0xff]   ;;  %4202 = vmatpush3.bf16.msra.mxu1 %v4350_v8 }
  0x71   : > { %4158 = vmatprep.subr.bf16.mxu0 %v4355_v23  ;;  %4198 = vmatprep.subr.bf16.mxu1 %v4355_v23 }
  0x72   : > { %v606_v36 = vrot.slane %v604_v32, 1 }
  0x73   : > { %711 = vrot.lane.b32.xlu1 %v600_v34, %s4481_s21  ;;  %v2389_v34 = vsel %vm504_vm1, %v2384_v21, %v2388_v17  ;;  %v1505_v17 = vshll.u32 %v4351_v12, 16  ;;  %4159 = vmatpush3.bf16.msra.mxu0 %v4355_v23 }
  0x74   : > { %2797 = vrot.lane.b32.xlu0 %v2756_v27, %s4485_s25  ;;  %4160 = vmatprep.subr.bf16.mxu0 %v4361_v28 }
  0x75   : > { %v1507_v25 = vrot.slane %v1505_v17, 1  ;;  %4203 = vmatpush3.bf16.msra.mxu1 %v4355_v23 }
  0x76   : > { %4199 = vmatprep.subr.bf16.mxu1 %v4361_v28 }
  0x77   : > { %1001 = vrot.lane.b32.xlu1 %v962_v40, %s4480_s20  ;;  %v4340_v40 = vld [vmem:[%s4520_s17 + $0x74] ss:$0 sps:$4 sm:$0x11]   ;;  %v1508_v32 = vor.u32 %v1507_v25, %v1503_v16  ;;  %4161 = vmatpush3.bf16.msra.mxu0 %v4361_v28 }
  0x78   : > { %999 = vrot.lane.b32.xlu0 %v959_v37, %s4480_s20  ;;  %v609_v37 = vshll.u32 %v4337_v31, 16  ;;  %4206 = vmatprep.subr.msk.bf16.mxu0 %vm2953_vm11, %v4365_v51 }
  0x79   : > { %4204 = vmatpush3.bf16.msra.mxu1 %v4361_v28  ;;  %v4374_v28 = vld [vmem:[%s4520_s17 + $0x84] sm:$0xfe]  }
  0x7a   : > { %v611_v44 = vrot.slane %v609_v37, 1  ;;  %v4358_v37 = vld [vmem:[%s4520_s17 + $0x74] ss:$0 sps:$4 sm:$0x11]   ;;  %4207 = vmatprep.subr.msk.bf16.mxu1 %vm2953_vm11, %v4365_v51 }
  0x7b   : > { %1179 = vrot.lane.b32.xlu1 %v4318_v47, %s4478_s18  ;;  %v2761_v47 = vrot.slane %v4340_v40, 1  ;;  %v1864_v41 = vrot.slane %v4358_v37, 1  ;;  %4163 = vmatpush3.bf16.msra.mxu0 %v2955_v54  ;;  %v4377_v37 = vld [vmem:[%s4520_s17 + $0x8c] ss:$0 sps:$4 sm:$0x11]  }
  0x7c   : > { %1177 = vrot.lane.b32.xlu0 %v4317_v43, %s4478_s18  ;;  %v607_v43 = vor.u32 %v606_v36, %v602_v29 }
  0x7d   : > { %v2762_v57 = vsel %vm938_vm0, %v2760_v46, %v2761_v47  ;;  %4205 = vmatpush3.bf16.msra.mxu1 %v2955_v54  ;;  %v4384_v54 = vld [vmem:[%s4520_s17 + $0x84] sm:$0xff]  }
  0x7e   : > { %v612_v50 = vsel %vm504_vm1, %v607_v43, %v611_v44  ;;  %v4360_v43 = vld [vmem:[%s4520_s17 + $0x80] ss:$0 sps:$4 sm:$0x11]  }
  0x7f   : > { %1612 = vrot.lane.b32.xlu1 %v1501_v62, %s4482_s22  ;;  %v964_v62 = vrot.slane %v4344_v56, 1  ;;  %v1867_v48 = vrot.slane %v4360_v43, 1 }
  0x80   : > { %1610 = vrot.lane.b32.xlu0 %v1489_v61, %s4482_s22  ;;  %v963_v61 = vrot.slane %v4343_v55, 1  ;;  %v4367_v55 = vld [vmem:[%s4520_s17 + $0x80] ss:$0 sps:$4 sm:$0x11]  }
  0x83   : > { %1901 = vrot.lane.b32.xlu1 %v1862_v9, %s4479_s19 }
  0x84   : > { %v4726_v5 = vpop.permute.xlu1 %1167  ;;  %v4728_v6 = vpop.permute.xlu0 %1165  ;;  %1899 = vrot.lane.b32.xlu0 %v1859_v4, %s4479_s19  ;;  %v966_v4 = vrot.slane %v4345_v63, 1  ;;  %v4369_v63 = vld [vmem:[%s4520_s17 + $0x8c] ss:$0 sps:$4 sm:$0x11]  }
  0x87   : > { %2079 = vrot.lane.b32.xlu1 %v4328_v15, %s4483_s23  ;;  %v4353_v15 = vld [vmem:[%s4520_s17 + $0x78] sm:$0xff]  }
  0x88   : > { %v4741_v26 = vpop.permute.xlu0 %1887  ;;  %2077 = vrot.lane.b32.xlu0 %v4327_v10, %s4483_s23  ;;  %v4348_v10 = vld [vmem:[%s4520_s17 + $0x6c] sm:$0xff]   ;;  %v1515_v21 = vshrl.u32 %v4353_v15, 16  ;;  %v1517_v22 = vshll.u32 %v4353_v15, 16 }
  0x89   : > { %v988_v27 = vpop.permute.xlu1 %987 }
  0x8a   : > { %v1519_v29 = vrot.slane %v1517_v22, 1 }
  0x8b   : > { %2512 = vrot.lane.b32.xlu1 %v2401_v35, %s4484_s24 }
  0x8c   : > { %2510 = vrot.lane.b32.xlu0 %v2389_v34, %s4484_s24  ;;  %v4357_v34 = vld [vmem:[%s4520_s17 + $0x6c] sm:$0xfe]   ;;  %v1520_v36 = vor.u32 %v1519_v29, %v1515_v21  ;;  %v4375_v29 = vld [vmem:[%s4520_s17 + $0x8c] ss:$0 sps:$4 sm:$0x11]  }
  0x8d   : > { %v990_v38 = vpop.permute.xlu1 %989  ;;  %v1863_v39 = vrot.slane %v4357_v34, 1  ;;  %v2766_v34 = vrot.slane %v4374_v28, 1  ;;  %v4394_v28 = vld [vmem:[%s4520_s17 + $0x90] sm:$0xff]  }
  0x8e   : > { %v698_v45 = vpop.permute.xlu0 %697 }
  0x8f   : > { %746 = vst.msk [vmem:[#allocation2] sm:$0xff] %vm745_vm3, %v698_v45  ;;  %713 = vrot.lane.b32.xlu1 %v612_v50, %s4481_s21  ;;  %v1865_v46 = vsel %vm938_vm0, %v1863_v39, %v1864_v41  ;;  %v4364_v50 = vld [vmem:[%s4520_s17 + $0x84] sm:$0xff]  }
  0x90   : > { %1036 = vst.msk [vmem:[#allocation2] sm:$0xff] %vm1035_vm4, %v988_v27  ;;  %2799 = vrot.lane.b32.xlu0 %v2759_v42, %s4485_s25  ;;  %v1522_v27 = vshll.u32 %v4354_v19, 16  ;;  %v4359_v42 = vld [vmem:[%s4520_s17 + $0x78] sm:$0xfe]  }
  0x91   : > { %v1890_v52 = vpop.permute.xlu1 %1889  ;;  %1214 = vst.msk [vmem:[#allocation2] sm:$0xff] %vm1213_vm5, %v4728_v6  ;;  %v965_v6 = vsel %vm938_vm0, %v963_v61, %v964_v62  ;;  %v1866_v47 = vrot.slane %v4359_v42, 1  ;;  %v2410_v61 = vshll.u32 %v4367_v55, 16  ;;  %v4368_v62 = vld [vmem:[%s4520_s17 + $0x84] sm:$0xff]   ;;  %v4378_v42 = vld [vmem:[%s4520_s17 + $0x78] sm:$0xfe]  }
  0x92   : > { %v700_v59 = vpop.permute.xlu0 %699  ;;  %v1524_v33 = vrot.slane %v1522_v27, 1 }
  0x93   : > { %747 = vst.msk [vmem:[#allocation2 + $0x8] sm:$0xff] %vm745_vm3, %v700_v59  ;;  %715 = vrot.lane.b32.xlu1 %v624_v2, %s4481_s21  ;;  %v1868_v53 = vsel %vm938_vm0, %v1866_v47, %v1867_v48  ;;  %v2412_v1 = vrot.slane %v2410_v61, 1  ;;  %v2415_v2 = vshrl.u32 %v4368_v62, 16 }
  0x94   : > { %1037 = vst.msk [vmem:[#allocation2 + $0x8] sm:$0xff] %vm1035_vm4, %v990_v38  ;;  %2801 = vrot.lane.b32.xlu0 %v2762_v57, %s4485_s25  ;;  %v1525_v40 = vsel %vm504_vm1, %v1520_v36, %v1524_v33 }
  0x95   : > { %v1601_v3 = vpop.permute.xlu1 %1600  ;;  %1215 = vst.msk [vmem:[#allocation2 + $0x8] sm:$0xff] %vm1213_vm5, %v4726_v5  ;;  %v968_v5 = vsel %vm938_vm0, %v966_v4, %v967_v7  ;;  %v4370_v4 = vld [vmem:[%s4520_s17 + $0x78] sm:$0xfe]  }
  0x96   : > { %1648 = vst.msk [vmem:[#allocation2 + $0x8] sm:$0xff] %vm1646_vm6, %v1601_v3  ;;  %v1599_v9 = vpop.permute.xlu0 %1598  ;;  %v2417_v3 = vshll.u32 %v4368_v62, 16  ;;  %v4385_v62 = vld [vmem:[%s4520_s17 + $0x8c] ss:$0 sps:$4 sm:$0x11]  }
  0x97   : > { %1647 = vst.msk [vmem:[#allocation2] sm:$0xff] %vm1646_vm6, %v1599_v9  ;;  %1005 = vrot.lane.b32.xlu1 %v968_v5, %s4480_s20  ;;  %v2422_v9 = vshll.u32 %v4369_v63, 16  ;;  %v4376_v5 = vld [vmem:[%s4520_s17 + $0x84] sm:$0xff]   ;;  %v1529_v63 = vshll.u32 %v4384_v54, 16 }
  0x98   : > { %1937 = vst.msk [vmem:[#allocation2 + $0x8] sm:$0xff] %vm1935_vm7, %v1890_v52  ;;  %1003 = vrot.lane.b32.xlu0 %v965_v6, %s4480_s20  ;;  %1936 = vst.msk [vmem:[#allocation2] sm:$0xff] %vm1935_vm7, %v4741_v26  ;;  %v1512_v26 = vrot.slane %v1510_v18, 1  ;;  %v4366_v52 = vld [vmem:[%s4520_s17 + $0x78] sm:$0xff]   ;;  %v2419_v13 = vrot.slane %v2417_v3, 1 }
  0x99   : > { %v2068_v14 = vpop.permute.xlu1 %2067  ;;  %v2403_v56 = vshrl.u32 %v4366_v52, 16  ;;  %v2405_v57 = vshll.u32 %v4366_v52, 16  ;;  %v4372_v6 = vld [vmem:[%s4520_s17 + $0x78] sm:$0xff]   ;;  %v2424_v15 = vrot.slane %v2422_v9, 1  ;;  %v1531_v3 = vrot.slane %v1529_v63, 1 }
  0x9a   : > { %2115 = vst.msk [vmem:[#allocation2 + $0x8] sm:$0xff] %vm2113_vm8, %v2068_v14  ;;  %v2066_v20 = vpop.permute.xlu0 %2065  ;;  %v1513_v38 = vsel %vm504_vm1, %v1508_v32, %v1512_v26  ;;  %v2763_v14 = vrot.slane %v4370_v4, 1  ;;  %v626_v17 = vshrl.u32 %v4372_v6, 16  ;;  %v628_v18 = vshll.u32 %v4372_v6, 16 }
  0x9b   : > { %2114 = vst.msk [vmem:[#allocation2] sm:$0xff] %vm2113_vm8, %v2066_v20  ;;  %1183 = vrot.lane.b32.xlu1 %v4349_v11, %s4478_s18  ;;  %v2407_v60 = vrot.slane %v2405_v57, 1  ;;  %v2420_v19 = vor.u32 %v2419_v13, %v2415_v2  ;;  %v4373_v20 = vld [vmem:[%s4520_s17 + $0x80] ss:$0 sps:$4 sm:$0x11]   ;;  %v640_v32 = vshll.u32 %v4376_v5, 16 }
  0x9c   : > { %1181 = vrot.lane.b32.xlu0 %v4348_v10, %s4478_s18  ;;  %v4371_v10 = vld [vmem:[%s4520_s17 + $0x80] ss:$0 sps:$4 sm:$0x11]   ;;  %v630_v24 = vrot.slane %v628_v18, 1  ;;  %v633_v27 = vshll.u32 %v4373_v20, 16  ;;  %v4383_v2 = vld [vmem:[%s4520_s17 + $0x90] sm:$0xff]  }
  0x9d   : > { %v2501_v31 = vpop.permute.xlu1 %2500  ;;  %v2408_v0 = vor.u32 %v2407_v60, %v2403_v56  ;;  %v2764_v16 = vrot.slane %v4371_v10, 1  ;;  %v2425_v25 = vsel %vm504_vm1, %v2420_v19, %v2424_v15  ;;  %v4381_v52 = vld [vmem:[%s4520_s17 + $0x8c] ss:$0 sps:$4 sm:$0x11]   ;;  %v1527_v60 = vshrl.u32 %v4384_v54, 16  ;;  %v4393_v13 = vld [vmem:[%s4520_s17 + $0x3c] sm:$0xff]  }
  0x9e   : > { %v2499_v35 = vpop.permute.xlu0 %2498  ;;  %2548 = vst.msk [vmem:[#allocation2 + $0x8] sm:$0xff] %vm2546_vm9, %v2501_v31  ;;  %v631_v30 = vor.u32 %v630_v24, %v626_v17  ;;  %v638_v31 = vshrl.u32 %v4376_v5, 16  ;;  %v635_v33 = vrot.slane %v633_v27, 1  ;;  %v1534_v4 = vshll.u32 %v4385_v62, 16  ;;  %v4389_v18 = vld [vmem:[%s4520_s17 + $0x84] sm:$0xfe]  }
  0x9f   : > { %2547 = vst.msk [vmem:[#allocation2] sm:$0xff] %vm2546_vm9, %v2499_v35  ;;  %1616 = vrot.lane.b32.xlu1 %v1525_v40, %s4482_s22  ;;  %v2413_v12 = vsel %vm504_vm1, %v2408_v0, %v2412_v1  ;;  %v2765_v23 = vsel %vm938_vm0, %v2763_v14, %v2764_v16  ;;  %v2767_v35 = vrot.slane %v4375_v29, 1  ;;  %v4387_v6 = vld [vmem:[%s4520_s17 + $0x98] ss:$0 sps:$4 sm:$0x11]   ;;  %v1532_v10 = vor.u32 %v1531_v3, %v1527_v60  ;;  %v4406_v3 = vld [vmem:[%s4520_s17 + $0x9c] sm:$0xff]  }
  0xa0   : > { %1614 = vrot.lane.b32.xlu0 %v1513_v38, %s4482_s22  ;;  %v642_v38 = vrot.slane %v640_v32, 1  ;;  %v636_v39 = vsel %vm504_vm1, %v631_v30, %v635_v33  ;;  %v1536_v5 = vrot.slane %v1534_v4, 1  ;;  %v4390_v19 = vld [vmem:[%s4520_s17 + $0x8c] ss:$0 sps:$4 sm:$0x11]   ;;  %317 = vst.msk [vmem:[#allocation2 + $0x28] sm:$0xff] %vm311_vm2, %v4393_v13 }
  0xa1   : > { %v702_v45 = vpop.permute.xlu1 %701  ;;  %v2768_v41 = vsel %vm938_vm0, %v2766_v34, %v2767_v35  ;;  %v4391_v24 = vld [vmem:[%s4520_s17 + $0x90] sm:$0xfe]   ;;  %v4392_v27 = vld [vmem:[%s4520_s17 + $0x98] ss:$0 sps:$4 sm:$0x11]  }
  0xa2   : > { %v2788_v44 = vpop.permute.xlu0 %2787  ;;  %748 = vst.msk [vmem:[#allocation2 + $0x10] sm:$0xff] %vm745_vm3, %v702_v45  ;;  %v643_v43 = vor.u32 %v642_v38, %v638_v31  ;;  %v4379_v45 = vld [vmem:[%s4520_s17 + $0x80] ss:$0 sps:$4 sm:$0x11]   ;;  %v1537_v16 = vsel %vm504_vm1, %v1532_v10, %v1536_v5  ;;  %v1872_v30 = vrot.slane %v4391_v24, 1  ;;  %v4396_v31 = vld [vmem:[%s4520_s17 + $0x90] sm:$0xff]  }
  0xa3   : > { %2836 = vst.msk [vmem:[#allocation2] sm:$0xff] %vm2835_vm10, %v2788_v44  ;;  %1905 = vrot.lane.b32.xlu1 %v1868_v53, %s4479_s19  ;;  %v645_v44 = vshll.u32 %v4377_v37, 16  ;;  %v4382_v53 = vld [vmem:[%s4520_s17 + $0x84] sm:$0xff]   ;;  %v1873_v32 = vrot.slane %v4392_v27, 1  ;;  %v2427_v38 = vshrl.u32 %v4396_v31, 16 }
  0xa4   : > { %1903 = vrot.lane.b32.xlu0 %v1865_v46, %s4479_s19  ;;  %v969_v46 = vrot.slane %v4378_v42, 1  ;;  %v4397_v37 = vld [vmem:[%s4520_s17 + $0x98] ss:$0 sps:$4 sm:$0x11]  }
  0xa5   : > { %v704_v59 = vpop.permute.xlu1 %703  ;;  %v647_v47 = vrot.slane %v645_v44, 1  ;;  %v1874_v34 = vsel %vm938_vm0, %v1872_v30, %v1873_v32  ;;  %v4399_v42 = vld [vmem:[%s4520_s17 + $0xa4] ss:$0 sps:$4 sm:$0x11]   ;;  %v4410_v32 = vld [vmem:[%s4520_s17 + $0x9c] sm:$0xfe]  }
  0xa6   : > { %v2790_v58 = vpop.permute.xlu0 %2789  ;;  %749 = vst.msk [vmem:[#allocation2 + $0x18] sm:$0xff] %vm745_vm3, %v704_v59  ;;  %v973_v59 = vrot.slane %v4381_v52, 1  ;;  %v4401_v54 = vld [vmem:[%s4520_s17 + $0x98] ss:$0 sps:$4 sm:$0x11]  }
  0xa7   : > { %2837 = vst.msk [vmem:[#allocation2 + $0x8] sm:$0xff] %vm2835_vm10, %v2790_v58  ;;  %2083 = vrot.lane.b32.xlu1 %v4364_v50, %s4483_s23  ;;  %v4380_v50 = vld [vmem:[%s4520_s17 + $0x84] sm:$0xfe]   ;;  %v648_v55 = vsel %vm504_vm1, %v643_v43, %v647_v47  ;;  %v4386_v58 = vld [vmem:[%s4520_s17 + $0x90] sm:$0xff]   ;;  %v2770_v62 = vrot.slane %v4401_v54, 1 }
  0xa8   : > { %2081 = vrot.lane.b32.xlu0 %v4363_v49, %s4483_s23  ;;  %v970_v49 = vrot.slane %v4379_v45, 1  ;;  %v972_v57 = vrot.slane %v4380_v50, 1  ;;  %v2446_v50 = vshll.u32 %v4399_v42, 16  ;;  %v4405_v5 = vld [vmem:[%s4520_s17 + $0xa4] ss:$0 sps:$4 sm:$0x11]  }
  0xa9   : > { %v994_v11 = vpop.permute.xlu1 %993 }
  0xaa   : > { %v992_v7 = vpop.permute.xlu0 %991  ;;  %v2852_v8 = vld [vmem:[#allocation2] sm:$0xff]  ;;  %1039 = vst.msk [vmem:[#allocation2 + $0x18] sm:$0xff] %vm1035_vm4, %v994_v11  ;;  %v971_v56 = vsel %vm938_vm0, %v969_v46, %v970_v49  ;;  %v974_v0 = vsel %vm938_vm0, %v972_v57, %v973_v59  ;;  %v1546_v11 = vshll.u32 %v4387_v6, 16 }
  0xab   : > { %1038 = vst.msk [vmem:[#allocation2 + $0x10] sm:$0xff] %vm1035_vm4, %v992_v7  ;;  %4164 = vmatprep.mubr.msk.bf16.mxu0 %vm2904_vm12, %v2852_v8  ;;  %2516 = vrot.lane.b32.xlu1 %v2425_v25, %s4484_s24  ;;  %v1539_v7 = vshrl.u32 %v4386_v58, 16  ;;  %v1541_v8 = vshll.u32 %v4386_v58, 16 }
  0xac   : > { %2514 = vrot.lane.b32.xlu0 %v2413_v12, %s4484_s24  ;;  %v4388_v12 = vld [vmem:[%s4520_s17 + $0x30] sm:$0xff]   ;;  %v1548_v17 = vrot.slane %v1546_v11, 1  ;;  %v662_v11 = vshrl.u32 %v4406_v3, 16 }
  0xad   : > { %v1172_v26 = vpop.permute.xlu1 %1171  ;;  %v1543_v15 = vrot.slane %v1541_v8, 1  ;;  %316 = vst.msk [vmem:[#allocation2 + $0x20] sm:$0xff] %vm311_vm2, %v4388_v12 }
  0xae   : > { %v1170_v21 = vpop.permute.xlu0 %1169  ;;  %v2853_v22 = vld [vmem:[#allocation2 + $0x8] sm:$0xff]  ;;  %1217 = vst.msk [vmem:[#allocation2 + $0x18] sm:$0xff] %vm1213_vm5, %v1172_v26 }
  0xaf   : > { %1216 = vst.msk [vmem:[#allocation2 + $0x10] sm:$0xff] %vm1213_vm5, %v1170_v21  ;;  %4165 = vmatmul.mubr.msk.bf16.vlgmr.msra.gmra.mrb[0].mxu0 %vm2904_vm12, %v2853_v22  ;;  %717 = vrot.lane.b32.xlu1 %v636_v39, %s4481_s21  ;;  %v1544_v20 = vor.u32 %v1543_v15, %v1539_v7  ;;  %v1869_v22 = vrot.slane %v4389_v18, 1  ;;  %v2429_v39 = vshll.u32 %v4396_v31, 16  ;;  %v4407_v18 = vld [vmem:[%s4520_s17 + $0xa4] ss:$0 sps:$4 sm:$0x11]  }
  0xb0   : > { %2803 = vrot.lane.b32.xlu0 %v2765_v23, %s4485_s25  ;;  %v1870_v23 = vrot.slane %v4390_v19, 1 }
  0xb1   : > { %v1605_v40 = vpop.permute.xlu1 %1604  ;;  %v1549_v25 = vsel %vm504_vm1, %v1544_v20, %v1548_v17  ;;  %v2431_v45 = vrot.slane %v2429_v39, 1  ;;  %v2773_v17 = vrot.slane %v4405_v5, 1  ;;  %v978_v39 = vrot.slane %v4410_v32, 1  ;;  %v4430_v32 = vld [vmem:[%s4520_s17 + $0xa8] sm:$0xfe]  }
  0xb2   : > { %v1603_v36 = vpop.permute.xlu0 %1602  ;;  %1650 = vst.msk [vmem:[#allocation2 + $0x18] sm:$0xff] %vm1646_vm6, %v1605_v40  ;;  %v1871_v29 = vsel %vm938_vm0, %v1869_v22, %v1870_v23  ;;  %v4398_v40 = vld [vmem:[%s4520_s17 + $0x9c] sm:$0xff]   ;;  %v669_v23 = vshll.u32 %v4407_v18, 16  ;;  %v4427_v18 = vld [vmem:[%s4520_s17 + $0xb0] ss:$0 sps:$4 sm:$0x11]  }
  0xb3   : > { %1649 = vst.msk [vmem:[#allocation2 + $0x10] sm:$0xff] %vm1646_vm6, %v1603_v36  ;;  %719 = vrot.lane.b32.xlu1 %v648_v55, %s4481_s21  ;;  %v4395_v36 = vld [vmem:[%s4520_s17 + $0x9c] sm:$0xff]   ;;  %v2439_v46 = vshrl.u32 %v4398_v40, 16  ;;  %v2441_v47 = vshll.u32 %v4398_v40, 16  ;;  %v2448_v55 = vrot.slane %v2446_v50, 1 }
  0xb4   : > { %2805 = vrot.lane.b32.xlu0 %v2768_v41, %s4485_s25  ;;  %v2434_v41 = vshll.u32 %v4397_v37, 16  ;;  %v4417_v50 = vld [vmem:[%s4520_s17 + $0xb0] ss:$0 sps:$4 sm:$0x11]  }
  0xb5   : > { %v1894_v51 = vpop.permute.xlu1 %1893  ;;  %v2443_v52 = vrot.slane %v2441_v47, 1  ;;  %v4415_v47 = vld [vmem:[%s4520_s17 + $0xa4] ss:$0 sps:$4 sm:$0x11]  }
  0xb6   : > { %v1892_v48 = vpop.permute.xlu0 %1891  ;;  %1939 = vst.msk [vmem:[#allocation2 + $0x18] sm:$0xff] %vm1935_vm7, %v1894_v51  ;;  %v2436_v49 = vrot.slane %v2434_v41, 1  ;;  %v2432_v51 = vor.u32 %v2431_v45, %v2427_v38  ;;  %v4416_v41 = vld [vmem:[%s4520_s17 + $0xa8] sm:$0xff]   ;;  %v1558_v54 = vshll.u32 %v4415_v47, 16 }
  0xb7   : > { %1938 = vst.msk [vmem:[#allocation2 + $0x10] sm:$0xff] %vm1935_vm7, %v1892_v48  ;;  %1009 = vrot.lane.b32.xlu1 %v974_v0, %s4480_s20  ;;  %v2444_v58 = vor.u32 %v2443_v52, %v2439_v46  ;;  %v4403_v0 = vld [vmem:[%s4520_s17 + $0x98] ss:$0 sps:$4 sm:$0x11]   ;;  %v4413_v46 = vld [vmem:[%s4520_s17 + $0xa8] sm:$0xff]  }
  0xb8   : > { %1007 = vrot.lane.b32.xlu0 %v971_v56, %s4480_s20  ;;  %v4402_v56 = vld [vmem:[%s4520_s17 + $0x90] sm:$0xff]   ;;  %v2437_v57 = vsel %vm504_vm1, %v2432_v51, %v2436_v49  ;;  %v657_v8 = vshll.u32 %v4403_v0, 16  ;;  %v1565_v51 = vshll.u32 %v4416_v41, 16  ;;  %v4420_v0 = vld [vmem:[%s4520_s17 + $0xa4] ss:$0 sps:$4 sm:$0x11]  }
  0xb9   : > { %v2072_v1 = vpop.permute.xlu1 %2071  ;;  %v2449_v4 = vsel %vm504_vm1, %v2444_v58, %v2448_v55  ;;  %v4423_v58 = vld [vmem:[%s4520_s17 + $0x54] sm:$0xff]   ;;  %v4433_v47 = vld [vmem:[%s4520_s17 + $0xb0] ss:$0 sps:$4 sm:$0x11]  }
  0xba   : > { %v2070_v61 = vpop.permute.xlu0 %2069  ;;  %2117 = vst.msk [vmem:[#allocation2 + $0x18] sm:$0xff] %vm2113_vm8, %v2072_v1  ;;  %v650_v1 = vshrl.u32 %v4402_v56, 16  ;;  %v659_v13 = vrot.slane %v657_v8, 1  ;;  %v1567_v55 = vrot.slane %v1565_v51, 1 }
  0xbb   : > { %2116 = vst.msk [vmem:[#allocation2 + $0x10] sm:$0xff] %vm2113_vm8, %v2070_v61  ;;  %1187 = vrot.lane.b32.xlu1 %v4383_v2, %s4478_s18  ;;  %v652_v2 = vshll.u32 %v4402_v56, 16  ;;  %v1570_v56 = vshll.u32 %v4417_v50, 16  ;;  %v4422_v8 = vld [vmem:[%s4520_s17 + $0xb0] ss:$0 sps:$4 sm:$0x11]  }
  0xbc   : > { %1185 = vrot.lane.b32.xlu0 %v4382_v53, %s4478_s18  ;;  %v4400_v53 = vld [vmem:[%s4520_s17 + $0x90] sm:$0xfe]   ;;  %319 = vst.msk [vmem:[#allocation2 + $0x38] sm:$0xff] %vm311_vm2, %v4423_v58 }
  0xbd   : > { %v2505_v14 = vpop.permute.xlu1 %2504  ;;  %v2769_v61 = vrot.slane %v4400_v53, 1  ;;  %v654_v7 = vrot.slane %v652_v2, 1 }
  0xbe   : > { %v2503_v9 = vpop.permute.xlu0 %2502  ;;  %2550 = vst.msk [vmem:[#allocation2 + $0x18] sm:$0xff] %vm2546_vm9, %v2505_v14 }
  0xbf   : > { %2549 = vst.msk [vmem:[#allocation2 + $0x10] sm:$0xff] %vm2546_vm9, %v2503_v9  ;;  %1620 = vrot.lane.b32.xlu1 %v1549_v25, %s4482_s22  ;;  %v2771_v6 = vsel %vm938_vm0, %v2769_v61, %v2770_v62  ;;  %v4404_v9 = vld [vmem:[%s4520_s17 + $0x9c] sm:$0xfe]   ;;  %v655_v12 = vor.u32 %v654_v7, %v650_v1  ;;  %v4408_v25 = vld [vmem:[%s4520_s17 + $0x90] sm:$0xfe]   ;;  %v1572_v61 = vrot.slane %v1570_v56, 1 }
  0xc0   : > { %1618 = vrot.lane.b32.xlu0 %v1537_v16, %s4482_s22  ;;  %v2772_v15 = vrot.slane %v4404_v9, 1  ;;  %v664_v16 = vshll.u32 %v4406_v3, 16  ;;  %v975_v30 = vrot.slane %v4408_v25, 1  ;;  %v4421_v7 = vld [vmem:[%s4520_s17 + $0xa8] sm:$0xfe]  }
  0xc1   : > { %v706_v26 = vpop.permute.xlu1 %705  ;;  %v660_v19 = vsel %vm504_vm1, %v655_v12, %v659_v13  ;;  %v4426_v12 = vld [vmem:[%s4520_s17 + $0xa8] sm:$0xff]   ;;  %v1879_v13 = vrot.slane %v4422_v8, 1  ;;  %v4434_v56 = vld [vmem:[%s4520_s17 + $0xb4] sm:$0xfe]  }
  0xc2   : > { %v2792_v21 = vpop.permute.xlu0 %2791  ;;  %750 = vst.msk [vmem:[#allocation2 + $0x20] sm:$0xff] %vm745_vm3, %v706_v26  ;;  %v666_v20 = vrot.slane %v664_v16, 1  ;;  %v2774_v22 = vsel %vm938_vm0, %v2772_v15, %v2773_v17  ;;  %v4409_v26 = vld [vmem:[%s4520_s17 + $0x98] ss:$0 sps:$4 sm:$0x11]  }
  0xc3   : > { %2838 = vst.msk [vmem:[#allocation2 + $0x10] sm:$0xff] %vm2835_vm10, %v2792_v21  ;;  %1909 = vrot.lane.b32.xlu1 %v1874_v34, %s4479_s19  ;;  %v4414_v21 = vld [vmem:[%s4520_s17 + $0x9c] sm:$0xff]   ;;  %v976_v31 = vrot.slane %v4409_v26, 1  ;;  %v4411_v34 = vld [vmem:[%s4520_s17 + $0xa4] ss:$0 sps:$4 sm:$0x11]  }
  0xc4   : > { %1907 = vrot.lane.b32.xlu0 %v1871_v29, %s4479_s19  ;;  %v667_v27 = vor.u32 %v666_v20, %v662_v11  ;;  %v671_v29 = vrot.slane %v669_v23, 1  ;;  %v979_v42 = vrot.slane %v4411_v34, 1  ;;  %v4424_v11 = vld [vmem:[%s4520_s17 + $0xa8] sm:$0xff]   ;;  %v4428_v15 = vld [vmem:[%s4520_s17 + $0xb4] sm:$0xff]   ;;  %v2453_v20 = vshll.u32 %v4426_v12, 16 }
  0xc5   : > { %v708_v35 = vpop.permute.xlu1 %707  ;;  %v977_v38 = vsel %vm938_vm0, %v975_v30, %v976_v31  ;;  %v4425_v17 = vld [vmem:[%s4520_s17 + $0xb4] sm:$0xff]  }
  0xc6   : > { %v2794_v33 = vpop.permute.xlu0 %2793  ;;  %751 = vst.msk [vmem:[#allocation2 + $0x28] sm:$0xff] %vm745_vm3, %v708_v35  ;;  %v4412_v35 = vld [vmem:[%s4520_s17 + $0x9c] sm:$0xff]   ;;  %v672_v37 = vsel %vm504_vm1, %v667_v27, %v671_v29  ;;  %v980_v45 = vsel %vm938_vm0, %v978_v39, %v979_v42  ;;  %v2455_v26 = vrot.slane %v2453_v20, 1  ;;  %v2458_v27 = vshll.u32 %v4427_v18, 16  ;;  %v4436_v39 = vld [vmem:[%s4520_s17 + $0xb4] sm:$0xff]  }
  0xc7   : > { %2839 = vst.msk [vmem:[#allocation2 + $0x18] sm:$0xff] %vm2835_vm10, %v2794_v33  ;;  %2087 = vrot.lane.b32.xlu1 %v4395_v36, %s4483_s23  ;;  %v1551_v33 = vshrl.u32 %v4414_v21, 16  ;;  %v1553_v36 = vshll.u32 %v4414_v21, 16  ;;  %v2463_v21 = vshrl.u32 %v4428_v15, 16  ;;  %v2775_v42 = vrot.slane %v4430_v32, 1 }
  0xc8   : > { %2085 = vrot.lane.b32.xlu0 %v4394_v28, %s4483_s23  ;;  %v2460_v31 = vrot.slane %v2458_v27, 1  ;;  %v4446_v27 = vld [vmem:[%s4520_s17 + $0xc0] sm:$0xff]   ;;  %v4447_v32 = vld [vmem:[%s4520_s17 + $0xc8] ss:$0 sps:$4 sm:$0x11]  }
  0xc9   : > { %v998_v48 = vpop.permute.xlu1 %997 }
  0xca   : > { %v996_v43 = vpop.permute.xlu0 %995  ;;  %v2854_v44 = vld [vmem:[#allocation2 + $0x10] sm:$0xff]  ;;  %1041 = vst.msk [vmem:[#allocation2 + $0x28] sm:$0xff] %vm1035_vm4, %v998_v48  ;;  %v1563_v48 = vshrl.u32 %v4416_v41, 16 }
  0xcb   : > { %1040 = vst.msk [vmem:[#allocation2 + $0x20] sm:$0xff] %vm1035_vm4, %v996_v43  ;;  %4168 = vmatprep.mubr.msk.bf16.mxu0 %vm2904_vm12, %v2854_v44  ;;  %2520 = vrot.lane.b32.xlu1 %v2449_v4, %s4484_s24  ;;  %v1555_v44 = vrot.slane %v1553_v36, 1 }
  0xcc   : > { %2518 = vrot.lane.b32.xlu0 %v2437_v57, %s4484_s24  ;;  %v4418_v57 = vld [vmem:[%s4520_s17 + $0x48] sm:$0xff]  }
  0xcd   : > { %v1176_v63 = vpop.permute.xlu1 %1175  ;;  %v1556_v53 = vor.u32 %v1555_v44, %v1551_v33  ;;  %318 = vst.msk [vmem:[#allocation2 + $0x30] sm:$0xff] %vm311_vm2, %v4418_v57  ;;  %v4432_v33 = vld [vmem:[%s4520_s17 + $0xa8] sm:$0xff]   ;;  %v4435_v57 = vld [vmem:[%s4520_s17 + $0xbc] ss:$0 sps:$4 sm:$0x11]  }
  0xce   : > { %v1174_v59 = vpop.permute.xlu0 %1173  ;;  %v2855_v60 = vld [vmem:[#allocation2 + $0x18] sm:$0xff]  ;;  %1219 = vst.msk [vmem:[#allocation2 + $0x28] sm:$0xff] %vm1213_vm5, %v1176_v63 }
  0xcf   : > { %1218 = vst.msk [vmem:[#allocation2 + $0x20] sm:$0xff] %vm1213_vm5, %v1174_v59  ;;  %4169 = vmatmul.mubr.msk.bf16.gmra.mrb[4].mxu0 %vm2904_vm12, %v2855_v60  ;;  %721 = vrot.lane.b32.xlu1 %v660_v19, %s4481_s21  ;;  %v1560_v59 = vrot.slane %v1558_v54, 1  ;;  %v1568_v60 = vor.u32 %v1567_v55, %v1563_v48  ;;  %v4419_v63 = vld [vmem:[%s4520_s17 + $0x9c] sm:$0xfe]   ;;  %v2451_v19 = vshrl.u32 %v4426_v12, 16  ;;  %v686_v48 = vshrl.u32 %v4436_v39, 16 }
  0xd0   : > { %2807 = vrot.lane.b32.xlu0 %v2771_v6, %s4485_s25  ;;  %v1875_v4 = vrot.slane %v4419_v63, 1  ;;  %v1876_v6 = vrot.slane %v4420_v0, 1  ;;  %v681_v54 = vshll.u32 %v4433_v47, 16  ;;  %v4440_v12 = vld [vmem:[%s4520_s17 + $0xb4] sm:$0xfe]  }
  0xd1   : > { %v1609_v14 = vpop.permute.xlu1 %1608  ;;  %v1561_v1 = vsel %vm504_vm1, %v1556_v53, %v1560_v59  ;;  %v1573_v3 = vsel %vm504_vm1, %v1568_v60, %v1572_v61  ;;  %v2456_v30 = vor.u32 %v2455_v26, %v2451_v19  ;;  %v688_v53 = vshll.u32 %v4436_v39, 16  ;;  %v4445_v26 = vld [vmem:[%s4520_s17 + $0xbc] ss:$0 sps:$4 sm:$0x11]  }
  0xd2   : > { %v1607_v10 = vpop.permute.xlu0 %1606  ;;  %1652 = vst.msk [vmem:[#allocation2 + $0x28] sm:$0xff] %vm1646_vm6, %v1609_v14  ;;  %v1877_v9 = vsel %vm938_vm0, %v1875_v4, %v1876_v6  ;;  %v683_v59 = vrot.slane %v681_v54, 1  ;;  %v2778_v60 = vrot.slane %v4434_v56, 1  ;;  %v2779_v61 = vrot.slane %v4435_v57, 1  ;;  %v4438_v6 = vld [vmem:[%s4520_s17 + $0xa8] sm:$0xfe]  }
  0xd3   : > { %1651 = vst.msk [vmem:[#allocation2 + $0x20] sm:$0xff] %vm1646_vm6, %v1607_v10  ;;  %723 = vrot.lane.b32.xlu1 %v672_v37, %s4481_s21  ;;  %v1878_v10 = vrot.slane %v4421_v7, 1  ;;  %v690_v63 = vrot.slane %v688_v53, 1  ;;  %v4444_v7 = vld [vmem:[%s4520_s17 + $0xb4] sm:$0xff]   ;;  %v984_v19 = vrot.slane %v4440_v12, 1 }
  0xd4   : > { %2809 = vrot.lane.b32.xlu0 %v2774_v22, %s4485_s25 }
  0xd5   : > { %v1898_v28 = vpop.permute.xlu1 %1897  ;;  %v1880_v16 = vsel %vm938_vm0, %v1878_v10, %v1879_v13  ;;  %v691_v8 = vor.u32 %v690_v63, %v686_v48  ;;  %v4441_v13 = vld [vmem:[%s4520_s17 + $0xbc] ss:$0 sps:$4 sm:$0x11]   ;;  %v4451_v48 = vld [vmem:[%s4520_s17 + $0xc0] sm:$0xfe]  }
  0xd6   : > { %v1896_v24 = vpop.permute.xlu0 %1895  ;;  %1941 = vst.msk [vmem:[#allocation2 + $0x28] sm:$0xff] %vm1935_vm7, %v1898_v28  ;;  %v4429_v28 = vld [vmem:[%s4520_s17 + $0xbc] ss:$0 sps:$4 sm:$0x11]   ;;  %v985_v20 = vrot.slane %v4441_v13, 1  ;;  %v1884_v53 = vrot.slane %v4451_v48, 1 }
  0xd7   : > { %1940 = vst.msk [vmem:[#allocation2 + $0x20] sm:$0xff] %vm1935_vm7, %v1896_v24  ;;  %1013 = vrot.lane.b32.xlu1 %v980_v45, %s4480_s20  ;;  %v2465_v24 = vshll.u32 %v4428_v15, 16  ;;  %v674_v45 = vshrl.u32 %v4432_v33, 16  ;;  %v4457_v63 = vld [vmem:[%s4520_s17 + $0xc8] ss:$0 sps:$4 sm:$0x11]  }
  0xd8   : > { %1011 = vrot.lane.b32.xlu0 %v977_v38, %s4480_s20  ;;  %v4431_v38 = vld [vmem:[%s4520_s17 + $0xb0] ss:$0 sps:$4 sm:$0x11]  }
  0xd9   : > { %v2076_v43 = vpop.permute.xlu1 %2075  ;;  %v2467_v29 = vrot.slane %v2465_v24, 1  ;;  %v2776_v44 = vrot.slane %v4431_v38, 1  ;;  %v4443_v24 = vld [vmem:[%s4520_s17 + $0xc0] sm:$0xff]   ;;  %v1594_v38 = vshll.u32 %v4447_v32, 16 }
  0xda   : > { %v2074_v40 = vpop.permute.xlu0 %2073  ;;  %2119 = vst.msk [vmem:[#allocation2 + $0x28] sm:$0xff] %vm2113_vm8, %v2076_v43 }
  0xdb   : > { %2118 = vst.msk [vmem:[#allocation2 + $0x20] sm:$0xff] %vm2113_vm8, %v2074_v40  ;;  %1191 = vrot.lane.b32.xlu1 %v4413_v46, %s4478_s18  ;;  %v2468_v34 = vor.u32 %v2467_v29, %v2463_v21  ;;  %v2461_v40 = vsel %vm504_vm1, %v2456_v30, %v2460_v31  ;;  %v676_v46 = vshll.u32 %v4432_v33, 16  ;;  %v2777_v50 = vsel %vm938_vm0, %v2775_v42, %v2776_v44  ;;  %v4448_v30 = vld [vmem:[%s4520_s17 + $0x60] sm:$0xff]   ;;  %v4449_v42 = vld [vmem:[%s4520_s17 + $0xb4] sm:$0xfe]  }
  0xdc   : > { %1189 = vrot.lane.b32.xlu0 %v4412_v35, %s4478_s18  ;;  %v2470_v35 = vshll.u32 %v4429_v28, 16  ;;  %v1575_v21 = vshrl.u32 %v4444_v7, 16  ;;  %v1582_v31 = vshll.u32 %v4445_v26, 16  ;;  %v1587_v33 = vshrl.u32 %v4446_v27, 16  ;;  %320 = vst.msk [vmem:[#allocation2 + $0x40] sm:$0xff] %vm311_vm2, %v4448_v30 }
  0xdd   : > { %v2509_v52 = vpop.permute.xlu1 %2508  ;;  %v678_v51 = vrot.slane %v676_v46, 1  ;;  %v4450_v46 = vld [vmem:[%s4520_s17 + $0xbc] ss:$0 sps:$4 sm:$0x11]   ;;  %v1881_v47 = vrot.slane %v4449_v42, 1 }
  0xde   : > { %v2507_v49 = vpop.permute.xlu0 %2506  ;;  %2552 = vst.msk [vmem:[#allocation2 + $0x28] sm:$0xff] %vm2546_vm9, %v2509_v52  ;;  %v2472_v43 = vrot.slane %v2470_v35, 1  ;;  %v4463_v26 = vld [vmem:[%s4520_s17 + $0xd4] ss:$0 sps:$4 sm:$0x11]  }
  0xdf   : > { %2551 = vst.msk [vmem:[#allocation2 + $0x20] sm:$0xff] %vm2546_vm9, %v2507_v49  ;;  %1624 = vrot.lane.b32.xlu1 %v1573_v3, %s4482_s22  ;;  %v679_v58 = vor.u32 %v678_v51, %v674_v45  ;;  %v1596_v45 = vrot.slane %v1594_v38, 1  ;;  %v4452_v51 = vld [vmem:[%s4520_s17 + $0xc8] ss:$0 sps:$4 sm:$0x11]  }
  0xe0   : > { %1622 = vrot.lane.b32.xlu0 %v1561_v1, %s4482_s22  ;;  %v2473_v49 = vsel %vm504_vm1, %v2468_v34, %v2472_v43  ;;  %v1589_v34 = vshll.u32 %v4446_v27, 16  ;;  %v1885_v57 = vrot.slane %v4452_v51, 1  ;;  %v4468_v38 = vld [vmem:[%s4520_s17 + $0xa8] sm:$0xff]  }
  0xe1   : > { %v710_v2 = vpop.permute.xlu1 %709  ;;  %v684_v1 = vsel %vm504_vm1, %v679_v58, %v683_v59  ;;  %v4456_v58 = vld [vmem:[%s4520_s17 + $0xc0] sm:$0xff]   ;;  %326 = vst.msk [vmem:[#allocation2 + $0x70] sm:$0xff] %vm311_vm2, %v4468_v38 }
  0xe2   : > { %v2796_v62 = vpop.permute.xlu0 %2795  ;;  %752 = vst.msk [vmem:[#allocation2 + $0x30] sm:$0xff] %vm745_vm3, %v710_v2  ;;  %v2780_v2 = vsel %vm938_vm0, %v2778_v60, %v2779_v61  ;;  %v1886_v59 = vsel %vm938_vm0, %v1884_v53, %v1885_v57  ;;  %v4455_v60 = vld [vmem:[%s4520_s17 + $0xcc] sm:$0xff]  }
  0xe3   : > { %2840 = vst.msk [vmem:[#allocation2 + $0x20] sm:$0xff] %vm2835_vm10, %v2796_v62  ;;  %1913 = vrot.lane.b32.xlu1 %v1880_v16, %s4479_s19  ;;  %v4437_v62 = vld [vmem:[%s4520_s17 + $0xbc] ss:$0 sps:$4 sm:$0x11]  }
  0xe4   : > { %1911 = vrot.lane.b32.xlu0 %v1877_v9, %s4479_s19  ;;  %v693_v3 = vshll.u32 %v4437_v62, 16  ;;  %v4439_v9 = vld [vmem:[%s4520_s17 + $0xb0] ss:$0 sps:$4 sm:$0x11]  }
  0xe5   : > { %v712_v14 = vpop.permute.xlu1 %711 }
  0xe6   : > { %v2798_v5 = vpop.permute.xlu0 %2797  ;;  %753 = vst.msk [vmem:[#allocation2 + $0x38] sm:$0xff] %vm745_vm3, %v712_v14  ;;  %v695_v10 = vrot.slane %v693_v3, 1  ;;  %v2482_v3 = vshll.u32 %v4457_v63, 16 }
  0xe7   : > { %2841 = vst.msk [vmem:[#allocation2 + $0x28] sm:$0xff] %vm2835_vm10, %v2798_v5  ;;  %2091 = vrot.lane.b32.xlu1 %v4425_v17, %s4483_s23  ;;  %v981_v5 = vrot.slane %v4438_v6, 1  ;;  %v4442_v17 = vld [vmem:[%s4520_s17 + $0xb4] sm:$0xff]  }
  0xe8   : > { %2089 = vrot.lane.b32.xlu0 %v4424_v11, %s4483_s23  ;;  %v982_v11 = vrot.slane %v4439_v9, 1  ;;  %v696_v15 = vsel %vm504_vm1, %v691_v8, %v695_v10  ;;  %v2484_v8 = vrot.slane %v2482_v3, 1 }
  0xe9   : > { %v1002_v25 = vpop.permute.xlu1 %1001 }
  0xea   : > { %v1000_v22 = vpop.permute.xlu0 %999  ;;  %v2856_v23 = vld [vmem:[#allocation2 + $0x20] sm:$0xff]  ;;  %1043 = vst.msk [vmem:[#allocation2 + $0x38] sm:$0xff] %vm1035_vm4, %v1002_v25  ;;  %v983_v18 = vsel %vm938_vm0, %v981_v5, %v982_v11 }
  0xeb   : > { %1042 = vst.msk [vmem:[#allocation2 + $0x30] sm:$0xff] %vm1035_vm4, %v1000_v22  ;;  %4172 = vmatprep.mubr.msk.bf16.mxu0 %vm2904_vm12, %v2856_v23  ;;  %2524 = vrot.lane.b32.xlu1 %v2473_v49, %s4484_s24  ;;  %v1577_v22 = vshll.u32 %v4444_v7, 16  ;;  %v986_v23 = vsel %vm938_vm0, %v984_v19, %v985_v20  ;;  %v4459_v7 = vld [vmem:[%s4520_s17 + $0xd4] ss:$0 sps:$4 sm:$0x11]  }
  0xec   : > { %2522 = vrot.lane.b32.xlu0 %v2461_v40, %s4484_s24  ;;  %v4453_v40 = vld [vmem:[%s4520_s17 + $0x6c] sm:$0xff]   ;;  %v2494_v13 = vshll.u32 %v4459_v7, 16 }
  0xed   : > { %v1180_v41 = vpop.permute.xlu1 %1179  ;;  %v1579_v29 = vrot.slane %v1577_v22, 1  ;;  %321 = vst.msk [vmem:[#allocation2 + $0x48] sm:$0xff] %vm311_vm2, %v4453_v40 }
  0xee   : > { %v1178_v36 = vpop.permute.xlu0 %1177  ;;  %v2857_v37 = vld [vmem:[#allocation2 + $0x28] sm:$0xff]  ;;  %1221 = vst.msk [vmem:[#allocation2 + $0x38] sm:$0xff] %vm1213_vm5, %v1180_v41  ;;  %v2496_v20 = vrot.slane %v2494_v13, 1 }
  0xef   : > { %1220 = vst.msk [vmem:[#allocation2 + $0x30] sm:$0xff] %vm1213_vm5, %v1178_v36  ;;  %4173 = vmatmul.mubr.msk.bf16.gmra.mrb[8].mxu0 %vm2904_vm12, %v2857_v37  ;;  %725 = vrot.lane.b32.xlu1 %v684_v1, %s4481_s21  ;;  %v1580_v35 = vor.u32 %v1579_v29, %v1575_v21  ;;  %v1584_v36 = vrot.slane %v1582_v31, 1  ;;  %v1591_v37 = vrot.slane %v1589_v34, 1  ;;  %v2475_v1 = vshrl.u32 %v4456_v58, 16 }
  0xf0   : > { %2811 = vrot.lane.b32.xlu0 %v2777_v50, %s4485_s25  ;;  %v1882_v50 = vrot.slane %v4450_v46, 1 }
  0xf1   : > { %v1613_v55 = vpop.permute.xlu1 %1612  ;;  %v1585_v43 = vsel %vm504_vm1, %v1580_v35, %v1584_v36  ;;  %v1592_v44 = vor.u32 %v1591_v37, %v1587_v33  ;;  %v2785_v33 = vrot.slane %v4463_v26, 1  ;;  %v4467_v36 = vld [vmem:[%s4520_s17 + $0x9c] sm:$0xff]  }
  0xf2   : > { %v1611_v52 = vpop.permute.xlu0 %1610  ;;  %1654 = vst.msk [vmem:[#allocation2 + $0x38] sm:$0xff] %vm1646_vm6, %v1613_v55  ;;  %v4454_v55 = vld [vmem:[%s4520_s17 + $0xc0] sm:$0xff]   ;;  %v1883_v56 = vsel %vm938_vm0, %v1881_v47, %v1882_v50 }
  0xf3   : > { %1653 = vst.msk [vmem:[#allocation2 + $0x30] sm:$0xff] %vm1646_vm6, %v1611_v52  ;;  %727 = vrot.lane.b32.xlu1 %v696_v15, %s4481_s21  ;;  %v1597_v49 = vsel %vm504_vm1, %v1592_v44, %v1596_v45  ;;  %v4460_v15 = vld [vmem:[%s4520_s17 + $0xc0] sm:$0xfe]  }
  0xf4   : > { %2813 = vrot.lane.b32.xlu0 %v2780_v2, %s4485_s25  ;;  %v2477_v2 = vshll.u32 %v4456_v58, 16  ;;  %v2781_v21 = vrot.slane %v4460_v15, 1  ;;  %325 = vst.msk [vmem:[#allocation2 + $0x68] sm:$0xff] %vm311_vm2, %v4467_v36 }
  0xf5   : > { %v1902_v4 = vpop.permute.xlu1 %1901 }
  0xf6   : > { %v1900_v0 = vpop.permute.xlu0 %1899  ;;  %1943 = vst.msk [vmem:[#allocation2 + $0x38] sm:$0xff] %vm1935_vm7, %v1902_v4  ;;  %v4458_v4 = vld [vmem:[%s4520_s17 + $0xcc] sm:$0xff]   ;;  %v2479_v6 = vrot.slane %v2477_v2, 1 }
  0xf7   : > { %1942 = vst.msk [vmem:[#allocation2 + $0x30] sm:$0xff] %vm1935_vm7, %v1900_v0  ;;  %1017 = vrot.lane.b32.xlu1 %v986_v23, %s4480_s20  ;;  %v2487_v9 = vshrl.u32 %v4458_v4, 16  ;;  %v2489_v10 = vshll.u32 %v4458_v4, 16  ;;  %v4465_v23 = vld [vmem:[%s4520_s17 + $0x84] sm:$0xff]  }
  0xf8   : > { %1015 = vrot.lane.b32.xlu0 %v983_v18, %s4480_s20  ;;  %v2480_v12 = vor.u32 %v2479_v6, %v2475_v1  ;;  %v4464_v18 = vld [vmem:[%s4520_s17 + $0x78] sm:$0xff]   ;;  %323 = vst.msk [vmem:[#allocation2 + $0x58] sm:$0xff] %vm311_vm2, %v4465_v23 }
  0xf9   : > { %v2080_v16 = vpop.permute.xlu1 %2079  ;;  %322 = vst.msk [vmem:[#allocation2 + $0x50] sm:$0xff] %vm311_vm2, %v4464_v18 }
  0xfa   : > { %v2078_v14 = vpop.permute.xlu0 %2077  ;;  %2121 = vst.msk [vmem:[#allocation2 + $0x38] sm:$0xff] %vm2113_vm8, %v2080_v16  ;;  %v4461_v16 = vld [vmem:[%s4520_s17 + $0xc8] ss:$0 sps:$4 sm:$0x11]   ;;  %v2485_v19 = vsel %vm504_vm1, %v2480_v12, %v2484_v8 }
  0xfb   : > { %2120 = vst.msk [vmem:[#allocation2 + $0x30] sm:$0xff] %vm2113_vm8, %v2078_v14  ;;  %1195 = vrot.lane.b32.xlu1 %v4443_v24, %s4478_s18  ;;  %v2782_v22 = vrot.slane %v4461_v16, 1 }
  0xfc   : > { %1193 = vrot.lane.b32.xlu0 %v4442_v17, %s4478_s18  ;;  %v2491_v17 = vrot.slane %v2489_v10, 1  ;;  %s181_s18 = scalar_lea.vmem %s5317_s3, %s3548_s15 }
  0xfd   : > { %v2513_v28 = vpop.permute.xlu1 %2512  ;;  %v2783_v29 = vsel %vm938_vm0, %v2781_v21, %v2782_v22 }
  0xfe   : > { %v2511_v25 = vpop.permute.xlu0 %2510  ;;  %2554 = vst.msk [vmem:[#allocation2 + $0x38] sm:$0xff] %vm2546_vm9, %v2513_v28  ;;  %v2492_v24 = vor.u32 %v2491_v17, %v2487_v9  ;;  %v4466_v28 = vld [vmem:[%s4520_s17 + $0x90] sm:$0xff]  }
  0xff   : > { %2553 = vst.msk [vmem:[#allocation2 + $0x30] sm:$0xff] %vm2546_vm9, %v2511_v25  ;;  %1628 = vrot.lane.b32.xlu1 %v1597_v49, %s4482_s22  ;;  %v4462_v25 = vld [vmem:[%s4520_s17 + $0xcc] sm:$0xfe]  }
 0x100   : > { %1626 = vrot.lane.b32.xlu0 %v1585_v43, %s4482_s22  ;;  %v2497_v31 = vsel %vm504_vm1, %v2492_v24, %v2496_v20  ;;  %v2784_v32 = vrot.slane %v4462_v25, 1  ;;  %324 = vst.msk [vmem:[#allocation2 + $0x60] sm:$0xff] %vm311_vm2, %v4466_v28 }
 0x101   : > { %v714_v41 = vpop.permute.xlu1 %713 }
 0x102   : > { %v2800_v39 = vpop.permute.xlu0 %2799  ;;  %754 = vst.msk [vmem:[#allocation2 + $0x40] sm:$0xff] %vm745_vm3, %v714_v41  ;;  %v2786_v34 = vsel %vm938_vm0, %v2784_v32, %v2785_v33  ;;  %vm3291_vm0 = vcmask 517120  }
 0x103   : > { %2842 = vst.msk [vmem:[#allocation2 + $0x30] sm:$0xff] %vm2835_vm10, %v2800_v39  ;;  %1917 = vrot.lane.b32.xlu1 %v1886_v59, %s4479_s19  ;;  %v4469_v39 = vld [vmem:[%s4520_s17 + $0xb4] sm:$0xff]  }
 0x104   : > { %1915 = vrot.lane.b32.xlu0 %v1883_v56, %s4479_s19  ;;  %327 = vst.msk [vmem:[#allocation2 + $0x78] sm:$0xff] %vm311_vm2, %v4469_v39 }
 0x105   : > { %v716_v54 = vpop.permute.xlu1 %715 }
 0x106   : > { %v2802_v52 = vpop.permute.xlu0 %2801  ;;  %755 = vst.msk [vmem:[#allocation2 + $0x48] sm:$0xff] %vm745_vm3, %v716_v54 }
 0x107   : > { %2843 = vst.msk [vmem:[#allocation2 + $0x38] sm:$0xff] %vm2835_vm10, %v2802_v52  ;;  %2095 = vrot.lane.b32.xlu1 %v4455_v60, %s4483_s23 }
 0x108   : > { %2093 = vrot.lane.b32.xlu0 %v4454_v55, %s4483_s23 }
 0x109   : > { %v1006_v0 = vpop.permute.xlu1 %1005 }
 0x10a   : > { %v1004_v61 = vpop.permute.xlu0 %1003  ;;  %v2858_v62 = vld [vmem:[#allocation2 + $0x30] sm:$0xff]  ;;  %1045 = vst.msk [vmem:[#allocation2 + $0x48] sm:$0xff] %vm1035_vm4, %v1006_v0 }
 0x10b   : > { %1044 = vst.msk [vmem:[#allocation2 + $0x40] sm:$0xff] %vm1035_vm4, %v1004_v61  ;;  %4176 = vmatprep.mubr.msk.bf16.mxu0 %vm2904_vm12, %v2858_v62  ;;  %2528 = vrot.lane.b32.xlu1 %v2497_v31, %s4484_s24 }
 0x10c   : > { %2526 = vrot.lane.b32.xlu0 %v2485_v19, %s4484_s24 }
 0x10d   : > { %v1184_v14 = vpop.permute.xlu1 %1183 }
 0x10e   : > { %v1182_v5 = vpop.permute.xlu0 %1181  ;;  %v2859_v11 = vld [vmem:[#allocation2 + $0x38] sm:$0xff]  ;;  %1223 = vst.msk [vmem:[#allocation2 + $0x48] sm:$0xff] %vm1213_vm5, %v1184_v14 }
 0x10f   : > { %1222 = vst.msk [vmem:[#allocation2 + $0x40] sm:$0xff] %vm1213_vm5, %v1182_v5  ;;  %4177 = vmatmul.mubr.msk.bf16.gmra.mrb[12].mxu0 %vm2904_vm12, %v2859_v11  ;;  %2817 = vrot.lane.b32.xlu1 %v2786_v34, %s4485_s25 }
 0x110   : > { %2815 = vrot.lane.b32.xlu0 %v2783_v29, %s4485_s25 }
 0x111   : > { %v1617_v30 = vpop.permute.xlu1 %1616 }
 0x112   : > { %v1615_v27 = vpop.permute.xlu0 %1614  ;;  %1656 = vst.msk [vmem:[#allocation2 + $0x48] sm:$0xff] %vm1646_vm6, %v1617_v30 }
 0x113   : > { %1655 = vst.msk [vmem:[#allocation2 + $0x40] sm:$0xff] %vm1646_vm6, %v1615_v27 }
 0x115   : > { %v1906_v37 = vpop.permute.xlu1 %1905 }
 0x116   : > { %v1904_v35 = vpop.permute.xlu0 %1903  ;;  %1945 = vst.msk [vmem:[#allocation2 + $0x48] sm:$0xff] %vm1935_vm7, %v1906_v37 }
 0x117   : > { %1944 = vst.msk [vmem:[#allocation2 + $0x40] sm:$0xff] %vm1935_vm7, %v1904_v35 }
 0x119   : > { %v2084_v41 = vpop.permute.xlu1 %2083 }
 0x11a   : > { %v2082_v40 = vpop.permute.xlu0 %2081  ;;  %2123 = vst.msk [vmem:[#allocation2 + $0x48] sm:$0xff] %vm2113_vm8, %v2084_v41 }
 0x11b   : > { %2122 = vst.msk [vmem:[#allocation2 + $0x40] sm:$0xff] %vm2113_vm8, %v2082_v40 }
 0x11d   : > { %v2517_v43 = vpop.permute.xlu1 %2516 }
 0x11e   : > { %v2515_v42 = vpop.permute.xlu0 %2514  ;;  %2556 = vst.msk [vmem:[#allocation2 + $0x48] sm:$0xff] %vm2546_vm9, %v2517_v43 }
 0x11f   : > { %2555 = vst.msk [vmem:[#allocation2 + $0x40] sm:$0xff] %vm2546_vm9, %v2515_v42 }
 0x121   : > { %v718_v45 = vpop.permute.xlu1 %717 }
 0x122   : > { %v2804_v44 = vpop.permute.xlu0 %2803  ;;  %756 = vst.msk [vmem:[#allocation2 + $0x50] sm:$0xff] %vm745_vm3, %v718_v45 }
 0x123   : > { %2844 = vst.msk [vmem:[#allocation2 + $0x40] sm:$0xff] %vm2835_vm10, %v2804_v44 }
 0x125   : > { %v720_v48 = vpop.permute.xlu1 %719 }
 0x126   : > { %v2806_v46 = vpop.permute.xlu0 %2805  ;;  %757 = vst.msk [vmem:[#allocation2 + $0x58] sm:$0xff] %vm745_vm3, %v720_v48 }
 0x127   : > { %2845 = vst.msk [vmem:[#allocation2 + $0x48] sm:$0xff] %vm2835_vm10, %v2806_v46 }
 0x129   : > { %v1010_v51 = vpop.permute.xlu1 %1009 }
 0x12a   : > { %v2860_v47 = vld [vmem:[#allocation2 + $0x40] sm:$0xff]  ;;  %v1008_v49 = vpop.permute.xlu0 %1007  ;;  %1047 = vst.msk [vmem:[#allocation2 + $0x58] sm:$0xff] %vm1035_vm4, %v1010_v51 }
 0x12b   : > { %4180 = vmatprep.mubr.msk.bf16.mxu1 %vm2904_vm12, %v2860_v47  ;;  %1046 = vst.msk [vmem:[#allocation2 + $0x50] sm:$0xff] %vm1035_vm4, %v1008_v49 }
 0x12d   : > { %v1188_v53 = vpop.permute.xlu1 %1187 }
 0x12e   : > { %v2861_v50 = vld [vmem:[#allocation2 + $0x48] sm:$0xff]  ;;  %v1186_v52 = vpop.permute.xlu0 %1185  ;;  %1225 = vst.msk [vmem:[#allocation2 + $0x58] sm:$0xff] %vm1213_vm5, %v1188_v53 }
 0x12f   : > { %4181 = vmatmul.mubr.msk.bf16.vlgmr.msra.gmra.mrb[0].mxu1 %vm2904_vm12, %v2861_v50  ;;  %1224 = vst.msk [vmem:[#allocation2 + $0x50] sm:$0xff] %vm1213_vm5, %v1186_v52 }
 0x131   : > { %v1621_v55 = vpop.permute.xlu1 %1620 }
 0x132   : > { %v1619_v54 = vpop.permute.xlu0 %1618  ;;  %1658 = vst.msk [vmem:[#allocation2 + $0x58] sm:$0xff] %vm1646_vm6, %v1621_v55 }
 0x133   : > { %1657 = vst.msk [vmem:[#allocation2 + $0x50] sm:$0xff] %vm1646_vm6, %v1619_v54 }
 0x135   : > { %v1910_v57 = vpop.permute.xlu1 %1909 }
 0x136   : > { %v1908_v56 = vpop.permute.xlu0 %1907  ;;  %1947 = vst.msk [vmem:[#allocation2 + $0x58] sm:$0xff] %vm1935_vm7, %v1910_v57 }
 0x137   : > { %1946 = vst.msk [vmem:[#allocation2 + $0x50] sm:$0xff] %vm1935_vm7, %v1908_v56 }
 0x139   : > { %v2088_v59 = vpop.permute.xlu1 %2087 }
 0x13a   : > { %v2086_v58 = vpop.permute.xlu0 %2085  ;;  %2125 = vst.msk [vmem:[#allocation2 + $0x58] sm:$0xff] %vm2113_vm8, %v2088_v59 }
 0x13b   : > { %2124 = vst.msk [vmem:[#allocation2 + $0x50] sm:$0xff] %vm2113_vm8, %v2086_v58 }
 0x13d   : > { %v2521_v61 = vpop.permute.xlu1 %2520 }
 0x13e   : > { %v2519_v60 = vpop.permute.xlu0 %2518  ;;  %2558 = vst.msk [vmem:[#allocation2 + $0x58] sm:$0xff] %vm2546_vm9, %v2521_v61 }
 0x13f   : > { %2557 = vst.msk [vmem:[#allocation2 + $0x50] sm:$0xff] %vm2546_vm9, %v2519_v60 }
 0x141   : > { %v722_v63 = vpop.permute.xlu1 %721 }
 0x142   : > { %v2808_v62 = vpop.permute.xlu0 %2807  ;;  %758 = vst.msk [vmem:[#allocation2 + $0x60] sm:$0xff] %vm745_vm3, %v722_v63 }
 0x143   : > { %2846 = vst.msk [vmem:[#allocation2 + $0x50] sm:$0xff] %vm2835_vm10, %v2808_v62 }
 0x145   : > { %v724_v1 = vpop.permute.xlu1 %723 }
 0x146   : > { %v2810_v0 = vpop.permute.xlu0 %2809  ;;  %759 = vst.msk [vmem:[#allocation2 + $0x68] sm:$0xff] %vm745_vm3, %v724_v1 }
 0x147   : > { %2847 = vst.msk [vmem:[#allocation2 + $0x58] sm:$0xff] %vm2835_vm10, %v2810_v0 }
 0x149   : > { %v1014_v4 = vpop.permute.xlu1 %1013 }
 0x14a   : > { %v1012_v2 = vpop.permute.xlu0 %1011  ;;  %v2862_v3 = vld [vmem:[#allocation2 + $0x50] sm:$0xff]  ;;  %1049 = vst.msk [vmem:[#allocation2 + $0x68] sm:$0xff] %vm1035_vm4, %v1014_v4 }
 0x14b   : > { %1048 = vst.msk [vmem:[#allocation2 + $0x60] sm:$0xff] %vm1035_vm4, %v1012_v2  ;;  %4184 = vmatprep.mubr.msk.bf16.mxu1 %vm2904_vm12, %v2862_v3 }
 0x14d   : > { %v1192_v8 = vpop.permute.xlu1 %1191 }
 0x14e   : > { %v1190_v6 = vpop.permute.xlu0 %1189  ;;  %v2863_v7 = vld [vmem:[#allocation2 + $0x58] sm:$0xff]  ;;  %1227 = vst.msk [vmem:[#allocation2 + $0x68] sm:$0xff] %vm1213_vm5, %v1192_v8 }
 0x14f   : > { %1226 = vst.msk [vmem:[#allocation2 + $0x60] sm:$0xff] %vm1213_vm5, %v1190_v6  ;;  %4185 = vmatmul.mubr.msk.bf16.gmra.mrb[4].mxu1 %vm2904_vm12, %v2863_v7 }
 0x151   : > { %v1625_v10 = vpop.permute.xlu1 %1624 }
 0x152   : > { %v1623_v9 = vpop.permute.xlu0 %1622  ;;  %1660 = vst.msk [vmem:[#allocation2 + $0x68] sm:$0xff] %vm1646_vm6, %v1625_v10 }
 0x153   : > { %1659 = vst.msk [vmem:[#allocation2 + $0x60] sm:$0xff] %vm1646_vm6, %v1623_v9 }
 0x155   : > { %v1914_v11 = vpop.permute.xlu1 %1913 }
 0x156   : > { %v1912_v5 = vpop.permute.xlu0 %1911  ;;  %1949 = vst.msk [vmem:[#allocation2 + $0x68] sm:$0xff] %vm1935_vm7, %v1914_v11 }
 0x157   : > { %1948 = vst.msk [vmem:[#allocation2 + $0x60] sm:$0xff] %vm1935_vm7, %v1912_v5 }
 0x159   : > { %v2092_v13 = vpop.permute.xlu1 %2091 }
 0x15a   : > { %v2090_v12 = vpop.permute.xlu0 %2089  ;;  %2127 = vst.msk [vmem:[#allocation2 + $0x68] sm:$0xff] %vm2113_vm8, %v2092_v13 }
 0x15b   : > { %2126 = vst.msk [vmem:[#allocation2 + $0x60] sm:$0xff] %vm2113_vm8, %v2090_v12 }
 0x15d   : > { %v2525_v15 = vpop.permute.xlu1 %2524 }
 0x15e   : > { %v2523_v14 = vpop.permute.xlu0 %2522  ;;  %2560 = vst.msk [vmem:[#allocation2 + $0x68] sm:$0xff] %vm2546_vm9, %v2525_v15 }
 0x15f   : > { %2559 = vst.msk [vmem:[#allocation2 + $0x60] sm:$0xff] %vm2546_vm9, %v2523_v14 }
 0x161   : > { %v726_v17 = vpop.permute.xlu1 %725 }
 0x162   : > { %v2812_v16 = vpop.permute.xlu0 %2811  ;;  %760 = vst.msk [vmem:[#allocation2 + $0x70] sm:$0xff] %vm745_vm3, %v726_v17 }
 0x163   : > { %2848 = vst.msk [vmem:[#allocation2 + $0x60] sm:$0xff] %vm2835_vm10, %v2812_v16 }
 0x165   : > { %v728_v19 = vpop.permute.xlu1 %727 }
 0x166   : > { %v2814_v18 = vpop.permute.xlu0 %2813  ;;  %761 = vst.msk [vmem:[#allocation2 + $0x78] sm:$0xff] %vm745_vm3, %v728_v19 }
 0x167   : > { %2849 = vst.msk [vmem:[#allocation2 + $0x68] sm:$0xff] %vm2835_vm10, %v2814_v18 }
 0x169   : > { %v1018_v22 = vpop.permute.xlu1 %1017 }
 0x16a   : > { %v2864_v20 = vld [vmem:[#allocation2 + $0x60] sm:$0xff]  ;;  %v1016_v21 = vpop.permute.xlu0 %1015  ;;  %1051 = vst.msk [vmem:[#allocation2 + $0x78] sm:$0xff] %vm1035_vm4, %v1018_v22 }
 0x16b   : > { %4188 = vmatprep.mubr.msk.bf16.mxu1 %vm2904_vm12, %v2864_v20  ;;  %1050 = vst.msk [vmem:[#allocation2 + $0x70] sm:$0xff] %vm1035_vm4, %v1016_v21 }
 0x16d   : > { %v1196_v25 = vpop.permute.xlu1 %1195 }
 0x16e   : > { %v2865_v23 = vld [vmem:[#allocation2 + $0x68] sm:$0xff]  ;;  %v1194_v24 = vpop.permute.xlu0 %1193  ;;  %1229 = vst.msk [vmem:[#allocation2 + $0x78] sm:$0xff] %vm1213_vm5, %v1196_v25 }
 0x16f   : > { %4189 = vmatmul.mubr.msk.bf16.gmra.mrb[8].mxu1 %vm2904_vm12, %v2865_v23  ;;  %1228 = vst.msk [vmem:[#allocation2 + $0x70] sm:$0xff] %vm1213_vm5, %v1194_v24 }
 0x171   : > { %v1629_v27 = vpop.permute.xlu1 %1628 }
 0x172   : > { %v1627_v26 = vpop.permute.xlu0 %1626  ;;  %1662 = vst.msk [vmem:[#allocation2 + $0x78] sm:$0xff] %vm1646_vm6, %v1629_v27 }
 0x173   : > { %1661 = vst.msk [vmem:[#allocation2 + $0x70] sm:$0xff] %vm1646_vm6, %v1627_v26 }
 0x175   : > { %v1918_v29 = vpop.permute.xlu1 %1917 }
 0x176   : > { %v1916_v28 = vpop.permute.xlu0 %1915  ;;  %1951 = vst.msk [vmem:[#allocation2 + $0x78] sm:$0xff] %vm1935_vm7, %v1918_v29 }
 0x177   : > { %1950 = vst.msk [vmem:[#allocation2 + $0x70] sm:$0xff] %vm1935_vm7, %v1916_v28 }
 0x179   : > { %v2096_v31 = vpop.permute.xlu1 %2095 }
 0x17a   : > { %v2094_v30 = vpop.permute.xlu0 %2093  ;;  %2129 = vst.msk [vmem:[#allocation2 + $0x78] sm:$0xff] %vm2113_vm8, %v2096_v31 }
 0x17b   : > { %2128 = vst.msk [vmem:[#allocation2 + $0x70] sm:$0xff] %vm2113_vm8, %v2094_v30 }
 0x17d   : > { %v2529_v46 = vpop.permute.xlu1 %2528 }
 0x17e   : > { %v2527_v35 = vpop.permute.xlu0 %2526  ;;  %2562 = vst.msk [vmem:[#allocation2 + $0x78] sm:$0xff] %vm2546_vm9, %v2529_v46 }
 0x17f   : > { %2561 = vst.msk [vmem:[#allocation2 + $0x70] sm:$0xff] %vm2546_vm9, %v2527_v35 }
 0x181   : > { %v2818_v57 = vpop.permute.xlu1 %2817 }
 0x182   : > { %v4166_v32 = vpop.f32.mrb[0].mxu0  ;;  %v2816_v48 = vpop.permute.xlu0 %2815  ;;  %2851 = vst.msk [vmem:[#allocation2 + $0x78] sm:$0xff] %vm2835_vm10, %v2818_v57 }
 0x183   : > { %v4103_v33 = vpack.c.bf16 %v4166_v32, %v4166_v32  ;;  %v2991_v34 = vpop.f32.mrb[1].mxu0  ;;  %v3190_v39 = vmul.f32 %v4166_v32, %v4166_v32  ;;  %v3122_v49 = vsel %vm3118_vm14, %v4166_v32, 0.0  ;;  %2850 = vst.msk [vmem:[#allocation2 + $0x70] sm:$0xff] %vm2835_vm10, %v2816_v48 }
 0x184   : > { %v3188_v36 = vmul.f32 %v2991_v34, %v2991_v34  ;;  %v4101_v37 = vpack.c.bf16 %v2991_v34, %v2991_v34  ;;  %v4167_v38 = vpop.f32.mrb[2].mxu0  ;;  %v3119_v42 = vsel %vm3118_vm14, %v2991_v34, 0.0 }
 0x185   : > { %3424 = vst.msk [vmem:[%s5170_s14 + $0x8] sm:$0xf] %vm3421_vm13, %v4103_v33  ;;  %v4104_v40 = vpack.c.bf16 %v4167_v38, %v4167_v38  ;;  %v2994_v41 = vpop.f32.mrb[3].mxu0  ;;  %v3191_v51 = vmul.f32 %v4167_v38, %v4167_v38  ;;  %v3223_v55 = vsel %vm3118_vm14, %v3190_v39, 0.0  ;;  %v3124_v56 = vsel %vm3118_vm14, %v4167_v38, 0.0 }
 0x186   : > { %3422 = vst.msk [vmem:[%s5170_s14] sm:$0xf] %vm3421_vm13, %v4101_v37  ;;  %v3120_v43 = vsel %vm3118_vm14, %v2994_v41, 0.0  ;;  %v3189_v44 = vmul.f32 %v2994_v41, %v2994_v41  ;;  %v4102_v45 = vpack.c.bf16 %v2994_v41, %v2994_v41  ;;  %v3220_v50 = vsel %vm3118_vm14, %v3188_v36, 0.0 }
 0x187   : > { %3425 = vst.msk [vmem:[%s5170_s14 + $0xc] sm:$0xf] %vm3421_vm13, %v4104_v40  ;;  %v3121_v47 = vadd.f32 %v3120_v43, %v3119_v42  ;;  %v3225_v60 = vsel %vm3118_vm14, %v3191_v51, 0.0 }
 0x188   : > { %v3221_v52 = vsel %vm3118_vm14, %v3189_v44, 0.0  ;;  %3423 = vst.msk [vmem:[%s5170_s14 + $0x4] sm:$0xf] %vm3421_vm13, %v4102_v45 }
 0x189   : > { %v3123_v53 = vadd.f32 %v3122_v49, %v3121_v47  ;;  %v3222_v54 = vadd.f32 %v3221_v52, %v3220_v50  ;;  %v2867_v63 = vld [vmem:[#allocation2 + $0x78] sm:$0xff] }
 0x18a   : > { %v2866_v62 = vld [vmem:[#allocation2 + $0x70] sm:$0xff] }
 0x18b   : > { %v3224_v58 = vadd.f32 %v3223_v55, %v3222_v54  ;;  %v3125_v59 = vadd.f32 %v3124_v56, %v3123_v53  ;;  %4192 = vmatprep.mubr.msk.bf16.mxu1 %vm2904_vm12, %v2866_v62 }
 0x18c   : > { %4193 = vmatmul.mubr.msk.bf16.gmra.mrb[12].mxu1 %vm2904_vm12, %v2867_v63 }
 0x18d   : > { %v3226_v61 = vadd.f32 %v3225_v60, %v3224_v58 }
 0x1a2   : > { %v4170_v0 = vpop.f32.mrb[4].mxu0 }
 0x1a3   : > { %v4107_v1 = vpack.c.bf16 %v4170_v0, %v4170_v0  ;;  %v3007_v2 = vpop.f32.mrb[5].mxu0  ;;  %v3194_v8 = vmul.f32 %v4170_v0, %v4170_v0  ;;  %v3130_v17 = vsel %vm3118_vm14, %v4170_v0, 0.0 }
 0x1a4   : > { %v3126_v3 = vsel %vm3118_vm14, %v3007_v2, 0.0  ;;  %v3192_v4 = vmul.f32 %v3007_v2, %v3007_v2  ;;  %v4105_v6 = vpack.c.bf16 %v3007_v2, %v3007_v2  ;;  %v4171_v7 = vpop.f32.mrb[6].mxu0 }
 0x1a5   : > { %3428 = vst.msk [vmem:[%s5170_s14 + $0x18] sm:$0xf] %vm3421_vm13, %v4107_v1  ;;  %v3127_v9 = vadd.f32 %v3126_v3, %v3125_v59  ;;  %v3010_v10 = vpop.f32.mrb[7].mxu0  ;;  %v4108_v11 = vpack.c.bf16 %v4171_v7, %v4171_v7  ;;  %v3195_v18 = vmul.f32 %v4171_v7, %v4171_v7  ;;  %v3231_v22 = vsel %vm3118_vm14, %v3194_v8, 0.0 }
 0x1a6   : > { %v3227_v5 = vsel %vm3118_vm14, %v3192_v4, 0.0  ;;  %3426 = vst.msk [vmem:[%s5170_s14 + $0x10] sm:$0xf] %vm3421_vm13, %v4105_v6  ;;  %v3128_v12 = vsel %vm3118_vm14, %v3010_v10, 0.0  ;;  %v3193_v13 = vmul.f32 %v3010_v10, %v3010_v10  ;;  %v4106_v16 = vpack.c.bf16 %v3010_v10, %v3010_v10 }
 0x1a7   : > { %v3228_v14 = vadd.f32 %v3227_v5, %v3226_v61  ;;  %v3129_v15 = vadd.f32 %v3128_v12, %v3127_v9  ;;  %3429 = vst.msk [vmem:[%s5170_s14 + $0x1c] sm:$0xf] %vm3421_vm13, %v4108_v11  ;;  %v3132_v23 = vsel %vm3118_vm14, %v4171_v7, 0.0  ;;  %v3233_v26 = vsel %vm3118_vm14, %v3195_v18, 0.0 }
 0x1a8   : > { %v3229_v19 = vsel %vm3118_vm14, %v3193_v13, 0.0  ;;  %3427 = vst.msk [vmem:[%s5170_s14 + $0x14] sm:$0xf] %vm3421_vm13, %v4106_v16 }
 0x1a9   : > { %v3131_v20 = vadd.f32 %v3130_v17, %v3129_v15  ;;  %v3230_v21 = vadd.f32 %v3229_v19, %v3228_v14 }
 0x1ab   : > { %v3232_v24 = vadd.f32 %v3231_v22, %v3230_v21  ;;  %v3133_v25 = vadd.f32 %v3132_v23, %v3131_v20 }
 0x1ad   : > { %v3234_v27 = vadd.f32 %v3233_v26, %v3232_v24 }
 0x1c2   : > { %v4174_v28 = vpop.f32.mrb[8].mxu0 }
 0x1c3   : > { %v4111_v29 = vpack.c.bf16 %v4174_v28, %v4174_v28  ;;  %v3023_v30 = vpop.f32.mrb[9].mxu0  ;;  %v3198_v35 = vmul.f32 %v4174_v28, %v4174_v28  ;;  %v3138_v45 = vsel %vm3118_vm14, %v4174_v28, 0.0 }
 0x1c4   : > { %v3134_v31 = vsel %vm3118_vm14, %v3023_v30, 0.0  ;;  %v3196_v32 = vmul.f32 %v3023_v30, %v3023_v30  ;;  %v4109_v33 = vpack.c.bf16 %v3023_v30, %v3023_v30  ;;  %v4175_v34 = vpop.f32.mrb[10].mxu0 }
 0x1c5   : > { %3432 = vst.msk [vmem:[%s5170_s14 + $0x28] sm:$0xf] %vm3421_vm13, %v4111_v29  ;;  %v3135_v36 = vadd.f32 %v3134_v31, %v3133_v25  ;;  %v3026_v37 = vpop.f32.mrb[11].mxu0  ;;  %v4112_v39 = vpack.c.bf16 %v4175_v34, %v4175_v34  ;;  %v3199_v46 = vmul.f32 %v4175_v34, %v4175_v34  ;;  %v3239_v50 = vsel %vm3118_vm14, %v3198_v35, 0.0 }
 0x1c6   : > { %v3235_v38 = vsel %vm3118_vm14, %v3196_v32, 0.0  ;;  %3430 = vst.msk [vmem:[%s5170_s14 + $0x20] sm:$0xf] %vm3421_vm13, %v4109_v33  ;;  %v3136_v40 = vsel %vm3118_vm14, %v3026_v37, 0.0  ;;  %v3197_v41 = vmul.f32 %v3026_v37, %v3026_v37  ;;  %v4110_v44 = vpack.c.bf16 %v3026_v37, %v3026_v37 }
 0x1c7   : > { %v3236_v42 = vadd.f32 %v3235_v38, %v3234_v27  ;;  %v3137_v43 = vadd.f32 %v3136_v40, %v3135_v36  ;;  %3433 = vst.msk [vmem:[%s5170_s14 + $0x2c] sm:$0xf] %vm3421_vm13, %v4112_v39  ;;  %v3140_v51 = vsel %vm3118_vm14, %v4175_v34, 0.0  ;;  %v3241_v54 = vsel %vm3118_vm14, %v3199_v46, 0.0 }
 0x1c8   : > { %v3237_v47 = vsel %vm3118_vm14, %v3197_v41, 0.0  ;;  %3431 = vst.msk [vmem:[%s5170_s14 + $0x24] sm:$0xf] %vm3421_vm13, %v4110_v44 }
 0x1c9   : > { %v3139_v48 = vadd.f32 %v3138_v45, %v3137_v43  ;;  %v3238_v49 = vadd.f32 %v3237_v47, %v3236_v42 }
 0x1cb   : > { %v3240_v52 = vadd.f32 %v3239_v50, %v3238_v49  ;;  %v3141_v53 = vadd.f32 %v3140_v51, %v3139_v48 }
 0x1cd   : > { %v3242_v55 = vadd.f32 %v3241_v54, %v3240_v52 }
 0x1e2   : > { %v4178_v56 = vpop.f32.mrb[12].mxu0 }
 0x1e3   : > { %v4115_v57 = vpack.c.bf16 %v4178_v56, %v4178_v56  ;;  %v3039_v58 = vpop.f32.mrb[13].mxu0  ;;  %v3202_v63 = vmul.f32 %v4178_v56, %v4178_v56  ;;  %v3146_v10 = vsel %vm3118_vm14, %v4178_v56, 0.0 }
 0x1e4   : > { %v3142_v59 = vsel %vm3118_vm14, %v3039_v58, 0.0  ;;  %v3200_v60 = vmul.f32 %v3039_v58, %v3039_v58  ;;  %v4113_v61 = vpack.c.bf16 %v3039_v58, %v3039_v58  ;;  %v4179_v62 = vpop.f32.mrb[14].mxu0 }
 0x1e5   : > { %3436 = vst.msk [vmem:[%s5170_s14 + $0x38] sm:$0xf] %vm3421_vm13, %v4115_v57  ;;  %v3143_v0 = vadd.f32 %v3142_v59, %v3141_v53  ;;  %v3042_v1 = vpop.f32.mrb[15].mxu0  ;;  %v4116_v3 = vpack.c.bf16 %v4179_v62, %v4179_v62  ;;  %v3203_v5 = vmul.f32 %v4179_v62, %v4179_v62  ;;  %v3247_v14 = vsel %vm3118_vm14, %v3202_v63, 0.0 }
 0x1e6   : > { %v3243_v2 = vsel %vm3118_vm14, %v3200_v60, 0.0  ;;  %3434 = vst.msk [vmem:[%s5170_s14 + $0x30] sm:$0xf] %vm3421_vm13, %v4113_v61  ;;  %v3144_v4 = vsel %vm3118_vm14, %v3042_v1, 0.0  ;;  %v3201_v6 = vmul.f32 %v3042_v1, %v3042_v1  ;;  %v4114_v9 = vpack.c.bf16 %v3042_v1, %v3042_v1 }
 0x1e7   : > { %v3244_v7 = vadd.f32 %v3243_v2, %v3242_v55  ;;  %v3145_v8 = vadd.f32 %v3144_v4, %v3143_v0  ;;  %3437 = vst.msk [vmem:[%s5170_s14 + $0x3c] sm:$0xf] %vm3421_vm13, %v4116_v3  ;;  %v3148_v15 = vsel %vm3118_vm14, %v4179_v62, 0.0  ;;  %v3249_v18 = vsel %vm3118_vm14, %v3203_v5, 0.0 }
 0x1e8   : > { %v3245_v11 = vsel %vm3118_vm14, %v3201_v6, 0.0  ;;  %3435 = vst.msk [vmem:[%s5170_s14 + $0x34] sm:$0xf] %vm3421_vm13, %v4114_v9 }
 0x1e9   : > { %v3147_v12 = vadd.f32 %v3146_v10, %v3145_v8  ;;  %v3246_v13 = vadd.f32 %v3245_v11, %v3244_v7 }
 0x1eb   : > { %v3248_v16 = vadd.f32 %v3247_v14, %v3246_v13  ;;  %v3149_v17 = vadd.f32 %v3148_v15, %v3147_v12 }
 0x1ed   : > { %v3250_v19 = vadd.f32 %v3249_v18, %v3248_v16 }
 0x202   : > { %v4182_v20 = vpop.f32.mrb[0].mxu1 }
 0x203   : > { %v4119_v21 = vpack.c.bf16 %v4182_v20, %v4182_v20  ;;  %v3055_v22 = vpop.f32.mrb[1].mxu1  ;;  %v3206_v27 = vmul.f32 %v4182_v20, %v4182_v20  ;;  %v3154_v37 = vsel %vm3118_vm14, %v4182_v20, 0.0 }
 0x204   : > { %v3150_v23 = vsel %vm3118_vm14, %v3055_v22, 0.0  ;;  %v3204_v24 = vmul.f32 %v3055_v22, %v3055_v22  ;;  %v4117_v25 = vpack.c.bf16 %v3055_v22, %v3055_v22  ;;  %v4183_v26 = vpop.f32.mrb[2].mxu1 }
 0x205   : > { %3440 = vst.msk [vmem:[%s5170_s14 + $0x48] sm:$0xf] %vm3421_vm13, %v4119_v21  ;;  %v3151_v28 = vadd.f32 %v3150_v23, %v3149_v17  ;;  %v3058_v29 = vpop.f32.mrb[3].mxu1  ;;  %v4120_v31 = vpack.c.bf16 %v4183_v26, %v4183_v26  ;;  %v3207_v38 = vmul.f32 %v4183_v26, %v4183_v26  ;;  %v3255_v42 = vsel %vm3118_vm14, %v3206_v27, 0.0 }
 0x206   : > { %v3251_v30 = vsel %vm3118_vm14, %v3204_v24, 0.0  ;;  %3438 = vst.msk [vmem:[%s5170_s14 + $0x40] sm:$0xf] %vm3421_vm13, %v4117_v25  ;;  %v3152_v32 = vsel %vm3118_vm14, %v3058_v29, 0.0  ;;  %v3205_v33 = vmul.f32 %v3058_v29, %v3058_v29  ;;  %v4118_v36 = vpack.c.bf16 %v3058_v29, %v3058_v29 }
 0x207   : > { %v3252_v34 = vadd.f32 %v3251_v30, %v3250_v19  ;;  %v3153_v35 = vadd.f32 %v3152_v32, %v3151_v28  ;;  %3441 = vst.msk [vmem:[%s5170_s14 + $0x4c] sm:$0xf] %vm3421_vm13, %v4120_v31  ;;  %v3156_v43 = vsel %vm3118_vm14, %v4183_v26, 0.0  ;;  %v3257_v46 = vsel %vm3118_vm14, %v3207_v38, 0.0 }
 0x208   : > { %v3253_v39 = vsel %vm3118_vm14, %v3205_v33, 0.0  ;;  %3439 = vst.msk [vmem:[%s5170_s14 + $0x44] sm:$0xf] %vm3421_vm13, %v4118_v36 }
 0x209   : > { %v3155_v40 = vadd.f32 %v3154_v37, %v3153_v35  ;;  %v3254_v41 = vadd.f32 %v3253_v39, %v3252_v34 }
 0x20b   : > { %v3256_v44 = vadd.f32 %v3255_v42, %v3254_v41  ;;  %v3157_v45 = vadd.f32 %v3156_v43, %v3155_v40 }
 0x20d   : > { %v3258_v47 = vadd.f32 %v3257_v46, %v3256_v44 }
 0x222   : > { %v4186_v48 = vpop.f32.mrb[4].mxu1 }
 0x223   : > { %v4123_v49 = vpack.c.bf16 %v4186_v48, %v4186_v48  ;;  %v3071_v50 = vpop.f32.mrb[5].mxu1  ;;  %v3210_v55 = vmul.f32 %v4186_v48, %v4186_v48  ;;  %v3162_v1 = vsel %vm3118_vm14, %v4186_v48, 0.0 }
 0x224   : > { %v3158_v51 = vsel %vm3118_vm14, %v3071_v50, 0.0  ;;  %v3208_v52 = vmul.f32 %v3071_v50, %v3071_v50  ;;  %v4121_v53 = vpack.c.bf16 %v3071_v50, %v3071_v50  ;;  %v4187_v54 = vpop.f32.mrb[6].mxu1 }
 0x225   : > { %3444 = vst.msk [vmem:[%s5170_s14 + $0x58] sm:$0xf] %vm3421_vm13, %v4123_v49  ;;  %v3159_v56 = vadd.f32 %v3158_v51, %v3157_v45  ;;  %v3074_v57 = vpop.f32.mrb[7].mxu1  ;;  %v4124_v59 = vpack.c.bf16 %v4187_v54, %v4187_v54  ;;  %v3211_v2 = vmul.f32 %v4187_v54, %v4187_v54  ;;  %v3263_v7 = vsel %vm3118_vm14, %v3210_v55, 0.0 }
 0x226   : > { %v3259_v58 = vsel %vm3118_vm14, %v3208_v52, 0.0  ;;  %3442 = vst.msk [vmem:[%s5170_s14 + $0x50] sm:$0xf] %vm3421_vm13, %v4121_v53  ;;  %v3160_v60 = vsel %vm3118_vm14, %v3074_v57, 0.0  ;;  %v3209_v61 = vmul.f32 %v3074_v57, %v3074_v57  ;;  %v4122_v0 = vpack.c.bf16 %v3074_v57, %v3074_v57 }
 0x227   : > { %v3260_v62 = vadd.f32 %v3259_v58, %v3258_v47  ;;  %v3161_v63 = vadd.f32 %v3160_v60, %v3159_v56  ;;  %3445 = vst.msk [vmem:[%s5170_s14 + $0x5c] sm:$0xf] %vm3421_vm13, %v4124_v59  ;;  %v3164_v8 = vsel %vm3118_vm14, %v4187_v54, 0.0  ;;  %v3265_v5 = vsel %vm3118_vm14, %v3211_v2, 0.0 }
 0x228   : > { %v3261_v3 = vsel %vm3118_vm14, %v3209_v61, 0.0  ;;  %3443 = vst.msk [vmem:[%s5170_s14 + $0x54] sm:$0xf] %vm3421_vm13, %v4122_v0 }
 0x229   : > { %v3163_v4 = vadd.f32 %v3162_v1, %v3161_v63  ;;  %v3262_v6 = vadd.f32 %v3261_v3, %v3260_v62 }
 0x22b   : > { %v3264_v9 = vadd.f32 %v3263_v7, %v3262_v6  ;;  %v3165_v10 = vadd.f32 %v3164_v8, %v3163_v4 }
 0x22d   : > { %v3266_v11 = vadd.f32 %v3265_v5, %v3264_v9 }
 0x242   : > { %v4190_v12 = vpop.f32.mrb[8].mxu1 }
 0x243   : > { %v4127_v13 = vpack.c.bf16 %v4190_v12, %v4190_v12  ;;  %v3087_v14 = vpop.f32.mrb[9].mxu1  ;;  %v3214_v19 = vmul.f32 %v4190_v12, %v4190_v12  ;;  %v3170_v29 = vsel %vm3118_vm14, %v4190_v12, 0.0 }
 0x244   : > { %v3166_v15 = vsel %vm3118_vm14, %v3087_v14, 0.0  ;;  %v3212_v16 = vmul.f32 %v3087_v14, %v3087_v14  ;;  %v4125_v17 = vpack.c.bf16 %v3087_v14, %v3087_v14  ;;  %v4191_v18 = vpop.f32.mrb[10].mxu1 }
 0x245   : > { %3448 = vst.msk [vmem:[%s5170_s14 + $0x68] sm:$0xf] %vm3421_vm13, %v4127_v13  ;;  %v3167_v20 = vadd.f32 %v3166_v15, %v3165_v10  ;;  %v3090_v21 = vpop.f32.mrb[11].mxu1  ;;  %v4128_v23 = vpack.c.bf16 %v4191_v18, %v4191_v18  ;;  %v3215_v30 = vmul.f32 %v4191_v18, %v4191_v18  ;;  %v3271_v34 = vsel %vm3118_vm14, %v3214_v19, 0.0 }
 0x246   : > { %v3267_v22 = vsel %vm3118_vm14, %v3212_v16, 0.0  ;;  %3446 = vst.msk [vmem:[%s5170_s14 + $0x60] sm:$0xf] %vm3421_vm13, %v4125_v17  ;;  %v3168_v24 = vsel %vm3118_vm14, %v3090_v21, 0.0  ;;  %v3213_v25 = vmul.f32 %v3090_v21, %v3090_v21  ;;  %v4126_v28 = vpack.c.bf16 %v3090_v21, %v3090_v21 }
 0x247   : > { %v3268_v26 = vadd.f32 %v3267_v22, %v3266_v11  ;;  %v3169_v27 = vadd.f32 %v3168_v24, %v3167_v20  ;;  %3449 = vst.msk [vmem:[%s5170_s14 + $0x6c] sm:$0xf] %vm3421_vm13, %v4128_v23  ;;  %v3172_v35 = vsel %vm3118_vm14, %v4191_v18, 0.0  ;;  %v3273_v38 = vsel %vm3118_vm14, %v3215_v30, 0.0 }
 0x248   : > { %v3269_v31 = vsel %vm3118_vm14, %v3213_v25, 0.0  ;;  %3447 = vst.msk [vmem:[%s5170_s14 + $0x64] sm:$0xf] %vm3421_vm13, %v4126_v28 }
 0x249   : > { %v3171_v32 = vadd.f32 %v3170_v29, %v3169_v27  ;;  %v3270_v33 = vadd.f32 %v3269_v31, %v3268_v26 }
 0x24b   : > { %v3272_v36 = vadd.f32 %v3271_v34, %v3270_v33  ;;  %v3173_v37 = vadd.f32 %v3172_v35, %v3171_v32 }
 0x24d   : > { %v3274_v39 = vadd.f32 %v3273_v38, %v3272_v36 }
 0x25f   : > { %v4194_v40 = vpop.f32.mrb[12].mxu1 }
 0x260   : > { %v4131_v41 = vpack.c.bf16 %v4194_v40, %v4194_v40  ;;  %v3103_v42 = vpop.f32.mrb[13].mxu1  ;;  %v3218_v47 = vmul.f32 %v4194_v40, %v4194_v40  ;;  %v3178_v57 = vsel %vm3118_vm14, %v4194_v40, 0.0 }
 0x261   : > { %v3174_v43 = vsel %vm3118_vm14, %v3103_v42, 0.0  ;;  %v3216_v44 = vmul.f32 %v3103_v42, %v3103_v42  ;;  %v4129_v45 = vpack.c.bf16 %v3103_v42, %v3103_v42  ;;  %v4195_v46 = vpop.f32.mrb[14].mxu1 }
 0x262   : > { %3452 = vst.msk [vmem:[%s5170_s14 + $0x78] sm:$0xf] %vm3421_vm13, %v4131_v41  ;;  %v3175_v48 = vadd.f32 %v3174_v43, %v3173_v37  ;;  %v3106_v49 = vpop.f32.mrb[15].mxu1  ;;  %v4132_v51 = vpack.c.bf16 %v4195_v46, %v4195_v46  ;;  %v3219_v58 = vmul.f32 %v4195_v46, %v4195_v46  ;;  %v3279_v62 = vsel %vm3118_vm14, %v3218_v47, 0.0 }
 0x263   : > { %v3275_v50 = vsel %vm3118_vm14, %v3216_v44, 0.0  ;;  %3450 = vst.msk [vmem:[%s5170_s14 + $0x70] sm:$0xf] %vm3421_vm13, %v4129_v45  ;;  %v3176_v52 = vsel %vm3118_vm14, %v3106_v49, 0.0  ;;  %v3217_v53 = vmul.f32 %v3106_v49, %v3106_v49  ;;  %v4130_v56 = vpack.c.bf16 %v3106_v49, %v3106_v49 }
 0x264   : > { %v3276_v54 = vadd.f32 %v3275_v50, %v3274_v39  ;;  %v3177_v55 = vadd.f32 %v3176_v52, %v3175_v48  ;;  %3453 = vst.msk [vmem:[%s5170_s14 + $0x7c] sm:$0xf] %vm3421_vm13, %v4132_v51  ;;  %v3180_v63 = vsel %vm3118_vm14, %v4195_v46, 0.0  ;;  %v3281_v2 = vsel %vm3118_vm14, %v3219_v58, 0.0 }
 0x265   : > { %v3277_v59 = vsel %vm3118_vm14, %v3217_v53, 0.0  ;;  %3451 = vst.msk [vmem:[%s5170_s14 + $0x74] sm:$0xf] %vm3421_vm13, %v4130_v56 }
 0x266   : > { %v3179_v60 = vadd.f32 %v3178_v57, %v3177_v55  ;;  %v3278_v61 = vadd.f32 %v3277_v59, %v3276_v54 }
 0x268   : > { %v3181_v0 = vadd.f32 %v3180_v63, %v3179_v60  ;;  %v3280_v1 = vadd.f32 %v3279_v62, %v3278_v61 }
 0x26a   : > { %v3182_v3 = vrot.slane %v3181_v0, 4  ;;  %v3282_v4 = vadd.f32 %v3281_v2, %v3280_v1 }
 0x26c   : > { %v3183_v6 = vadd.f32 %v3182_v3, %v3181_v0  ;;  %v3283_v7 = vrot.slane %v3282_v4, 4 }
 0x26e   : > { %v3184_v8 = vrot.slane %v3183_v6, 2  ;;  %v3284_v9 = vadd.f32 %v3283_v7, %v3282_v4 }
 0x270   : > { %v3185_v10 = vadd.f32 %v3184_v8, %v3183_v6  ;;  %v3285_v5 = vrot.slane %v3284_v9, 2 }
 0x272   : > { %v3186_v11 = vrot.slane %v3185_v10, 1  ;;  %v3286_v12 = vadd.f32 %v3285_v5, %v3284_v9 }
 0x274   : > { %v3287_v13 = vrot.slane %v3286_v12, 1  ;;  %v3187_v14 = vadd.f32 %v3186_v11, %v3185_v10 }
 0x276   : > { %v3288_v15 = vadd.f32 %v3287_v13, %v3286_v12 }
 0x278   : > { %v3290_v16 = vsel %vm3289_vm15, %v3187_v14, %v3288_v15 }
 0x279   : > { %3292 = vst.msk [vmem:[%s181_s18] sm:$0x3] %vm3291_vm0, %v3290_v16 }
 0x27a PF: > { %s14_s12 = sadd.s32 1, %s4476_s12  }
 0x27b   : > { %p11_p4 = scmp.ge.s32.totalorder %s14_s12, 4  }
 0x27d   :  { %13 = sbr.rel (!%p11_p4) target bundleno = 1 (0x1), region = 72 }

// kernel: convnet_forward.15
= control target key start
LH: loop header
LB: loop body
LE: loop exit
PB: predicated region body
PF: predicated region fallthrough
CT: control target
= control target key end

     0   :  { %s374_s12 = smov 0   ;;  %s376_s13 = smov 0   ;;  %s413_s0 = inlined_call_operand.vmem [shape: bf16[2,2,1,128], index: 0, kind: input, shape index: {}]   ;;  %s414_s1 = inlined_call_operand.vmem [shape: f32[1,1,1,128], index: 1, kind: input, shape index: {}]   ;;  %s415_s2 = inlined_call_operand.vmem [shape: f32[1,1,1,128], index: 2, kind: input, shape index: {}]   ;;  %s416_s3 = inlined_call_operand.vmem [shape: bf16[2,1,1,64], index: 3, kind: output, shape index: {}]  }
   0x1   :  { %s378_s14 = smov 0  }
   0x2 LB: > { %s25_s15 = sadd.s32 1, %s347_s13  ;;  %p300_p0 = scmp.ge.s32.totalorder %s351_s14, 1  ;;  %s351_s14 = sphi %s378_s14, %s13_s14   ;;  %s347_s13 = sphi %s376_s13, %s418_s13   ;;  %s343_s12 = sphi %s374_s12, %s417_s12  }
   0x3   : > { %p27_p1 = scmp.ge.s32.totalorder %s25_s15, 2  ;;  %p157_p2 = scmp.lt.s32.totalorder %s351_s14, 3 }
   0x5   : > { %s420_s15 = smov (%p27_p1, %s25_s15), 0  ;;  %p158_p3 = pnand %p300_p0, %p157_p2 }
   0x6   : > { %p186_p4 = scmp.lt.s32.totalorder (!%p158_p3), %s343_s12, 1  ;;  %v204_v2 = vld [vmem:[%s414_s1] sm:$0x1] (!%p158_p3)  ;;  %vm212_vm0 = vcmask (!%p158_p3), 1040384   ;;  %s353_s24 = smov (!%p158_p3), 64   ;;  %vm222_vm1 = vcmask (!%p158_p3), 516096  }
   0x7   : > { %161 = sbr.rel (%p158_p3) target bundleno = 150 (0x96), region = 32  ;;  %v207_v5 = vld [vmem:[%s415_s2] sm:$0x1] (!%p158_p3)  ;;  %vm223_vm2 = vsmask.f32 (!%p158_p3), 256 }
   0x8   : > { %vm224_vm3 = vmand (!%p158_p3), %vm222_vm1, %vm223_vm2 }
   0xe   : > { %s422_s12 = smov (!%p186_p4, %s343_s12), 1 }
   0xf   : > { %s301_s16 = sshll.u32 %s422_s12, 1  ;;  %s199_s27 = scalar_lea.vmem %s416_s3, %s422_s12 }
  0x10   : > { %s192_s19 = scalar_lea.vmem %s413_s0, %s301_s16  ;;  %v225_v17 = vld [vmem:[%s199_s27] sm:$0x1] }
  0x11   : > { %v200_v0 = vld [vmem:[%s192_s19] sm:$0x1]  ;;  %v201_v1 = vld [vmem:[%s192_s19 + $0x1] sm:$0x1] }
  0x12   : > { %v202_v3 = vunpack.c.l.bf16 %v200_v0  ;;  %v203_v4 = vunpack.c.l.bf16 %v201_v1 }
  0x14   : > { %v205_v6 = vmul.f32 %v204_v2, %v202_v3  ;;  %v206_v7 = vmul.f32 %v204_v2, %v203_v4 }
  0x16   : > { %v208_v8 = vadd.f32 %v207_v5, %v205_v6  ;;  %v209_v9 = vadd.f32 %v207_v5, %v206_v7 }
  0x18   : > { %v210_v10 = vmax.f32 %v208_v8, 0.0  ;;  %v211_v11 = vmax.f32 %v209_v9, 0.0 }
  0x1a   : > { %v213_v12 = vsel %vm212_vm0, %v210_v10, -inf  ;;  %v214_v13 = vsel %vm212_vm0, %v211_v11, -inf }
  0x1b   : > { %v215_v14 = vmax.f32 %v213_v12, %v214_v13 }
  0x1d   : > { %217 = vrot.lane.b32.xlu0 %v215_v14, %s353_s24 }
  0x8f   : > { %v218_v15 = vpop.permute.xlu0 %217 }
  0x90   : > { %v220_v16 = vmax.f32 %v215_v14, %v218_v15 }
  0x92   : > { %v221_v18 = vpack.c.bf16 %v220_v16, %v220_v16 }
  0x94   : > { %v226_v19 = vsel %vm224_vm3, %v221_v18, %v225_v17 }
  0x95   : > { %227 = vst [vmem:[%s199_s27] sm:$0x1] %v226_v19 }
  0x96 PF: > { %s13_s14 = sadd.s32 1, %s351_s14   ;;  %s417_s12 = smov %s347_s13 }
  0x97   : > { %p10_p5 = scmp.ge.s32.totalorder %s13_s14, 4   ;;  %s418_s13 = smov %s420_s15 }
  0x99   :  { %12 = sbr.rel (!%p10_p5) target bundleno = 2 (0x2), region = 62 }

// kernel: convnet_forward.14
= control target key start
LH: loop header
LB: loop body
LE: loop exit
PB: predicated region body
PF: predicated region fallthrough
CT: control target
= control target key end

     0   :  { %s1235_s12 = smov 0   ;;  %s1425_s0 = inlined_call_operand.vmem [shape: bf16[2,4,4,64], index: 0, kind: input, shape index: {}]   ;;  %s1426_s1 = inlined_call_operand.vmem [shape: bf16[576,64], index: 1, kind: input, shape index: {}]   ;;  %s1427_s2 = inlined_call_operand.vmem [shape: bf16[2,4,64], index: 2, kind: output, shape index: {0}]   ;;  %s1428_s3 = inlined_call_operand.vmem [shape: f32[2,2,64], index: 3, kind: output, shape index: {1}]  }
   0x1 LB: > { %s1010_s13 = sadd.s32 4294967295, %s1209_s12   ;;  %p1014_p0 = scmp.ge.s32.totalorder %s1209_s12, 1  ;;  %s1209_s12 = sphi %s1235_s12, %s14_s12  }
   0x2   : > { %p140_p1 = scmp.lt.s32.totalorder %s1209_s12, 3 }
   0x4   : > { %p141_p2 = pnand %p1014_p0, %p140_p1 }
   0x5   : > { %p167_p3 = scmp.lt.s32.totalorder (!%p141_p2), %s1010_s13, 1  ;;  %vm206_vm0 = vsmask.f32 (!%p141_p2), 256  ;;  %vm207_vm1 = vsmask.f32 (!%p141_p2), 1284  ;;  %v1164_v0 = vld [vmem:[%s1426_s1 + $0x40] sm:$0xff] (!%p141_p2)  }
   0x6   : > { %144 = sbr.rel (%p141_p2) target bundleno = 410 (0x19a), region = 28  ;;  %vm208_vm2 = vmor (!%p141_p2), %vm206_vm0, %vm207_vm1  ;;  %vm209_vm3 = vsmask.f32 (!%p141_p2), 2312  ;;  %vm211_vm4 = vsmask.f32 (!%p141_p2), 3340  ;;  %1091 = vmatprep.subr.bf16.mxu0 (!%p141_p2), %v1164_v0  ;;  %v1165_v1 = vld [vmem:[%s1426_s1] sm:$0xff] (!%p141_p2)  }
   0x7   : > { %vm213_vm5 = vsmask.f32 (!%p141_p2), 4368  ;;  %vm210_vm6 = vmor (!%p141_p2), %vm208_vm2, %vm209_vm3  ;;  %vm215_vm7 = vsmask.f32 (!%p141_p2), 5396  ;;  %vm217_vm9 = vsmask.f32 (!%p141_p2), 6424  ;;  %1092 = vmatpush3.bf16.msra.mxu0 (!%p141_p2), %v1165_v1 }
   0x8   : > { %vm212_vm8 = vmor (!%p141_p2), %vm210_vm6, %vm211_vm4  ;;  %vm219_vm12 = vsmask.f32 (!%p141_p2), 7452  ;;  %s1211_s22 = smov (!%p141_p2), 64   ;;  %vm183_vm13 = vcmask (!%p141_p2), 516096   ;;  %v1166_v4 = vld [vmem:[%s1426_s1 + $0xc0] sm:$0xff] (!%p141_p2)   ;;  %v1167_v11 = vld [vmem:[%s1426_s1 + $0x48] sm:$0xff] (!%p141_p2)  }
   0x9   : > { %vm214_vm10 = vmor (!%p141_p2), %vm212_vm8, %vm213_vm5  ;;  %1113 = vmatprep.subr.bf16.mxu1 (!%p141_p2), %v1166_v4  ;;  %1093 = vmatprep.subr.bf16.mxu0 (!%p141_p2), %v1167_v11  ;;  %v1168_v22 = vld [vmem:[%s1426_s1 + $0x80] sm:$0xff] (!%p141_p2)   ;;  %v1169_v32 = vld [vmem:[%s1426_s1 + $0x8] sm:$0xff] (!%p141_p2)   ;;  %vm245_vm0 = vcmask (!%p141_p2), 1040896   ;;  %v1213_v11 = vmov (!%p141_p2), 1966171168   ;;  %vm1214_vm1 = vmmov (!%p141_p2), 0  }
   0xa   : > { %vm216_vm11 = vmor (!%p141_p2), %vm214_vm10, %vm215_vm7  ;;  %1114 = vmatpush3.bf16.msra.mxu1 (!%p141_p2), %v1168_v22  ;;  %v1170_v34 = vld [vmem:[%s1426_s1 + $0xc8] sm:$0xff] (!%p141_p2)   ;;  %v1171_v37 = vld [vmem:[%s1426_s1 + $0x50] sm:$0xff] (!%p141_p2)   ;;  %v523_v12 = vunpack.c.l.s4 (!%p141_p2), %v1213_v11  ;;  %vm780_vm2 = vcmask (!%p141_p2), 523264   ;;  %vm904_vm3 = vcmask (!%p141_p2), 519168   ;;  %vm922_vm4 = vcmask (!%p141_p2), 517120  }
   0xb   : > { %vm218_vm14 = vmor (!%p141_p2), %vm216_vm11, %vm217_vm9  ;;  %1094 = vmatpush3.bf16.msra.mxu0 (!%p141_p2), %v1169_v32  ;;  %1115 = vmatprep.subr.bf16.mxu1 (!%p141_p2), %v1170_v34  ;;  %v1172_v38 = vld [vmem:[%s1426_s1 + $0x88] sm:$0xff] (!%p141_p2)   ;;  %v1173_v39 = vld [vmem:[%s1426_s1 + $0x10] sm:$0xff] (!%p141_p2)   ;;  %vm920_vm5 = vcmask (!%p141_p2), 1040384  }
   0xc   : > { %vm1274_vm15 = vmor (!%p141_p2), %vm218_vm14, %vm219_vm12  ;;  %1095 = vmatprep.subr.bf16.mxu0 (!%p141_p2), %v1171_v37  ;;  %v1174_v40 = vld [vmem:[%s1426_s1 + $0xd0] sm:$0xff] (!%p141_p2)   ;;  %v1175_v42 = vld [vmem:[%s1426_s1 + $0x58] sm:$0xff] (!%p141_p2)  }
   0xd   : > { %s1432_s13 = smov (!%p167_p3, %s1010_s13), 1  ;;  %v1176_v43 = vld [vmem:[%s1426_s1 + $0x90] sm:$0xff]   ;;  %v1177_v44 = vld [vmem:[%s1426_s1 + $0x18] sm:$0xff]   ;;  %v1179_v48 = vld [vmem:[%s1426_s1 + $0x60] sm:$0xff]  }
   0xe   : > { %s1090_s16 = sshll.u32 %s1432_s13, 3  ;;  %1116 = vmatpush3.bf16.msra.mxu1 %v1172_v38  ;;  %v1178_v46 = vld [vmem:[%s1426_s1 + $0xd8] sm:$0xff]   ;;  %v1181_v50 = vld [vmem:[%s1426_s1 + $0x20] sm:$0xff]   ;;  %v1183_v52 = vld [vmem:[%s1426_s1 + $0x68] sm:$0xff]   ;;  %s1017_s17 = sshll.u32 %s1432_s13, 1 }
   0xf   : > { %s1252_s19 = scalar_lea.vmem %s1425_s0, %s1090_s16  ;;  %1096 = vmatpush3.bf16.msra.mxu0 %v1173_v39  ;;  %1117 = vmatprep.subr.bf16.mxu1 %v1174_v40  ;;  %v1180_v49 = vld [vmem:[%s1426_s1 + $0x98] sm:$0xff]   ;;  %v1182_v51 = vld [vmem:[%s1426_s1 + $0xe0] sm:$0xff]   ;;  %v1185_v54 = vld [vmem:[%s1426_s1 + $0x28] sm:$0xff]   ;;  %s175_s21 = scalar_lea.vmem %s1427_s2, %s1017_s17 }
  0x10   : > { %v1027_v2 = vld.sshfl [vmem:[%s1252_s19 + $0x2] sm:$0x1 pattern:$0x75316420]  ;;  %v181_v35 = vld [vmem:[%s1252_s19] sm:$0x1]  ;;  %1097 = vmatprep.subr.bf16.mxu0 %v1175_v42 }
  0x11   : > { %291 = vrot.lane.b32.xlu1 %v1027_v2, %s1211_s22  ;;  %v1037_v3 = vld.sshfl [vmem:[%s1252_s19 + $0x2] sm:$0x10 pattern:$0x75316420]  ;;  %184 = vst.msk [vmem:[#allocation2] sm:$0x1] %vm183_vm13, %v181_v35 }
  0x12   : > { %v352_v5 = vcombine.high %v1037_v3, %v1037_v3  ;;  %v1028_v6 = vld.sshfl [vmem:[%s1252_s19 + $0x4] sm:$0x1 pattern:$0x75316420]  ;;  %v182_v41 = vld [vmem:[%s1252_s19 + $0x2] sm:$0x1]  ;;  %1118 = vmatpush3.bf16.msra.mxu1 %v1176_v43 }
  0x13   : > { %v1019_v7 = vld.sshfl [vmem:[%s1252_s19] sm:$0x11 pattern:$0x75316420]  ;;  %185 = vst.msk [vmem:[#allocation2 + $0x5] sm:$0x1] %vm183_vm13, %v182_v41  ;;  %1098 = vmatpush3.bf16.msra.mxu0 %v1177_v44  ;;  %1119 = vmatprep.subr.bf16.mxu1 %v1178_v46 }
  0x14   : > { %361 = vrot.lane.b32.xlu0 %v352_v5, %s1211_s22  ;;  %v197_v8 = vcombine.high %v1019_v7, %v1019_v7  ;;  %v222_v9 = vshrl.u32 %v1019_v7, 16  ;;  %v1038_v10 = vld.sshfl [vmem:[%s1252_s19 + $0x4] sm:$0x10 pattern:$0x75316420]  ;;  %1099 = vmatprep.subr.bf16.mxu0 %v1179_v48  ;;  %v1186_v55 = vld [vmem:[%s1426_s1 + $0xe8] sm:$0xff]  }
  0x15   : > { %271 = vst.msk [vmem:[#allocation2 + $0x6] sm:$0x1] %vm183_vm13, %v352_v5  ;;  %293 = vrot.lane.b32.xlu1 %v1028_v6, %s1211_s22  ;;  %v360_v13 = vcombine.high %v1038_v10, %v1038_v10  ;;  %v1020_v14 = vld.sshfl [vmem:[%s1252_s19 + $0x2] sm:$0x11 pattern:$0x75316420] }
  0x16   : > { %v227_v15 = vshll.u32 %v197_v8, 16  ;;  %v205_v16 = vcombine.high %v1020_v14, %v1020_v14  ;;  %v231_v17 = vshrl.u32 %v1020_v14, 16  ;;  %v1044_v18 = vld.sshfl [vmem:[%s1252_s19 + $0x6] sm:$0x11 pattern:$0x75316420]  ;;  %1120 = vmatpush3.bf16.msra.mxu1 %v1180_v49 }
  0x17   : > { %v393_v19 = vcombine.high %v1044_v18, %v1044_v18  ;;  %v404_v20 = vshrl.u32 %v1044_v18, 16  ;;  %v1043_v21 = vld.sshfl [vmem:[%s1252_s19 + $0x4] sm:$0x11 pattern:$0x75316420]  ;;  %1100 = vmatpush3.bf16.msra.mxu0 %v1181_v50  ;;  %1121 = vmatprep.subr.bf16.mxu1 %v1182_v51  ;;  %v1187_v56 = vld [vmem:[%s1426_s1 + $0x70] sm:$0xff]  }
  0x18   : > { %442 = vst.msk [vmem:[#allocation2 + $0x4] sm:$0x1] %vm183_vm13, %v360_v13  ;;  %v229_v23 = vsel %vm1274_vm15, %v222_v9, %v227_v15  ;;  %v236_v24 = vshll.u32 %v205_v16, 16  ;;  %v385_v25 = vcombine.high %v1043_v21, %v1043_v21  ;;  %v395_v26 = vshrl.u32 %v1043_v21, 16  ;;  %v1040_v45 = vld [vmem:[%s1252_s19 + $0x6] sm:$0x1]  ;;  %1101 = vmatprep.subr.bf16.mxu0 %v1183_v52 }
  0x19   : > { %v1023_v27 = vld.sshfl [vmem:[%s1252_s19] sm:$0x10 pattern:$0x75316420]  ;;  %239 = vrot.lane.b32.xlu0 %v229_v23, %s1211_s22  ;;  %363 = vrot.lane.b32.xlu1 %v360_v13, %s1211_s22  ;;  %v409_v28 = vshll.u32 %v393_v19, 16  ;;  %v1188_v57 = vld [vmem:[%s1426_s1 + $0xa8] sm:$0xff]   ;;  %v525_v13 = vlaneseq  ;;  %v524_v15 = vunpack.c.0.s8 %v523_v12 }
  0x1a   : > { %v259_v29 = vcombine.high %v1023_v27, %v1023_v27  ;;  %v238_v30 = vsel %vm1274_vm15, %v231_v17, %v236_v24  ;;  %v400_v31 = vshll.u32 %v385_v25, 16  ;;  %373 = vst.msk [vmem:[#allocation2 + $0x8] sm:$0x1] %vm183_vm13, %v1040_v45  ;;  %v1039_v47 = vld [vmem:[%s1252_s19 + $0x4] sm:$0x1]  ;;  %v1189_v58 = vld [vmem:[%s1426_s1 + $0x30] sm:$0xff]  }
  0x1b   : > { %v411_v33 = vsel %vm1274_vm15, %v404_v20, %v409_v28  ;;  %339 = vst.msk [vmem:[#allocation2 + $0x2] sm:$0x1] %vm183_vm13, %v238_v30  ;;  %372 = vst.msk [vmem:[#allocation2 + $0x3] sm:$0x1] %vm183_vm13, %v1039_v47  ;;  %v1184_v53 = vld [vmem:[%s1426_s1 + $0xa0] sm:$0xff]   ;;  %1102 = vmatpush3.bf16.msra.mxu0 %v1185_v54  ;;  %v1190_v59 = vld [vmem:[%s1426_s1 + $0xf0] sm:$0xff]  }
  0x1c   : > { %270 = vst.msk [vmem:[#allocation2 + $0x1] sm:$0x1] %vm183_vm13, %v259_v29  ;;  %v402_v36 = vsel %vm1274_vm15, %v395_v26, %v400_v31  ;;  %1122 = vmatpush3.bf16.msra.mxu1 %v1184_v53  ;;  %1103 = vmatprep.subr.bf16.mxu0 %v1187_v56  ;;  %v1191_v60 = vld [vmem:[%s1426_s1 + $0x78] sm:$0xff]   ;;  %v1192_v61 = vld [vmem:[%s1426_s1 + $0xb0] sm:$0xff]   ;;  %v1212_v3 = vmov 0.0   ;;  %v526_v16 = vshrl.u32 %v525_v13, 7 }
  0x1d   : > { %241 = vrot.lane.b32.xlu0 %v238_v30, %s1211_s22  ;;  %414 = vrot.lane.b32.xlu1 %v411_v33, %s1211_s22  ;;  %340 = vst.msk [vmem:[#allocation2 + $0x7] sm:$0x1] %vm183_vm13, %v402_v36  ;;  %v1193_v62 = vld [vmem:[%s1426_s1 + $0x38] sm:$0xff]   ;;  %v1199_v23 = vld [vmem:[%s1426_s1 + $0x100] sm:$0xff]  }
  0x1e   : > { %1123 = vmatprep.subr.bf16.mxu1 %v1186_v55  ;;  %v1194_v63 = vld [vmem:[%s1426_s1 + $0xf8] sm:$0xff]   ;;  %v1050_v0 = vld.sshfl [vmem:[%s1252_s19 + $0x6] sm:$0x10 pattern:$0x75316420]  ;;  %v527_v17 = vsub.s32 %v524_v15, %v526_v16  ;;  %v1200_v26 = vld [vmem:[%s1426_s1 + $0x108] sm:$0xff]  }
  0x1f   : > { %1104 = vmatpush3.bf16.msra.mxu0 %v1189_v58  ;;  %v1198_v1 = vld [vmem:[%s1426_s1 + $0xb8] sm:$0xff]   ;;  %v439_v2 = vcombine.high %v1050_v0, %v1050_v0  ;;  %v1201_v27 = vld [vmem:[%s1426_s1 + $0x110] sm:$0xff]  }
  0x20   : > { %1124 = vmatpush3.bf16.msra.mxu1 %v1188_v57  ;;  %1105 = vmatprep.subr.bf16.mxu0 %v1191_v60  ;;  %v1202_v29 = vld [vmem:[%s1426_s1 + $0x118] sm:$0xff]  }
  0x21   : > { %412 = vrot.lane.b32.xlu0 %v402_v36, %s1211_s22  ;;  %1125 = vmatprep.subr.bf16.mxu1 %v1190_v59  ;;  %443 = vst.msk [vmem:[#allocation2 + $0x9] sm:$0x1] %vm183_vm13, %v439_v2  ;;  %s179_s22 = scalar_lea.vmem %s1428_s3, %s1017_s17 }
  0x23   : > { %1106 = vmatpush3.bf16.msra.mxu0 %v1193_v62 }
  0x24   : > { %1126 = vmatpush3.bf16.msra.mxu1 %v1192_v61  ;;  %1140 = vmatprep.subr.bf16.mxu0 %v1212_v3 }
  0x25   : > { %1127 = vmatprep.subr.bf16.mxu1 %v1194_v63 }
  0x28   : > { %1128 = vmatpush3.bf16.msra.mxu1 %v1198_v1  ;;  %v1197_v28 = vld [vmem:[#allocation2 + $0x4] ss:$5 sps:$4 sm:$0x11]  }
  0x29   : > { %v535_v30 = vrot.slane %v1197_v28, %v527_v17 }
  0x2b   : > { %v550_v31 = vrot.slane %v535_v30, %v527_v17 }
  0x83   : > { %v292_v4 = vpop.permute.xlu1 %291 }
  0x84   : > { %297 = vst.msk [vmem:[#allocation2 + $0x1] sm:$0x1] %vm245_vm0, %v292_v4 }
  0x86   : > { %v362_v5 = vpop.permute.xlu0 %361 }
  0x87   : > { %367 = vst.msk [vmem:[#allocation2 + $0x2] sm:$0x1] %vm245_vm0, %v362_v5  ;;  %v294_v6 = vpop.permute.xlu1 %293 }
  0x88   : > { %298 = vst.msk [vmem:[#allocation2 + $0x6] sm:$0x1] %vm245_vm0, %v294_v6 }
  0x8b   : > { %v240_v7 = vpop.permute.xlu0 %239  ;;  %v364_v8 = vpop.permute.xlu1 %363 }
  0x8c   : > { %246 = vst.msk [vmem:[#allocation2] sm:$0x1] %vm245_vm0, %v240_v7  ;;  %368 = vst.msk [vmem:[#allocation2 + $0x7] sm:$0x1] %vm245_vm0, %v364_v8 }
  0x8f   : > { %v242_v9 = vpop.permute.xlu0 %241  ;;  %v415_v10 = vpop.permute.xlu1 %414 }
  0x90   : > { %247 = vst.msk [vmem:[#allocation2 + $0x5] sm:$0x1] %vm245_vm0, %v242_v9  ;;  %419 = vst.msk [vmem:[#allocation2 + $0x8] sm:$0x1] %vm245_vm0, %v415_v10 }
  0x93   : > { %v413_v14 = vpop.permute.xlu0 %412 }
  0x94   : > { %418 = vst.msk [vmem:[#allocation2 + $0x3] sm:$0x1] %vm245_vm0, %v413_v14 }
  0x9b   : > { %v1195_v18 = vld [vmem:[#allocation2] ss:$5 sps:$4 sm:$0xff]  }
  0x9c   : > { %v528_v19 = vrot.slane %v1195_v18, %v527_v17 }
  0x9e   : > { %v536_v20 = vcombine.high %v528_v19, %v528_v19  ;;  %v543_v21 = vrot.slane %v528_v19, %v527_v17 }
  0xa0   : > { %v557_v22 = vrot.slane %v536_v20, %v527_v17  ;;  %v558_v25 = vcombine.high %v543_v21, %v543_v21 }
  0xa2   : > { %816 = vmatprep.mubr.bf16.mxu0 %v557_v22  ;;  %v559_v24 = vcombine.high %v557_v22, %v557_v22 }
  0xa3   : > { %817 = vmatmul.mubr.bf16.vlgmr.msra.gmra.mrb[0].mxu0 %v543_v21 }
  0xa4   : > { %1141 = vmatpush3.bf16.msra.mxu0 %v1199_v23  ;;  %856 = vmatprep.mubr.bf16.mxu1 %v559_v24 }
  0xa5   : > { %857 = vmatmul.mubr.bf16.vlgmr.msra.gmra.mrb[0].mxu1 %v558_v25  ;;  %1142 = vmatprep.subr.bf16.mxu0 %v1212_v3 }
  0xa6   : > { %1148 = vmatprep.mubr.msk.bf16.mxu0 %vm1214_vm1, %v1212_v3 }
  0xa8   : > { %1143 = vmatpush3.bf16.msra.mxu0 %v1200_v26 }
  0xa9   : > { %1144 = vmatprep.subr.bf16.mxu0 %v1212_v3 }
  0xac   : > { %1145 = vmatpush3.bf16.msra.mxu0 %v1201_v27 }
  0xad   : > { %1146 = vmatprep.subr.bf16.mxu0 %v1212_v3 }
  0xb0   : > { %1147 = vmatpush3.bf16.msra.mxu0 %v1202_v29 }
  0xb3   : > { %1149 = vmatmul.mubr.msk.bf16.vlgmr.msra.gmra.mrb[4].mxu0 %vm780_vm2, %v550_v31 }
 0x176   : > { %v1107_v32 = vpop.f32.mrb[0].mxu0 }
 0x177   : > { %v1108_v33 = vpop.f32.mrb[1].mxu0 }
 0x178   : > { %v1109_v34 = vadd.f32 %v1108_v33, %v1107_v32  ;;  %v1110_v35 = vpop.f32.mrb[2].mxu0  ;;  %v1129_v36 = vpop.f32.mrb[0].mxu1 }
 0x179   : > { %v1111_v37 = vpop.f32.mrb[3].mxu0  ;;  %v1130_v38 = vpop.f32.mrb[1].mxu1 }
 0x17a   : > { %v1131_v39 = vadd.f32 %v1130_v38, %v1129_v36  ;;  %v1132_v40 = vpop.f32.mrb[2].mxu1 }
 0x17b   : > { %v1133_v41 = vpop.f32.mrb[3].mxu1 }
 0x17c   : > { %v859_v42 = vadd.f32 %v1131_v39, %v1109_v34 }
 0x186   : > { %v898_v43 = vpop.f32.mrb[4].mxu0 }
 0x187   : > { %v899_v44 = vadd.f32 %v898_v43, %v859_v42  ;;  %v1150_v45 = vpop.f32.mrb[5].mxu0 }
 0x188   : > { %v901_v46 = vpop.f32.mrb[6].mxu0 }
 0x189   : > { %v905_v47 = vsel %vm904_vm3, %v899_v44, 0.0  ;;  %v912_v48 = vmul.f32 %v899_v44, %v899_v44  ;;  %v924_v49 = vpack.c.bf16 %v899_v44, %v899_v44  ;;  %v1151_v50 = vpop.f32.mrb[7].mxu0 }
 0x18a   : > { %v906_v51 = vrot.slane %v905_v47, 4 }
 0x18b   : > { %v913_v52 = vsel %vm904_vm3, %v912_v48, 0.0  ;;  %925 = vst.msk [vmem:[%s175_s21] sm:$0x3] %vm922_vm4, %v924_v49 }
 0x18c   : > { %v907_v53 = vadd.f32 %v906_v51, %v905_v47  ;;  %v914_v54 = vrot.slane %v913_v52, 4 }
 0x18e   : > { %v908_v55 = vrot.slane %v907_v53, 2  ;;  %v915_v56 = vadd.f32 %v914_v54, %v913_v52 }
 0x190   : > { %v909_v57 = vadd.f32 %v908_v55, %v907_v53  ;;  %v916_v58 = vrot.slane %v915_v56, 2 }
 0x192   : > { %v910_v59 = vrot.slane %v909_v57, 1  ;;  %v917_v60 = vadd.f32 %v916_v58, %v915_v56 }
 0x194   : > { %v918_v61 = vrot.slane %v917_v60, 1  ;;  %v911_v62 = vadd.f32 %v910_v59, %v909_v57 }
 0x196   : > { %v919_v63 = vadd.f32 %v918_v61, %v917_v60 }
 0x198   : > { %v921_v0 = vsel %vm920_vm5, %v911_v62, %v919_v63 }
 0x199   : > { %923 = vst.msk [vmem:[%s179_s22] sm:$0x3] %vm922_vm4, %v921_v0 }
 0x19a PF: > { %s14_s12 = sadd.s32 1, %s1209_s12  }
 0x19b   : > { %p11_p4 = scmp.ge.s32.totalorder %s14_s12, 4  }
 0x19d   :  { %13 = sbr.rel (!%p11_p4) target bundleno = 1 (0x1), region = 72 }

</bundles_post_ra>
